<compile_context>
chip_gen: v6e
topology: v6e:2x2x1
jax: 0.10.0
libtpu: 0.0.40
codegen_flags: <defaults>
</compile_context>

<pallas_src>
import functools

import numpy as np
import jax
import jax.numpy as jnp
from jax import lax
from jax.experimental import pallas as pl
from jax.experimental.pallas import tpu as pltpu

NUM_CLASSES = 2
BN_EPS = 1e-5


# ----------------------------- small helpers -----------------------------
def _round_up(x, m):
    return ((x + m - 1) // m) * m


def _row_tile(m, target=1024):
    """Padded row count + row tile for elementwise / reduction kernels."""
    if m >= target:
        return _round_up(m, target), target
    p = _round_up(m, 8)
    return p, p


def _pad_axis(x, axis, new_size, value=0.0):
    if x.shape[axis] == new_size:
        return x
    cfg = [(0, 0)] * x.ndim
    cfg[axis] = (0, new_size - x.shape[axis])
    return jnp.pad(x, cfg, constant_values=value)


# ----------------------------- Pallas MXU matmul ---------------------------
def _matmul_kernel(a_ref, b_ref, bias_ref, o_ref, acc_ref, *, relu):
    @pl.when(pl.program_id(2) == 0)
    def _():
        acc_ref[...] = jnp.zeros_like(acc_ref)

    acc_ref[...] += jnp.dot(a_ref[...], b_ref[...],
                            preferred_element_type=jnp.float32)

    @pl.when(pl.program_id(2) == pl.num_programs(2) - 1)
    def _():
        y = acc_ref[...] + bias_ref[...]
        if relu:
            y = jnp.maximum(y, 0.0)
        o_ref[...] = y.astype(o_ref.dtype)


def pallas_matmul(a, b, bias=None, relu=False):
    """C = relu?(a @ b + bias).  Inputs are cast to bf16 for the MXU; accumulation,
    bias add and output stay float32.  N is padded to a multiple of 128 so stores are
    lane-dense and the MXU columns are fully used even for 64-wide outputs."""
    M, K = a.shape
    K2, N = b.shape
    assert K == K2
    a = a.astype(jnp.bfloat16)
    b = b.astype(jnp.bfloat16)
    if bias is None:
        bias = jnp.zeros((N,), jnp.float32)

    # lane-dense output columns (>=128, multiple of 128)
    Np = _round_up(max(N, 128), 128)
    tn = 256 if (Np % 256 == 0) else 128

    # reduction depth: single K step when modest, else 512-deep steps
    Kp = _round_up(K, 128)
    if Kp <= 2048:
        tk = Kp
    else:
        tk = 512
        Kp = _round_up(K, tk)

    # rows
    if M >= 512:
        tm, Mp = 512, _round_up(M, 512)
    else:
        Mp = _round_up(M, 8)
        tm = Mp

    a_p = _pad_axis(_pad_axis(a, 0, Mp), 1, Kp)
    b_p = _pad_axis(_pad_axis(b, 0, Kp), 1, Np)
    bias_p = _pad_axis(bias.reshape(1, N).astype(jnp.float32), 1, Np)

    grid = (Mp // tm, Np // tn, Kp // tk)
    out = pl.pallas_call(
        functools.partial(_matmul_kernel, relu=relu),
        out_shape=jax.ShapeDtypeStruct((Mp, Np), jnp.float32),
        grid_spec=pltpu.PrefetchScalarGridSpec(
            num_scalar_prefetch=0,
            grid=grid,
            in_specs=[
                pl.BlockSpec((tm, tk), lambda i, j, k: (i, k)),
                pl.BlockSpec((tk, tn), lambda i, j, k: (k, j)),
                pl.BlockSpec((1, tn), lambda i, j, k: (0, j)),
            ],
            out_specs=pl.BlockSpec((tm, tn), lambda i, j, k: (i, j)),
            scratch_shapes=[pltpu.VMEM((tm, tn), jnp.float32)],
        ),
        compiler_params=pltpu.CompilerParams(
            dimension_semantics=("parallel", "parallel", "arbitrary")),
    )(a_p, b_p, bias_p)
    return out[:M, :N]


# ------------------- fused BN statistics (one pass) -------------------------
def _bnstats_kernel(x_ref, s_ref, q_ref):
    @pl.when(pl.program_id(0) == 0)
    def _():
        s_ref[...] = jnp.zeros_like(s_ref)
        q_ref[...] = jnp.zeros_like(q_ref)

    x = x_ref[...]
    s_ref[...] += jnp.sum(x, axis=0, keepdims=True)
    q_ref[...] += jnp.sum(x * x, axis=0, keepdims=True)


def pallas_channel_stats(x2):
    """Per-channel (sum, sum_of_squares) over the row axis in a single HBM pass."""
    M, C = x2.shape
    Mp, tm = _row_tile(M, 1024)
    xp = _pad_axis(x2, 0, Mp)                      # zero rows do not affect the sums
    s, q = pl.pallas_call(
        _bnstats_kernel,
        out_shape=(jax.ShapeDtypeStruct((1, C), jnp.float32),
                   jax.ShapeDtypeStruct((1, C), jnp.float32)),
        grid=(Mp // tm,),
        in_specs=[pl.BlockSpec((tm, C), lambda i: (i, 0))],
        out_specs=(pl.BlockSpec((1, C), lambda i: (0, 0)),
                   pl.BlockSpec((1, C), lambda i: (0, 0))),
        compiler_params=pltpu.CompilerParams(dimension_semantics=("arbitrary",)),
    )(xp)
    return s[0], q[0]


# ------------------- fused BN scale/shift (+ReLU) kernel --------------------
def _affine_kernel(x_ref, s_ref, b_ref, o_ref, *, relu):
    y = x_ref[...] * s_ref[...] + b_ref[...]
    if relu:
        y = jnp.maximum(y, 0.0)
    o_ref[...] = y


def pallas_affine(x2, scale, shift, relu):
    M, C = x2.shape
    Mp, tm = _row_tile(M, 1024)
    xp = _pad_axis(x2, 0, Mp)
    s2 = scale.reshape(1, C).astype(jnp.float32)
    b2 = shift.reshape(1, C).astype(jnp.float32)
    out = pl.pallas_call(
        functools.partial(_affine_kernel, relu=relu),
        out_shape=jax.ShapeDtypeStruct((Mp, C), jnp.float32),
        grid=(Mp // tm,),
        in_specs=[pl.BlockSpec((tm, C), lambda i: (i, 0)),
                  pl.BlockSpec((1, C), lambda i: (0, 0)),
                  pl.BlockSpec((1, C), lambda i: (0, 0))],
        out_specs=pl.BlockSpec((tm, C), lambda i: (i, 0)),
        compiler_params=pltpu.CompilerParams(dimension_semantics=("parallel",)),
    )(xp, s2, b2)
    return out[:M]


def batchnorm3d_relu(x, gamma, beta, relu=True):
    """BatchNorm3d (training mode: per-batch biased statistics, eps=1e-5) + optional ReLU."""
    B, D, H, W, C = x.shape
    x2 = x.reshape(-1, C)
    M = x2.shape[0]
    s, q = pallas_channel_stats(x2)
    mean = s / M
    var = jnp.maximum(q / M - mean * mean, 0.0)
    scale = gamma * lax.rsqrt(var + BN_EPS)
    shift = beta - mean * scale
    out2 = pallas_affine(x2, scale, shift, relu)
    return out2.reshape(B, D, H, W, C)


# ------------------------- 3-D conv via bf16 im2col + MXU -------------------
def conv3d(x, w, b, stride=1, padding=0):
    """x: (B, D, H, W, Cin) channels-last f32; w: (Cout, Cin, k, k, k); b: (Cout,)."""
    B, D, H, W, Cin = x.shape
    Cout, Cin2, k, _, _ = w.shape
    assert Cin == Cin2
    xb = x.astype(jnp.bfloat16)                    # bf16 im2col: half the HBM bytes
    if padding:
        xb = jnp.pad(xb, ((0, 0), (padding,) * 2, (padding,) * 2,
                          (padding,) * 2, (0, 0)))
    Do = (D + 2 * padding - k) // stride + 1
    Ho = (H + 2 * padding - k) // stride + 1
    Wo = (W + 2 * padding - k) // stride + 1
    cols = []
    for kd in range(k):
        for kh in range(k):
            for kw in range(k):
                cols.append(lax.slice(
                    xb,
                    (0, kd, kh, kw, 0),
                    (B, kd + (Do - 1) * stride + 1,
                     kh + (Ho - 1) * stride + 1,
                     kw + (Wo - 1) * stride + 1, Cin),
                    (1, stride, stride, stride, 1)))
    a = jnp.concatenate(cols, axis=-1).reshape(B * Do * Ho * Wo, k * k * k * Cin)
    wm = jnp.transpose(w, (2, 3, 4, 1, 0)).reshape(k * k * k * Cin, Cout)
    wm = wm.astype(jnp.bfloat16)
    out = pallas_matmul(a, wm, b)                  # fused bias, f32 accumulate
    return out.reshape(B, Do, Ho, Wo, Cout)


# --------------------- separable max pooling (3 taps / axis) ----------------
def _max3_kernel(a_ref, b_ref, c_ref, o_ref):
    o_ref[...] = jnp.maximum(jnp.maximum(a_ref[...], b_ref[...]), c_ref[...])


def pallas_max3(a, b, c):
    """Elementwise max of three equal-shaped arrays; lane-dense (rows, 128) tiling."""
    shape = a.shape
    T = int(np.prod(shape))
    R = -(-T // 128)
    if R >= 1024:
        tr, Rp = 1024, _round_up(R, 1024)
    else:
        Rp = _round_up(R, 8)
        tr = Rp

    def prep(t):
        flat = t.reshape(-1)
        flat = jnp.pad(flat, (0, Rp * 128 - T))
        return flat.reshape(Rp, 128)

    spec = pl.BlockSpec((tr, 128), lambda i: (i, 0))
    out = pl.pallas_call(
        _max3_kernel,
        out_shape=jax.ShapeDtypeStruct((Rp, 128), jnp.float32),
        grid=(Rp // tr,),
        in_specs=[spec, spec, spec],
        out_specs=spec,
        compiler_params=pltpu.CompilerParams(dimension_semantics=("parallel",)),
    )(prep(a), prep(b), prep(c))
    return out.reshape(-1)[:T].reshape(shape)


def _maxpool_axis(x, axis, k, s):
    assert k == 3, "separable pooling implemented for kernel_size=3"
    n = x.shape[axis]
    no = (n - k) // s + 1
    taps = []
    for t in range(k):
        start = [0] * x.ndim
        limit = list(x.shape)
        strides = [1] * x.ndim
        start[axis] = t
        limit[axis] = t + (no - 1) * s + 1
        strides[axis] = s
        taps.append(lax.slice(x, tuple(start), tuple(limit), tuple(strides)))
    return pallas_max3(*taps)


def maxpool3d(x, k, s):
    for axis in (1, 2, 3):          # separable: D, then H, then W
        x = _maxpool_axis(x, axis, k, s)
    return x


# ------------------------ adaptive average pool to 1x1x1 --------------------
def _gap_kernel(x_ref, o_ref):
    @pl.when(pl.program_id(1) == 0)
    def _():
        o_ref[...] = jnp.zeros_like(o_ref)
    o_ref[...] += jnp.sum(x_ref[...], axis=1, keepdims=True)


def global_avgpool(x):
    """AdaptiveAvgPool3d([1,1,1]): global mean over D,H,W per (batch, channel)."""
    B, D, H, W, C = x.shape
    S = D * H * W
    x3 = x.reshape(B, S, C)
    Sp = _round_up(S, 8)
    ts = min(Sp, 1024)
    Sp = _round_up(Sp, ts)
    x3 = _pad_axis(x3, 1, Sp)                      # zero rows do not affect the sum
    out = pl.pallas_call(
        _gap_kernel,
        out_shape=jax.ShapeDtypeStruct((B, 1, C), jnp.float32),
        grid=(B, Sp // ts),
        in_specs=[pl.BlockSpec((1, ts, C), lambda b, i: (b, i, 0))],
        out_specs=pl.BlockSpec((1, 1, C), lambda b, i: (b, 0, 0)),
        compiler_params=pltpu.CompilerParams(
            dimension_semantics=("parallel", "arbitrary")),
    )(x3)
    return (out / float(S)).reshape(B, 1, 1, 1, C)


# ------------------------------- forward pass -------------------------------
def an3ddr_forward(params, x_ncdhw):
    # NCDHW -> NDHWC
    x = jnp.transpose(x_ncdhw, (0, 2, 3, 4, 1)).astype(jnp.float32)

    x = conv3d(x, params["conv1_w"], params["conv1_b"], stride=1, padding=0)
    x = batchnorm3d_relu(x, params["bn1_g"], params["bn1_b"])
    x = maxpool3d(x, 3, 3)

    x = conv3d(x, params["conv2_w"], params["conv2_b"], stride=1, padding=0)
    x = batchnorm3d_relu(x, params["bn2_g"], params["bn2_b"])
    x = maxpool3d(x, 3, 1)

    x = conv3d(x, params["conv3_w"], params["conv3_b"], stride=1, padding=1)
    x = batchnorm3d_relu(x, params["bn3_g"], params["bn3_b"])
    x = conv3d(x, params["conv4_w"], params["conv4_b"], stride=1, padding=1)
    x = batchnorm3d_relu(x, params["bn4_g"], params["bn4_b"])
    x = conv3d(x, params["conv5_w"], params["conv5_b"], stride=1, padding=1)
    x = batchnorm3d_relu(x, params["bn5_g"], params["bn5_b"])

    xp = global_avgpool(x)                          # (B, 1, 1, 1, 128) NDHWC
    feat = xp.reshape(xp.shape[0], -1)              # == xp.view(B, -1) (spatial dims are 1)

    # classifier: Dropout -> Linear(128,64) -> ReLU -> Dropout -> Linear(64,num_classes)
    # TODO(synk): Dropout is identity here (inference semantics).
    h = pallas_matmul(feat, params["fc1_w"].T, params["fc1_b"], relu=True)
    logits = pallas_matmul(h, params["fc2_w"].T, params["fc2_b"])

    xp_ncdhw = jnp.transpose(xp, (0, 4, 1, 2, 3))   # (B, 128, 1, 1, 1)
    return [logits, xp_ncdhw]


# ----------------------------- parameter init --------------------------------
def init_params(key, num_classes=NUM_CLASSES, num_channels=1):
    ks = iter(jax.random.split(key, 16))

    def conv(cout, cin, k):
        fan = cin * k * k * k
        w = jax.random.normal(next(ks), (cout, cin, k, k, k), jnp.float32) * np.sqrt(2.0 / fan)
        b = jax.random.normal(next(ks), (cout,), jnp.float32) * 0.01
        return w, b

    def linear(cout, cin):
        w = jax.random.normal(next(ks), (cout, cin), jnp.float32) / np.sqrt(cin)
        b = jax.random.normal(next(ks), (cout,), jnp.float32) * 0.01
        return w, b

    def ones(c):
        return jnp.ones((c,), jnp.float32)

    def zeros(c):
        return jnp.zeros((c,), jnp.float32)

    p = {}
    p["conv1_w"], p["conv1_b"] = conv(64, num_channels, 5)
    p["bn1_g"], p["bn1_b"] = ones(64), zeros(64)
    p["conv2_w"], p["conv2_b"] = conv(128, 64, 3)
    p["bn2_g"], p["bn2_b"] = ones(128), zeros(128)
    p["conv3_w"], p["conv3_b"] = conv(192, 128, 3)
    p["bn3_g"], p["bn3_b"] = ones(192), zeros(192)
    p["conv4_w"], p["conv4_b"] = conv(192, 192, 3)
    p["bn4_g"], p["bn4_b"] = ones(192), zeros(192)
    p["conv5_w"], p["conv5_b"] = conv(128, 192, 3)
    p["bn5_g"], p["bn5_b"] = ones(128), zeros(128)
    p["fc1_w"], p["fc1_b"] = linear(64, 128)
    p["fc2_w"], p["fc2_b"] = linear(num_classes, 64)
    return p


if __name__ == "__main__":
    key = jax.random.PRNGKey(0)
    pkey, xkey = jax.random.split(key)
    params = init_params(pkey, num_classes=NUM_CLASSES, num_channels=1)

    # Small input consistent with the module: (B=2, C=1, 22, 22, 22)
    #   conv1(k5)->18^3, maxpool(3,3)->6^3, conv2(k3)->4^3, maxpool(3,1)->2^3,
    #   three padded k3 convs keep 2^3, adaptive avg pool -> 1^3, classifier 128->64->2.
    x = jax.random.normal(xkey, (2, 1, 22, 22, 22), jnp.float32)

    fwd = jax.jit(an3ddr_forward)
    logits, feats = fwd(params, x)
    jax.block_until_ready((logits, feats))

    assert logits.shape == (2, NUM_CLASSES), logits.shape
    assert feats.shape == (2, 128, 1, 1, 1), feats.shape
    assert bool(jnp.all(jnp.isfinite(logits))) and bool(jnp.all(jnp.isfinite(feats)))
    print("KERNEL_OK")
</pallas_src>

<mosaic_0001>
module attributes {stable_mosaic.version = 11 : i64} {
  func.func @_matmul_kernel(%arg0: i32, %arg1: i32, %arg2: i32, %arg3: memref<512x128xbf16, #tpu.memory_space<vmem>>, %arg4: memref<128x128xbf16, #tpu.memory_space<vmem>>, %arg5: memref<1x128xf32, #tpu.memory_space<vmem>>, %arg6: memref<512x128xf32, #tpu.memory_space<vmem>>, %arg7: memref<512x128xf32, #tpu.memory_space<vmem>>) attributes {dimension_semantics = [#tpu.dimension_semantics<parallel>, #tpu.dimension_semantics<parallel>, #tpu.dimension_semantics<arbitrary>], iteration_bounds = array<i64: 23, 1, 1>, scalar_prefetch = 0 : i64, scratch_operands = 1 : i64, tpu.core_type = #tpu.core_type<tc>, window_params = [{transform_indices = @transform_0, window_bounds = array<i64: 512, 128>}, {transform_indices = @transform_1, window_bounds = array<i64: 128, 128>}, {transform_indices = @transform_2, window_bounds = array<i64: 1, 128>}, {transform_indices = @transform_3, window_bounds = array<i64: 512, 128>}]} {
    %c0_i32 = arith.constant 0 : i32
    %0 = arith.cmpi eq, %arg2, %c0_i32 : i32
    %1 = arith.extui %0 : i1 to i32
    %c0_i32_0 = arith.constant 0 : i32
    %2 = arith.cmpi ne, %1, %c0_i32_0 : i32
    scf.if %2 {
      %cst_10 = arith.constant 0.000000e+00 : f32
      %12 = vector.broadcast %cst_10 : f32 to vector<512x128xf32>
      %c0_11 = arith.constant 0 : index
      %c0_12 = arith.constant 0 : index
      %13 = vector.load %arg7[%c0_11, %c0_12] : memref<512x128xf32, #tpu.memory_space<vmem>>, vector<512x128xf32>
      tpu.vector_store %arg7[%c0_11, %c0_12], %12 {strides = array<i32>} : memref<512x128xf32, #tpu.memory_space<vmem>>, vector<512x128xf32>,
    } else {
    }
    %c0 = arith.constant 0 : index
    %c0_1 = arith.constant 0 : index
    %3 = vector.load %arg7[%c0, %c0_1] : memref<512x128xf32, #tpu.memory_space<vmem>>, vector<512x128xf32>
    %c0_2 = arith.constant 0 : index
    %c0_3 = arith.constant 0 : index
    %4 = vector.load %arg3[%c0_2, %c0_3] : memref<512x128xbf16, #tpu.memory_space<vmem>>, vector<512x128xbf16>
    %c0_4 = arith.constant 0 : index
    %c0_5 = arith.constant 0 : index
    %5 = vector.load %arg4[%c0_4, %c0_5] : memref<128x128xbf16, #tpu.memory_space<vmem>>, vector<128x128xbf16>
    %cst = arith.constant dense<0.000000e+00> : vector<512x128xf32>
    %6 = tpu.matmul %4, %5, %cst {dimension_numbers = #tpu.dot_dimension_numbers<[1], [0], [0], [1], [0, 0, 1, 1], [], []>} : vector<512x128xbf16>, vector<128x128xbf16>, vector<512x128xf32> -> vector<512x128xf32>
    %7 = arith.addf %3, %6 : vector<512x128xf32>
    %c0_6 = arith.constant 0 : index
    %c0_7 = arith.constant 0 : index
    %8 = vector.load %arg7[%c0_6, %c0_7] : memref<512x128xf32, #tpu.memory_space<vmem>>, vector<512x128xf32>
    tpu.vector_store %arg7[%c0_6, %c0_7], %7 {strides = array<i32>} : memref<512x128xf32, #tpu.memory_space<vmem>>, vector<512x128xf32>,
    %c0_i32_8 = arith.constant 0 : i32
    %9 = arith.cmpi eq, %arg2, %c0_i32_8 : i32
    %10 = arith.extui %9 : i1 to i32
    %c0_i32_9 = arith.constant 0 : i32
    %11 = arith.cmpi ne, %10, %c0_i32_9 : i32
    scf.if %11 {
      %c0_10 = arith.constant 0 : index
      %c0_11 = arith.constant 0 : index
      %12 = vector.load %arg7[%c0_10, %c0_11] : memref<512x128xf32, #tpu.memory_space<vmem>>, vector<512x128xf32>
      %c0_12 = arith.constant 0 : index
      %c0_13 = arith.constant 0 : index
      %13 = vector.load %arg5[%c0_12, %c0_13] : memref<1x128xf32, #tpu.memory_space<vmem>>, vector<1x128xf32>
      %14 = vector.broadcast %13 : vector<1x128xf32> to vector<512x128xf32>
      %15 = arith.addf %12, %14 : vector<512x128xf32>
      %c0_14 = arith.constant 0 : index
      %c0_15 = arith.constant 0 : index
      %16 = vector.load %arg6[%c0_14, %c0_15] : memref<512x128xf32, #tpu.memory_space<vmem>>, vector<512x128xf32>
      tpu.vector_store %arg6[%c0_14, %c0_15], %15 {strides = array<i32>} : memref<512x128xf32, #tpu.memory_space<vmem>>, vector<512x128xf32>,
    } else {
    }
    return
  }
  func.func @transform_0(%arg0: i32, %arg1: i32, %arg2: i32) -> (i32, i32) {
    %c0_i32 = arith.constant 0 : i32
    return %arg0, %arg2 : i32, i32
  }
  func.func @transform_1(%arg0: i32, %arg1: i32, %arg2: i32) -> (i32, i32) {
    %c0_i32 = arith.constant 0 : i32
    return %arg2, %arg1 : i32, i32
  }
  func.func @transform_2(%arg0: i32, %arg1: i32, %arg2: i32) -> (i32, i32) {
    %c0_i32 = arith.constant 0 : i32
    %c0_i32_0 = arith.constant 0 : i32
    return %c0_i32, %arg1 : i32, i32
  }
  func.func @transform_3(%arg0: i32, %arg1: i32, %arg2: i32) -> (i32, i32) {
    %c0_i32 = arith.constant 0 : i32
    return %arg0, %arg1 : i32, i32
  }
}

module attributes {stable_mosaic.version = 11 : i64} {
  func.func @_bnstats_kernel(%arg0: i32, %arg1: memref<1024x64xf32, #tpu.memory_space<vmem>>, %arg2: memref<1x64xf32, #tpu.memory_space<vmem>>, %arg3: memref<1x64xf32, #tpu.memory_space<vmem>>) attributes {dimension_semantics = [#tpu.dimension_semantics<arbitrary>], iteration_bounds = array<i64: 12>, scalar_prefetch = 0 : i64, scratch_operands = 0 : i64, tpu.core_type = #tpu.core_type<tc>, window_params = [{transform_indices = @transform_0, window_bounds = array<i64: 1024, 64>}, {pipeline_mode = #tpu.pipeline_mode<synchronous>, transform_indices = @transform_1, window_bounds = array<i64: 1, 64>}, {pipeline_mode = #tpu.pipeline_mode<synchronous>, transform_indices = @transform_2, window_bounds = array<i64: 1, 64>}]} {
    %c0_i32 = arith.constant 0 : i32
    %0 = arith.cmpi eq, %arg0, %c0_i32 : i32
    %1 = arith.extui %0 : i1 to i32
    %c0_i32_0 = arith.constant 0 : i32
    %2 = arith.cmpi ne, %1, %c0_i32_0 : i32
    scf.if %2 {
      %cst_11 = arith.constant 0.000000e+00 : f32
      %15 = vector.broadcast %cst_11 : f32 to vector<1x64xf32>
      %c0_12 = arith.constant 0 : index
      %c0_13 = arith.constant 0 : index
      %16 = vector.load %arg2[%c0_12, %c0_13] : memref<1x64xf32, #tpu.memory_space<vmem>>, vector<1x64xf32>
      tpu.vector_store %arg2[%c0_12, %c0_13], %15 {strides = array<i32>} : memref<1x64xf32, #tpu.memory_space<vmem>>, vector<1x64xf32>,
      %cst_14 = arith.constant 0.000000e+00 : f32
      %17 = vector.broadcast %cst_14 : f32 to vector<1x64xf32>
      %c0_15 = arith.constant 0 : index
      %c0_16 = arith.constant 0 : index
      %18 = vector.load %arg3[%c0_15, %c0_16] : memref<1x64xf32, #tpu.memory_space<vmem>>, vector<1x64xf32>
      tpu.vector_store %arg3[%c0_15, %c0_16], %17 {strides = array<i32>} : memref<1x64xf32, #tpu.memory_space<vmem>>, vector<1x64xf32>,
    } else {
    }
    %c0 = arith.constant 0 : index
    %c0_1 = arith.constant 0 : index
    %3 = vector.load %arg1[%c0, %c0_1] : memref<1024x64xf32, #tpu.memory_space<vmem>>, vector<1024x64xf32>
    %c0_2 = arith.constant 0 : index
    %c0_3 = arith.constant 0 : index
    %4 = vector.load %arg2[%c0_2, %c0_3] : memref<1x64xf32, #tpu.memory_space<vmem>>, vector<1x64xf32>
    %cst = arith.constant dense<0.000000e+00> : vector<64xf32>
    %5 = vector.multi_reduction <add>, %3, %cst [0] : vector<1024x64xf32> to vector<64xf32>
    %6 = vector.shape_cast %5 : vector<64xf32> to vector<1x64xf32>
    %7 = arith.addf %4, %6 : vector<1x64xf32>
    %c0_4 = arith.constant 0 : index
    %c0_5 = arith.constant 0 : index
    %8 = vector.load %arg2[%c0_4, %c0_5] : memref<1x64xf32, #tpu.memory_space<vmem>>, vector<1x64xf32>
    tpu.vector_store %arg2[%c0_4, %c0_5], %7 {strides = array<i32>} : memref<1x64xf32, #tpu.memory_space<vmem>>, vector<1x64xf32>,
    %c0_6 = arith.constant 0 : index
    %c0_7 = arith.constant 0 : index
    %9 = vector.load %arg3[%c0_6, %c0_7] : memref<1x64xf32, #tpu.memory_space<vmem>>, vector<1x64xf32>
    %10 = arith.mulf %3, %3 : vector<1024x64xf32>
    %cst_8 = arith.constant dense<0.000000e+00> : vector<64xf32>
    %11 = vector.multi_reduction <add>, %10, %cst_8 [0] : vector<1024x64xf32> to vector<64xf32>
    %12 = vector.shape_cast %11 : vector<64xf32> to vector<1x64xf32>
    %13 = arith.addf %9, %12 : vector<1x64xf32>
    %c0_9 = arith.constant 0 : index
    %c0_10 = arith.constant 0 : index
    %14 = vector.load %arg3[%c0_9, %c0_10] : memref<1x64xf32, #tpu.memory_space<vmem>>, vector<1x64xf32>
    tpu.vector_store %arg3[%c0_9, %c0_10], %13 {strides = array<i32>} : memref<1x64xf32, #tpu.memory_space<vmem>>, vector<1x64xf32>,
    return
  }
  func.func @transform_0(%arg0: i32) -> (i32, i32) {
    %c0_i32 = arith.constant 0 : i32
    %c0_i32_0 = arith.constant 0 : i32
    return %arg0, %c0_i32 : i32, i32
  }
  func.func @transform_1(%arg0: i32) -> (i32, i32) {
    %c0_i32 = arith.constant 0 : i32
    %c0_i32_0 = arith.constant 0 : i32
    %c0_i32_1 = arith.constant 0 : i32
    return %c0_i32, %c0_i32_0 : i32, i32
  }
  func.func @transform_2(%arg0: i32) -> (i32, i32) {
    %c0_i32 = arith.constant 0 : i32
    %c0_i32_0 = arith.constant 0 : i32
    %c0_i32_1 = arith.constant 0 : i32
    return %c0_i32, %c0_i32_0 : i32, i32
  }
}

module attributes {stable_mosaic.version = 11 : i64} {
  func.func @_affine_kernel(%arg0: i32, %arg1: memref<1024x64xf32, #tpu.memory_space<vmem>>, %arg2: memref<1x64xf32, #tpu.memory_space<vmem>>, %arg3: memref<1x64xf32, #tpu.memory_space<vmem>>, %arg4: memref<1024x64xf32, #tpu.memory_space<vmem>>) attributes {dimension_semantics = [#tpu.dimension_semantics<parallel>], iteration_bounds = array<i64: 12>, scalar_prefetch = 0 : i64, scratch_operands = 0 : i64, tpu.core_type = #tpu.core_type<tc>, window_params = [{transform_indices = @transform_0, window_bounds = array<i64: 1024, 64>}, {pipeline_mode = #tpu.pipeline_mode<synchronous>, transform_indices = @transform_1, window_bounds = array<i64: 1, 64>}, {pipeline_mode = #tpu.pipeline_mode<synchronous>, transform_indices = @transform_2, window_bounds = array<i64: 1, 64>}, {transform_indices = @transform_3, window_bounds = array<i64: 1024, 64>}]} {
    %c0 = arith.constant 0 : index
    %c0_0 = arith.constant 0 : index
    %0 = vector.load %arg1[%c0, %c0_0] : memref<1024x64xf32, #tpu.memory_space<vmem>>, vector<1024x64xf32>
    %c0_1 = arith.constant 0 : index
    %c0_2 = arith.constant 0 : index
    %1 = vector.load %arg2[%c0_1, %c0_2] : memref<1x64xf32, #tpu.memory_space<vmem>>, vector<1x64xf32>
    %2 = vector.broadcast %1 : vector<1x64xf32> to vector<1024x64xf32>
    %3 = arith.mulf %0, %2 : vector<1024x64xf32>
    %c0_3 = arith.constant 0 : index
    %c0_4 = arith.constant 0 : index
    %4 = vector.load %arg3[%c0_3, %c0_4] : memref<1x64xf32, #tpu.memory_space<vmem>>, vector<1x64xf32>
    %5 = vector.broadcast %4 : vector<1x64xf32> to vector<1024x64xf32>
    %6 = arith.addf %3, %5 : vector<1024x64xf32>
    %cst = arith.constant 0.000000e+00 : f32
    %7 = vector.broadcast %cst : f32 to vector<1024x64xf32>
    %8 = arith.maximumf %6, %7 : vector<1024x64xf32>
    %c0_5 = arith.constant 0 : index
    %c0_6 = arith.constant 0 : index
    %9 = vector.load %arg4[%c0_5, %c0_6] : memref<1024x64xf32, #tpu.memory_space<vmem>>, vector<1024x64xf32>
    tpu.vector_store %arg4[%c0_5, %c0_6], %8 {strides = array<i32>} : memref<1024x64xf32, #tpu.memory_space<vmem>>, vector<1024x64xf32>,
    return
  }
  func.func @transform_0(%arg0: i32) -> (i32, i32) {
    %c0_i32 = arith.constant 0 : i32
    %c0_i32_0 = arith.constant 0 : i32
    return %arg0, %c0_i32 : i32, i32
  }
  func.func @transform_1(%arg0: i32) -> (i32, i32) {
    %c0_i32 = arith.constant 0 : i32
    %c0_i32_0 = arith.constant 0 : i32
    %c0_i32_1 = arith.constant 0 : i32
    return %c0_i32, %c0_i32_0 : i32, i32
  }
  func.func @transform_2(%arg0: i32) -> (i32, i32) {
    %c0_i32 = arith.constant 0 : i32
    %c0_i32_0 = arith.constant 0 : i32
    %c0_i32_1 = arith.constant 0 : i32
    return %c0_i32, %c0_i32_0 : i32, i32
  }
  func.func @transform_3(%arg0: i32) -> (i32, i32) {
    %c0_i32 = arith.constant 0 : i32
    %c0_i32_0 = arith.constant 0 : i32
    return %arg0, %c0_i32 : i32, i32
  }
}

module attributes {stable_mosaic.version = 11 : i64} {
  func.func @_max3_kernel(%arg0: i32, %arg1: memref<1024x128xf32, #tpu.memory_space<vmem>>, %arg2: memref<1024x128xf32, #tpu.memory_space<vmem>>, %arg3: memref<1024x128xf32, #tpu.memory_space<vmem>>, %arg4: memref<1024x128xf32, #tpu.memory_space<vmem>>) attributes {dimension_semantics = [#tpu.dimension_semantics<parallel>], iteration_bounds = array<i64: 2>, scalar_prefetch = 0 : i64, scratch_operands = 0 : i64, tpu.core_type = #tpu.core_type<tc>, window_params = [{transform_indices = @transform_0, window_bounds = array<i64: 1024, 128>}, {transform_indices = @transform_1, window_bounds = array<i64: 1024, 128>}, {transform_indices = @transform_2, window_bounds = array<i64: 1024, 128>}, {transform_indices = @transform_3, window_bounds = array<i64: 1024, 128>}]} {
    %c0 = arith.constant 0 : index
    %c0_0 = arith.constant 0 : index
    %0 = vector.load %arg1[%c0, %c0_0] : memref<1024x128xf32, #tpu.memory_space<vmem>>, vector<1024x128xf32>
    %c0_1 = arith.constant 0 : index
    %c0_2 = arith.constant 0 : index
    %1 = vector.load %arg2[%c0_1, %c0_2] : memref<1024x128xf32, #tpu.memory_space<vmem>>, vector<1024x128xf32>
    %2 = arith.maximumf %0, %1 : vector<1024x128xf32>
    %c0_3 = arith.constant 0 : index
    %c0_4 = arith.constant 0 : index
    %3 = vector.load %arg3[%c0_3, %c0_4] : memref<1024x128xf32, #tpu.memory_space<vmem>>, vector<1024x128xf32>
    %4 = arith.maximumf %2, %3 : vector<1024x128xf32>
    %c0_5 = arith.constant 0 : index
    %c0_6 = arith.constant 0 : index
    %5 = vector.load %arg4[%c0_5, %c0_6] : memref<1024x128xf32, #tpu.memory_space<vmem>>, vector<1024x128xf32>
    tpu.vector_store %arg4[%c0_5, %c0_6], %4 {strides = array<i32>} : memref<1024x128xf32, #tpu.memory_space<vmem>>, vector<1024x128xf32>,
    return
  }
  func.func @transform_0(%arg0: i32) -> (i32, i32) {
    %c0_i32 = arith.constant 0 : i32
    %c0_i32_0 = arith.constant 0 : i32
    return %arg0, %c0_i32 : i32, i32
  }
  func.func @transform_1(%arg0: i32) -> (i32, i32) {
    %c0_i32 = arith.constant 0 : i32
    %c0_i32_0 = arith.constant 0 : i32
    return %arg0, %c0_i32 : i32, i32
  }
  func.func @transform_2(%arg0: i32) -> (i32, i32) {
    %c0_i32 = arith.constant 0 : i32
    %c0_i32_0 = arith.constant 0 : i32
    return %arg0, %c0_i32 : i32, i32
  }
  func.func @transform_3(%arg0: i32) -> (i32, i32) {
    %c0_i32 = arith.constant 0 : i32
    %c0_i32_0 = arith.constant 0 : i32
    return %arg0, %c0_i32 : i32, i32
  }
}

module attributes {stable_mosaic.version = 11 : i64} {
  func.func @_max3_kernel(%arg0: i32, %arg1: memref<648x128xf32, #tpu.memory_space<vmem>>, %arg2: memref<648x128xf32, #tpu.memory_space<vmem>>, %arg3: memref<648x128xf32, #tpu.memory_space<vmem>>, %arg4: memref<648x128xf32, #tpu.memory_space<vmem>>) attributes {dimension_semantics = [#tpu.dimension_semantics<parallel>], iteration_bounds = array<i64: 1>, scalar_prefetch = 0 : i64, scratch_operands = 0 : i64, tpu.core_type = #tpu.core_type<tc>, window_params = [{transform_indices = @transform_0, window_bounds = array<i64: 648, 128>}, {transform_indices = @transform_1, window_bounds = array<i64: 648, 128>}, {transform_indices = @transform_2, window_bounds = array<i64: 648, 128>}, {transform_indices = @transform_3, window_bounds = array<i64: 648, 128>}]} {
    %c0 = arith.constant 0 : index
    %c0_0 = arith.constant 0 : index
    %0 = vector.load %arg1[%c0, %c0_0] : memref<648x128xf32, #tpu.memory_space<vmem>>, vector<648x128xf32>
    %c0_1 = arith.constant 0 : index
    %c0_2 = arith.constant 0 : index
    %1 = vector.load %arg2[%c0_1, %c0_2] : memref<648x128xf32, #tpu.memory_space<vmem>>, vector<648x128xf32>
    %2 = arith.maximumf %0, %1 : vector<648x128xf32>
    %c0_3 = arith.constant 0 : index
    %c0_4 = arith.constant 0 : index
    %3 = vector.load %arg3[%c0_3, %c0_4] : memref<648x128xf32, #tpu.memory_space<vmem>>, vector<648x128xf32>
    %4 = arith.maximumf %2, %3 : vector<648x128xf32>
    %c0_5 = arith.constant 0 : index
    %c0_6 = arith.constant 0 : index
    %5 = vector.load %arg4[%c0_5, %c0_6] : memref<648x128xf32, #tpu.memory_space<vmem>>, vector<648x128xf32>
    tpu.vector_store %arg4[%c0_5, %c0_6], %4 {strides = array<i32>} : memref<648x128xf32, #tpu.memory_space<vmem>>, vector<648x128xf32>,
    return
  }
  func.func @transform_0(%arg0: i32) -> (i32, i32) {
    %c0_i32 = arith.constant 0 : i32
    %c0_i32_0 = arith.constant 0 : i32
    return %arg0, %c0_i32 : i32, i32
  }
  func.func @transform_1(%arg0: i32) -> (i32, i32) {
    %c0_i32 = arith.constant 0 : i32
    %c0_i32_0 = arith.constant 0 : i32
    return %arg0, %c0_i32 : i32, i32
  }
  func.func @transform_2(%arg0: i32) -> (i32, i32) {
    %c0_i32 = arith.constant 0 : i32
    %c0_i32_0 = arith.constant 0 : i32
    return %arg0, %c0_i32 : i32, i32
  }
  func.func @transform_3(%arg0: i32) -> (i32, i32) {
    %c0_i32 = arith.constant 0 : i32
    %c0_i32_0 = arith.constant 0 : i32
    return %arg0, %c0_i32 : i32, i32
  }
}

module attributes {stable_mosaic.version = 11 : i64} {
  func.func @_max3_kernel(%arg0: i32, %arg1: memref<216x128xf32, #tpu.memory_space<vmem>>, %arg2: memref<216x128xf32, #tpu.memory_space<vmem>>, %arg3: memref<216x128xf32, #tpu.memory_space<vmem>>, %arg4: memref<216x128xf32, #tpu.memory_space<vmem>>) attributes {dimension_semantics = [#tpu.dimension_semantics<parallel>], iteration_bounds = array<i64: 1>, scalar_prefetch = 0 : i64, scratch_operands = 0 : i64, tpu.core_type = #tpu.core_type<tc>, window_params = [{transform_indices = @transform_0, window_bounds = array<i64: 216, 128>}, {transform_indices = @transform_1, window_bounds = array<i64: 216, 128>}, {transform_indices = @transform_2, window_bounds = array<i64: 216, 128>}, {transform_indices = @transform_3, window_bounds = array<i64: 216, 128>}]} {
    %c0 = arith.constant 0 : index
    %c0_0 = arith.constant 0 : index
    %0 = vector.load %arg1[%c0, %c0_0] : memref<216x128xf32, #tpu.memory_space<vmem>>, vector<216x128xf32>
    %c0_1 = arith.constant 0 : index
    %c0_2 = arith.constant 0 : index
    %1 = vector.load %arg2[%c0_1, %c0_2] : memref<216x128xf32, #tpu.memory_space<vmem>>, vector<216x128xf32>
    %2 = arith.maximumf %0, %1 : vector<216x128xf32>
    %c0_3 = arith.constant 0 : index
    %c0_4 = arith.constant 0 : index
    %3 = vector.load %arg3[%c0_3, %c0_4] : memref<216x128xf32, #tpu.memory_space<vmem>>, vector<216x128xf32>
    %4 = arith.maximumf %2, %3 : vector<216x128xf32>
    %c0_5 = arith.constant 0 : index
    %c0_6 = arith.constant 0 : index
    %5 = vector.load %arg4[%c0_5, %c0_6] : memref<216x128xf32, #tpu.memory_space<vmem>>, vector<216x128xf32>
    tpu.vector_store %arg4[%c0_5, %c0_6], %4 {strides = array<i32>} : memref<216x128xf32, #tpu.memory_space<vmem>>, vector<216x128xf32>,
    return
  }
  func.func @transform_0(%arg0: i32) -> (i32, i32) {
    %c0_i32 = arith.constant 0 : i32
    %c0_i32_0 = arith.constant 0 : i32
    return %arg0, %c0_i32 : i32, i32
  }
  func.func @transform_1(%arg0: i32) -> (i32, i32) {
    %c0_i32 = arith.constant 0 : i32
    %c0_i32_0 = arith.constant 0 : i32
    return %arg0, %c0_i32 : i32, i32
  }
  func.func @transform_2(%arg0: i32) -> (i32, i32) {
    %c0_i32 = arith.constant 0 : i32
    %c0_i32_0 = arith.constant 0 : i32
    return %arg0, %c0_i32 : i32, i32
  }
  func.func @transform_3(%arg0: i32) -> (i32, i32) {
    %c0_i32 = arith.constant 0 : i32
    %c0_i32_0 = arith.constant 0 : i32
    return %arg0, %c0_i32 : i32, i32
  }
}

module attributes {stable_mosaic.version = 11 : i64} {
  func.func @_matmul_kernel(%arg0: i32, %arg1: i32, %arg2: i32, %arg3: memref<128x1792xbf16, #tpu.memory_space<vmem>>, %arg4: memref<1792x128xbf16, #tpu.memory_space<vmem>>, %arg5: memref<1x128xf32, #tpu.memory_space<vmem>>, %arg6: memref<128x128xf32, #tpu.memory_space<vmem>>, %arg7: memref<128x128xf32, #tpu.memory_space<vmem>>) attributes {dimension_semantics = [#tpu.dimension_semantics<parallel>, #tpu.dimension_semantics<parallel>, #tpu.dimension_semantics<arbitrary>], iteration_bounds = array<i64: 1, 1, 1>, scalar_prefetch = 0 : i64, scratch_operands = 1 : i64, tpu.core_type = #tpu.core_type<tc>, window_params = [{transform_indices = @transform_0, window_bounds = array<i64: 128, 1792>}, {transform_indices = @transform_1, window_bounds = array<i64: 1792, 128>}, {transform_indices = @transform_2, window_bounds = array<i64: 1, 128>}, {transform_indices = @transform_3, window_bounds = array<i64: 128, 128>}]} {
    %c0_i32 = arith.constant 0 : i32
    %0 = arith.cmpi eq, %arg2, %c0_i32 : i32
    %1 = arith.extui %0 : i1 to i32
    %c0_i32_0 = arith.constant 0 : i32
    %2 = arith.cmpi ne, %1, %c0_i32_0 : i32
    scf.if %2 {
      %cst_10 = arith.constant 0.000000e+00 : f32
      %12 = vector.broadcast %cst_10 : f32 to vector<128x128xf32>
      %c0_11 = arith.constant 0 : index
      %c0_12 = arith.constant 0 : index
      %13 = vector.load %arg7[%c0_11, %c0_12] : memref<128x128xf32, #tpu.memory_space<vmem>>, vector<128x128xf32>
      tpu.vector_store %arg7[%c0_11, %c0_12], %12 {strides = array<i32>} : memref<128x128xf32, #tpu.memory_space<vmem>>, vector<128x128xf32>,
    } else {
    }
    %c0 = arith.constant 0 : index
    %c0_1 = arith.constant 0 : index
    %3 = vector.load %arg7[%c0, %c0_1] : memref<128x128xf32, #tpu.memory_space<vmem>>, vector<128x128xf32>
    %c0_2 = arith.constant 0 : index
    %c0_3 = arith.constant 0 : index
    %4 = vector.load %arg3[%c0_2, %c0_3] : memref<128x1792xbf16, #tpu.memory_space<vmem>>, vector<128x1792xbf16>
    %c0_4 = arith.constant 0 : index
    %c0_5 = arith.constant 0 : index
    %5 = vector.load %arg4[%c0_4, %c0_5] : memref<1792x128xbf16, #tpu.memory_space<vmem>>, vector<1792x128xbf16>
    %cst = arith.constant dense<0.000000e+00> : vector<128x128xf32>
    %6 = tpu.matmul %4, %5, %cst {dimension_numbers = #tpu.dot_dimension_numbers<[1], [0], [0], [1], [0, 0, 1, 1], [], []>} : vector<128x1792xbf16>, vector<1792x128xbf16>, vector<128x128xf32> -> vector<128x128xf32>
    %7 = arith.addf %3, %6 : vector<128x128xf32>
    %c0_6 = arith.constant 0 : index
    %c0_7 = arith.constant 0 : index
    %8 = vector.load %arg7[%c0_6, %c0_7] : memref<128x128xf32, #tpu.memory_space<vmem>>, vector<128x128xf32>
    tpu.vector_store %arg7[%c0_6, %c0_7], %7 {strides = array<i32>} : memref<128x128xf32, #tpu.memory_space<vmem>>, vector<128x128xf32>,
    %c0_i32_8 = arith.constant 0 : i32
    %9 = arith.cmpi eq, %arg2, %c0_i32_8 : i32
    %10 = arith.extui %9 : i1 to i32
    %c0_i32_9 = arith.constant 0 : i32
    %11 = arith.cmpi ne, %10, %c0_i32_9 : i32
    scf.if %11 {
      %c0_10 = arith.constant 0 : index
      %c0_11 = arith.constant 0 : index
      %12 = vector.load %arg7[%c0_10, %c0_11] : memref<128x128xf32, #tpu.memory_space<vmem>>, vector<128x128xf32>
      %c0_12 = arith.constant 0 : index
      %c0_13 = arith.constant 0 : index
      %13 = vector.load %arg5[%c0_12, %c0_13] : memref<1x128xf32, #tpu.memory_space<vmem>>, vector<1x128xf32>
      %14 = vector.broadcast %13 : vector<1x128xf32> to vector<128x128xf32>
      %15 = arith.addf %12, %14 : vector<128x128xf32>
      %c0_14 = arith.constant 0 : index
      %c0_15 = arith.constant 0 : index
      %16 = vector.load %arg6[%c0_14, %c0_15] : memref<128x128xf32, #tpu.memory_space<vmem>>, vector<128x128xf32>
      tpu.vector_store %arg6[%c0_14, %c0_15], %15 {strides = array<i32>} : memref<128x128xf32, #tpu.memory_space<vmem>>, vector<128x128xf32>,
    } else {
    }
    return
  }
  func.func @transform_0(%arg0: i32, %arg1: i32, %arg2: i32) -> (i32, i32) {
    %c0_i32 = arith.constant 0 : i32
    return %arg0, %arg2 : i32, i32
  }
  func.func @transform_1(%arg0: i32, %arg1: i32, %arg2: i32) -> (i32, i32) {
    %c0_i32 = arith.constant 0 : i32
    return %arg2, %arg1 : i32, i32
  }
  func.func @transform_2(%arg0: i32, %arg1: i32, %arg2: i32) -> (i32, i32) {
    %c0_i32 = arith.constant 0 : i32
    %c0_i32_0 = arith.constant 0 : i32
    return %c0_i32, %arg1 : i32, i32
  }
  func.func @transform_3(%arg0: i32, %arg1: i32, %arg2: i32) -> (i32, i32) {
    %c0_i32 = arith.constant 0 : i32
    return %arg0, %arg1 : i32, i32
  }
}

module attributes {stable_mosaic.version = 11 : i64} {
  func.func @_bnstats_kernel(%arg0: i32, %arg1: memref<128x128xf32, #tpu.memory_space<vmem>>, %arg2: memref<1x128xf32, #tpu.memory_space<vmem>>, %arg3: memref<1x128xf32, #tpu.memory_space<vmem>>) attributes {dimension_semantics = [#tpu.dimension_semantics<arbitrary>], iteration_bounds = array<i64: 1>, scalar_prefetch = 0 : i64, scratch_operands = 0 : i64, tpu.core_type = #tpu.core_type<tc>, window_params = [{transform_indices = @transform_0, window_bounds = array<i64: 128, 128>}, {pipeline_mode = #tpu.pipeline_mode<synchronous>, transform_indices = @transform_1, window_bounds = array<i64: 1, 128>}, {pipeline_mode = #tpu.pipeline_mode<synchronous>, transform_indices = @transform_2, window_bounds = array<i64: 1, 128>}]} {
    %c0_i32 = arith.constant 0 : i32
    %0 = arith.cmpi eq, %arg0, %c0_i32 : i32
    %1 = arith.extui %0 : i1 to i32
    %c0_i32_0 = arith.constant 0 : i32
    %2 = arith.cmpi ne, %1, %c0_i32_0 : i32
    scf.if %2 {
      %cst_11 = arith.constant 0.000000e+00 : f32
      %15 = vector.broadcast %cst_11 : f32 to vector<1x128xf32>
      %c0_12 = arith.constant 0 : index
      %c0_13 = arith.constant 0 : index
      %16 = vector.load %arg2[%c0_12, %c0_13] : memref<1x128xf32, #tpu.memory_space<vmem>>, vector<1x128xf32>
      tpu.vector_store %arg2[%c0_12, %c0_13], %15 {strides = array<i32>} : memref<1x128xf32, #tpu.memory_space<vmem>>, vector<1x128xf32>,
      %cst_14 = arith.constant 0.000000e+00 : f32
      %17 = vector.broadcast %cst_14 : f32 to vector<1x128xf32>
      %c0_15 = arith.constant 0 : index
      %c0_16 = arith.constant 0 : index
      %18 = vector.load %arg3[%c0_15, %c0_16] : memref<1x128xf32, #tpu.memory_space<vmem>>, vector<1x128xf32>
      tpu.vector_store %arg3[%c0_15, %c0_16], %17 {strides = array<i32>} : memref<1x128xf32, #tpu.memory_space<vmem>>, vector<1x128xf32>,
    } else {
    }
    %c0 = arith.constant 0 : index
    %c0_1 = arith.constant 0 : index
    %3 = vector.load %arg1[%c0, %c0_1] : memref<128x128xf32, #tpu.memory_space<vmem>>, vector<128x128xf32>
    %c0_2 = arith.constant 0 : index
    %c0_3 = arith.constant 0 : index
    %4 = vector.load %arg2[%c0_2, %c0_3] : memref<1x128xf32, #tpu.memory_space<vmem>>, vector<1x128xf32>
    %cst = arith.constant dense<0.000000e+00> : vector<128xf32>
    %5 = vector.multi_reduction <add>, %3, %cst [0] : vector<128x128xf32> to vector<128xf32>
    %6 = vector.shape_cast %5 : vector<128xf32> to vector<1x128xf32>
    %7 = arith.addf %4, %6 : vector<1x128xf32>
    %c0_4 = arith.constant 0 : index
    %c0_5 = arith.constant 0 : index
    %8 = vector.load %arg2[%c0_4, %c0_5] : memref<1x128xf32, #tpu.memory_space<vmem>>, vector<1x128xf32>
    tpu.vector_store %arg2[%c0_4, %c0_5], %7 {strides = array<i32>} : memref<1x128xf32, #tpu.memory_space<vmem>>, vector<1x128xf32>,
    %c0_6 = arith.constant 0 : index
    %c0_7 = arith.constant 0 : index
    %9 = vector.load %arg3[%c0_6, %c0_7] : memref<1x128xf32, #tpu.memory_space<vmem>>, vector<1x128xf32>
    %10 = arith.mulf %3, %3 : vector<128x128xf32>
    %cst_8 = arith.constant dense<0.000000e+00> : vector<128xf32>
    %11 = vector.multi_reduction <add>, %10, %cst_8 [0] : vector<128x128xf32> to vector<128xf32>
    %12 = vector.shape_cast %11 : vector<128xf32> to vector<1x128xf32>
    %13 = arith.addf %9, %12 : vector<1x128xf32>
    %c0_9 = arith.constant 0 : index
    %c0_10 = arith.constant 0 : index
    %14 = vector.load %arg3[%c0_9, %c0_10] : memref<1x128xf32, #tpu.memory_space<vmem>>, vector<1x128xf32>
    tpu.vector_store %arg3[%c0_9, %c0_10], %13 {strides = array<i32>} : memref<1x128xf32, #tpu.memory_space<vmem>>, vector<1x128xf32>,
    return
  }
  func.func @transform_0(%arg0: i32) -> (i32, i32) {
    %c0_i32 = arith.constant 0 : i32
    %c0_i32_0 = arith.constant 0 : i32
    return %arg0, %c0_i32 : i32, i32
  }
  func.func @transform_1(%arg0: i32) -> (i32, i32) {
    %c0_i32 = arith.constant 0 : i32
    %c0_i32_0 = arith.constant 0 : i32
    %c0_i32_1 = arith.constant 0 : i32
    return %c0_i32, %c0_i32_0 : i32, i32
  }
  func.func @transform_2(%arg0: i32) -> (i32, i32) {
    %c0_i32 = arith.constant 0 : i32
    %c0_i32_0 = arith.constant 0 : i32
    %c0_i32_1 = arith.constant 0 : i32
    return %c0_i32, %c0_i32_0 : i32, i32
  }
}

module attributes {stable_mosaic.version = 11 : i64} {
  func.func @_affine_kernel(%arg0: i32, %arg1: memref<128x128xf32, #tpu.memory_space<vmem>>, %arg2: memref<1x128xf32, #tpu.memory_space<vmem>>, %arg3: memref<1x128xf32, #tpu.memory_space<vmem>>, %arg4: memref<128x128xf32, #tpu.memory_space<vmem>>) attributes {dimension_semantics = [#tpu.dimension_semantics<parallel>], iteration_bounds = array<i64: 1>, scalar_prefetch = 0 : i64, scratch_operands = 0 : i64, tpu.core_type = #tpu.core_type<tc>, window_params = [{transform_indices = @transform_0, window_bounds = array<i64: 128, 128>}, {pipeline_mode = #tpu.pipeline_mode<synchronous>, transform_indices = @transform_1, window_bounds = array<i64: 1, 128>}, {pipeline_mode = #tpu.pipeline_mode<synchronous>, transform_indices = @transform_2, window_bounds = array<i64: 1, 128>}, {transform_indices = @transform_3, window_bounds = array<i64: 128, 128>}]} {
    %c0 = arith.constant 0 : index
    %c0_0 = arith.constant 0 : index
    %0 = vector.load %arg1[%c0, %c0_0] : memref<128x128xf32, #tpu.memory_space<vmem>>, vector<128x128xf32>
    %c0_1 = arith.constant 0 : index
    %c0_2 = arith.constant 0 : index
    %1 = vector.load %arg2[%c0_1, %c0_2] : memref<1x128xf32, #tpu.memory_space<vmem>>, vector<1x128xf32>
    %2 = vector.broadcast %1 : vector<1x128xf32> to vector<128x128xf32>
    %3 = arith.mulf %0, %2 : vector<128x128xf32>
    %c0_3 = arith.constant 0 : index
    %c0_4 = arith.constant 0 : index
    %4 = vector.load %arg3[%c0_3, %c0_4] : memref<1x128xf32, #tpu.memory_space<vmem>>, vector<1x128xf32>
    %5 = vector.broadcast %4 : vector<1x128xf32> to vector<128x128xf32>
    %6 = arith.addf %3, %5 : vector<128x128xf32>
    %cst = arith.constant 0.000000e+00 : f32
    %7 = vector.broadcast %cst : f32 to vector<128x128xf32>
    %8 = arith.maximumf %6, %7 : vector<128x128xf32>
    %c0_5 = arith.constant 0 : index
    %c0_6 = arith.constant 0 : index
    %9 = vector.load %arg4[%c0_5, %c0_6] : memref<128x128xf32, #tpu.memory_space<vmem>>, vector<128x128xf32>
    tpu.vector_store %arg4[%c0_5, %c0_6], %8 {strides = array<i32>} : memref<128x128xf32, #tpu.memory_space<vmem>>, vector<128x128xf32>,
    return
  }
  func.func @transform_0(%arg0: i32) -> (i32, i32) {
    %c0_i32 = arith.constant 0 : i32
    %c0_i32_0 = arith.constant 0 : i32
    return %arg0, %c0_i32 : i32, i32
  }
  func.func @transform_1(%arg0: i32) -> (i32, i32) {
    %c0_i32 = arith.constant 0 : i32
    %c0_i32_0 = arith.constant 0 : i32
    %c0_i32_1 = arith.constant 0 : i32
    return %c0_i32, %c0_i32_0 : i32, i32
  }
  func.func @transform_2(%arg0: i32) -> (i32, i32) {
    %c0_i32 = arith.constant 0 : i32
    %c0_i32_0 = arith.constant 0 : i32
    %c0_i32_1 = arith.constant 0 : i32
    return %c0_i32, %c0_i32_0 : i32, i32
  }
  func.func @transform_3(%arg0: i32) -> (i32, i32) {
    %c0_i32 = arith.constant 0 : i32
    %c0_i32_0 = arith.constant 0 : i32
    return %arg0, %c0_i32 : i32, i32
  }
}

module attributes {stable_mosaic.version = 11 : i64} {
  func.func @_max3_kernel(%arg0: i32, %arg1: memref<64x128xf32, #tpu.memory_space<vmem>>, %arg2: memref<64x128xf32, #tpu.memory_space<vmem>>, %arg3: memref<64x128xf32, #tpu.memory_space<vmem>>, %arg4: memref<64x128xf32, #tpu.memory_space<vmem>>) attributes {dimension_semantics = [#tpu.dimension_semantics<parallel>], iteration_bounds = array<i64: 1>, scalar_prefetch = 0 : i64, scratch_operands = 0 : i64, tpu.core_type = #tpu.core_type<tc>, window_params = [{transform_indices = @transform_0, window_bounds = array<i64: 64, 128>}, {transform_indices = @transform_1, window_bounds = array<i64: 64, 128>}, {transform_indices = @transform_2, window_bounds = array<i64: 64, 128>}, {transform_indices = @transform_3, window_bounds = array<i64: 64, 128>}]} {
    %c0 = arith.constant 0 : index
    %c0_0 = arith.constant 0 : index
    %0 = vector.load %arg1[%c0, %c0_0] : memref<64x128xf32, #tpu.memory_space<vmem>>, vector<64x128xf32>
    %c0_1 = arith.constant 0 : index
    %c0_2 = arith.constant 0 : index
    %1 = vector.load %arg2[%c0_1, %c0_2] : memref<64x128xf32, #tpu.memory_space<vmem>>, vector<64x128xf32>
    %2 = arith.maximumf %0, %1 : vector<64x128xf32>
    %c0_3 = arith.constant 0 : index
    %c0_4 = arith.constant 0 : index
    %3 = vector.load %arg3[%c0_3, %c0_4] : memref<64x128xf32, #tpu.memory_space<vmem>>, vector<64x128xf32>
    %4 = arith.maximumf %2, %3 : vector<64x128xf32>
    %c0_5 = arith.constant 0 : index
    %c0_6 = arith.constant 0 : index
    %5 = vector.load %arg4[%c0_5, %c0_6] : memref<64x128xf32, #tpu.memory_space<vmem>>, vector<64x128xf32>
    tpu.vector_store %arg4[%c0_5, %c0_6], %4 {strides = array<i32>} : memref<64x128xf32, #tpu.memory_space<vmem>>, vector<64x128xf32>,
    return
  }
  func.func @transform_0(%arg0: i32) -> (i32, i32) {
    %c0_i32 = arith.constant 0 : i32
    %c0_i32_0 = arith.constant 0 : i32
    return %arg0, %c0_i32 : i32, i32
  }
  func.func @transform_1(%arg0: i32) -> (i32, i32) {
    %c0_i32 = arith.constant 0 : i32
    %c0_i32_0 = arith.constant 0 : i32
    return %arg0, %c0_i32 : i32, i32
  }
  func.func @transform_2(%arg0: i32) -> (i32, i32) {
    %c0_i32 = arith.constant 0 : i32
    %c0_i32_0 = arith.constant 0 : i32
    return %arg0, %c0_i32 : i32, i32
  }
  func.func @transform_3(%arg0: i32) -> (i32, i32) {
    %c0_i32 = arith.constant 0 : i32
    %c0_i32_0 = arith.constant 0 : i32
    return %arg0, %c0_i32 : i32, i32
  }
}

module attributes {stable_mosaic.version = 11 : i64} {
  func.func @_max3_kernel(%arg0: i32, %arg1: memref<32x128xf32, #tpu.memory_space<vmem>>, %arg2: memref<32x128xf32, #tpu.memory_space<vmem>>, %arg3: memref<32x128xf32, #tpu.memory_space<vmem>>, %arg4: memref<32x128xf32, #tpu.memory_space<vmem>>) attributes {dimension_semantics = [#tpu.dimension_semantics<parallel>], iteration_bounds = array<i64: 1>, scalar_prefetch = 0 : i64, scratch_operands = 0 : i64, tpu.core_type = #tpu.core_type<tc>, window_params = [{transform_indices = @transform_0, window_bounds = array<i64: 32, 128>}, {transform_indices = @transform_1, window_bounds = array<i64: 32, 128>}, {transform_indices = @transform_2, window_bounds = array<i64: 32, 128>}, {transform_indices = @transform_3, window_bounds = array<i64: 32, 128>}]} {
    %c0 = arith.constant 0 : index
    %c0_0 = arith.constant 0 : index
    %0 = vector.load %arg1[%c0, %c0_0] : memref<32x128xf32, #tpu.memory_space<vmem>>, vector<32x128xf32>
    %c0_1 = arith.constant 0 : index
    %c0_2 = arith.constant 0 : index
    %1 = vector.load %arg2[%c0_1, %c0_2] : memref<32x128xf32, #tpu.memory_space<vmem>>, vector<32x128xf32>
    %2 = arith.maximumf %0, %1 : vector<32x128xf32>
    %c0_3 = arith.constant 0 : index
    %c0_4 = arith.constant 0 : index
    %3 = vector.load %arg3[%c0_3, %c0_4] : memref<32x128xf32, #tpu.memory_space<vmem>>, vector<32x128xf32>
    %4 = arith.maximumf %2, %3 : vector<32x128xf32>
    %c0_5 = arith.constant 0 : index
    %c0_6 = arith.constant 0 : index
    %5 = vector.load %arg4[%c0_5, %c0_6] : memref<32x128xf32, #tpu.memory_space<vmem>>, vector<32x128xf32>
    tpu.vector_store %arg4[%c0_5, %c0_6], %4 {strides = array<i32>} : memref<32x128xf32, #tpu.memory_space<vmem>>, vector<32x128xf32>,
    return
  }
  func.func @transform_0(%arg0: i32) -> (i32, i32) {
    %c0_i32 = arith.constant 0 : i32
    %c0_i32_0 = arith.constant 0 : i32
    return %arg0, %c0_i32 : i32, i32
  }
  func.func @transform_1(%arg0: i32) -> (i32, i32) {
    %c0_i32 = arith.constant 0 : i32
    %c0_i32_0 = arith.constant 0 : i32
    return %arg0, %c0_i32 : i32, i32
  }
  func.func @transform_2(%arg0: i32) -> (i32, i32) {
    %c0_i32 = arith.constant 0 : i32
    %c0_i32_0 = arith.constant 0 : i32
    return %arg0, %c0_i32 : i32, i32
  }
  func.func @transform_3(%arg0: i32) -> (i32, i32) {
    %c0_i32 = arith.constant 0 : i32
    %c0_i32_0 = arith.constant 0 : i32
    return %arg0, %c0_i32 : i32, i32
  }
}

module attributes {stable_mosaic.version = 11 : i64} {
  func.func @_max3_kernel(%arg0: i32, %arg1: memref<16x128xf32, #tpu.memory_space<vmem>>, %arg2: memref<16x128xf32, #tpu.memory_space<vmem>>, %arg3: memref<16x128xf32, #tpu.memory_space<vmem>>, %arg4: memref<16x128xf32, #tpu.memory_space<vmem>>) attributes {dimension_semantics = [#tpu.dimension_semantics<parallel>], iteration_bounds = array<i64: 1>, scalar_prefetch = 0 : i64, scratch_operands = 0 : i64, tpu.core_type = #tpu.core_type<tc>, window_params = [{transform_indices = @transform_0, window_bounds = array<i64: 16, 128>}, {transform_indices = @transform_1, window_bounds = array<i64: 16, 128>}, {transform_indices = @transform_2, window_bounds = array<i64: 16, 128>}, {transform_indices = @transform_3, window_bounds = array<i64: 16, 128>}]} {
    %c0 = arith.constant 0 : index
    %c0_0 = arith.constant 0 : index
    %0 = vector.load %arg1[%c0, %c0_0] : memref<16x128xf32, #tpu.memory_space<vmem>>, vector<16x128xf32>
    %c0_1 = arith.constant 0 : index
    %c0_2 = arith.constant 0 : index
    %1 = vector.load %arg2[%c0_1, %c0_2] : memref<16x128xf32, #tpu.memory_space<vmem>>, vector<16x128xf32>
    %2 = arith.maximumf %0, %1 : vector<16x128xf32>
    %c0_3 = arith.constant 0 : index
    %c0_4 = arith.constant 0 : index
    %3 = vector.load %arg3[%c0_3, %c0_4] : memref<16x128xf32, #tpu.memory_space<vmem>>, vector<16x128xf32>
    %4 = arith.maximumf %2, %3 : vector<16x128xf32>
    %c0_5 = arith.constant 0 : index
    %c0_6 = arith.constant 0 : index
    %5 = vector.load %arg4[%c0_5, %c0_6] : memref<16x128xf32, #tpu.memory_space<vmem>>, vector<16x128xf32>
    tpu.vector_store %arg4[%c0_5, %c0_6], %4 {strides = array<i32>} : memref<16x128xf32, #tpu.memory_space<vmem>>, vector<16x128xf32>,
    return
  }
  func.func @transform_0(%arg0: i32) -> (i32, i32) {
    %c0_i32 = arith.constant 0 : i32
    %c0_i32_0 = arith.constant 0 : i32
    return %arg0, %c0_i32 : i32, i32
  }
  func.func @transform_1(%arg0: i32) -> (i32, i32) {
    %c0_i32 = arith.constant 0 : i32
    %c0_i32_0 = arith.constant 0 : i32
    return %arg0, %c0_i32 : i32, i32
  }
  func.func @transform_2(%arg0: i32) -> (i32, i32) {
    %c0_i32 = arith.constant 0 : i32
    %c0_i32_0 = arith.constant 0 : i32
    return %arg0, %c0_i32 : i32, i32
  }
  func.func @transform_3(%arg0: i32) -> (i32, i32) {
    %c0_i32 = arith.constant 0 : i32
    %c0_i32_0 = arith.constant 0 : i32
    return %arg0, %c0_i32 : i32, i32
  }
}

module attributes {stable_mosaic.version = 11 : i64} {
  func.func @_matmul_kernel(%arg0: i32, %arg1: i32, %arg2: i32, %arg3: memref<16x512xbf16, #tpu.memory_space<vmem>>, %arg4: memref<512x256xbf16, #tpu.memory_space<vmem>>, %arg5: memref<1x256xf32, #tpu.memory_space<vmem>>, %arg6: memref<16x256xf32, #tpu.memory_space<vmem>>, %arg7: memref<16x256xf32, #tpu.memory_space<vmem>>) attributes {dimension_semantics = [#tpu.dimension_semantics<parallel>, #tpu.dimension_semantics<parallel>, #tpu.dimension_semantics<arbitrary>], iteration_bounds = array<i64: 1, 1, 7>, scalar_prefetch = 0 : i64, scratch_operands = 1 : i64, tpu.core_type = #tpu.core_type<tc>, window_params = [{transform_indices = @transform_0, window_bounds = array<i64: 16, 512>}, {transform_indices = @transform_1, window_bounds = array<i64: 512, 256>}, {transform_indices = @transform_2, window_bounds = array<i64: 1, 256>}, {transform_indices = @transform_3, window_bounds = array<i64: 16, 256>}]} {
    %c0_i32 = arith.constant 0 : i32
    %0 = arith.cmpi eq, %arg2, %c0_i32 : i32
    %1 = arith.extui %0 : i1 to i32
    %c0_i32_0 = arith.constant 0 : i32
    %2 = arith.cmpi ne, %1, %c0_i32_0 : i32
    scf.if %2 {
      %cst_9 = arith.constant 0.000000e+00 : f32
      %12 = vector.broadcast %cst_9 : f32 to vector<16x256xf32>
      %c0_10 = arith.constant 0 : index
      %c0_11 = arith.constant 0 : index
      %13 = vector.load %arg7[%c0_10, %c0_11] : memref<16x256xf32, #tpu.memory_space<vmem>>, vector<16x256xf32>
      tpu.vector_store %arg7[%c0_10, %c0_11], %12 {strides = array<i32>} : memref<16x256xf32, #tpu.memory_space<vmem>>, vector<16x256xf32>,
    } else {
    }
    %c0 = arith.constant 0 : index
    %c0_1 = arith.constant 0 : index
    %3 = vector.load %arg7[%c0, %c0_1] : memref<16x256xf32, #tpu.memory_space<vmem>>, vector<16x256xf32>
    %c0_2 = arith.constant 0 : index
    %c0_3 = arith.constant 0 : index
    %4 = vector.load %arg3[%c0_2, %c0_3] : memref<16x512xbf16, #tpu.memory_space<vmem>>, vector<16x512xbf16>
    %c0_4 = arith.constant 0 : index
    %c0_5 = arith.constant 0 : index
    %5 = vector.load %arg4[%c0_4, %c0_5] : memref<512x256xbf16, #tpu.memory_space<vmem>>, vector<512x256xbf16>
    %cst = arith.constant dense<0.000000e+00> : vector<16x256xf32>
    %6 = tpu.matmul %4, %5, %cst {dimension_numbers = #tpu.dot_dimension_numbers<[1], [0], [0], [1], [0, 0, 1, 1], [], []>} : vector<16x512xbf16>, vector<512x256xbf16>, vector<16x256xf32> -> vector<16x256xf32>
    %7 = arith.addf %3, %6 : vector<16x256xf32>
    %c0_6 = arith.constant 0 : index
    %c0_7 = arith.constant 0 : index
    %8 = vector.load %arg7[%c0_6, %c0_7] : memref<16x256xf32, #tpu.memory_space<vmem>>, vector<16x256xf32>
    tpu.vector_store %arg7[%c0_6, %c0_7], %7 {strides = array<i32>} : memref<16x256xf32, #tpu.memory_space<vmem>>, vector<16x256xf32>,
    %c6_i32 = arith.constant 6 : i32
    %9 = arith.cmpi eq, %arg2, %c6_i32 : i32
    %10 = arith.extui %9 : i1 to i32
    %c0_i32_8 = arith.constant 0 : i32
    %11 = arith.cmpi ne, %10, %c0_i32_8 : i32
    scf.if %11 {
      %c0_9 = arith.constant 0 : index
      %c0_10 = arith.constant 0 : index
      %12 = vector.load %arg7[%c0_9, %c0_10] : memref<16x256xf32, #tpu.memory_space<vmem>>, vector<16x256xf32>
      %c0_11 = arith.constant 0 : index
      %c0_12 = arith.constant 0 : index
      %13 = vector.load %arg5[%c0_11, %c0_12] : memref<1x256xf32, #tpu.memory_space<vmem>>, vector<1x256xf32>
      %14 = vector.broadcast %13 : vector<1x256xf32> to vector<16x256xf32>
      %15 = arith.addf %12, %14 : vector<16x256xf32>
      %c0_13 = arith.constant 0 : index
      %c0_14 = arith.constant 0 : index
      %16 = vector.load %arg6[%c0_13, %c0_14] : memref<16x256xf32, #tpu.memory_space<vmem>>, vector<16x256xf32>
      tpu.vector_store %arg6[%c0_13, %c0_14], %15 {strides = array<i32>} : memref<16x256xf32, #tpu.memory_space<vmem>>, vector<16x256xf32>,
    } else {
    }
    return
  }
  func.func @transform_0(%arg0: i32, %arg1: i32, %arg2: i32) -> (i32, i32) {
    %c0_i32 = arith.constant 0 : i32
    return %arg0, %arg2 : i32, i32
  }
  func.func @transform_1(%arg0: i32, %arg1: i32, %arg2: i32) -> (i32, i32) {
    %c0_i32 = arith.constant 0 : i32
    return %arg2, %arg1 : i32, i32
  }
  func.func @transform_2(%arg0: i32, %arg1: i32, %arg2: i32) -> (i32, i32) {
    %c0_i32 = arith.constant 0 : i32
    %c0_i32_0 = arith.constant 0 : i32
    return %c0_i32, %arg1 : i32, i32
  }
  func.func @transform_3(%arg0: i32, %arg1: i32, %arg2: i32) -> (i32, i32) {
    %c0_i32 = arith.constant 0 : i32
    return %arg0, %arg1 : i32, i32
  }
}

module attributes {stable_mosaic.version = 11 : i64} {
  func.func @_bnstats_kernel(%arg0: i32, %arg1: memref<16x192xf32, #tpu.memory_space<vmem>>, %arg2: memref<1x192xf32, #tpu.memory_space<vmem>>, %arg3: memref<1x192xf32, #tpu.memory_space<vmem>>) attributes {dimension_semantics = [#tpu.dimension_semantics<arbitrary>], iteration_bounds = array<i64: 1>, scalar_prefetch = 0 : i64, scratch_operands = 0 : i64, tpu.core_type = #tpu.core_type<tc>, window_params = [{transform_indices = @transform_0, window_bounds = array<i64: 16, 192>}, {pipeline_mode = #tpu.pipeline_mode<synchronous>, transform_indices = @transform_1, window_bounds = array<i64: 1, 192>}, {pipeline_mode = #tpu.pipeline_mode<synchronous>, transform_indices = @transform_2, window_bounds = array<i64: 1, 192>}]} {
    %c0_i32 = arith.constant 0 : i32
    %0 = arith.cmpi eq, %arg0, %c0_i32 : i32
    %1 = arith.extui %0 : i1 to i32
    %c0_i32_0 = arith.constant 0 : i32
    %2 = arith.cmpi ne, %1, %c0_i32_0 : i32
    scf.if %2 {
      %cst_11 = arith.constant 0.000000e+00 : f32
      %15 = vector.broadcast %cst_11 : f32 to vector<1x192xf32>
      %c0_12 = arith.constant 0 : index
      %c0_13 = arith.constant 0 : index
      %16 = vector.load %arg2[%c0_12, %c0_13] : memref<1x192xf32, #tpu.memory_space<vmem>>, vector<1x192xf32>
      tpu.vector_store %arg2[%c0_12, %c0_13], %15 {strides = array<i32>} : memref<1x192xf32, #tpu.memory_space<vmem>>, vector<1x192xf32>,
      %cst_14 = arith.constant 0.000000e+00 : f32
      %17 = vector.broadcast %cst_14 : f32 to vector<1x192xf32>
      %c0_15 = arith.constant 0 : index
      %c0_16 = arith.constant 0 : index
      %18 = vector.load %arg3[%c0_15, %c0_16] : memref<1x192xf32, #tpu.memory_space<vmem>>, vector<1x192xf32>
      tpu.vector_store %arg3[%c0_15, %c0_16], %17 {strides = array<i32>} : memref<1x192xf32, #tpu.memory_space<vmem>>, vector<1x192xf32>,
    } else {
    }
    %c0 = arith.constant 0 : index
    %c0_1 = arith.constant 0 : index
    %3 = vector.load %arg1[%c0, %c0_1] : memref<16x192xf32, #tpu.memory_space<vmem>>, vector<16x192xf32>
    %c0_2 = arith.constant 0 : index
    %c0_3 = arith.constant 0 : index
    %4 = vector.load %arg2[%c0_2, %c0_3] : memref<1x192xf32, #tpu.memory_space<vmem>>, vector<1x192xf32>
    %cst = arith.constant dense<0.000000e+00> : vector<192xf32>
    %5 = vector.multi_reduction <add>, %3, %cst [0] : vector<16x192xf32> to vector<192xf32>
    %6 = vector.shape_cast %5 : vector<192xf32> to vector<1x192xf32>
    %7 = arith.addf %4, %6 : vector<1x192xf32>
    %c0_4 = arith.constant 0 : index
    %c0_5 = arith.constant 0 : index
    %8 = vector.load %arg2[%c0_4, %c0_5] : memref<1x192xf32, #tpu.memory_space<vmem>>, vector<1x192xf32>
    tpu.vector_store %arg2[%c0_4, %c0_5], %7 {strides = array<i32>} : memref<1x192xf32, #tpu.memory_space<vmem>>, vector<1x192xf32>,
    %c0_6 = arith.constant 0 : index
    %c0_7 = arith.constant 0 : index
    %9 = vector.load %arg3[%c0_6, %c0_7] : memref<1x192xf32, #tpu.memory_space<vmem>>, vector<1x192xf32>
    %10 = arith.mulf %3, %3 : vector<16x192xf32>
    %cst_8 = arith.constant dense<0.000000e+00> : vector<192xf32>
    %11 = vector.multi_reduction <add>, %10, %cst_8 [0] : vector<16x192xf32> to vector<192xf32>
    %12 = vector.shape_cast %11 : vector<192xf32> to vector<1x192xf32>
    %13 = arith.addf %9, %12 : vector<1x192xf32>
    %c0_9 = arith.constant 0 : index
    %c0_10 = arith.constant 0 : index
    %14 = vector.load %arg3[%c0_9, %c0_10] : memref<1x192xf32, #tpu.memory_space<vmem>>, vector<1x192xf32>
    tpu.vector_store %arg3[%c0_9, %c0_10], %13 {strides = array<i32>} : memref<1x192xf32, #tpu.memory_space<vmem>>, vector<1x192xf32>,
    return
  }
  func.func @transform_0(%arg0: i32) -> (i32, i32) {
    %c0_i32 = arith.constant 0 : i32
    %c0_i32_0 = arith.constant 0 : i32
    return %arg0, %c0_i32 : i32, i32
  }
  func.func @transform_1(%arg0: i32) -> (i32, i32) {
    %c0_i32 = arith.constant 0 : i32
    %c0_i32_0 = arith.constant 0 : i32
    %c0_i32_1 = arith.constant 0 : i32
    return %c0_i32, %c0_i32_0 : i32, i32
  }
  func.func @transform_2(%arg0: i32) -> (i32, i32) {
    %c0_i32 = arith.constant 0 : i32
    %c0_i32_0 = arith.constant 0 : i32
    %c0_i32_1 = arith.constant 0 : i32
    return %c0_i32, %c0_i32_0 : i32, i32
  }
}

module attributes {stable_mosaic.version = 11 : i64} {
  func.func @_affine_kernel(%arg0: i32, %arg1: memref<16x192xf32, #tpu.memory_space<vmem>>, %arg2: memref<1x192xf32, #tpu.memory_space<vmem>>, %arg3: memref<1x192xf32, #tpu.memory_space<vmem>>, %arg4: memref<16x192xf32, #tpu.memory_space<vmem>>) attributes {dimension_semantics = [#tpu.dimension_semantics<parallel>], iteration_bounds = array<i64: 1>, scalar_prefetch = 0 : i64, scratch_operands = 0 : i64, tpu.core_type = #tpu.core_type<tc>, window_params = [{transform_indices = @transform_0, window_bounds = array<i64: 16, 192>}, {pipeline_mode = #tpu.pipeline_mode<synchronous>, transform_indices = @transform_1, window_bounds = array<i64: 1, 192>}, {pipeline_mode = #tpu.pipeline_mode<synchronous>, transform_indices = @transform_2, window_bounds = array<i64: 1, 192>}, {transform_indices = @transform_3, window_bounds = array<i64: 16, 192>}]} {
    %c0 = arith.constant 0 : index
    %c0_0 = arith.constant 0 : index
    %0 = vector.load %arg1[%c0, %c0_0] : memref<16x192xf32, #tpu.memory_space<vmem>>, vector<16x192xf32>
    %c0_1 = arith.constant 0 : index
    %c0_2 = arith.constant 0 : index
    %1 = vector.load %arg2[%c0_1, %c0_2] : memref<1x192xf32, #tpu.memory_space<vmem>>, vector<1x192xf32>
    %2 = vector.broadcast %1 : vector<1x192xf32> to vector<16x192xf32>
    %3 = arith.mulf %0, %2 : vector<16x192xf32>
    %c0_3 = arith.constant 0 : index
    %c0_4 = arith.constant 0 : index
    %4 = vector.load %arg3[%c0_3, %c0_4] : memref<1x192xf32, #tpu.memory_space<vmem>>, vector<1x192xf32>
    %5 = vector.broadcast %4 : vector<1x192xf32> to vector<16x192xf32>
    %6 = arith.addf %3, %5 : vector<16x192xf32>
    %cst = arith.constant 0.000000e+00 : f32
    %7 = vector.broadcast %cst : f32 to vector<16x192xf32>
    %8 = arith.maximumf %6, %7 : vector<16x192xf32>
    %c0_5 = arith.constant 0 : index
    %c0_6 = arith.constant 0 : index
    %9 = vector.load %arg4[%c0_5, %c0_6] : memref<16x192xf32, #tpu.memory_space<vmem>>, vector<16x192xf32>
    tpu.vector_store %arg4[%c0_5, %c0_6], %8 {strides = array<i32>} : memref<16x192xf32, #tpu.memory_space<vmem>>, vector<16x192xf32>,
    return
  }
  func.func @transform_0(%arg0: i32) -> (i32, i32) {
    %c0_i32 = arith.constant 0 : i32
    %c0_i32_0 = arith.constant 0 : i32
    return %arg0, %c0_i32 : i32, i32
  }
  func.func @transform_1(%arg0: i32) -> (i32, i32) {
    %c0_i32 = arith.constant 0 : i32
    %c0_i32_0 = arith.constant 0 : i32
    %c0_i32_1 = arith.constant 0 : i32
    return %c0_i32, %c0_i32_0 : i32, i32
  }
  func.func @transform_2(%arg0: i32) -> (i32, i32) {
    %c0_i32 = arith.constant 0 : i32
    %c0_i32_0 = arith.constant 0 : i32
    %c0_i32_1 = arith.constant 0 : i32
    return %c0_i32, %c0_i32_0 : i32, i32
  }
  func.func @transform_3(%arg0: i32) -> (i32, i32) {
    %c0_i32 = arith.constant 0 : i32
    %c0_i32_0 = arith.constant 0 : i32
    return %arg0, %c0_i32 : i32, i32
  }
}

module attributes {stable_mosaic.version = 11 : i64} {
  func.func @_matmul_kernel(%arg0: i32, %arg1: i32, %arg2: i32, %arg3: memref<16x512xbf16, #tpu.memory_space<vmem>>, %arg4: memref<512x256xbf16, #tpu.memory_space<vmem>>, %arg5: memref<1x256xf32, #tpu.memory_space<vmem>>, %arg6: memref<16x256xf32, #tpu.memory_space<vmem>>, %arg7: memref<16x256xf32, #tpu.memory_space<vmem>>) attributes {dimension_semantics = [#tpu.dimension_semantics<parallel>, #tpu.dimension_semantics<parallel>, #tpu.dimension_semantics<arbitrary>], iteration_bounds = array<i64: 1, 1, 11>, scalar_prefetch = 0 : i64, scratch_operands = 1 : i64, tpu.core_type = #tpu.core_type<tc>, window_params = [{transform_indices = @transform_0, window_bounds = array<i64: 16, 512>}, {transform_indices = @transform_1, window_bounds = array<i64: 512, 256>}, {transform_indices = @transform_2, window_bounds = array<i64: 1, 256>}, {transform_indices = @transform_3, window_bounds = array<i64: 16, 256>}]} {
    %c0_i32 = arith.constant 0 : i32
    %0 = arith.cmpi eq, %arg2, %c0_i32 : i32
    %1 = arith.extui %0 : i1 to i32
    %c0_i32_0 = arith.constant 0 : i32
    %2 = arith.cmpi ne, %1, %c0_i32_0 : i32
    scf.if %2 {
      %cst_9 = arith.constant 0.000000e+00 : f32
      %12 = vector.broadcast %cst_9 : f32 to vector<16x256xf32>
      %c0_10 = arith.constant 0 : index
      %c0_11 = arith.constant 0 : index
      %13 = vector.load %arg7[%c0_10, %c0_11] : memref<16x256xf32, #tpu.memory_space<vmem>>, vector<16x256xf32>
      tpu.vector_store %arg7[%c0_10, %c0_11], %12 {strides = array<i32>} : memref<16x256xf32, #tpu.memory_space<vmem>>, vector<16x256xf32>,
    } else {
    }
    %c0 = arith.constant 0 : index
    %c0_1 = arith.constant 0 : index
    %3 = vector.load %arg7[%c0, %c0_1] : memref<16x256xf32, #tpu.memory_space<vmem>>, vector<16x256xf32>
    %c0_2 = arith.constant 0 : index
    %c0_3 = arith.constant 0 : index
    %4 = vector.load %arg3[%c0_2, %c0_3] : memref<16x512xbf16, #tpu.memory_space<vmem>>, vector<16x512xbf16>
    %c0_4 = arith.constant 0 : index
    %c0_5 = arith.constant 0 : index
    %5 = vector.load %arg4[%c0_4, %c0_5] : memref<512x256xbf16, #tpu.memory_space<vmem>>, vector<512x256xbf16>
    %cst = arith.constant dense<0.000000e+00> : vector<16x256xf32>
    %6 = tpu.matmul %4, %5, %cst {dimension_numbers = #tpu.dot_dimension_numbers<[1], [0], [0], [1], [0, 0, 1, 1], [], []>} : vector<16x512xbf16>, vector<512x256xbf16>, vector<16x256xf32> -> vector<16x256xf32>
    %7 = arith.addf %3, %6 : vector<16x256xf32>
    %c0_6 = arith.constant 0 : index
    %c0_7 = arith.constant 0 : index
    %8 = vector.load %arg7[%c0_6, %c0_7] : memref<16x256xf32, #tpu.memory_space<vmem>>, vector<16x256xf32>
    tpu.vector_store %arg7[%c0_6, %c0_7], %7 {strides = array<i32>} : memref<16x256xf32, #tpu.memory_space<vmem>>, vector<16x256xf32>,
    %c10_i32 = arith.constant 10 : i32
    %9 = arith.cmpi eq, %arg2, %c10_i32 : i32
    %10 = arith.extui %9 : i1 to i32
    %c0_i32_8 = arith.constant 0 : i32
    %11 = arith.cmpi ne, %10, %c0_i32_8 : i32
    scf.if %11 {
      %c0_9 = arith.constant 0 : index
      %c0_10 = arith.constant 0 : index
      %12 = vector.load %arg7[%c0_9, %c0_10] : memref<16x256xf32, #tpu.memory_space<vmem>>, vector<16x256xf32>
      %c0_11 = arith.constant 0 : index
      %c0_12 = arith.constant 0 : index
      %13 = vector.load %arg5[%c0_11, %c0_12] : memref<1x256xf32, #tpu.memory_space<vmem>>, vector<1x256xf32>
      %14 = vector.broadcast %13 : vector<1x256xf32> to vector<16x256xf32>
      %15 = arith.addf %12, %14 : vector<16x256xf32>
      %c0_13 = arith.constant 0 : index
      %c0_14 = arith.constant 0 : index
      %16 = vector.load %arg6[%c0_13, %c0_14] : memref<16x256xf32, #tpu.memory_space<vmem>>, vector<16x256xf32>
      tpu.vector_store %arg6[%c0_13, %c0_14], %15 {strides = array<i32>} : memref<16x256xf32, #tpu.memory_space<vmem>>, vector<16x256xf32>,
    } else {
    }
    return
  }
  func.func @transform_0(%arg0: i32, %arg1: i32, %arg2: i32) -> (i32, i32) {
    %c0_i32 = arith.constant 0 : i32
    return %arg0, %arg2 : i32, i32
  }
  func.func @transform_1(%arg0: i32, %arg1: i32, %arg2: i32) -> (i32, i32) {
    %c0_i32 = arith.constant 0 : i32
    return %arg2, %arg1 : i32, i32
  }
  func.func @transform_2(%arg0: i32, %arg1: i32, %arg2: i32) -> (i32, i32) {
    %c0_i32 = arith.constant 0 : i32
    %c0_i32_0 = arith.constant 0 : i32
    return %c0_i32, %arg1 : i32, i32
  }
  func.func @transform_3(%arg0: i32, %arg1: i32, %arg2: i32) -> (i32, i32) {
    %c0_i32 = arith.constant 0 : i32
    return %arg0, %arg1 : i32, i32
  }
}

module attributes {stable_mosaic.version = 11 : i64} {
  func.func @_matmul_kernel(%arg0: i32, %arg1: i32, %arg2: i32, %arg3: memref<16x512xbf16, #tpu.memory_space<vmem>>, %arg4: memref<512x128xbf16, #tpu.memory_space<vmem>>, %arg5: memref<1x128xf32, #tpu.memory_space<vmem>>, %arg6: memref<16x128xf32, #tpu.memory_space<vmem>>, %arg7: memref<16x128xf32, #tpu.memory_space<vmem>>) attributes {dimension_semantics = [#tpu.dimension_semantics<parallel>, #tpu.dimension_semantics<parallel>, #tpu.dimension_semantics<arbitrary>], iteration_bounds = array<i64: 1, 1, 11>, scalar_prefetch = 0 : i64, scratch_operands = 1 : i64, tpu.core_type = #tpu.core_type<tc>, window_params = [{transform_indices = @transform_0, window_bounds = array<i64: 16, 512>}, {transform_indices = @transform_1, window_bounds = array<i64: 512, 128>}, {transform_indices = @transform_2, window_bounds = array<i64: 1, 128>}, {transform_indices = @transform_3, window_bounds = array<i64: 16, 128>}]} {
    %c0_i32 = arith.constant 0 : i32
    %0 = arith.cmpi eq, %arg2, %c0_i32 : i32
    %1 = arith.extui %0 : i1 to i32
    %c0_i32_0 = arith.constant 0 : i32
    %2 = arith.cmpi ne, %1, %c0_i32_0 : i32
    scf.if %2 {
      %cst_9 = arith.constant 0.000000e+00 : f32
      %12 = vector.broadcast %cst_9 : f32 to vector<16x128xf32>
      %c0_10 = arith.constant 0 : index
      %c0_11 = arith.constant 0 : index
      %13 = vector.load %arg7[%c0_10, %c0_11] : memref<16x128xf32, #tpu.memory_space<vmem>>, vector<16x128xf32>
      tpu.vector_store %arg7[%c0_10, %c0_11], %12 {strides = array<i32>} : memref<16x128xf32, #tpu.memory_space<vmem>>, vector<16x128xf32>,
    } else {
    }
    %c0 = arith.constant 0 : index
    %c0_1 = arith.constant 0 : index
    %3 = vector.load %arg7[%c0, %c0_1] : memref<16x128xf32, #tpu.memory_space<vmem>>, vector<16x128xf32>
    %c0_2 = arith.constant 0 : index
    %c0_3 = arith.constant 0 : index
    %4 = vector.load %arg3[%c0_2, %c0_3] : memref<16x512xbf16, #tpu.memory_space<vmem>>, vector<16x512xbf16>
    %c0_4 = arith.constant 0 : index
    %c0_5 = arith.constant 0 : index
    %5 = vector.load %arg4[%c0_4, %c0_5] : memref<512x128xbf16, #tpu.memory_space<vmem>>, vector<512x128xbf16>
    %cst = arith.constant dense<0.000000e+00> : vector<16x128xf32>
    %6 = tpu.matmul %4, %5, %cst {dimension_numbers = #tpu.dot_dimension_numbers<[1], [0], [0], [1], [0, 0, 1, 1], [], []>} : vector<16x512xbf16>, vector<512x128xbf16>, vector<16x128xf32> -> vector<16x128xf32>
    %7 = arith.addf %3, %6 : vector<16x128xf32>
    %c0_6 = arith.constant 0 : index
    %c0_7 = arith.constant 0 : index
    %8 = vector.load %arg7[%c0_6, %c0_7] : memref<16x128xf32, #tpu.memory_space<vmem>>, vector<16x128xf32>
    tpu.vector_store %arg7[%c0_6, %c0_7], %7 {strides = array<i32>} : memref<16x128xf32, #tpu.memory_space<vmem>>, vector<16x128xf32>,
    %c10_i32 = arith.constant 10 : i32
    %9 = arith.cmpi eq, %arg2, %c10_i32 : i32
    %10 = arith.extui %9 : i1 to i32
    %c0_i32_8 = arith.constant 0 : i32
    %11 = arith.cmpi ne, %10, %c0_i32_8 : i32
    scf.if %11 {
      %c0_9 = arith.constant 0 : index
      %c0_10 = arith.constant 0 : index
      %12 = vector.load %arg7[%c0_9, %c0_10] : memref<16x128xf32, #tpu.memory_space<vmem>>, vector<16x128xf32>
      %c0_11 = arith.constant 0 : index
      %c0_12 = arith.constant 0 : index
      %13 = vector.load %arg5[%c0_11, %c0_12] : memref<1x128xf32, #tpu.memory_space<vmem>>, vector<1x128xf32>
      %14 = vector.broadcast %13 : vector<1x128xf32> to vector<16x128xf32>
      %15 = arith.addf %12, %14 : vector<16x128xf32>
      %c0_13 = arith.constant 0 : index
      %c0_14 = arith.constant 0 : index
      %16 = vector.load %arg6[%c0_13, %c0_14] : memref<16x128xf32, #tpu.memory_space<vmem>>, vector<16x128xf32>
      tpu.vector_store %arg6[%c0_13, %c0_14], %15 {strides = array<i32>} : memref<16x128xf32, #tpu.memory_space<vmem>>, vector<16x128xf32>,
    } else {
    }
    return
  }
  func.func @transform_0(%arg0: i32, %arg1: i32, %arg2: i32) -> (i32, i32) {
    %c0_i32 = arith.constant 0 : i32
    return %arg0, %arg2 : i32, i32
  }
  func.func @transform_1(%arg0: i32, %arg1: i32, %arg2: i32) -> (i32, i32) {
    %c0_i32 = arith.constant 0 : i32
    return %arg2, %arg1 : i32, i32
  }
  func.func @transform_2(%arg0: i32, %arg1: i32, %arg2: i32) -> (i32, i32) {
    %c0_i32 = arith.constant 0 : i32
    %c0_i32_0 = arith.constant 0 : i32
    return %c0_i32, %arg1 : i32, i32
  }
  func.func @transform_3(%arg0: i32, %arg1: i32, %arg2: i32) -> (i32, i32) {
    %c0_i32 = arith.constant 0 : i32
    return %arg0, %arg1 : i32, i32
  }
}

module attributes {stable_mosaic.version = 11 : i64} {
  func.func @_bnstats_kernel(%arg0: i32, %arg1: memref<16x128xf32, #tpu.memory_space<vmem>>, %arg2: memref<1x128xf32, #tpu.memory_space<vmem>>, %arg3: memref<1x128xf32, #tpu.memory_space<vmem>>) attributes {dimension_semantics = [#tpu.dimension_semantics<arbitrary>], iteration_bounds = array<i64: 1>, scalar_prefetch = 0 : i64, scratch_operands = 0 : i64, tpu.core_type = #tpu.core_type<tc>, window_params = [{transform_indices = @transform_0, window_bounds = array<i64: 16, 128>}, {pipeline_mode = #tpu.pipeline_mode<synchronous>, transform_indices = @transform_1, window_bounds = array<i64: 1, 128>}, {pipeline_mode = #tpu.pipeline_mode<synchronous>, transform_indices = @transform_2, window_bounds = array<i64: 1, 128>}]} {
    %c0_i32 = arith.constant 0 : i32
    %0 = arith.cmpi eq, %arg0, %c0_i32 : i32
    %1 = arith.extui %0 : i1 to i32
    %c0_i32_0 = arith.constant 0 : i32
    %2 = arith.cmpi ne, %1, %c0_i32_0 : i32
    scf.if %2 {
      %cst_11 = arith.constant 0.000000e+00 : f32
      %15 = vector.broadcast %cst_11 : f32 to vector<1x128xf32>
      %c0_12 = arith.constant 0 : index
      %c0_13 = arith.constant 0 : index
      %16 = vector.load %arg2[%c0_12, %c0_13] : memref<1x128xf32, #tpu.memory_space<vmem>>, vector<1x128xf32>
      tpu.vector_store %arg2[%c0_12, %c0_13], %15 {strides = array<i32>} : memref<1x128xf32, #tpu.memory_space<vmem>>, vector<1x128xf32>,
      %cst_14 = arith.constant 0.000000e+00 : f32
      %17 = vector.broadcast %cst_14 : f32 to vector<1x128xf32>
      %c0_15 = arith.constant 0 : index
      %c0_16 = arith.constant 0 : index
      %18 = vector.load %arg3[%c0_15, %c0_16] : memref<1x128xf32, #tpu.memory_space<vmem>>, vector<1x128xf32>
      tpu.vector_store %arg3[%c0_15, %c0_16], %17 {strides = array<i32>} : memref<1x128xf32, #tpu.memory_space<vmem>>, vector<1x128xf32>,
    } else {
    }
    %c0 = arith.constant 0 : index
    %c0_1 = arith.constant 0 : index
    %3 = vector.load %arg1[%c0, %c0_1] : memref<16x128xf32, #tpu.memory_space<vmem>>, vector<16x128xf32>
    %c0_2 = arith.constant 0 : index
    %c0_3 = arith.constant 0 : index
    %4 = vector.load %arg2[%c0_2, %c0_3] : memref<1x128xf32, #tpu.memory_space<vmem>>, vector<1x128xf32>
    %cst = arith.constant dense<0.000000e+00> : vector<128xf32>
    %5 = vector.multi_reduction <add>, %3, %cst [0] : vector<16x128xf32> to vector<128xf32>
    %6 = vector.shape_cast %5 : vector<128xf32> to vector<1x128xf32>
    %7 = arith.addf %4, %6 : vector<1x128xf32>
    %c0_4 = arith.constant 0 : index
    %c0_5 = arith.constant 0 : index
    %8 = vector.load %arg2[%c0_4, %c0_5] : memref<1x128xf32, #tpu.memory_space<vmem>>, vector<1x128xf32>
    tpu.vector_store %arg2[%c0_4, %c0_5], %7 {strides = array<i32>} : memref<1x128xf32, #tpu.memory_space<vmem>>, vector<1x128xf32>,
    %c0_6 = arith.constant 0 : index
    %c0_7 = arith.constant 0 : index
    %9 = vector.load %arg3[%c0_6, %c0_7] : memref<1x128xf32, #tpu.memory_space<vmem>>, vector<1x128xf32>
    %10 = arith.mulf %3, %3 : vector<16x128xf32>
    %cst_8 = arith.constant dense<0.000000e+00> : vector<128xf32>
    %11 = vector.multi_reduction <add>, %10, %cst_8 [0] : vector<16x128xf32> to vector<128xf32>
    %12 = vector.shape_cast %11 : vector<128xf32> to vector<1x128xf32>
    %13 = arith.addf %9, %12 : vector<1x128xf32>
    %c0_9 = arith.constant 0 : index
    %c0_10 = arith.constant 0 : index
    %14 = vector.load %arg3[%c0_9, %c0_10] : memref<1x128xf32, #tpu.memory_space<vmem>>, vector<1x128xf32>
    tpu.vector_store %arg3[%c0_9, %c0_10], %13 {strides = array<i32>} : memref<1x128xf32, #tpu.memory_space<vmem>>, vector<1x128xf32>,
    return
  }
  func.func @transform_0(%arg0: i32) -> (i32, i32) {
    %c0_i32 = arith.constant 0 : i32
    %c0_i32_0 = arith.constant 0 : i32
    return %arg0, %c0_i32 : i32, i32
  }
  func.func @transform_1(%arg0: i32) -> (i32, i32) {
    %c0_i32 = arith.constant 0 : i32
    %c0_i32_0 = arith.constant 0 : i32
    %c0_i32_1 = arith.constant 0 : i32
    return %c0_i32, %c0_i32_0 : i32, i32
  }
  func.func @transform_2(%arg0: i32) -> (i32, i32) {
    %c0_i32 = arith.constant 0 : i32
    %c0_i32_0 = arith.constant 0 : i32
    %c0_i32_1 = arith.constant 0 : i32
    return %c0_i32, %c0_i32_0 : i32, i32
  }
}

module attributes {stable_mosaic.version = 11 : i64} {
  func.func @_affine_kernel(%arg0: i32, %arg1: memref<16x128xf32, #tpu.memory_space<vmem>>, %arg2: memref<1x128xf32, #tpu.memory_space<vmem>>, %arg3: memref<1x128xf32, #tpu.memory_space<vmem>>, %arg4: memref<16x128xf32, #tpu.memory_space<vmem>>) attributes {dimension_semantics = [#tpu.dimension_semantics<parallel>], iteration_bounds = array<i64: 1>, scalar_prefetch = 0 : i64, scratch_operands = 0 : i64, tpu.core_type = #tpu.core_type<tc>, window_params = [{transform_indices = @transform_0, window_bounds = array<i64: 16, 128>}, {pipeline_mode = #tpu.pipeline_mode<synchronous>, transform_indices = @transform_1, window_bounds = array<i64: 1, 128>}, {pipeline_mode = #tpu.pipeline_mode<synchronous>, transform_indices = @transform_2, window_bounds = array<i64: 1, 128>}, {transform_indices = @transform_3, window_bounds = array<i64: 16, 128>}]} {
    %c0 = arith.constant 0 : index
    %c0_0 = arith.constant 0 : index
    %0 = vector.load %arg1[%c0, %c0_0] : memref<16x128xf32, #tpu.memory_space<vmem>>, vector<16x128xf32>
    %c0_1 = arith.constant 0 : index
    %c0_2 = arith.constant 0 : index
    %1 = vector.load %arg2[%c0_1, %c0_2] : memref<1x128xf32, #tpu.memory_space<vmem>>, vector<1x128xf32>
    %2 = vector.broadcast %1 : vector<1x128xf32> to vector<16x128xf32>
    %3 = arith.mulf %0, %2 : vector<16x128xf32>
    %c0_3 = arith.constant 0 : index
    %c0_4 = arith.constant 0 : index
    %4 = vector.load %arg3[%c0_3, %c0_4] : memref<1x128xf32, #tpu.memory_space<vmem>>, vector<1x128xf32>
    %5 = vector.broadcast %4 : vector<1x128xf32> to vector<16x128xf32>
    %6 = arith.addf %3, %5 : vector<16x128xf32>
    %cst = arith.constant 0.000000e+00 : f32
    %7 = vector.broadcast %cst : f32 to vector<16x128xf32>
    %8 = arith.maximumf %6, %7 : vector<16x128xf32>
    %c0_5 = arith.constant 0 : index
    %c0_6 = arith.constant 0 : index
    %9 = vector.load %arg4[%c0_5, %c0_6] : memref<16x128xf32, #tpu.memory_space<vmem>>, vector<16x128xf32>
    tpu.vector_store %arg4[%c0_5, %c0_6], %8 {strides = array<i32>} : memref<16x128xf32, #tpu.memory_space<vmem>>, vector<16x128xf32>,
    return
  }
  func.func @transform_0(%arg0: i32) -> (i32, i32) {
    %c0_i32 = arith.constant 0 : i32
    %c0_i32_0 = arith.constant 0 : i32
    return %arg0, %c0_i32 : i32, i32
  }
  func.func @transform_1(%arg0: i32) -> (i32, i32) {
    %c0_i32 = arith.constant 0 : i32
    %c0_i32_0 = arith.constant 0 : i32
    %c0_i32_1 = arith.constant 0 : i32
    return %c0_i32, %c0_i32_0 : i32, i32
  }
  func.func @transform_2(%arg0: i32) -> (i32, i32) {
    %c0_i32 = arith.constant 0 : i32
    %c0_i32_0 = arith.constant 0 : i32
    %c0_i32_1 = arith.constant 0 : i32
    return %c0_i32, %c0_i32_0 : i32, i32
  }
  func.func @transform_3(%arg0: i32) -> (i32, i32) {
    %c0_i32 = arith.constant 0 : i32
    %c0_i32_0 = arith.constant 0 : i32
    return %arg0, %c0_i32 : i32, i32
  }
}

module attributes {stable_mosaic.version = 11 : i64} {
  func.func @_gap_kernel(%arg0: i32, %arg1: i32, %arg2: memref<1x8x128xf32, #tpu.memory_space<vmem>>, %arg3: memref<1x1x128xf32, #tpu.memory_space<vmem>>) attributes {dimension_semantics = [#tpu.dimension_semantics<parallel>, #tpu.dimension_semantics<arbitrary>], iteration_bounds = array<i64: 2, 1>, scalar_prefetch = 0 : i64, scratch_operands = 0 : i64, tpu.core_type = #tpu.core_type<tc>, window_params = [{transform_indices = @transform_0, window_bounds = array<i64: 1, 8, 128>}, {transform_indices = @transform_1, window_bounds = array<i64: 1, 1, 128>}]} {
    %c0_i32 = arith.constant 0 : i32
    %0 = arith.cmpi eq, %arg1, %c0_i32 : i32
    %1 = arith.extui %0 : i1 to i32
    %c0_i32_0 = arith.constant 0 : i32
    %2 = arith.cmpi ne, %1, %c0_i32_0 : i32
    scf.if %2 {
      %cst_9 = arith.constant 0.000000e+00 : f32
      %9 = vector.broadcast %cst_9 : f32 to vector<1x1x128xf32>
      %c0_10 = arith.constant 0 : index
      %c0_11 = arith.constant 0 : index
      %c0_12 = arith.constant 0 : index
      %10 = vector.load %arg3[%c0_10, %c0_11, %c0_12] : memref<1x1x128xf32, #tpu.memory_space<vmem>>, vector<1x1x128xf32>
      tpu.vector_store %arg3[%c0_10, %c0_11, %c0_12], %9 {strides = array<i32>} : memref<1x1x128xf32, #tpu.memory_space<vmem>>, vector<1x1x128xf32>,
    } else {
    }
    %c0 = arith.constant 0 : index
    %c0_1 = arith.constant 0 : index
    %c0_2 = arith.constant 0 : index
    %3 = vector.load %arg3[%c0, %c0_1, %c0_2] : memref<1x1x128xf32, #tpu.memory_space<vmem>>, vector<1x1x128xf32>
    %c0_3 = arith.constant 0 : index
    %c0_4 = arith.constant 0 : index
    %c0_5 = arith.constant 0 : index
    %4 = vector.load %arg2[%c0_3, %c0_4, %c0_5] : memref<1x8x128xf32, #tpu.memory_space<vmem>>, vector<1x8x128xf32>
    %cst = arith.constant dense<0.000000e+00> : vector<1x128xf32>
    %5 = vector.multi_reduction <add>, %4, %cst [1] : vector<1x8x128xf32> to vector<1x128xf32>
    %6 = vector.shape_cast %5 : vector<1x128xf32> to vector<1x1x128xf32>
    %7 = arith.addf %3, %6 : vector<1x1x128xf32>
    %c0_6 = arith.constant 0 : index
    %c0_7 = arith.constant 0 : index
    %c0_8 = arith.constant 0 : index
    %8 = vector.load %arg3[%c0_6, %c0_7, %c0_8] : memref<1x1x128xf32, #tpu.memory_space<vmem>>, vector<1x1x128xf32>
    tpu.vector_store %arg3[%c0_6, %c0_7, %c0_8], %7 {strides = array<i32>} : memref<1x1x128xf32, #tpu.memory_space<vmem>>, vector<1x1x128xf32>,
    return
  }
  func.func @transform_0(%arg0: i32, %arg1: i32) -> (i32, i32, i32) {
    %c0_i32 = arith.constant 0 : i32
    %c0_i32_0 = arith.constant 0 : i32
    return %arg0, %arg1, %c0_i32 : i32, i32, i32
  }
  func.func @transform_1(%arg0: i32, %arg1: i32) -> (i32, i32, i32) {
    %c0_i32 = arith.constant 0 : i32
    %c0_i32_0 = arith.constant 0 : i32
    %c0_i32_1 = arith.constant 0 : i32
    return %arg0, %c0_i32, %c0_i32_0 : i32, i32, i32
  }
}

module attributes {stable_mosaic.version = 11 : i64} {
  func.func @_matmul_kernel(%arg0: i32, %arg1: i32, %arg2: i32, %arg3: memref<8x128xbf16, #tpu.memory_space<vmem>>, %arg4: memref<128x128xbf16, #tpu.memory_space<vmem>>, %arg5: memref<1x128xf32, #tpu.memory_space<vmem>>, %arg6: memref<8x128xf32, #tpu.memory_space<vmem>>, %arg7: memref<8x128xf32, #tpu.memory_space<vmem>>) attributes {dimension_semantics = [#tpu.dimension_semantics<parallel>, #tpu.dimension_semantics<parallel>, #tpu.dimension_semantics<arbitrary>], iteration_bounds = array<i64: 1, 1, 1>, scalar_prefetch = 0 : i64, scratch_operands = 1 : i64, tpu.core_type = #tpu.core_type<tc>, window_params = [{transform_indices = @transform_0, window_bounds = array<i64: 8, 128>}, {transform_indices = @transform_1, window_bounds = array<i64: 128, 128>}, {transform_indices = @transform_2, window_bounds = array<i64: 1, 128>}, {transform_indices = @transform_3, window_bounds = array<i64: 8, 128>}]} {
    %c0_i32 = arith.constant 0 : i32
    %0 = arith.cmpi eq, %arg2, %c0_i32 : i32
    %1 = arith.extui %0 : i1 to i32
    %c0_i32_0 = arith.constant 0 : i32
    %2 = arith.cmpi ne, %1, %c0_i32_0 : i32
    scf.if %2 {
      %cst_10 = arith.constant 0.000000e+00 : f32
      %12 = vector.broadcast %cst_10 : f32 to vector<8x128xf32>
      %c0_11 = arith.constant 0 : index
      %c0_12 = arith.constant 0 : index
      %13 = vector.load %arg7[%c0_11, %c0_12] : memref<8x128xf32, #tpu.memory_space<vmem>>, vector<8x128xf32>
      tpu.vector_store %arg7[%c0_11, %c0_12], %12 {strides = array<i32>} : memref<8x128xf32, #tpu.memory_space<vmem>>, vector<8x128xf32>,
    } else {
    }
    %c0 = arith.constant 0 : index
    %c0_1 = arith.constant 0 : index
    %3 = vector.load %arg7[%c0, %c0_1] : memref<8x128xf32, #tpu.memory_space<vmem>>, vector<8x128xf32>
    %c0_2 = arith.constant 0 : index
    %c0_3 = arith.constant 0 : index
    %4 = vector.load %arg3[%c0_2, %c0_3] : memref<8x128xbf16, #tpu.memory_space<vmem>>, vector<8x128xbf16>
    %c0_4 = arith.constant 0 : index
    %c0_5 = arith.constant 0 : index
    %5 = vector.load %arg4[%c0_4, %c0_5] : memref<128x128xbf16, #tpu.memory_space<vmem>>, vector<128x128xbf16>
    %cst = arith.constant dense<0.000000e+00> : vector<8x128xf32>
    %6 = tpu.matmul %4, %5, %cst {dimension_numbers = #tpu.dot_dimension_numbers<[1], [0], [0], [1], [0, 0, 1, 1], [], []>} : vector<8x128xbf16>, vector<128x128xbf16>, vector<8x128xf32> -> vector<8x128xf32>
    %7 = arith.addf %3, %6 : vector<8x128xf32>
    %c0_6 = arith.constant 0 : index
    %c0_7 = arith.constant 0 : index
    %8 = vector.load %arg7[%c0_6, %c0_7] : memref<8x128xf32, #tpu.memory_space<vmem>>, vector<8x128xf32>
    tpu.vector_store %arg7[%c0_6, %c0_7], %7 {strides = array<i32>} : memref<8x128xf32, #tpu.memory_space<vmem>>, vector<8x128xf32>,
    %c0_i32_8 = arith.constant 0 : i32
    %9 = arith.cmpi eq, %arg2, %c0_i32_8 : i32
    %10 = arith.extui %9 : i1 to i32
    %c0_i32_9 = arith.constant 0 : i32
    %11 = arith.cmpi ne, %10, %c0_i32_9 : i32
    scf.if %11 {
      %c0_10 = arith.constant 0 : index
      %c0_11 = arith.constant 0 : index
      %12 = vector.load %arg7[%c0_10, %c0_11] : memref<8x128xf32, #tpu.memory_space<vmem>>, vector<8x128xf32>
      %c0_12 = arith.constant 0 : index
      %c0_13 = arith.constant 0 : index
      %13 = vector.load %arg5[%c0_12, %c0_13] : memref<1x128xf32, #tpu.memory_space<vmem>>, vector<1x128xf32>
      %14 = vector.broadcast %13 : vector<1x128xf32> to vector<8x128xf32>
      %15 = arith.addf %12, %14 : vector<8x128xf32>
      %cst_14 = arith.constant 0.000000e+00 : f32
      %16 = vector.broadcast %cst_14 : f32 to vector<8x128xf32>
      %17 = arith.maximumf %15, %16 : vector<8x128xf32>
      %c0_15 = arith.constant 0 : index
      %c0_16 = arith.constant 0 : index
      %18 = vector.load %arg6[%c0_15, %c0_16] : memref<8x128xf32, #tpu.memory_space<vmem>>, vector<8x128xf32>
      tpu.vector_store %arg6[%c0_15, %c0_16], %17 {strides = array<i32>} : memref<8x128xf32, #tpu.memory_space<vmem>>, vector<8x128xf32>,
    } else {
    }
    return
  }
  func.func @transform_0(%arg0: i32, %arg1: i32, %arg2: i32) -> (i32, i32) {
    %c0_i32 = arith.constant 0 : i32
    return %arg0, %arg2 : i32, i32
  }
  func.func @transform_1(%arg0: i32, %arg1: i32, %arg2: i32) -> (i32, i32) {
    %c0_i32 = arith.constant 0 : i32
    return %arg2, %arg1 : i32, i32
  }
  func.func @transform_2(%arg0: i32, %arg1: i32, %arg2: i32) -> (i32, i32) {
    %c0_i32 = arith.constant 0 : i32
    %c0_i32_0 = arith.constant 0 : i32
    return %c0_i32, %arg1 : i32, i32
  }
  func.func @transform_3(%arg0: i32, %arg1: i32, %arg2: i32) -> (i32, i32) {
    %c0_i32 = arith.constant 0 : i32
    return %arg0, %arg1 : i32, i32
  }
}

module attributes {stable_mosaic.version = 11 : i64} {
  func.func @_matmul_kernel(%arg0: i32, %arg1: i32, %arg2: i32, %arg3: memref<8x128xbf16, #tpu.memory_space<vmem>>, %arg4: memref<128x128xbf16, #tpu.memory_space<vmem>>, %arg5: memref<1x128xf32, #tpu.memory_space<vmem>>, %arg6: memref<8x128xf32, #tpu.memory_space<vmem>>, %arg7: memref<8x128xf32, #tpu.memory_space<vmem>>) attributes {dimension_semantics = [#tpu.dimension_semantics<parallel>, #tpu.dimension_semantics<parallel>, #tpu.dimension_semantics<arbitrary>], iteration_bounds = array<i64: 1, 1, 1>, scalar_prefetch = 0 : i64, scratch_operands = 1 : i64, tpu.core_type = #tpu.core_type<tc>, window_params = [{transform_indices = @transform_0, window_bounds = array<i64: 8, 128>}, {transform_indices = @transform_1, window_bounds = array<i64: 128, 128>}, {transform_indices = @transform_2, window_bounds = array<i64: 1, 128>}, {transform_indices = @transform_3, window_bounds = array<i64: 8, 128>}]} {
    %c0_i32 = arith.constant 0 : i32
    %0 = arith.cmpi eq, %arg2, %c0_i32 : i32
    %1 = arith.extui %0 : i1 to i32
    %c0_i32_0 = arith.constant 0 : i32
    %2 = arith.cmpi ne, %1, %c0_i32_0 : i32
    scf.if %2 {
      %cst_10 = arith.constant 0.000000e+00 : f32
      %12 = vector.broadcast %cst_10 : f32 to vector<8x128xf32>
      %c0_11 = arith.constant 0 : index
      %c0_12 = arith.constant 0 : index
      %13 = vector.load %arg7[%c0_11, %c0_12] : memref<8x128xf32, #tpu.memory_space<vmem>>, vector<8x128xf32>
      tpu.vector_store %arg7[%c0_11, %c0_12], %12 {strides = array<i32>} : memref<8x128xf32, #tpu.memory_space<vmem>>, vector<8x128xf32>,
    } else {
    }
    %c0 = arith.constant 0 : index
    %c0_1 = arith.constant 0 : index
    %3 = vector.load %arg7[%c0, %c0_1] : memref<8x128xf32, #tpu.memory_space<vmem>>, vector<8x128xf32>
    %c0_2 = arith.constant 0 : index
    %c0_3 = arith.constant 0 : index
    %4 = vector.load %arg3[%c0_2, %c0_3] : memref<8x128xbf16, #tpu.memory_space<vmem>>, vector<8x128xbf16>
    %c0_4 = arith.constant 0 : index
    %c0_5 = arith.constant 0 : index
    %5 = vector.load %arg4[%c0_4, %c0_5] : memref<128x128xbf16, #tpu.memory_space<vmem>>, vector<128x128xbf16>
    %cst = arith.constant dense<0.000000e+00> : vector<8x128xf32>
    %6 = tpu.matmul %4, %5, %cst {dimension_numbers = #tpu.dot_dimension_numbers<[1], [0], [0], [1], [0, 0, 1, 1], [], []>} : vector<8x128xbf16>, vector<128x128xbf16>, vector<8x128xf32> -> vector<8x128xf32>
    %7 = arith.addf %3, %6 : vector<8x128xf32>
    %c0_6 = arith.constant 0 : index
    %c0_7 = arith.constant 0 : index
    %8 = vector.load %arg7[%c0_6, %c0_7] : memref<8x128xf32, #tpu.memory_space<vmem>>, vector<8x128xf32>
    tpu.vector_store %arg7[%c0_6, %c0_7], %7 {strides = array<i32>} : memref<8x128xf32, #tpu.memory_space<vmem>>, vector<8x128xf32>,
    %c0_i32_8 = arith.constant 0 : i32
    %9 = arith.cmpi eq, %arg2, %c0_i32_8 : i32
    %10 = arith.extui %9 : i1 to i32
    %c0_i32_9 = arith.constant 0 : i32
    %11 = arith.cmpi ne, %10, %c0_i32_9 : i32
    scf.if %11 {
      %c0_10 = arith.constant 0 : index
      %c0_11 = arith.constant 0 : index
      %12 = vector.load %arg7[%c0_10, %c0_11] : memref<8x128xf32, #tpu.memory_space<vmem>>, vector<8x128xf32>
      %c0_12 = arith.constant 0 : index
      %c0_13 = arith.constant 0 : index
      %13 = vector.load %arg5[%c0_12, %c0_13] : memref<1x128xf32, #tpu.memory_space<vmem>>, vector<1x128xf32>
      %14 = vector.broadcast %13 : vector<1x128xf32> to vector<8x128xf32>
      %15 = arith.addf %12, %14 : vector<8x128xf32>
      %c0_14 = arith.constant 0 : index
      %c0_15 = arith.constant 0 : index
      %16 = vector.load %arg6[%c0_14, %c0_15] : memref<8x128xf32, #tpu.memory_space<vmem>>, vector<8x128xf32>
      tpu.vector_store %arg6[%c0_14, %c0_15], %15 {strides = array<i32>} : memref<8x128xf32, #tpu.memory_space<vmem>>, vector<8x128xf32>,
    } else {
    }
    return
  }
  func.func @transform_0(%arg0: i32, %arg1: i32, %arg2: i32) -> (i32, i32) {
    %c0_i32 = arith.constant 0 : i32
    return %arg0, %arg2 : i32, i32
  }
  func.func @transform_1(%arg0: i32, %arg1: i32, %arg2: i32) -> (i32, i32) {
    %c0_i32 = arith.constant 0 : i32
    return %arg2, %arg1 : i32, i32
  }
  func.func @transform_2(%arg0: i32, %arg1: i32, %arg2: i32) -> (i32, i32) {
    %c0_i32 = arith.constant 0 : i32
    %c0_i32_0 = arith.constant 0 : i32
    return %c0_i32, %arg1 : i32, i32
  }
  func.func @transform_3(%arg0: i32, %arg1: i32, %arg2: i32) -> (i32, i32) {
    %c0_i32 = arith.constant 0 : i32
    return %arg0, %arg1 : i32, i32
  }
}

</mosaic_0001>

<bundles_post_ra>
// kernel: an3ddr_forward.24
= control target key start
LH: loop header
LB: loop body
LE: loop exit
PB: predicated region body
PF: predicated region fallthrough
CT: control target
= control target key end

     0   :  { %s1740_s12 = smov 0   ;;  %s1742_s13 = smov 0   ;;  %s1970_s0 = inlined_call_operand.vmem [shape: bf16[11776,128], index: 0, kind: input, shape index: {}]   ;;  %s1971_s1 = inlined_call_operand.vmem [shape: bf16[128,128], index: 1, kind: input, shape index: {}]   ;;  %s1972_s2 = inlined_call_operand.vmem [shape: f32[1,128], index: 2, kind: input, shape index: {}]   ;;  %s1973_s3 = inlined_call_operand.vmem [shape: f32[11776,128], index: 3, kind: output, shape index: {}]  }
   0x1   :  { %s1744_s14 = smov 0  }
   0x2 LB: > { %s32_s15 = sadd.s32 1, %s1714_s13  ;;  %p1448_p0 = scmp.ge.s32.totalorder %s1718_s14, 1  ;;  %s1718_s14 = sphi %s1744_s14, %s13_s14   ;;  %s1714_s13 = sphi %s1742_s13, %s1975_s13   ;;  %s1710_s12 = sphi %s1740_s12, %s1974_s12  }
   0x3   : > { %p34_p1 = scmp.ge.s32.totalorder %s32_s15, 23  ;;  %p188_p2 = scmp.lt.s32.totalorder %s1718_s14, 24 }
   0x5   : > { %s1977_s15 = smov (%p34_p1, %s32_s15), 0  ;;  %p189_p3 = pnand %p1448_p0, %p188_p2 }
   0x6   : > { %s1449_s18 = sshll.u32 (!%p189_p3), %s1710_s12, 6 }
   0x7   : > { %192 = sbr.rel (%p189_p3) target bundleno = 303 (0x12f), region = 32  ;;  %p230_p4 = scmp.lt.s32.totalorder (!%p189_p3), %s1449_s18, 1471 }
   0xc   : > { %v1656_v0 = vld [vmem:[%s1971_s1 + $0x38] sm:$0xff]   ;;  %v1657_v1 = vld [vmem:[%s1971_s1 + $0x30] sm:$0xff]   ;;  %s1979_s18 = smov (!%p230_p4, %s1449_s18), 1471  ;;  %v1658_v2 = vld [vmem:[%s1971_s1 + $0x28] sm:$0xff]  }
   0xd   : > { %1536 = vmatprep.subr.bf16.mxu0 %v1656_v0  ;;  %1616 = vmatprep.subr.bf16.mxu1 %v1656_v0  ;;  %s1450_s23 = sshll.u32 %s1979_s18, 2  ;;  %v1659_v3 = vld [vmem:[%s1971_s1 + $0x20] sm:$0xff]   ;;  %v1660_v6 = vld [vmem:[%s1971_s1 + $0x18] sm:$0xff]   ;;  %v1661_v7 = vld [vmem:[%s1971_s1 + $0x10] sm:$0xff]   ;;  %s1452_s10 = sshll.u32 %s1979_s18, 3 }
   0xe   : > { %1537 = vmatpush3.bf16.msra.mxu0 %v1656_v0  ;;  %1624 = vmatpush3.bf16.msra.mxu1 %v1656_v0  ;;  %s1773_s26 = scalar_lea.vmem %s1970_s0, %s1450_s23  ;;  %v1662_v8 = vld [vmem:[%s1971_s1 + $0x8] sm:$0xff]   ;;  %v1663_v9 = vld [vmem:[%s1971_s1] sm:$0xff]   ;;  %s1831_s19 = scalar_lea.vmem %s1973_s3, %s1452_s10 }
   0xf   : > { %1538 = vmatprep.subr.bf16.mxu0 %v1657_v1  ;;  %1617 = vmatprep.subr.bf16.mxu1 %v1657_v1  ;;  %v1664_v4 = vld [vmem:[%s1773_s26] sm:$0xff]   ;;  %v1666_v10 = vld [vmem:[%s1773_s26 + $0x8] sm:$0xff]   ;;  %v1668_v12 = vld [vmem:[%s1773_s26 + $0x10] sm:$0xff]  }
  0x10   : > { %v1665_v5 = vld [vmem:[%s1773_s26 + $0x80] sm:$0xff]   ;;  %1552 = vmatprep.mubr.bf16.mxu0 %v1664_v4  ;;  %v1667_v11 = vld [vmem:[%s1773_s26 + $0x88] sm:$0xff]   ;;  %v1669_v13 = vld [vmem:[%s1773_s26 + $0x90] sm:$0xff]  }
  0x11   : > { %1584 = vmatprep.mubr.bf16.mxu1 %v1665_v5  ;;  %v1670_v14 = vld [vmem:[%s1773_s26 + $0x18] sm:$0xff]   ;;  %v1672_v16 = vld [vmem:[%s1773_s26 + $0x20] sm:$0xff]   ;;  %v1674_v18 = vld [vmem:[%s1773_s26 + $0x28] sm:$0xff]  }
  0x12   : > { %1539 = vmatpush3.bf16.msra.mxu0 %v1657_v1  ;;  %1625 = vmatpush3.bf16.msra.mxu1 %v1657_v1  ;;  %v1671_v15 = vld [vmem:[%s1773_s26 + $0x98] sm:$0xff]   ;;  %v1673_v17 = vld [vmem:[%s1773_s26 + $0xa0] sm:$0xff]   ;;  %v1675_v19 = vld [vmem:[%s1773_s26 + $0xa8] sm:$0xff]  }
  0x13   : > { %1540 = vmatprep.subr.bf16.mxu0 %v1658_v2  ;;  %1618 = vmatprep.subr.bf16.mxu1 %v1658_v2  ;;  %v1676_v20 = vld [vmem:[%s1773_s26 + $0x30] sm:$0xff]   ;;  %v1678_v22 = vld [vmem:[%s1773_s26 + $0x38] sm:$0xff]   ;;  %v1680_v24 = vld [vmem:[%s1773_s26 + $0x40] sm:$0xff]  }
  0x14   : > { %v1677_v21 = vld [vmem:[%s1773_s26 + $0xb0] sm:$0xff]   ;;  %v1679_v23 = vld [vmem:[%s1773_s26 + $0xb8] sm:$0xff]   ;;  %v1681_v25 = vld [vmem:[%s1773_s26 + $0xc0] sm:$0xff]  }
  0x15   : > { %v1682_v26 = vld [vmem:[%s1773_s26 + $0x48] sm:$0xff]   ;;  %v1684_v28 = vld [vmem:[%s1773_s26 + $0x50] sm:$0xff]   ;;  %v1686_v30 = vld [vmem:[%s1773_s26 + $0x58] sm:$0xff]  }
  0x16   : > { %1541 = vmatpush3.bf16.msra.mxu0 %v1658_v2  ;;  %1626 = vmatpush3.bf16.msra.mxu1 %v1658_v2  ;;  %v1683_v27 = vld [vmem:[%s1773_s26 + $0xc8] sm:$0xff]   ;;  %v1685_v29 = vld [vmem:[%s1773_s26 + $0xd0] sm:$0xff]   ;;  %v1687_v31 = vld [vmem:[%s1773_s26 + $0xd8] sm:$0xff]  }
  0x17   : > { %1542 = vmatprep.subr.bf16.mxu0 %v1659_v3  ;;  %1619 = vmatprep.subr.bf16.mxu1 %v1659_v3  ;;  %v1688_v32 = vld [vmem:[%s1773_s26 + $0x60] sm:$0xff]   ;;  %v1690_v34 = vld [vmem:[%s1773_s26 + $0x68] sm:$0xff]   ;;  %v1692_v36 = vld [vmem:[%s1773_s26 + $0x70] sm:$0xff]  }
  0x18   : > { %v1689_v33 = vld [vmem:[%s1773_s26 + $0xe0] sm:$0xff]   ;;  %v1691_v35 = vld [vmem:[%s1773_s26 + $0xe8] sm:$0xff]   ;;  %v1693_v37 = vld [vmem:[%s1773_s26 + $0xf0] sm:$0xff]  }
  0x19   : > { %v1694_v38 = vld [vmem:[%s1773_s26 + $0x78] sm:$0xff]   ;;  %v1826_v40 = vld [vmem:[%s1972_s2] ss:$0 sm:$0xff] }
  0x1a   : > { %1543 = vmatpush3.bf16.msra.mxu0 %v1659_v3  ;;  %1627 = vmatpush3.bf16.msra.mxu1 %v1659_v3  ;;  %v1695_v39 = vld [vmem:[%s1773_s26 + $0xf8] sm:$0xff]  }
  0x1b   : > { %1544 = vmatprep.subr.bf16.mxu0 %v1660_v6  ;;  %1620 = vmatprep.subr.bf16.mxu1 %v1660_v6 }
  0x1e   : > { %1545 = vmatpush3.bf16.msra.mxu0 %v1660_v6  ;;  %1628 = vmatpush3.bf16.msra.mxu1 %v1660_v6 }
  0x1f   : > { %1546 = vmatprep.subr.bf16.mxu0 %v1661_v7  ;;  %1621 = vmatprep.subr.bf16.mxu1 %v1661_v7 }
  0x22   : > { %1547 = vmatpush3.bf16.msra.mxu0 %v1661_v7  ;;  %1629 = vmatpush3.bf16.msra.mxu1 %v1661_v7 }
  0x23   : > { %1548 = vmatprep.subr.bf16.mxu0 %v1662_v8  ;;  %1622 = vmatprep.subr.bf16.mxu1 %v1662_v8 }
  0x26   : > { %1549 = vmatpush3.bf16.msra.mxu0 %v1662_v8  ;;  %1630 = vmatpush3.bf16.msra.mxu1 %v1662_v8 }
  0x27   : > { %1550 = vmatprep.subr.bf16.mxu0 %v1663_v9  ;;  %1623 = vmatprep.subr.bf16.mxu1 %v1663_v9 }
  0x2a   : > { %1551 = vmatpush3.bf16.msra.mxu0 %v1663_v9  ;;  %1631 = vmatpush3.bf16.msra.mxu1 %v1663_v9 }
  0x2d   : > { %1553 = vmatmul.mubr.bf16.vlgmr.msra.gmra.mxu0 %v1666_v10  ;;  %1585 = vmatmul.mubr.bf16.vlgmr.msra.gmra.mxu1 %v1667_v11 }
  0x2e   : > { %1556 = vmatprep.mubr.bf16.mxu0 %v1668_v12  ;;  %1588 = vmatprep.mubr.bf16.mxu1 %v1669_v13 }
  0x35   : > { %1557 = vmatmul.mubr.bf16.gmra.mxu0 %v1670_v14  ;;  %1589 = vmatmul.mubr.bf16.gmra.mxu1 %v1671_v15 }
  0x36   : > { %1560 = vmatprep.mubr.bf16.mxu0 %v1672_v16  ;;  %1592 = vmatprep.mubr.bf16.mxu1 %v1673_v17 }
  0x3d   : > { %1561 = vmatmul.mubr.bf16.gmra.mxu0 %v1674_v18  ;;  %1593 = vmatmul.mubr.bf16.gmra.mxu1 %v1675_v19 }
  0x3e   : > { %1564 = vmatprep.mubr.bf16.mxu0 %v1676_v20  ;;  %1596 = vmatprep.mubr.bf16.mxu1 %v1677_v21 }
  0x45   : > { %1565 = vmatmul.mubr.bf16.gmra.mxu0 %v1678_v22  ;;  %1597 = vmatmul.mubr.bf16.gmra.mxu1 %v1679_v23 }
  0x46   : > { %1568 = vmatprep.mubr.bf16.mxu0 %v1680_v24  ;;  %1600 = vmatprep.mubr.bf16.mxu1 %v1681_v25 }
  0x4d   : > { %1569 = vmatmul.mubr.bf16.gmra.mxu0 %v1682_v26  ;;  %1601 = vmatmul.mubr.bf16.gmra.mxu1 %v1683_v27 }
  0x4e   : > { %1572 = vmatprep.mubr.bf16.mxu0 %v1684_v28  ;;  %1604 = vmatprep.mubr.bf16.mxu1 %v1685_v29 }
  0x55   : > { %1573 = vmatmul.mubr.bf16.gmra.mxu0 %v1686_v30  ;;  %1605 = vmatmul.mubr.bf16.gmra.mxu1 %v1687_v31 }
  0x56   : > { %1576 = vmatprep.mubr.bf16.mxu0 %v1688_v32  ;;  %1608 = vmatprep.mubr.bf16.mxu1 %v1689_v33 }
  0x5d   : > { %1577 = vmatmul.mubr.bf16.gmra.mxu0 %v1690_v34  ;;  %1609 = vmatmul.mubr.bf16.gmra.mxu1 %v1691_v35 }
  0x5e   : > { %1580 = vmatprep.mubr.bf16.mxu0 %v1692_v36  ;;  %1612 = vmatprep.mubr.bf16.mxu1 %v1693_v37 }
  0x65   : > { %1581 = vmatmul.mubr.bf16.gmra.mxu0 %v1694_v38  ;;  %1613 = vmatmul.mubr.bf16.gmra.mxu1 %v1695_v39 }
  0xed   : > { %v1554_v41 = vpop.f32.mrf.mxu0  ;;  %v1586_v42 = vpop.f32.mrf.mxu1 }
  0xee   : > { %v1205_v43 = vadd.f32 %v1554_v41, %v1826_v40  ;;  %v1237_v44 = vadd.f32 %v1586_v42, %v1826_v40 }
  0xef   : > { %v746_v45 = vpop.f32.mrf.mxu0  ;;  %v874_v46 = vpop.f32.mrf.mxu1 }
  0xf0   : > { %1269 = vst [vmem:[%s1831_s19 + $0x10] sm:$0xff] %v1205_v43  ;;  %1301 = vst [vmem:[%s1831_s19 + $0x110] sm:$0xff] %v1237_v44  ;;  %v1203_v47 = vadd.f32 %v1826_v40, %v746_v45  ;;  %v1235_v48 = vadd.f32 %v1826_v40, %v874_v46 }
  0xf1   : > { %v1555_v49 = vpop.f32.mrf.mxu0  ;;  %v1587_v50 = vpop.f32.mrf.mxu1 }
  0xf2   : > { %1267 = vst [vmem:[%s1831_s19] sm:$0xff] %v1203_v47  ;;  %1299 = vst [vmem:[%s1831_s19 + $0x100] sm:$0xff] %v1235_v48  ;;  %v1206_v51 = vadd.f32 %v1555_v49, %v1826_v40  ;;  %v1238_v52 = vadd.f32 %v1587_v50, %v1826_v40 }
  0xf3   : > { %v749_v53 = vpop.f32.mrf.mxu0  ;;  %v877_v54 = vpop.f32.mrf.mxu1 }
  0xf4   : > { %1270 = vst [vmem:[%s1831_s19 + $0x18] sm:$0xff] %v1206_v51  ;;  %1302 = vst [vmem:[%s1831_s19 + $0x118] sm:$0xff] %v1238_v52  ;;  %v1204_v55 = vadd.f32 %v1826_v40, %v749_v53  ;;  %v1236_v56 = vadd.f32 %v1826_v40, %v877_v54 }
  0xf5   : > { %v1558_v57 = vpop.f32.mrf.mxu0  ;;  %v1590_v58 = vpop.f32.mrf.mxu1 }
  0xf6   : > { %1268 = vst [vmem:[%s1831_s19 + $0x8] sm:$0xff] %v1204_v55  ;;  %1300 = vst [vmem:[%s1831_s19 + $0x108] sm:$0xff] %v1236_v56  ;;  %v1209_v59 = vadd.f32 %v1558_v57, %v1826_v40  ;;  %v1241_v60 = vadd.f32 %v1590_v58, %v1826_v40 }
  0xf7   : > { %v762_v61 = vpop.f32.mrf.mxu0  ;;  %v890_v62 = vpop.f32.mrf.mxu1 }
  0xf8   : > { %1273 = vst [vmem:[%s1831_s19 + $0x30] sm:$0xff] %v1209_v59  ;;  %1305 = vst [vmem:[%s1831_s19 + $0x130] sm:$0xff] %v1241_v60  ;;  %v1207_v63 = vadd.f32 %v1826_v40, %v762_v61  ;;  %v1239_v0 = vadd.f32 %v1826_v40, %v890_v62 }
  0xf9   : > { %v1559_v1 = vpop.f32.mrf.mxu0  ;;  %v1591_v2 = vpop.f32.mrf.mxu1 }
  0xfa   : > { %1271 = vst [vmem:[%s1831_s19 + $0x20] sm:$0xff] %v1207_v63  ;;  %1303 = vst [vmem:[%s1831_s19 + $0x120] sm:$0xff] %v1239_v0  ;;  %v1210_v3 = vadd.f32 %v1559_v1, %v1826_v40  ;;  %v1242_v4 = vadd.f32 %v1591_v2, %v1826_v40 }
  0xfb   : > { %v765_v5 = vpop.f32.mrf.mxu0  ;;  %v893_v6 = vpop.f32.mrf.mxu1 }
  0xfc   : > { %1274 = vst [vmem:[%s1831_s19 + $0x38] sm:$0xff] %v1210_v3  ;;  %1306 = vst [vmem:[%s1831_s19 + $0x138] sm:$0xff] %v1242_v4  ;;  %v1208_v7 = vadd.f32 %v1826_v40, %v765_v5  ;;  %v1240_v8 = vadd.f32 %v1826_v40, %v893_v6 }
  0xfd   : > { %v1562_v9 = vpop.f32.mrf.mxu0  ;;  %v1594_v10 = vpop.f32.mrf.mxu1 }
  0xfe   : > { %1272 = vst [vmem:[%s1831_s19 + $0x28] sm:$0xff] %v1208_v7  ;;  %1304 = vst [vmem:[%s1831_s19 + $0x128] sm:$0xff] %v1240_v8  ;;  %v1213_v11 = vadd.f32 %v1562_v9, %v1826_v40  ;;  %v1245_v12 = vadd.f32 %v1594_v10, %v1826_v40 }
  0xff   : > { %v778_v13 = vpop.f32.mrf.mxu0  ;;  %v906_v14 = vpop.f32.mrf.mxu1 }
 0x100   : > { %1277 = vst [vmem:[%s1831_s19 + $0x50] sm:$0xff] %v1213_v11  ;;  %1309 = vst [vmem:[%s1831_s19 + $0x150] sm:$0xff] %v1245_v12  ;;  %v1211_v15 = vadd.f32 %v1826_v40, %v778_v13  ;;  %v1243_v16 = vadd.f32 %v1826_v40, %v906_v14 }
 0x101   : > { %v1563_v17 = vpop.f32.mrf.mxu0  ;;  %v1595_v18 = vpop.f32.mrf.mxu1 }
 0x102   : > { %1275 = vst [vmem:[%s1831_s19 + $0x40] sm:$0xff] %v1211_v15  ;;  %1307 = vst [vmem:[%s1831_s19 + $0x140] sm:$0xff] %v1243_v16  ;;  %v1214_v19 = vadd.f32 %v1563_v17, %v1826_v40  ;;  %v1246_v20 = vadd.f32 %v1595_v18, %v1826_v40 }
 0x103   : > { %v781_v21 = vpop.f32.mrf.mxu0  ;;  %v909_v22 = vpop.f32.mrf.mxu1 }
 0x104   : > { %1278 = vst [vmem:[%s1831_s19 + $0x58] sm:$0xff] %v1214_v19  ;;  %1310 = vst [vmem:[%s1831_s19 + $0x158] sm:$0xff] %v1246_v20  ;;  %v1212_v23 = vadd.f32 %v1826_v40, %v781_v21  ;;  %v1244_v24 = vadd.f32 %v1826_v40, %v909_v22 }
 0x105   : > { %v1566_v25 = vpop.f32.mrf.mxu0  ;;  %v1598_v26 = vpop.f32.mrf.mxu1 }
 0x106   : > { %1276 = vst [vmem:[%s1831_s19 + $0x48] sm:$0xff] %v1212_v23  ;;  %1308 = vst [vmem:[%s1831_s19 + $0x148] sm:$0xff] %v1244_v24  ;;  %v1217_v27 = vadd.f32 %v1566_v25, %v1826_v40  ;;  %v1249_v28 = vadd.f32 %v1598_v26, %v1826_v40 }
 0x107   : > { %v794_v29 = vpop.f32.mrf.mxu0  ;;  %v922_v30 = vpop.f32.mrf.mxu1 }
 0x108   : > { %1281 = vst [vmem:[%s1831_s19 + $0x70] sm:$0xff] %v1217_v27  ;;  %1313 = vst [vmem:[%s1831_s19 + $0x170] sm:$0xff] %v1249_v28  ;;  %v1215_v31 = vadd.f32 %v1826_v40, %v794_v29  ;;  %v1247_v32 = vadd.f32 %v1826_v40, %v922_v30 }
 0x109   : > { %v1567_v33 = vpop.f32.mrf.mxu0  ;;  %v1599_v34 = vpop.f32.mrf.mxu1 }
 0x10a   : > { %1279 = vst [vmem:[%s1831_s19 + $0x60] sm:$0xff] %v1215_v31  ;;  %1311 = vst [vmem:[%s1831_s19 + $0x160] sm:$0xff] %v1247_v32  ;;  %v1218_v35 = vadd.f32 %v1567_v33, %v1826_v40  ;;  %v1250_v36 = vadd.f32 %v1599_v34, %v1826_v40 }
 0x10b   : > { %v797_v37 = vpop.f32.mrf.mxu0  ;;  %v925_v38 = vpop.f32.mrf.mxu1 }
 0x10c   : > { %1282 = vst [vmem:[%s1831_s19 + $0x78] sm:$0xff] %v1218_v35  ;;  %1314 = vst [vmem:[%s1831_s19 + $0x178] sm:$0xff] %v1250_v36  ;;  %v1216_v39 = vadd.f32 %v1826_v40, %v797_v37  ;;  %v1248_v41 = vadd.f32 %v1826_v40, %v925_v38 }
 0x10d   : > { %v1570_v42 = vpop.f32.mrf.mxu0  ;;  %v1602_v43 = vpop.f32.mrf.mxu1 }
 0x10e   : > { %1280 = vst [vmem:[%s1831_s19 + $0x68] sm:$0xff] %v1216_v39  ;;  %1312 = vst [vmem:[%s1831_s19 + $0x168] sm:$0xff] %v1248_v41  ;;  %v1221_v44 = vadd.f32 %v1570_v42, %v1826_v40  ;;  %v1253_v45 = vadd.f32 %v1602_v43, %v1826_v40 }
 0x10f   : > { %v810_v46 = vpop.f32.mrf.mxu0  ;;  %v938_v47 = vpop.f32.mrf.mxu1 }
 0x110   : > { %1285 = vst [vmem:[%s1831_s19 + $0x90] sm:$0xff] %v1221_v44  ;;  %1317 = vst [vmem:[%s1831_s19 + $0x190] sm:$0xff] %v1253_v45  ;;  %v1219_v48 = vadd.f32 %v1826_v40, %v810_v46  ;;  %v1251_v49 = vadd.f32 %v1826_v40, %v938_v47 }
 0x111   : > { %v1571_v50 = vpop.f32.mrf.mxu0  ;;  %v1603_v51 = vpop.f32.mrf.mxu1 }
 0x112   : > { %1283 = vst [vmem:[%s1831_s19 + $0x80] sm:$0xff] %v1219_v48  ;;  %1315 = vst [vmem:[%s1831_s19 + $0x180] sm:$0xff] %v1251_v49  ;;  %v1222_v52 = vadd.f32 %v1571_v50, %v1826_v40  ;;  %v1254_v53 = vadd.f32 %v1603_v51, %v1826_v40 }
 0x113   : > { %v813_v54 = vpop.f32.mrf.mxu0  ;;  %v941_v55 = vpop.f32.mrf.mxu1 }
 0x114   : > { %1286 = vst [vmem:[%s1831_s19 + $0x98] sm:$0xff] %v1222_v52  ;;  %1318 = vst [vmem:[%s1831_s19 + $0x198] sm:$0xff] %v1254_v53  ;;  %v1220_v56 = vadd.f32 %v1826_v40, %v813_v54  ;;  %v1252_v57 = vadd.f32 %v1826_v40, %v941_v55 }
 0x115   : > { %v1574_v58 = vpop.f32.mrf.mxu0  ;;  %v1606_v59 = vpop.f32.mrf.mxu1 }
 0x116   : > { %1284 = vst [vmem:[%s1831_s19 + $0x88] sm:$0xff] %v1220_v56  ;;  %1316 = vst [vmem:[%s1831_s19 + $0x188] sm:$0xff] %v1252_v57  ;;  %v1225_v60 = vadd.f32 %v1574_v58, %v1826_v40  ;;  %v1257_v61 = vadd.f32 %v1606_v59, %v1826_v40 }
 0x117   : > { %v826_v62 = vpop.f32.mrf.mxu0  ;;  %v954_v63 = vpop.f32.mrf.mxu1 }
 0x118   : > { %1289 = vst [vmem:[%s1831_s19 + $0xb0] sm:$0xff] %v1225_v60  ;;  %1321 = vst [vmem:[%s1831_s19 + $0x1b0] sm:$0xff] %v1257_v61  ;;  %v1223_v0 = vadd.f32 %v1826_v40, %v826_v62  ;;  %v1255_v1 = vadd.f32 %v1826_v40, %v954_v63 }
 0x119   : > { %v1575_v2 = vpop.f32.mrf.mxu0  ;;  %v1607_v3 = vpop.f32.mrf.mxu1 }
 0x11a   : > { %1287 = vst [vmem:[%s1831_s19 + $0xa0] sm:$0xff] %v1223_v0  ;;  %1319 = vst [vmem:[%s1831_s19 + $0x1a0] sm:$0xff] %v1255_v1  ;;  %v1226_v4 = vadd.f32 %v1575_v2, %v1826_v40  ;;  %v1258_v5 = vadd.f32 %v1607_v3, %v1826_v40 }
 0x11b   : > { %v829_v6 = vpop.f32.mrf.mxu0  ;;  %v957_v7 = vpop.f32.mrf.mxu1 }
 0x11c   : > { %1290 = vst [vmem:[%s1831_s19 + $0xb8] sm:$0xff] %v1226_v4  ;;  %1322 = vst [vmem:[%s1831_s19 + $0x1b8] sm:$0xff] %v1258_v5  ;;  %v1224_v8 = vadd.f32 %v1826_v40, %v829_v6  ;;  %v1256_v9 = vadd.f32 %v1826_v40, %v957_v7 }
 0x11d   : > { %v1578_v10 = vpop.f32.mrf.mxu0  ;;  %v1610_v11 = vpop.f32.mrf.mxu1 }
 0x11e   : > { %1288 = vst [vmem:[%s1831_s19 + $0xa8] sm:$0xff] %v1224_v8  ;;  %1320 = vst [vmem:[%s1831_s19 + $0x1a8] sm:$0xff] %v1256_v9  ;;  %v1229_v12 = vadd.f32 %v1578_v10, %v1826_v40  ;;  %v1261_v13 = vadd.f32 %v1610_v11, %v1826_v40 }
 0x11f   : > { %v842_v14 = vpop.f32.mrf.mxu0  ;;  %v970_v15 = vpop.f32.mrf.mxu1 }
 0x120   : > { %1293 = vst [vmem:[%s1831_s19 + $0xd0] sm:$0xff] %v1229_v12  ;;  %1325 = vst [vmem:[%s1831_s19 + $0x1d0] sm:$0xff] %v1261_v13  ;;  %v1227_v16 = vadd.f32 %v1826_v40, %v842_v14  ;;  %v1259_v17 = vadd.f32 %v1826_v40, %v970_v15 }
 0x121   : > { %v1579_v18 = vpop.f32.mrf.mxu0  ;;  %v1611_v19 = vpop.f32.mrf.mxu1 }
 0x122   : > { %1291 = vst [vmem:[%s1831_s19 + $0xc0] sm:$0xff] %v1227_v16  ;;  %1323 = vst [vmem:[%s1831_s19 + $0x1c0] sm:$0xff] %v1259_v17  ;;  %v1230_v20 = vadd.f32 %v1579_v18, %v1826_v40  ;;  %v1262_v21 = vadd.f32 %v1611_v19, %v1826_v40 }
 0x123   : > { %v845_v22 = vpop.f32.mrf.mxu0  ;;  %v973_v23 = vpop.f32.mrf.mxu1 }
 0x124   : > { %1294 = vst [vmem:[%s1831_s19 + $0xd8] sm:$0xff] %v1230_v20  ;;  %1326 = vst [vmem:[%s1831_s19 + $0x1d8] sm:$0xff] %v1262_v21  ;;  %v1228_v24 = vadd.f32 %v1826_v40, %v845_v22  ;;  %v1260_v25 = vadd.f32 %v1826_v40, %v973_v23 }
 0x125   : > { %v1582_v26 = vpop.f32.mrf.mxu0  ;;  %v1614_v27 = vpop.f32.mrf.mxu1 }
 0x126   : > { %1292 = vst [vmem:[%s1831_s19 + $0xc8] sm:$0xff] %v1228_v24  ;;  %1324 = vst [vmem:[%s1831_s19 + $0x1c8] sm:$0xff] %v1260_v25  ;;  %v1233_v28 = vadd.f32 %v1582_v26, %v1826_v40  ;;  %v1265_v29 = vadd.f32 %v1614_v27, %v1826_v40 }
 0x127   : > { %v858_v30 = vpop.f32.mrf.mxu0  ;;  %v986_v31 = vpop.f32.mrf.mxu1 }
 0x128   : > { %1297 = vst [vmem:[%s1831_s19 + $0xf0] sm:$0xff] %v1233_v28  ;;  %1329 = vst [vmem:[%s1831_s19 + $0x1f0] sm:$0xff] %v1265_v29  ;;  %v1231_v32 = vadd.f32 %v1826_v40, %v858_v30  ;;  %v1263_v33 = vadd.f32 %v1826_v40, %v986_v31 }
 0x129   : > { %v1583_v34 = vpop.f32.mrf.mxu0  ;;  %v1615_v35 = vpop.f32.mrf.mxu1 }
 0x12a   : > { %1295 = vst [vmem:[%s1831_s19 + $0xe0] sm:$0xff] %v1231_v32  ;;  %1327 = vst [vmem:[%s1831_s19 + $0x1e0] sm:$0xff] %v1263_v33  ;;  %v1234_v36 = vadd.f32 %v1583_v34, %v1826_v40  ;;  %v1266_v37 = vadd.f32 %v1615_v35, %v1826_v40 }
 0x12b   : > { %v861_v38 = vpop.f32.mrf.mxu0  ;;  %v989_v39 = vpop.f32.mrf.mxu1 }
 0x12c   : > { %1298 = vst [vmem:[%s1831_s19 + $0xf8] sm:$0xff] %v1234_v36  ;;  %1330 = vst [vmem:[%s1831_s19 + $0x1f8] sm:$0xff] %v1266_v37  ;;  %v1232_v41 = vadd.f32 %v1826_v40, %v861_v38  ;;  %v1264_v42 = vadd.f32 %v1826_v40, %v989_v39 }
 0x12e   : > { %1296 = vst [vmem:[%s1831_s19 + $0xe8] sm:$0xff] %v1232_v41  ;;  %1328 = vst [vmem:[%s1831_s19 + $0x1e8] sm:$0xff] %v1264_v42 }
 0x12f PF: > { %s13_s14 = sadd.s32 1, %s1718_s14   ;;  %s1974_s12 = smov %s1714_s13 }
 0x130   : > { %p10_p5 = scmp.ge.s32.totalorder %s13_s14, 25   ;;  %s1975_s13 = smov %s1977_s15 }
 0x132   :  { %12 = sbr.rel (!%p10_p5) target bundleno = 2 (0x2), region = 76 }

// kernel: an3ddr_forward.25
= control target key start
LH: loop header
LB: loop body
LE: loop exit
PB: predicated region body
PF: predicated region fallthrough
CT: control target
= control target key end

     0   :  { %s998_s9 = smov 0   ;;  %s2058_s0 = inlined_call_operand.vmem [shape: f32[12288,64], index: 0, kind: input, shape index: {}]   ;;  %s2059_s1 = inlined_call_operand.vmem [shape: f32[1,64], index: 1, kind: output, shape index: {0}]   ;;  %s2060_s2 = inlined_call_operand.vmem [shape: f32[1,64], index: 2, kind: output, shape index: {1}]  }
   0x1 LB: > { %s956_s10 = sadd.s32 4294967295, %s980_s9   ;;  %p959_p0 = scmp.ge.s32.totalorder %s980_s9, 1  ;;  %s980_s9 = sphi %s998_s9, %s13_s9  }
   0x2   : > { %p106_p1 = scmp.lt.s32.totalorder %s980_s9, 13 }
   0x4   : > { %p107_p2 = pnand %p959_p0, %p106_p1 }
   0x5   : > { %s960_s11 = sshll.u32 (!%p107_p2), %s956_s10, 7  ;;  %p962_p4 = scmp.ne.s32.totalorder (!%p107_p2), %s956_s10, 0 }
   0x6   : > { %110 = sbr.rel (%p107_p2) target bundleno = 329 (0x149), region = 24  ;;  %p124_p3 = scmp.lt.s32.totalorder (!%p107_p2), %s960_s11, 1535 }
   0xb   : > { %s2062_s11 = smov (!%p124_p3, %s960_s11), 1535  ;;  %132 = sbr.rel (%p962_p4) target bundleno = 18 (0x12), region = 28 }
   0xc   : > { %s961_s12 = sshll.u32 %s2062_s11, 3 }
   0xd   : > { %s1009_s15 = scalar_lea.vmem %s2058_s0, %s961_s12 }
  0x10   : > { %vm133_vm0 = vcmask 516096   ;;  %v982_v0 = vmov 0.0  }
  0x11   : > { %134 = vst.msk [vmem:[%s2059_s1] sm:$0x1] %vm133_vm0, %v982_v0  ;;  %135 = vst.msk [vmem:[%s2060_s2] sm:$0x1] %vm133_vm0, %v982_v0 }
  0x12 PF: > { %v1018_v1 = vld [vmem:[%s1009_s15] sm:$0xff]  ;;  %v1021_v2 = vld [vmem:[%s1009_s15 + $0x8] sm:$0xff]  ;;  %v1024_v3 = vld [vmem:[%s1009_s15 + $0x10] sm:$0xff]  ;;  %vm265_vm1 = vcmask 523264   ;;  %vm528_vm2 = vcmask 516096  }
  0x13   : > { %v266_v4 = vsel %vm265_vm1, %v1018_v1, 0.0  ;;  %v267_v5 = vsel %vm265_vm1, %v1021_v2, 0.0  ;;  %v269_v6 = vsel %vm265_vm1, %v1024_v3, 0.0  ;;  %v1033_v7 = vld [vmem:[%s1009_s15 + $0x18] sm:$0xff]  ;;  %v1038_v10 = vld [vmem:[%s1009_s15 + $0x20] sm:$0xff]  ;;  %v1043_v13 = vld [vmem:[%s1009_s15 + $0x28] sm:$0xff] }
  0x14   : > { %v268_v8 = vadd.f32 %v267_v5, %v266_v4  ;;  %v271_v9 = vsel %vm265_vm1, %v1033_v7, 0.0  ;;  %v273_v12 = vsel %vm265_vm1, %v1038_v10, 0.0  ;;  %v275_v15 = vsel %vm265_vm1, %v1043_v13, 0.0  ;;  %v1048_v16 = vld [vmem:[%s1009_s15 + $0x30] sm:$0xff]  ;;  %v1053_v19 = vld [vmem:[%s1009_s15 + $0x38] sm:$0xff]  ;;  %v1058_v22 = vld [vmem:[%s1009_s15 + $0x40] sm:$0xff] }
  0x15   : > { %v277_v18 = vsel %vm265_vm1, %v1048_v16, 0.0  ;;  %v279_v21 = vsel %vm265_vm1, %v1053_v19, 0.0  ;;  %v281_v24 = vsel %vm265_vm1, %v1058_v22, 0.0  ;;  %v1063_v25 = vld [vmem:[%s1009_s15 + $0x48] sm:$0xff]  ;;  %v1068_v28 = vld [vmem:[%s1009_s15 + $0x50] sm:$0xff]  ;;  %v1073_v31 = vld [vmem:[%s1009_s15 + $0x58] sm:$0xff] }
  0x16   : > { %v270_v11 = vadd.f32 %v269_v6, %v268_v8  ;;  %v283_v27 = vsel %vm265_vm1, %v1063_v25, 0.0  ;;  %v285_v30 = vsel %vm265_vm1, %v1068_v28, 0.0  ;;  %v287_v33 = vsel %vm265_vm1, %v1073_v31, 0.0  ;;  %v1078_v34 = vld [vmem:[%s1009_s15 + $0x60] sm:$0xff]  ;;  %v1083_v37 = vld [vmem:[%s1009_s15 + $0x68] sm:$0xff]  ;;  %v1088_v40 = vld [vmem:[%s1009_s15 + $0x70] sm:$0xff] }
  0x17   : > { %v289_v36 = vsel %vm265_vm1, %v1078_v34, 0.0  ;;  %v291_v39 = vsel %vm265_vm1, %v1083_v37, 0.0  ;;  %v293_v42 = vsel %vm265_vm1, %v1088_v40, 0.0  ;;  %v1093_v43 = vld [vmem:[%s1009_s15 + $0x78] sm:$0xff]  ;;  %v1098_v46 = vld [vmem:[%s1009_s15 + $0x80] sm:$0xff]  ;;  %v1103_v49 = vld [vmem:[%s1009_s15 + $0x88] sm:$0xff] }
  0x18   : > { %v272_v14 = vadd.f32 %v271_v9, %v270_v11  ;;  %v295_v45 = vsel %vm265_vm1, %v1093_v43, 0.0  ;;  %v297_v48 = vsel %vm265_vm1, %v1098_v46, 0.0  ;;  %v299_v51 = vsel %vm265_vm1, %v1103_v49, 0.0  ;;  %v1108_v52 = vld [vmem:[%s1009_s15 + $0x90] sm:$0xff]  ;;  %v1113_v55 = vld [vmem:[%s1009_s15 + $0x98] sm:$0xff]  ;;  %v1118_v58 = vld [vmem:[%s1009_s15 + $0xa0] sm:$0xff] }
  0x19   : > { %v301_v54 = vsel %vm265_vm1, %v1108_v52, 0.0  ;;  %v303_v57 = vsel %vm265_vm1, %v1113_v55, 0.0  ;;  %v305_v60 = vsel %vm265_vm1, %v1118_v58, 0.0  ;;  %v1123_v61 = vld [vmem:[%s1009_s15 + $0xa8] sm:$0xff]  ;;  %v1128_v0 = vld [vmem:[%s1009_s15 + $0xb0] sm:$0xff]  ;;  %v1133_v6 = vld [vmem:[%s1009_s15 + $0xb8] sm:$0xff] }
  0x1a   : > { %v274_v17 = vadd.f32 %v273_v12, %v272_v14  ;;  %v307_v63 = vsel %vm265_vm1, %v1123_v61, 0.0  ;;  %v309_v5 = vsel %vm265_vm1, %v1128_v0, 0.0  ;;  %v311_v9 = vsel %vm265_vm1, %v1133_v6, 0.0  ;;  %v1138_v11 = vld [vmem:[%s1009_s15 + $0xc0] sm:$0xff] }
  0x1b   : > { %v313_v14 = vsel %vm265_vm1, %v1138_v11, 0.0 }
  0x1c   : > { %v276_v20 = vadd.f32 %v275_v15, %v274_v17  ;;  %v1143_v15 = vld [vmem:[%s1009_s15 + $0xc8] sm:$0xff] }
  0x1e   : > { %v278_v23 = vadd.f32 %v277_v18, %v276_v20  ;;  %v315_v18 = vsel %vm265_vm1, %v1143_v15, 0.0  ;;  %v1148_v20 = vld [vmem:[%s1009_s15 + $0xd0] sm:$0xff] }
  0x20   : > { %v280_v26 = vadd.f32 %v279_v21, %v278_v23  ;;  %v317_v23 = vsel %vm265_vm1, %v1148_v20, 0.0 }
  0x22   : > { %v282_v29 = vadd.f32 %v281_v24, %v280_v26  ;;  %v531_v24 = vmul.f32 %v1018_v1, %v1018_v1  ;;  %v532_v26 = vmul.f32 %v1021_v2, %v1021_v2  ;;  %v535_v1 = vmul.f32 %v1038_v10, %v1038_v10 }
  0x23   : > { %v536_v10 = vmul.f32 %v1043_v13, %v1043_v13 }
  0x24   : > { %v284_v32 = vadd.f32 %v283_v27, %v282_v29  ;;  %v533_v27 = vmul.f32 %v1024_v3, %v1024_v3  ;;  %v1159_v29 = vld [vmem:[%s1009_s15 + $0xd8] sm:$0xff]  ;;  %v659_v3 = vsel %vm265_vm1, %v531_v24, 0.0 }
  0x26   : > { %v286_v35 = vadd.f32 %v285_v30, %v284_v32  ;;  %v319_v32 = vsel %vm265_vm1, %v1159_v29, 0.0 }
  0x28   : > { %v288_v38 = vadd.f32 %v287_v33, %v286_v35  ;;  %v534_v33 = vmul.f32 %v1033_v7, %v1033_v7  ;;  %v1166_v35 = vld [vmem:[%s1009_s15 + $0xe0] sm:$0xff] }
  0x29   : > { %v321_v2 = vsel %vm265_vm1, %v1166_v35, 0.0 }
  0x2a   : > { %v290_v41 = vadd.f32 %v289_v36, %v288_v38  ;;  %v660_v38 = vsel %vm265_vm1, %v532_v26, 0.0 }
  0x2b   : > { %v661_v7 = vadd.f32 %v660_v38, %v659_v3  ;;  %v1232_v3 = vld [vmem:[%s1009_s15 + $0x120] sm:$0xff] }
  0x2c   : > { %v292_v44 = vadd.f32 %v291_v39, %v290_v41  ;;  %v662_v39 = vsel %vm265_vm1, %v533_v27, 0.0  ;;  %v1176_v41 = vld [vmem:[%s1009_s15 + $0xe8] sm:$0xff]  ;;  %v541_v27 = vmul.f32 %v1068_v28, %v1068_v28  ;;  %v337_v28 = vsel %vm265_vm1, %v1232_v3, 0.0 }
  0x2e   : > { %v294_v47 = vadd.f32 %v293_v42, %v292_v44  ;;  %v323_v44 = vsel %vm265_vm1, %v1176_v41, 0.0 }
  0x30   : > { %v296_v50 = vadd.f32 %v295_v45, %v294_v47  ;;  %v664_v45 = vsel %vm265_vm1, %v534_v33, 0.0  ;;  %v1184_v47 = vld [vmem:[%s1009_s15 + $0xf0] sm:$0xff] }
  0x32   : > { %v298_v53 = vadd.f32 %v297_v48, %v296_v50  ;;  %v663_v50 = vadd.f32 %v662_v39, %v661_v7  ;;  %v678_v7 = vsel %vm265_vm1, %v541_v27, 0.0 }
  0x34   : > { %v300_v56 = vadd.f32 %v299_v51, %v298_v53  ;;  %v325_v51 = vsel %vm265_vm1, %v1184_v47, 0.0  ;;  %v537_v53 = vmul.f32 %v1048_v16, %v1048_v16 }
  0x36   : > { %v302_v59 = vadd.f32 %v301_v54, %v300_v56  ;;  %v666_v54 = vsel %vm265_vm1, %v535_v1, 0.0  ;;  %v1192_v56 = vld [vmem:[%s1009_s15 + $0xf8] sm:$0xff]  ;;  %v542_v1 = vmul.f32 %v1073_v31, %v1073_v31 }
  0x37   : > { %v327_v13 = vsel %vm265_vm1, %v1192_v56, 0.0 }
  0x38   : > { %v304_v62 = vadd.f32 %v303_v57, %v302_v59  ;;  %v665_v59 = vadd.f32 %v664_v45, %v663_v50  ;;  %v680_v50 = vsel %vm265_vm1, %v542_v1, 0.0 }
  0x3a   : > { %v306_v4 = vadd.f32 %v305_v60, %v304_v62  ;;  %v538_v60 = vmul.f32 %v1053_v19, %v1053_v19  ;;  %v668_v62 = vsel %vm265_vm1, %v536_v10, 0.0 }
  0x3c   : > { %v308_v8 = vadd.f32 %v307_v63, %v306_v4  ;;  %v1200_v63 = vld [vmem:[%s1009_s15 + $0x100] sm:$0xff] }
  0x3d   : > { %v329_v16 = vsel %vm265_vm1, %v1200_v63, 0.0 }
  0x3e   : > { %v310_v12 = vadd.f32 %v309_v5, %v308_v8  ;;  %v667_v5 = vadd.f32 %v666_v54, %v665_v59  ;;  %v539_v8 = vmul.f32 %v1058_v22, %v1058_v22 }
  0x40   : > { %v312_v17 = vadd.f32 %v311_v9, %v310_v12  ;;  %v670_v9 = vsel %vm265_vm1, %v537_v53, 0.0  ;;  %v1208_v12 = vld [vmem:[%s1009_s15 + $0x108] sm:$0xff] }
  0x41   : > { %v331_v19 = vsel %vm265_vm1, %v1208_v12, 0.0 }
  0x42   : > { %v314_v21 = vadd.f32 %v313_v14, %v312_v17  ;;  %v669_v17 = vadd.f32 %v668_v62, %v667_v5 }
  0x44   : > { %v316_v30 = vadd.f32 %v315_v18, %v314_v21  ;;  %v540_v18 = vmul.f32 %v1063_v25, %v1063_v25  ;;  %v672_v21 = vsel %vm265_vm1, %v538_v60, 0.0  ;;  %v671_v26 = vadd.f32 %v670_v9, %v669_v17 }
  0x46   : > { %v318_v36 = vadd.f32 %v317_v23, %v316_v30  ;;  %v1216_v23 = vld [vmem:[%s1009_s15 + $0x110] sm:$0xff]  ;;  %v674_v30 = vsel %vm265_vm1, %v539_v8, 0.0 }
  0x47   : > { %v333_v22 = vsel %vm265_vm1, %v1216_v23, 0.0 }
  0x48   : > { %v320_v42 = vadd.f32 %v319_v32, %v318_v36  ;;  %v1224_v32 = vld [vmem:[%s1009_s15 + $0x118] sm:$0xff]  ;;  %v673_v36 = vadd.f32 %v672_v21, %v671_v26 }
  0x49   : > { %v335_v25 = vsel %vm265_vm1, %v1224_v32, 0.0 }
  0x4a   : > { %v322_v48 = vadd.f32 %v321_v2, %v320_v42  ;;  %v676_v2 = vsel %vm265_vm1, %v540_v18, 0.0  ;;  %v675_v39 = vadd.f32 %v674_v30, %v673_v36  ;;  %v543_v42 = vmul.f32 %v1078_v34, %v1078_v34 }
  0x4c   : > { %v324_v57 = vadd.f32 %v323_v44, %v322_v48  ;;  %v1240_v44 = vld [vmem:[%s1009_s15 + $0x128] sm:$0xff]  ;;  %v677_v45 = vadd.f32 %v676_v2, %v675_v39  ;;  %v544_v48 = vmul.f32 %v1083_v37, %v1083_v37  ;;  %v682_v59 = vsel %vm265_vm1, %v543_v42, 0.0 }
  0x4d   : > { %v339_v31 = vsel %vm265_vm1, %v1240_v44, 0.0 }
  0x4e   : > { %v326_v4 = vadd.f32 %v325_v51, %v324_v57  ;;  %v1248_v51 = vld [vmem:[%s1009_s15 + $0x130] sm:$0xff]  ;;  %v679_v54 = vadd.f32 %v678_v7, %v677_v45  ;;  %v545_v57 = vmul.f32 %v1088_v40, %v1088_v40  ;;  %v684_v5 = vsel %vm265_vm1, %v544_v48, 0.0 }
  0x4f   : > { %v341_v34 = vsel %vm265_vm1, %v1248_v51, 0.0 }
  0x50   : > { %v328_v14 = vadd.f32 %v327_v13, %v326_v4  ;;  %v1256_v13 = vld [vmem:[%s1009_s15 + $0x138] sm:$0xff]  ;;  %v681_v62 = vadd.f32 %v680_v50, %v679_v54  ;;  %v546_v4 = vmul.f32 %v1093_v43, %v1093_v43  ;;  %v686_v17 = vsel %vm265_vm1, %v545_v57, 0.0 }
  0x51   : > { %v343_v37 = vsel %vm265_vm1, %v1256_v13, 0.0 }
  0x52   : > { %v330_v24 = vadd.f32 %v329_v16, %v328_v14  ;;  %v1264_v16 = vld [vmem:[%s1009_s15 + $0x140] sm:$0xff]  ;;  %v683_v9 = vadd.f32 %v682_v59, %v681_v62  ;;  %v547_v14 = vmul.f32 %v1098_v46, %v1098_v46  ;;  %v688_v26 = vsel %vm265_vm1, %v546_v4, 0.0 }
  0x53   : > { %v345_v40 = vsel %vm265_vm1, %v1264_v16, 0.0 }
  0x54   : > { %v332_v33 = vadd.f32 %v331_v19, %v330_v24  ;;  %v1272_v19 = vld [vmem:[%s1009_s15 + $0x148] sm:$0xff]  ;;  %v685_v21 = vadd.f32 %v684_v5, %v683_v9  ;;  %v548_v24 = vmul.f32 %v1103_v49, %v1103_v49  ;;  %v690_v36 = vsel %vm265_vm1, %v547_v14, 0.0 }
  0x55   : > { %v347_v43 = vsel %vm265_vm1, %v1272_v19, 0.0 }
  0x56   : > { %v334_v38 = vadd.f32 %v333_v22, %v332_v33  ;;  %v1280_v22 = vld [vmem:[%s1009_s15 + $0x150] sm:$0xff]  ;;  %v687_v30 = vadd.f32 %v686_v17, %v685_v21  ;;  %v549_v33 = vmul.f32 %v1108_v52, %v1108_v52  ;;  %v692_v39 = vsel %vm265_vm1, %v548_v24, 0.0 }
  0x57   : > { %v349_v46 = vsel %vm265_vm1, %v1280_v22, 0.0 }
  0x58   : > { %v336_v10 = vadd.f32 %v335_v25, %v334_v38  ;;  %v1288_v25 = vld [vmem:[%s1009_s15 + $0x158] sm:$0xff]  ;;  %v689_v2 = vadd.f32 %v688_v26, %v687_v30  ;;  %v550_v38 = vmul.f32 %v1113_v55, %v1113_v55  ;;  %v694_v45 = vsel %vm265_vm1, %v549_v33, 0.0 }
  0x59   : > { %v351_v49 = vsel %vm265_vm1, %v1288_v25, 0.0 }
  0x5a   : > { %v338_v53 = vadd.f32 %v337_v28, %v336_v10  ;;  %v1296_v28 = vld [vmem:[%s1009_s15 + $0x160] sm:$0xff]  ;;  %v691_v7 = vadd.f32 %v690_v36, %v689_v2  ;;  %v551_v10 = vmul.f32 %v1118_v58, %v1118_v58  ;;  %v696_v54 = vsel %vm265_vm1, %v550_v38, 0.0 }
  0x5b   : > { %v353_v52 = vsel %vm265_vm1, %v1296_v28, 0.0 }
  0x5c   : > { %v340_v60 = vadd.f32 %v339_v31, %v338_v53  ;;  %v1304_v31 = vld [vmem:[%s1009_s15 + $0x168] sm:$0xff]  ;;  %v693_v50 = vadd.f32 %v692_v39, %v691_v7  ;;  %v552_v53 = vmul.f32 %v1123_v61, %v1123_v61  ;;  %v698_v62 = vsel %vm265_vm1, %v551_v10, 0.0 }
  0x5d   : > { %v355_v55 = vsel %vm265_vm1, %v1304_v31, 0.0 }
  0x5e   : > { %v342_v8 = vadd.f32 %v341_v34, %v340_v60  ;;  %v1312_v34 = vld [vmem:[%s1009_s15 + $0x170] sm:$0xff]  ;;  %v695_v59 = vadd.f32 %v694_v45, %v693_v50  ;;  %v553_v60 = vmul.f32 %v1128_v0, %v1128_v0  ;;  %v700_v9 = vsel %vm265_vm1, %v552_v53, 0.0 }
  0x5f   : > { %v357_v58 = vsel %vm265_vm1, %v1312_v34, 0.0 }
  0x60   : > { %v344_v18 = vadd.f32 %v343_v37, %v342_v8  ;;  %v1320_v37 = vld [vmem:[%s1009_s15 + $0x178] sm:$0xff]  ;;  %v697_v5 = vadd.f32 %v696_v54, %v695_v59  ;;  %v554_v8 = vmul.f32 %v1133_v6, %v1133_v6  ;;  %v702_v21 = vsel %vm265_vm1, %v553_v60, 0.0 }
  0x61   : > { %v359_v61 = vsel %vm265_vm1, %v1320_v37, 0.0 }
  0x62   : > { %v346_v27 = vadd.f32 %v345_v40, %v344_v18  ;;  %v1328_v40 = vld [vmem:[%s1009_s15 + $0x180] sm:$0xff]  ;;  %v699_v17 = vadd.f32 %v698_v62, %v697_v5  ;;  %v555_v18 = vmul.f32 %v1138_v11, %v1138_v11  ;;  %v704_v30 = vsel %vm265_vm1, %v554_v8, 0.0 }
  0x63   : > { %v361_v0 = vsel %vm265_vm1, %v1328_v40, 0.0 }
  0x64   : > { %v348_v1 = vadd.f32 %v347_v43, %v346_v27  ;;  %v1336_v43 = vld [vmem:[%s1009_s15 + $0x188] sm:$0xff]  ;;  %v701_v26 = vadd.f32 %v700_v9, %v699_v17  ;;  %v556_v27 = vmul.f32 %v1143_v15, %v1143_v15  ;;  %v706_v2 = vsel %vm265_vm1, %v555_v18, 0.0 }
  0x65   : > { %v363_v6 = vsel %vm265_vm1, %v1336_v43, 0.0 }
  0x66   : > { %v350_v42 = vadd.f32 %v349_v46, %v348_v1  ;;  %v1344_v46 = vld [vmem:[%s1009_s15 + $0x190] sm:$0xff]  ;;  %v703_v36 = vadd.f32 %v702_v21, %v701_v26  ;;  %v557_v1 = vmul.f32 %v1148_v20, %v1148_v20  ;;  %v708_v7 = vsel %vm265_vm1, %v556_v27, 0.0 }
  0x67   : > { %v365_v11 = vsel %vm265_vm1, %v1344_v46, 0.0 }
  0x68   : > { %v352_v48 = vadd.f32 %v351_v49, %v350_v42  ;;  %v1352_v49 = vld [vmem:[%s1009_s15 + $0x198] sm:$0xff]  ;;  %v705_v39 = vadd.f32 %v704_v30, %v703_v36  ;;  %v558_v42 = vmul.f32 %v1159_v29, %v1159_v29  ;;  %v710_v50 = vsel %vm265_vm1, %v557_v1, 0.0 }
  0x69   : > { %v367_v15 = vsel %vm265_vm1, %v1352_v49, 0.0 }
  0x6a   : > { %v354_v57 = vadd.f32 %v353_v52, %v352_v48  ;;  %v1360_v52 = vld [vmem:[%s1009_s15 + $0x1a0] sm:$0xff]  ;;  %v707_v45 = vadd.f32 %v706_v2, %v705_v39  ;;  %v559_v48 = vmul.f32 %v1166_v35, %v1166_v35  ;;  %v712_v59 = vsel %vm265_vm1, %v558_v42, 0.0 }
  0x6b   : > { %v369_v20 = vsel %vm265_vm1, %v1360_v52, 0.0 }
  0x6c   : > { %v356_v4 = vadd.f32 %v355_v55, %v354_v57  ;;  %v1368_v55 = vld [vmem:[%s1009_s15 + $0x1a8] sm:$0xff]  ;;  %v709_v54 = vadd.f32 %v708_v7, %v707_v45  ;;  %v560_v57 = vmul.f32 %v1176_v41, %v1176_v41  ;;  %v714_v5 = vsel %vm265_vm1, %v559_v48, 0.0 }
  0x6d   : > { %v371_v29 = vsel %vm265_vm1, %v1368_v55, 0.0 }
  0x6e   : > { %v358_v14 = vadd.f32 %v357_v58, %v356_v4  ;;  %v1376_v58 = vld [vmem:[%s1009_s15 + $0x1b0] sm:$0xff]  ;;  %v711_v62 = vadd.f32 %v710_v50, %v709_v54  ;;  %v561_v4 = vmul.f32 %v1184_v47, %v1184_v47  ;;  %v716_v17 = vsel %vm265_vm1, %v560_v57, 0.0 }
  0x6f   : > { %v373_v35 = vsel %vm265_vm1, %v1376_v58, 0.0 }
  0x70   : > { %v360_v24 = vadd.f32 %v359_v61, %v358_v14  ;;  %v1384_v61 = vld [vmem:[%s1009_s15 + $0x1b8] sm:$0xff]  ;;  %v713_v9 = vadd.f32 %v712_v59, %v711_v62  ;;  %v562_v14 = vmul.f32 %v1192_v56, %v1192_v56  ;;  %v718_v26 = vsel %vm265_vm1, %v561_v4, 0.0 }
  0x71   : > { %v375_v41 = vsel %vm265_vm1, %v1384_v61, 0.0 }
  0x72   : > { %v362_v33 = vadd.f32 %v361_v0, %v360_v24  ;;  %v1392_v0 = vld [vmem:[%s1009_s15 + $0x1c0] sm:$0xff]  ;;  %v715_v21 = vadd.f32 %v714_v5, %v713_v9  ;;  %v563_v24 = vmul.f32 %v1200_v63, %v1200_v63  ;;  %v720_v36 = vsel %vm265_vm1, %v562_v14, 0.0 }
  0x73   : > { %v377_v47 = vsel %vm265_vm1, %v1392_v0, 0.0 }
  0x74   : > { %v364_v38 = vadd.f32 %v363_v6, %v362_v33  ;;  %v1400_v6 = vld [vmem:[%s1009_s15 + $0x1c8] sm:$0xff]  ;;  %v717_v30 = vadd.f32 %v716_v17, %v715_v21  ;;  %v564_v33 = vmul.f32 %v1208_v12, %v1208_v12  ;;  %v722_v39 = vsel %vm265_vm1, %v563_v24, 0.0 }
  0x75   : > { %v379_v56 = vsel %vm265_vm1, %v1400_v6, 0.0 }
  0x76   : > { %v366_v10 = vadd.f32 %v365_v11, %v364_v38  ;;  %v1408_v11 = vld [vmem:[%s1009_s15 + $0x1d0] sm:$0xff]  ;;  %v719_v2 = vadd.f32 %v718_v26, %v717_v30  ;;  %v565_v38 = vmul.f32 %v1216_v23, %v1216_v23  ;;  %v724_v45 = vsel %vm265_vm1, %v564_v33, 0.0 }
  0x77   : > { %v381_v63 = vsel %vm265_vm1, %v1408_v11, 0.0 }
  0x78   : > { %v368_v53 = vadd.f32 %v367_v15, %v366_v10  ;;  %v1416_v15 = vld [vmem:[%s1009_s15 + $0x1d8] sm:$0xff]  ;;  %v721_v7 = vadd.f32 %v720_v36, %v719_v2  ;;  %v566_v10 = vmul.f32 %v1224_v32, %v1224_v32  ;;  %v726_v54 = vsel %vm265_vm1, %v565_v38, 0.0 }
  0x79   : > { %v383_v12 = vsel %vm265_vm1, %v1416_v15, 0.0 }
  0x7a   : > { %v370_v60 = vadd.f32 %v369_v20, %v368_v53  ;;  %v1424_v20 = vld [vmem:[%s1009_s15 + $0x1e0] sm:$0xff]  ;;  %v723_v50 = vadd.f32 %v722_v39, %v721_v7  ;;  %v567_v53 = vmul.f32 %v1232_v3, %v1232_v3  ;;  %v728_v62 = vsel %vm265_vm1, %v566_v10, 0.0 }
  0x7b   : > { %v385_v23 = vsel %vm265_vm1, %v1424_v20, 0.0 }
  0x7c   : > { %v372_v8 = vadd.f32 %v371_v29, %v370_v60  ;;  %v1432_v29 = vld [vmem:[%s1009_s15 + $0x1e8] sm:$0xff]  ;;  %v725_v59 = vadd.f32 %v724_v45, %v723_v50  ;;  %v568_v60 = vmul.f32 %v1240_v44, %v1240_v44  ;;  %v730_v9 = vsel %vm265_vm1, %v567_v53, 0.0 }
  0x7d   : > { %v387_v32 = vsel %vm265_vm1, %v1432_v29, 0.0 }
  0x7e   : > { %v374_v18 = vadd.f32 %v373_v35, %v372_v8  ;;  %v1440_v35 = vld [vmem:[%s1009_s15 + $0x1f0] sm:$0xff]  ;;  %v727_v5 = vadd.f32 %v726_v54, %v725_v59  ;;  %v569_v8 = vmul.f32 %v1248_v51, %v1248_v51  ;;  %v732_v21 = vsel %vm265_vm1, %v568_v60, 0.0 }
  0x7f   : > { %v389_v3 = vsel %vm265_vm1, %v1440_v35, 0.0 }
  0x80   : > { %v376_v27 = vadd.f32 %v375_v41, %v374_v18  ;;  %v1448_v41 = vld [vmem:[%s1009_s15 + $0x1f8] sm:$0xff]  ;;  %v729_v17 = vadd.f32 %v728_v62, %v727_v5  ;;  %v570_v18 = vmul.f32 %v1256_v13, %v1256_v13  ;;  %v734_v30 = vsel %vm265_vm1, %v569_v8, 0.0 }
  0x81   : > { %v391_v44 = vsel %vm265_vm1, %v1448_v41, 0.0 }
  0x82   : > { %v378_v1 = vadd.f32 %v377_v47, %v376_v27  ;;  %v1456_v47 = vld [vmem:[%s1009_s15 + $0x200] sm:$0xff]  ;;  %v731_v26 = vadd.f32 %v730_v9, %v729_v17  ;;  %v571_v27 = vmul.f32 %v1264_v16, %v1264_v16  ;;  %v736_v2 = vsel %vm265_vm1, %v570_v18, 0.0 }
  0x83   : > { %v393_v51 = vsel %vm265_vm1, %v1456_v47, 0.0 }
  0x84   : > { %v380_v42 = vadd.f32 %v379_v56, %v378_v1  ;;  %v1464_v56 = vld [vmem:[%s1009_s15 + $0x208] sm:$0xff]  ;;  %v733_v36 = vadd.f32 %v732_v21, %v731_v26  ;;  %v572_v1 = vmul.f32 %v1272_v19, %v1272_v19  ;;  %v738_v7 = vsel %vm265_vm1, %v571_v27, 0.0 }
  0x85   : > { %v395_v13 = vsel %vm265_vm1, %v1464_v56, 0.0 }
  0x86   : > { %v382_v48 = vadd.f32 %v381_v63, %v380_v42  ;;  %v1472_v63 = vld [vmem:[%s1009_s15 + $0x210] sm:$0xff]  ;;  %v735_v39 = vadd.f32 %v734_v30, %v733_v36  ;;  %v573_v42 = vmul.f32 %v1280_v22, %v1280_v22  ;;  %v740_v50 = vsel %vm265_vm1, %v572_v1, 0.0 }
  0x87   : > { %v397_v16 = vsel %vm265_vm1, %v1472_v63, 0.0 }
  0x88   : > { %v384_v57 = vadd.f32 %v383_v12, %v382_v48  ;;  %v1480_v12 = vld [vmem:[%s1009_s15 + $0x218] sm:$0xff]  ;;  %v737_v45 = vadd.f32 %v736_v2, %v735_v39  ;;  %v574_v48 = vmul.f32 %v1288_v25, %v1288_v25  ;;  %v742_v59 = vsel %vm265_vm1, %v573_v42, 0.0 }
  0x89   : > { %v399_v19 = vsel %vm265_vm1, %v1480_v12, 0.0 }
  0x8a   : > { %v386_v4 = vadd.f32 %v385_v23, %v384_v57  ;;  %v1488_v23 = vld [vmem:[%s1009_s15 + $0x220] sm:$0xff]  ;;  %v739_v54 = vadd.f32 %v738_v7, %v737_v45  ;;  %v575_v57 = vmul.f32 %v1296_v28, %v1296_v28  ;;  %v744_v5 = vsel %vm265_vm1, %v574_v48, 0.0 }
  0x8b   : > { %v401_v22 = vsel %vm265_vm1, %v1488_v23, 0.0 }
  0x8c   : > { %v388_v14 = vadd.f32 %v387_v32, %v386_v4  ;;  %v1496_v32 = vld [vmem:[%s1009_s15 + $0x228] sm:$0xff]  ;;  %v741_v62 = vadd.f32 %v740_v50, %v739_v54  ;;  %v576_v4 = vmul.f32 %v1304_v31, %v1304_v31  ;;  %v746_v17 = vsel %vm265_vm1, %v575_v57, 0.0 }
  0x8d   : > { %v403_v25 = vsel %vm265_vm1, %v1496_v32, 0.0 }
  0x8e   : > { %v390_v24 = vadd.f32 %v389_v3, %v388_v14  ;;  %v1504_v3 = vld [vmem:[%s1009_s15 + $0x230] sm:$0xff]  ;;  %v743_v9 = vadd.f32 %v742_v59, %v741_v62  ;;  %v577_v14 = vmul.f32 %v1312_v34, %v1312_v34  ;;  %v748_v26 = vsel %vm265_vm1, %v576_v4, 0.0 }
  0x8f   : > { %v405_v28 = vsel %vm265_vm1, %v1504_v3, 0.0 }
  0x90   : > { %v392_v33 = vadd.f32 %v391_v44, %v390_v24  ;;  %v1512_v44 = vld [vmem:[%s1009_s15 + $0x238] sm:$0xff]  ;;  %v745_v21 = vadd.f32 %v744_v5, %v743_v9  ;;  %v578_v24 = vmul.f32 %v1320_v37, %v1320_v37  ;;  %v750_v36 = vsel %vm265_vm1, %v577_v14, 0.0 }
  0x91   : > { %v407_v31 = vsel %vm265_vm1, %v1512_v44, 0.0 }
  0x92   : > { %v394_v38 = vadd.f32 %v393_v51, %v392_v33  ;;  %v1520_v51 = vld [vmem:[%s1009_s15 + $0x240] sm:$0xff]  ;;  %v747_v30 = vadd.f32 %v746_v17, %v745_v21  ;;  %v579_v33 = vmul.f32 %v1328_v40, %v1328_v40  ;;  %v752_v39 = vsel %vm265_vm1, %v578_v24, 0.0 }
  0x93   : > { %v409_v34 = vsel %vm265_vm1, %v1520_v51, 0.0 }
  0x94   : > { %v396_v10 = vadd.f32 %v395_v13, %v394_v38  ;;  %v1528_v13 = vld [vmem:[%s1009_s15 + $0x248] sm:$0xff]  ;;  %v749_v2 = vadd.f32 %v748_v26, %v747_v30  ;;  %v580_v38 = vmul.f32 %v1336_v43, %v1336_v43  ;;  %v754_v45 = vsel %vm265_vm1, %v579_v33, 0.0 }
  0x95   : > { %v411_v37 = vsel %vm265_vm1, %v1528_v13, 0.0 }
  0x96   : > { %v398_v53 = vadd.f32 %v397_v16, %v396_v10  ;;  %v1536_v16 = vld [vmem:[%s1009_s15 + $0x250] sm:$0xff]  ;;  %v751_v7 = vadd.f32 %v750_v36, %v749_v2  ;;  %v581_v10 = vmul.f32 %v1344_v46, %v1344_v46  ;;  %v756_v54 = vsel %vm265_vm1, %v580_v38, 0.0 }
  0x97   : > { %v413_v40 = vsel %vm265_vm1, %v1536_v16, 0.0 }
  0x98   : > { %v400_v60 = vadd.f32 %v399_v19, %v398_v53  ;;  %v1544_v19 = vld [vmem:[%s1009_s15 + $0x258] sm:$0xff]  ;;  %v753_v50 = vadd.f32 %v752_v39, %v751_v7  ;;  %v582_v53 = vmul.f32 %v1352_v49, %v1352_v49  ;;  %v758_v62 = vsel %vm265_vm1, %v581_v10, 0.0 }
  0x99   : > { %v415_v43 = vsel %vm265_vm1, %v1544_v19, 0.0 }
  0x9a   : > { %v402_v8 = vadd.f32 %v401_v22, %v400_v60  ;;  %v1552_v22 = vld [vmem:[%s1009_s15 + $0x260] sm:$0xff]  ;;  %v755_v59 = vadd.f32 %v754_v45, %v753_v50  ;;  %v583_v60 = vmul.f32 %v1360_v52, %v1360_v52  ;;  %v760_v9 = vsel %vm265_vm1, %v582_v53, 0.0 }
  0x9b   : > { %v417_v46 = vsel %vm265_vm1, %v1552_v22, 0.0 }
  0x9c   : > { %v404_v18 = vadd.f32 %v403_v25, %v402_v8  ;;  %v1560_v25 = vld [vmem:[%s1009_s15 + $0x268] sm:$0xff]  ;;  %v757_v5 = vadd.f32 %v756_v54, %v755_v59  ;;  %v584_v8 = vmul.f32 %v1368_v55, %v1368_v55  ;;  %v762_v21 = vsel %vm265_vm1, %v583_v60, 0.0 }
  0x9d   : > { %v419_v49 = vsel %vm265_vm1, %v1560_v25, 0.0 }
  0x9e   : > { %v406_v27 = vadd.f32 %v405_v28, %v404_v18  ;;  %v1568_v28 = vld [vmem:[%s1009_s15 + $0x270] sm:$0xff]  ;;  %v759_v17 = vadd.f32 %v758_v62, %v757_v5  ;;  %v585_v18 = vmul.f32 %v1376_v58, %v1376_v58  ;;  %v764_v30 = vsel %vm265_vm1, %v584_v8, 0.0 }
  0x9f   : > { %v421_v52 = vsel %vm265_vm1, %v1568_v28, 0.0 }
  0xa0   : > { %v408_v1 = vadd.f32 %v407_v31, %v406_v27  ;;  %v1576_v31 = vld [vmem:[%s1009_s15 + $0x278] sm:$0xff]  ;;  %v761_v26 = vadd.f32 %v760_v9, %v759_v17  ;;  %v586_v27 = vmul.f32 %v1384_v61, %v1384_v61  ;;  %v766_v2 = vsel %vm265_vm1, %v585_v18, 0.0 }
  0xa1   : > { %v423_v55 = vsel %vm265_vm1, %v1576_v31, 0.0 }
  0xa2   : > { %v410_v42 = vadd.f32 %v409_v34, %v408_v1  ;;  %v1584_v34 = vld [vmem:[%s1009_s15 + $0x280] sm:$0xff]  ;;  %v763_v36 = vadd.f32 %v762_v21, %v761_v26  ;;  %v587_v1 = vmul.f32 %v1392_v0, %v1392_v0  ;;  %v768_v7 = vsel %vm265_vm1, %v586_v27, 0.0 }
  0xa3   : > { %v425_v58 = vsel %vm265_vm1, %v1584_v34, 0.0 }
  0xa4   : > { %v412_v48 = vadd.f32 %v411_v37, %v410_v42  ;;  %v1592_v37 = vld [vmem:[%s1009_s15 + $0x288] sm:$0xff]  ;;  %v765_v39 = vadd.f32 %v764_v30, %v763_v36  ;;  %v588_v42 = vmul.f32 %v1400_v6, %v1400_v6  ;;  %v770_v50 = vsel %vm265_vm1, %v587_v1, 0.0 }
  0xa5   : > { %v427_v61 = vsel %vm265_vm1, %v1592_v37, 0.0 }
  0xa6   : > { %v414_v57 = vadd.f32 %v413_v40, %v412_v48  ;;  %v1600_v40 = vld [vmem:[%s1009_s15 + $0x290] sm:$0xff]  ;;  %v767_v45 = vadd.f32 %v766_v2, %v765_v39  ;;  %v589_v48 = vmul.f32 %v1408_v11, %v1408_v11  ;;  %v772_v59 = vsel %vm265_vm1, %v588_v42, 0.0 }
  0xa7   : > { %v429_v0 = vsel %vm265_vm1, %v1600_v40, 0.0 }
  0xa8   : > { %v416_v4 = vadd.f32 %v415_v43, %v414_v57  ;;  %v1608_v43 = vld [vmem:[%s1009_s15 + $0x298] sm:$0xff]  ;;  %v769_v54 = vadd.f32 %v768_v7, %v767_v45  ;;  %v590_v57 = vmul.f32 %v1416_v15, %v1416_v15  ;;  %v774_v5 = vsel %vm265_vm1, %v589_v48, 0.0 }
  0xa9   : > { %v431_v6 = vsel %vm265_vm1, %v1608_v43, 0.0 }
  0xaa   : > { %v418_v14 = vadd.f32 %v417_v46, %v416_v4  ;;  %v1616_v46 = vld [vmem:[%s1009_s15 + $0x2a0] sm:$0xff]  ;;  %v771_v62 = vadd.f32 %v770_v50, %v769_v54  ;;  %v591_v4 = vmul.f32 %v1424_v20, %v1424_v20  ;;  %v776_v17 = vsel %vm265_vm1, %v590_v57, 0.0 }
  0xab   : > { %v433_v11 = vsel %vm265_vm1, %v1616_v46, 0.0 }
  0xac   : > { %v420_v24 = vadd.f32 %v419_v49, %v418_v14  ;;  %v1624_v49 = vld [vmem:[%s1009_s15 + $0x2a8] sm:$0xff]  ;;  %v773_v9 = vadd.f32 %v772_v59, %v771_v62  ;;  %v592_v14 = vmul.f32 %v1432_v29, %v1432_v29  ;;  %v778_v26 = vsel %vm265_vm1, %v591_v4, 0.0 }
  0xad   : > { %v435_v15 = vsel %vm265_vm1, %v1624_v49, 0.0 }
  0xae   : > { %v422_v33 = vadd.f32 %v421_v52, %v420_v24  ;;  %v1632_v52 = vld [vmem:[%s1009_s15 + $0x2b0] sm:$0xff]  ;;  %v775_v21 = vadd.f32 %v774_v5, %v773_v9  ;;  %v593_v24 = vmul.f32 %v1440_v35, %v1440_v35  ;;  %v780_v36 = vsel %vm265_vm1, %v592_v14, 0.0 }
  0xaf   : > { %v437_v20 = vsel %vm265_vm1, %v1632_v52, 0.0 }
  0xb0   : > { %v424_v38 = vadd.f32 %v423_v55, %v422_v33  ;;  %v1640_v55 = vld [vmem:[%s1009_s15 + $0x2b8] sm:$0xff]  ;;  %v777_v30 = vadd.f32 %v776_v17, %v775_v21  ;;  %v594_v33 = vmul.f32 %v1448_v41, %v1448_v41  ;;  %v782_v39 = vsel %vm265_vm1, %v593_v24, 0.0 }
  0xb1   : > { %v439_v29 = vsel %vm265_vm1, %v1640_v55, 0.0 }
  0xb2   : > { %v426_v10 = vadd.f32 %v425_v58, %v424_v38  ;;  %v1648_v58 = vld [vmem:[%s1009_s15 + $0x2c0] sm:$0xff]  ;;  %v779_v2 = vadd.f32 %v778_v26, %v777_v30  ;;  %v595_v38 = vmul.f32 %v1456_v47, %v1456_v47  ;;  %v784_v45 = vsel %vm265_vm1, %v594_v33, 0.0 }
  0xb3   : > { %v441_v35 = vsel %vm265_vm1, %v1648_v58, 0.0 }
  0xb4   : > { %v428_v53 = vadd.f32 %v427_v61, %v426_v10  ;;  %v1656_v61 = vld [vmem:[%s1009_s15 + $0x2c8] sm:$0xff]  ;;  %v781_v7 = vadd.f32 %v780_v36, %v779_v2  ;;  %v596_v10 = vmul.f32 %v1464_v56, %v1464_v56  ;;  %v786_v54 = vsel %vm265_vm1, %v595_v38, 0.0 }
  0xb5   : > { %v443_v41 = vsel %vm265_vm1, %v1656_v61, 0.0 }
  0xb6   : > { %v430_v60 = vadd.f32 %v429_v0, %v428_v53  ;;  %v1664_v0 = vld [vmem:[%s1009_s15 + $0x2d0] sm:$0xff]  ;;  %v783_v50 = vadd.f32 %v782_v39, %v781_v7  ;;  %v597_v53 = vmul.f32 %v1472_v63, %v1472_v63  ;;  %v788_v62 = vsel %vm265_vm1, %v596_v10, 0.0 }
  0xb7   : > { %v445_v47 = vsel %vm265_vm1, %v1664_v0, 0.0 }
  0xb8   : > { %v432_v8 = vadd.f32 %v431_v6, %v430_v60  ;;  %v1672_v6 = vld [vmem:[%s1009_s15 + $0x2d8] sm:$0xff]  ;;  %v785_v59 = vadd.f32 %v784_v45, %v783_v50  ;;  %v598_v60 = vmul.f32 %v1480_v12, %v1480_v12  ;;  %v790_v9 = vsel %vm265_vm1, %v597_v53, 0.0 }
  0xb9   : > { %v447_v56 = vsel %vm265_vm1, %v1672_v6, 0.0 }
  0xba   : > { %v434_v18 = vadd.f32 %v433_v11, %v432_v8  ;;  %v1680_v11 = vld [vmem:[%s1009_s15 + $0x2e0] sm:$0xff]  ;;  %v787_v5 = vadd.f32 %v786_v54, %v785_v59  ;;  %v599_v8 = vmul.f32 %v1488_v23, %v1488_v23  ;;  %v792_v21 = vsel %vm265_vm1, %v598_v60, 0.0 }
  0xbb   : > { %v449_v63 = vsel %vm265_vm1, %v1680_v11, 0.0 }
  0xbc   : > { %v436_v27 = vadd.f32 %v435_v15, %v434_v18  ;;  %v1688_v15 = vld [vmem:[%s1009_s15 + $0x2e8] sm:$0xff]  ;;  %v789_v17 = vadd.f32 %v788_v62, %v787_v5  ;;  %v600_v18 = vmul.f32 %v1496_v32, %v1496_v32  ;;  %v794_v30 = vsel %vm265_vm1, %v599_v8, 0.0 }
  0xbd   : > { %v451_v12 = vsel %vm265_vm1, %v1688_v15, 0.0 }
  0xbe   : > { %v438_v1 = vadd.f32 %v437_v20, %v436_v27  ;;  %v1696_v20 = vld [vmem:[%s1009_s15 + $0x2f0] sm:$0xff]  ;;  %v791_v26 = vadd.f32 %v790_v9, %v789_v17  ;;  %v601_v27 = vmul.f32 %v1504_v3, %v1504_v3  ;;  %v796_v2 = vsel %vm265_vm1, %v600_v18, 0.0 }
  0xbf   : > { %v453_v23 = vsel %vm265_vm1, %v1696_v20, 0.0 }
  0xc0   : > { %v440_v42 = vadd.f32 %v439_v29, %v438_v1  ;;  %v1704_v29 = vld [vmem:[%s1009_s15 + $0x2f8] sm:$0xff]  ;;  %v793_v36 = vadd.f32 %v792_v21, %v791_v26  ;;  %v602_v1 = vmul.f32 %v1512_v44, %v1512_v44  ;;  %v798_v7 = vsel %vm265_vm1, %v601_v27, 0.0 }
  0xc1   : > { %v455_v32 = vsel %vm265_vm1, %v1704_v29, 0.0 }
  0xc2   : > { %v442_v48 = vadd.f32 %v441_v35, %v440_v42  ;;  %v1712_v35 = vld [vmem:[%s1009_s15 + $0x300] sm:$0xff]  ;;  %v795_v39 = vadd.f32 %v794_v30, %v793_v36  ;;  %v603_v42 = vmul.f32 %v1520_v51, %v1520_v51  ;;  %v800_v50 = vsel %vm265_vm1, %v602_v1, 0.0 }
  0xc3   : > { %v457_v3 = vsel %vm265_vm1, %v1712_v35, 0.0 }
  0xc4   : > { %v444_v57 = vadd.f32 %v443_v41, %v442_v48  ;;  %v1720_v41 = vld [vmem:[%s1009_s15 + $0x308] sm:$0xff]  ;;  %v797_v45 = vadd.f32 %v796_v2, %v795_v39  ;;  %v604_v48 = vmul.f32 %v1528_v13, %v1528_v13  ;;  %v802_v59 = vsel %vm265_vm1, %v603_v42, 0.0 }
  0xc5   : > { %v459_v44 = vsel %vm265_vm1, %v1720_v41, 0.0 }
  0xc6   : > { %v446_v4 = vadd.f32 %v445_v47, %v444_v57  ;;  %v1728_v47 = vld [vmem:[%s1009_s15 + $0x310] sm:$0xff]  ;;  %v799_v54 = vadd.f32 %v798_v7, %v797_v45  ;;  %v605_v57 = vmul.f32 %v1536_v16, %v1536_v16  ;;  %v804_v5 = vsel %vm265_vm1, %v604_v48, 0.0 }
  0xc7   : > { %v461_v51 = vsel %vm265_vm1, %v1728_v47, 0.0 }
  0xc8   : > { %v448_v14 = vadd.f32 %v447_v56, %v446_v4  ;;  %v1736_v56 = vld [vmem:[%s1009_s15 + $0x318] sm:$0xff]  ;;  %v801_v62 = vadd.f32 %v800_v50, %v799_v54  ;;  %v606_v4 = vmul.f32 %v1544_v19, %v1544_v19  ;;  %v806_v17 = vsel %vm265_vm1, %v605_v57, 0.0 }
  0xc9   : > { %v463_v13 = vsel %vm265_vm1, %v1736_v56, 0.0 }
  0xca   : > { %v450_v24 = vadd.f32 %v449_v63, %v448_v14  ;;  %v1744_v63 = vld [vmem:[%s1009_s15 + $0x320] sm:$0xff]  ;;  %v803_v9 = vadd.f32 %v802_v59, %v801_v62  ;;  %v607_v14 = vmul.f32 %v1552_v22, %v1552_v22  ;;  %v808_v26 = vsel %vm265_vm1, %v606_v4, 0.0 }
  0xcb   : > { %v465_v16 = vsel %vm265_vm1, %v1744_v63, 0.0 }
  0xcc   : > { %v452_v33 = vadd.f32 %v451_v12, %v450_v24  ;;  %v1752_v12 = vld [vmem:[%s1009_s15 + $0x328] sm:$0xff]  ;;  %v805_v21 = vadd.f32 %v804_v5, %v803_v9  ;;  %v608_v24 = vmul.f32 %v1560_v25, %v1560_v25  ;;  %v810_v36 = vsel %vm265_vm1, %v607_v14, 0.0 }
  0xcd   : > { %v467_v19 = vsel %vm265_vm1, %v1752_v12, 0.0 }
  0xce   : > { %v454_v38 = vadd.f32 %v453_v23, %v452_v33  ;;  %v1760_v23 = vld [vmem:[%s1009_s15 + $0x330] sm:$0xff]  ;;  %v807_v30 = vadd.f32 %v806_v17, %v805_v21  ;;  %v609_v33 = vmul.f32 %v1568_v28, %v1568_v28  ;;  %v812_v39 = vsel %vm265_vm1, %v608_v24, 0.0 }
  0xcf   : > { %v469_v22 = vsel %vm265_vm1, %v1760_v23, 0.0 }
  0xd0   : > { %v456_v10 = vadd.f32 %v455_v32, %v454_v38  ;;  %v1768_v32 = vld [vmem:[%s1009_s15 + $0x338] sm:$0xff]  ;;  %v809_v2 = vadd.f32 %v808_v26, %v807_v30  ;;  %v610_v38 = vmul.f32 %v1576_v31, %v1576_v31  ;;  %v814_v45 = vsel %vm265_vm1, %v609_v33, 0.0 }
  0xd1   : > { %v471_v25 = vsel %vm265_vm1, %v1768_v32, 0.0 }
  0xd2   : > { %v458_v53 = vadd.f32 %v457_v3, %v456_v10  ;;  %v1776_v3 = vld [vmem:[%s1009_s15 + $0x340] sm:$0xff]  ;;  %v811_v7 = vadd.f32 %v810_v36, %v809_v2  ;;  %v611_v10 = vmul.f32 %v1584_v34, %v1584_v34  ;;  %v816_v54 = vsel %vm265_vm1, %v610_v38, 0.0 }
  0xd3   : > { %v473_v28 = vsel %vm265_vm1, %v1776_v3, 0.0 }
  0xd4   : > { %v460_v60 = vadd.f32 %v459_v44, %v458_v53  ;;  %v1784_v44 = vld [vmem:[%s1009_s15 + $0x348] sm:$0xff]  ;;  %v813_v50 = vadd.f32 %v812_v39, %v811_v7  ;;  %v612_v53 = vmul.f32 %v1592_v37, %v1592_v37  ;;  %v818_v62 = vsel %vm265_vm1, %v611_v10, 0.0 }
  0xd5   : > { %v475_v31 = vsel %vm265_vm1, %v1784_v44, 0.0 }
  0xd6   : > { %v462_v8 = vadd.f32 %v461_v51, %v460_v60  ;;  %v1792_v51 = vld [vmem:[%s1009_s15 + $0x350] sm:$0xff]  ;;  %v815_v59 = vadd.f32 %v814_v45, %v813_v50  ;;  %v613_v60 = vmul.f32 %v1600_v40, %v1600_v40  ;;  %v820_v9 = vsel %vm265_vm1, %v612_v53, 0.0 }
  0xd7   : > { %v477_v34 = vsel %vm265_vm1, %v1792_v51, 0.0 }
  0xd8   : > { %v464_v18 = vadd.f32 %v463_v13, %v462_v8  ;;  %v1800_v13 = vld [vmem:[%s1009_s15 + $0x358] sm:$0xff]  ;;  %v817_v5 = vadd.f32 %v816_v54, %v815_v59  ;;  %v614_v8 = vmul.f32 %v1608_v43, %v1608_v43  ;;  %v822_v21 = vsel %vm265_vm1, %v613_v60, 0.0 }
  0xd9   : > { %v479_v37 = vsel %vm265_vm1, %v1800_v13, 0.0 }
  0xda   : > { %v466_v27 = vadd.f32 %v465_v16, %v464_v18  ;;  %v1808_v16 = vld [vmem:[%s1009_s15 + $0x360] sm:$0xff]  ;;  %v819_v17 = vadd.f32 %v818_v62, %v817_v5  ;;  %v615_v18 = vmul.f32 %v1616_v46, %v1616_v46  ;;  %v824_v30 = vsel %vm265_vm1, %v614_v8, 0.0 }
  0xdb   : > { %v481_v40 = vsel %vm265_vm1, %v1808_v16, 0.0 }
  0xdc   : > { %v468_v1 = vadd.f32 %v467_v19, %v466_v27  ;;  %v1816_v19 = vld [vmem:[%s1009_s15 + $0x368] sm:$0xff]  ;;  %v821_v26 = vadd.f32 %v820_v9, %v819_v17  ;;  %v616_v27 = vmul.f32 %v1624_v49, %v1624_v49  ;;  %v826_v2 = vsel %vm265_vm1, %v615_v18, 0.0 }
  0xdd   : > { %v483_v43 = vsel %vm265_vm1, %v1816_v19, 0.0 }
  0xde   : > { %v470_v42 = vadd.f32 %v469_v22, %v468_v1  ;;  %v1824_v22 = vld [vmem:[%s1009_s15 + $0x370] sm:$0xff]  ;;  %v823_v36 = vadd.f32 %v822_v21, %v821_v26  ;;  %v617_v1 = vmul.f32 %v1632_v52, %v1632_v52  ;;  %v828_v7 = vsel %vm265_vm1, %v616_v27, 0.0 }
  0xdf   : > { %v485_v46 = vsel %vm265_vm1, %v1824_v22, 0.0 }
  0xe0   : > { %v472_v48 = vadd.f32 %v471_v25, %v470_v42  ;;  %v1832_v25 = vld [vmem:[%s1009_s15 + $0x378] sm:$0xff]  ;;  %v825_v39 = vadd.f32 %v824_v30, %v823_v36  ;;  %v618_v42 = vmul.f32 %v1640_v55, %v1640_v55  ;;  %v830_v50 = vsel %vm265_vm1, %v617_v1, 0.0 }
  0xe1   : > { %v487_v49 = vsel %vm265_vm1, %v1832_v25, 0.0 }
  0xe2   : > { %v474_v57 = vadd.f32 %v473_v28, %v472_v48  ;;  %v1840_v28 = vld [vmem:[%s1009_s15 + $0x380] sm:$0xff]  ;;  %v827_v45 = vadd.f32 %v826_v2, %v825_v39  ;;  %v619_v48 = vmul.f32 %v1648_v58, %v1648_v58  ;;  %v832_v59 = vsel %vm265_vm1, %v618_v42, 0.0 }
  0xe3   : > { %v489_v52 = vsel %vm265_vm1, %v1840_v28, 0.0 }
  0xe4   : > { %v476_v4 = vadd.f32 %v475_v31, %v474_v57  ;;  %v1848_v31 = vld [vmem:[%s1009_s15 + $0x388] sm:$0xff]  ;;  %v829_v54 = vadd.f32 %v828_v7, %v827_v45  ;;  %v620_v57 = vmul.f32 %v1656_v61, %v1656_v61  ;;  %v834_v5 = vsel %vm265_vm1, %v619_v48, 0.0 }
  0xe5   : > { %v491_v55 = vsel %vm265_vm1, %v1848_v31, 0.0 }
  0xe6   : > { %v478_v14 = vadd.f32 %v477_v34, %v476_v4  ;;  %v1856_v34 = vld [vmem:[%s1009_s15 + $0x390] sm:$0xff]  ;;  %v831_v62 = vadd.f32 %v830_v50, %v829_v54  ;;  %v621_v4 = vmul.f32 %v1664_v0, %v1664_v0  ;;  %v836_v17 = vsel %vm265_vm1, %v620_v57, 0.0 }
  0xe7   : > { %v493_v58 = vsel %vm265_vm1, %v1856_v34, 0.0 }
  0xe8   : > { %v480_v24 = vadd.f32 %v479_v37, %v478_v14  ;;  %v1864_v37 = vld [vmem:[%s1009_s15 + $0x398] sm:$0xff]  ;;  %v833_v9 = vadd.f32 %v832_v59, %v831_v62  ;;  %v622_v14 = vmul.f32 %v1672_v6, %v1672_v6  ;;  %v838_v26 = vsel %vm265_vm1, %v621_v4, 0.0 }
  0xe9   : > { %v495_v61 = vsel %vm265_vm1, %v1864_v37, 0.0 }
  0xea   : > { %v482_v33 = vadd.f32 %v481_v40, %v480_v24  ;;  %v1872_v40 = vld [vmem:[%s1009_s15 + $0x3a0] sm:$0xff]  ;;  %v835_v21 = vadd.f32 %v834_v5, %v833_v9  ;;  %v623_v24 = vmul.f32 %v1680_v11, %v1680_v11  ;;  %v840_v36 = vsel %vm265_vm1, %v622_v14, 0.0 }
  0xeb   : > { %v497_v0 = vsel %vm265_vm1, %v1872_v40, 0.0 }
  0xec   : > { %v484_v38 = vadd.f32 %v483_v43, %v482_v33  ;;  %v1880_v43 = vld [vmem:[%s1009_s15 + $0x3a8] sm:$0xff]  ;;  %v837_v30 = vadd.f32 %v836_v17, %v835_v21  ;;  %v624_v33 = vmul.f32 %v1688_v15, %v1688_v15  ;;  %v842_v39 = vsel %vm265_vm1, %v623_v24, 0.0 }
  0xed   : > { %v499_v6 = vsel %vm265_vm1, %v1880_v43, 0.0 }
  0xee   : > { %v486_v10 = vadd.f32 %v485_v46, %v484_v38  ;;  %v1888_v46 = vld [vmem:[%s1009_s15 + $0x3b0] sm:$0xff]  ;;  %v839_v2 = vadd.f32 %v838_v26, %v837_v30  ;;  %v625_v38 = vmul.f32 %v1696_v20, %v1696_v20  ;;  %v844_v45 = vsel %vm265_vm1, %v624_v33, 0.0 }
  0xef   : > { %v501_v11 = vsel %vm265_vm1, %v1888_v46, 0.0 }
  0xf0   : > { %v488_v53 = vadd.f32 %v487_v49, %v486_v10  ;;  %v1896_v49 = vld [vmem:[%s1009_s15 + $0x3b8] sm:$0xff]  ;;  %v841_v7 = vadd.f32 %v840_v36, %v839_v2  ;;  %v626_v10 = vmul.f32 %v1704_v29, %v1704_v29  ;;  %v846_v54 = vsel %vm265_vm1, %v625_v38, 0.0 }
  0xf1   : > { %v503_v15 = vsel %vm265_vm1, %v1896_v49, 0.0 }
  0xf2   : > { %v490_v60 = vadd.f32 %v489_v52, %v488_v53  ;;  %v1904_v52 = vld [vmem:[%s1009_s15 + $0x3c0] sm:$0xff]  ;;  %v843_v50 = vadd.f32 %v842_v39, %v841_v7  ;;  %v627_v53 = vmul.f32 %v1712_v35, %v1712_v35  ;;  %v848_v62 = vsel %vm265_vm1, %v626_v10, 0.0 }
  0xf3   : > { %v505_v20 = vsel %vm265_vm1, %v1904_v52, 0.0 }
  0xf4   : > { %v492_v8 = vadd.f32 %v491_v55, %v490_v60  ;;  %v1912_v55 = vld [vmem:[%s1009_s15 + $0x3c8] sm:$0xff]  ;;  %v845_v59 = vadd.f32 %v844_v45, %v843_v50  ;;  %v628_v60 = vmul.f32 %v1720_v41, %v1720_v41  ;;  %v850_v9 = vsel %vm265_vm1, %v627_v53, 0.0 }
  0xf5   : > { %v507_v29 = vsel %vm265_vm1, %v1912_v55, 0.0 }
  0xf6   : > { %v494_v18 = vadd.f32 %v493_v58, %v492_v8  ;;  %v1920_v58 = vld [vmem:[%s1009_s15 + $0x3d0] sm:$0xff]  ;;  %v847_v5 = vadd.f32 %v846_v54, %v845_v59  ;;  %v629_v8 = vmul.f32 %v1728_v47, %v1728_v47  ;;  %v852_v21 = vsel %vm265_vm1, %v628_v60, 0.0 }
  0xf7   : > { %v509_v35 = vsel %vm265_vm1, %v1920_v58, 0.0  ;;  %v635_v54 = vmul.f32 %v1776_v3, %v1776_v3  ;;  %v638_v3 = vmul.f32 %v1800_v13, %v1800_v13  ;;  %v264_v13 = vld [vmem:[%s2059_s1] sm:$0x1] }
  0xf8   : > { %v496_v27 = vadd.f32 %v495_v61, %v494_v18  ;;  %v1928_v61 = vld [vmem:[%s1009_s15 + $0x3d8] sm:$0xff]  ;;  %v849_v17 = vadd.f32 %v848_v62, %v847_v5  ;;  %v630_v18 = vmul.f32 %v1736_v56, %v1736_v56  ;;  %v854_v30 = vsel %vm265_vm1, %v629_v8, 0.0 }
  0xf9   : > { %v511_v41 = vsel %vm265_vm1, %v1928_v61, 0.0  ;;  %v866_v5 = vsel %vm265_vm1, %v635_v54, 0.0  ;;  %v649_v54 = vmul.f32 %v1888_v46, %v1888_v46 }
  0xfa   : > { %v498_v1 = vadd.f32 %v497_v0, %v496_v27  ;;  %v1936_v0 = vld [vmem:[%s1009_s15 + $0x3e0] sm:$0xff]  ;;  %v851_v26 = vadd.f32 %v850_v9, %v849_v17  ;;  %v631_v27 = vmul.f32 %v1744_v63, %v1744_v63  ;;  %v856_v2 = vsel %vm265_vm1, %v630_v18, 0.0 }
  0xfb   : > { %v513_v47 = vsel %vm265_vm1, %v1936_v0, 0.0 }
  0xfc   : > { %v500_v42 = vadd.f32 %v499_v6, %v498_v1  ;;  %v1944_v6 = vld [vmem:[%s1009_s15 + $0x3e8] sm:$0xff]  ;;  %v853_v36 = vadd.f32 %v852_v21, %v851_v26  ;;  %v632_v1 = vmul.f32 %v1752_v12, %v1752_v12  ;;  %v858_v7 = vsel %vm265_vm1, %v631_v27, 0.0 }
  0xfd   : > { %v515_v56 = vsel %vm265_vm1, %v1944_v6, 0.0  ;;  %v641_v27 = vmul.f32 %v1824_v22, %v1824_v22 }
  0xfe   : > { %v502_v48 = vadd.f32 %v501_v11, %v500_v42  ;;  %v1952_v11 = vld [vmem:[%s1009_s15 + $0x3f0] sm:$0xff]  ;;  %v855_v39 = vadd.f32 %v854_v30, %v853_v36  ;;  %v633_v42 = vmul.f32 %v1760_v23, %v1760_v23  ;;  %v860_v50 = vsel %vm265_vm1, %v632_v1, 0.0 }
  0xff   : > { %v517_v63 = vsel %vm265_vm1, %v1952_v11, 0.0  ;;  %v642_v36 = vmul.f32 %v1832_v25, %v1832_v25 }
 0x100   : > { %v504_v57 = vadd.f32 %v503_v15, %v502_v48  ;;  %v1960_v15 = vld [vmem:[%s1009_s15 + $0x3f8] sm:$0xff]  ;;  %v857_v45 = vadd.f32 %v856_v2, %v855_v39  ;;  %v634_v48 = vmul.f32 %v1768_v32, %v1768_v32  ;;  %v862_v23 = vsel %vm265_vm1, %v633_v42, 0.0 }
 0x101   : > { %v519_v12 = vsel %vm265_vm1, %v1960_v15, 0.0  ;;  %v637_v32 = vmul.f32 %v1792_v51, %v1792_v51  ;;  %v640_v51 = vmul.f32 %v1816_v19, %v1816_v19  ;;  %v643_v2 = vmul.f32 %v1840_v28, %v1840_v28 }
 0x102   : > { %v506_v4 = vadd.f32 %v505_v20, %v504_v57  ;;  %v859_v53 = vadd.f32 %v858_v7, %v857_v45  ;;  %v864_v60 = vsel %vm265_vm1, %v634_v48, 0.0  ;;  %v644_v39 = vmul.f32 %v1848_v31, %v1848_v31 }
 0x103   : > { %v876_v19 = vsel %vm265_vm1, %v640_v51, 0.0  ;;  %v880_v25 = vsel %vm265_vm1, %v642_v36, 0.0  ;;  %v645_v42 = vmul.f32 %v1856_v34, %v1856_v34  ;;  %v882_v7 = vsel %vm265_vm1, %v643_v2, 0.0 }
 0x104   : > { %v508_v14 = vadd.f32 %v507_v29, %v506_v4  ;;  %v861_v59 = vadd.f32 %v860_v50, %v859_v53  ;;  %v636_v29 = vmul.f32 %v1784_v44, %v1784_v44  ;;  %v639_v44 = vmul.f32 %v1808_v16, %v1808_v16 }
 0x105   : > { %v884_v45 = vsel %vm265_vm1, %v644_v39, 0.0  ;;  %v647_v48 = vmul.f32 %v1872_v40, %v1872_v40  ;;  %v886_v31 = vsel %vm265_vm1, %v645_v42, 0.0 }
 0x106   : > { %v510_v24 = vadd.f32 %v509_v35, %v508_v14  ;;  %v863_v4 = vadd.f32 %v862_v23, %v861_v59  ;;  %v868_v9 = vsel %vm265_vm1, %v636_v29, 0.0  ;;  %v874_v16 = vsel %vm265_vm1, %v639_v44, 0.0 }
 0x107   : > { %v651_v29 = vmul.f32 %v1904_v52, %v1904_v52  ;;  %v657_v44 = vmul.f32 %v1952_v11, %v1952_v11 }
 0x108   : > { %v512_v33 = vadd.f32 %v511_v41, %v510_v24  ;;  %v865_v8 = vadd.f32 %v864_v60, %v863_v4  ;;  %v870_v41 = vsel %vm265_vm1, %v637_v32, 0.0  ;;  %v872_v24 = vsel %vm265_vm1, %v638_v3, 0.0 }
 0x109   : > { %v653_v32 = vmul.f32 %v1920_v58, %v1920_v58  ;;  %v655_v3 = vmul.f32 %v1936_v0, %v1936_v0  ;;  %v910_v51 = vsel %vm265_vm1, %v657_v44, 0.0 }
 0x10a   : > { %v514_v38 = vadd.f32 %v513_v47, %v512_v33  ;;  %v867_v17 = vadd.f32 %v866_v5, %v865_v8 }
 0x10c   : > { %v516_v10 = vadd.f32 %v515_v56, %v514_v38  ;;  %v869_v21 = vadd.f32 %v868_v9, %v867_v17  ;;  %v878_v38 = vsel %vm265_vm1, %v641_v27, 0.0 }
 0x10e   : > { %v518_v20 = vadd.f32 %v517_v63, %v516_v10  ;;  %v871_v47 = vadd.f32 %v870_v41, %v869_v21  ;;  %v646_v10 = vmul.f32 %v1864_v37, %v1864_v37  ;;  %v890_v37 = vsel %vm265_vm1, %v647_v48, 0.0 }
 0x110   : > { %v520_v57 = vadd.f32 %v519_v12, %v518_v20  ;;  %v873_v33 = vadd.f32 %v872_v24, %v871_v47  ;;  %v648_v20 = vmul.f32 %v1880_v43, %v1880_v43  ;;  %v888_v34 = vsel %vm265_vm1, %v646_v10, 0.0 }
 0x111   : > { %v894_v43 = vsel %vm265_vm1, %v649_v54, 0.0 }
 0x112   : > { %v521_v62 = vrot.slane %v520_v57, 4  ;;  %v875_v1 = vadd.f32 %v874_v16, %v873_v33  ;;  %v892_v40 = vsel %vm265_vm1, %v648_v20, 0.0  ;;  %v530_v33 = vld [vmem:[%s2060_s2] sm:$0x1] }
 0x114   : > { %v522_v35 = vadd.f32 %v521_v62, %v520_v57  ;;  %v877_v22 = vadd.f32 %v876_v19, %v875_v1  ;;  %v650_v57 = vmul.f32 %v1896_v49, %v1896_v49  ;;  %v652_v62 = vmul.f32 %v1912_v55, %v1912_v55 }
 0x115   : > { %v898_v49 = vsel %vm265_vm1, %v651_v29, 0.0  ;;  %v902_v55 = vsel %vm265_vm1, %v653_v32, 0.0 }
 0x116   : > { %v523_v14 = vrot.slane %v522_v35, 2  ;;  %v879_v63 = vadd.f32 %v878_v38, %v877_v22  ;;  %v896_v46 = vsel %vm265_vm1, %v650_v57, 0.0  ;;  %v900_v52 = vsel %vm265_vm1, %v652_v62, 0.0 }
 0x118   : > { %v524_v18 = vadd.f32 %v523_v14, %v522_v35  ;;  %v881_v28 = vadd.f32 %v880_v25, %v879_v63  ;;  %v654_v35 = vmul.f32 %v1928_v61, %v1928_v61  ;;  %v656_v14 = vmul.f32 %v1944_v6, %v1944_v6 }
 0x119   : > { %v906_v61 = vsel %vm265_vm1, %v655_v3, 0.0 }
 0x11a   : > { %v525_v26 = vrot.slane %v524_v18, 1  ;;  %v883_v12 = vadd.f32 %v882_v7, %v881_v28  ;;  %v904_v58 = vsel %vm265_vm1, %v654_v35, 0.0  ;;  %v908_v0 = vsel %vm265_vm1, %v656_v14, 0.0 }
 0x11c   : > { %v526_v30 = vadd.f32 %v525_v26, %v524_v18  ;;  %v885_v50 = vadd.f32 %v884_v45, %v883_v12  ;;  %v658_v18 = vmul.f32 %v1960_v15, %v1960_v15 }
 0x11e   : > { %v527_v56 = vadd.f32 %v526_v30, %v264_v13  ;;  %v887_v53 = vadd.f32 %v886_v31, %v885_v50  ;;  %v912_v6 = vsel %vm265_vm1, %v658_v18, 0.0 }
 0x120   : > { %529 = vst.msk [vmem:[%s2059_s1] sm:$0x1] %vm528_vm2, %v527_v56  ;;  %v889_v23 = vadd.f32 %v888_v34, %v887_v53 }
 0x122   : > { %v891_v59 = vadd.f32 %v890_v37, %v889_v23 }
 0x124   : > { %v893_v60 = vadd.f32 %v892_v40, %v891_v59 }
 0x126   : > { %v895_v4 = vadd.f32 %v894_v43, %v893_v60 }
 0x128   : > { %v897_v5 = vadd.f32 %v896_v46, %v895_v4 }
 0x12a   : > { %v899_v8 = vadd.f32 %v898_v49, %v897_v5 }
 0x12c   : > { %v901_v9 = vadd.f32 %v900_v52, %v899_v8 }
 0x12e   : > { %v903_v17 = vadd.f32 %v902_v55, %v901_v9 }
 0x130   : > { %v905_v41 = vadd.f32 %v904_v58, %v903_v17 }
 0x132   : > { %v907_v21 = vadd.f32 %v906_v61, %v905_v41 }
 0x134   : > { %v909_v24 = vadd.f32 %v908_v0, %v907_v21 }
 0x136   : > { %v911_v26 = vadd.f32 %v910_v51, %v909_v24 }
 0x138   : > { %v913_v47 = vadd.f32 %v912_v6, %v911_v26 }
 0x13a   : > { %v914_v13 = vrot.slane %v913_v47, 4 }
 0x13c   : > { %v915_v27 = vadd.f32 %v914_v13, %v913_v47 }
 0x13e   : > { %v916_v16 = vrot.slane %v915_v27, 2 }
 0x140   : > { %v917_v11 = vadd.f32 %v916_v16, %v915_v27 }
 0x142   : > { %v918_v30 = vrot.slane %v917_v11, 1 }
 0x144   : > { %v919_v15 = vadd.f32 %v918_v30, %v917_v11 }
 0x146   : > { %v920_v36 = vadd.f32 %v919_v15, %v530_v33 }
 0x148   : > { %921 = vst.msk [vmem:[%s2060_s2] sm:$0x1] %vm528_vm2, %v920_v36 }
 0x149 PF: > { %s13_s9 = sadd.s32 1, %s980_s9  }
 0x14a   : > { %p10_p5 = scmp.ge.s32.totalorder %s13_s9, 14  }
 0x14c   :  { %12 = sbr.rel (!%p10_p5) target bundleno = 1 (0x1), region = 62 }

// kernel: an3ddr_forward.26
= control target key start
LH: loop header
LB: loop body
LE: loop exit
PB: predicated region body
PF: predicated region fallthrough
CT: control target
= control target key end

     0   :  { %s936_s12 = smov 0   ;;  %s1617_s0 = inlined_call_operand.vmem [shape: f32[12288,64], index: 0, kind: input, shape index: {}]   ;;  %s1618_s1 = inlined_call_operand.vmem [shape: f32[1,64], index: 1, kind: input, shape index: {}]   ;;  %s1619_s2 = inlined_call_operand.vmem [shape: f32[1,64], index: 2, kind: input, shape index: {}]   ;;  %s1620_s3 = inlined_call_operand.vmem [shape: f32[12288,64], index: 3, kind: output, shape index: {}]  }
   0x1 LB: > { %s885_s13 = sadd.s32 4294967295, %s914_s12   ;;  %p889_p0 = scmp.ge.s32.totalorder %s914_s12, 1  ;;  %s914_s12 = sphi %s936_s12, %s13_s12  }
   0x2   : > { %p138_p1 = scmp.lt.s32.totalorder %s914_s12, 13 }
   0x4   : > { %p139_p2 = pnand %p889_p0, %p138_p1 }
   0x5   : > { %s890_s14 = sshll.u32 (!%p139_p2), %s885_s13, 7 }
   0x6   : > { %142 = sbr.rel (%p139_p2) target bundleno = 116 (0x74), region = 32  ;;  %p163_p3 = scmp.lt.s32.totalorder (!%p139_p2), %s890_s14, 1535 }
   0xb   : > { %s1622_s14 = smov (!%p163_p3, %s890_s14), 1535  ;;  %v947_v0 = vld [vmem:[%s1618_s1] ss:$0 sm:$0xff]  ;;  %vm700_vm0 = vcmask 523264  }
   0xc   : > { %s891_s15 = sshll.u32 %s1622_s14, 3  ;;  %v957_v1 = vld [vmem:[%s1619_s2] ss:$0 sm:$0xff] }
   0xd   : > { %s952_s20 = scalar_lea.vmem %s1617_s0, %s891_s15  ;;  %s980_s25 = scalar_lea.vmem %s1620_s3, %s891_s15 }
   0xe   : > { %v174_v2 = vld [vmem:[%s952_s20] sm:$0xff]  ;;  %v175_v3 = vld [vmem:[%s952_s20 + $0x8] sm:$0xff]  ;;  %v176_v4 = vld [vmem:[%s952_s20 + $0x10] sm:$0xff] }
   0xf   : > { %v309_v5 = vmul.f32 %v947_v0, %v174_v2  ;;  %v310_v6 = vmul.f32 %v947_v0, %v175_v3  ;;  %v311_v7 = vmul.f32 %v947_v0, %v176_v4  ;;  %v177_v8 = vld [vmem:[%s952_s20 + $0x18] sm:$0xff]  ;;  %v178_v9 = vld [vmem:[%s952_s20 + $0x20] sm:$0xff]  ;;  %v179_v10 = vld [vmem:[%s952_s20 + $0x28] sm:$0xff] }
  0x10   : > { %v312_v11 = vmul.f32 %v947_v0, %v177_v8  ;;  %v313_v12 = vmul.f32 %v947_v0, %v178_v9  ;;  %v314_v13 = vmul.f32 %v947_v0, %v179_v10  ;;  %v180_v14 = vld [vmem:[%s952_s20 + $0x30] sm:$0xff]  ;;  %v181_v15 = vld [vmem:[%s952_s20 + $0x38] sm:$0xff]  ;;  %v182_v24 = vld [vmem:[%s952_s20 + $0x40] sm:$0xff] }
  0x11   : > { %v444_v16 = vadd.f32 %v957_v1, %v309_v5  ;;  %v445_v17 = vadd.f32 %v957_v1, %v310_v6  ;;  %v446_v18 = vadd.f32 %v957_v1, %v311_v7  ;;  %v315_v19 = vmul.f32 %v947_v0, %v180_v14  ;;  %v183_v25 = vld [vmem:[%s952_s20 + $0x48] sm:$0xff]  ;;  %v184_v26 = vld [vmem:[%s952_s20 + $0x50] sm:$0xff]  ;;  %v185_v31 = vld [vmem:[%s952_s20 + $0x58] sm:$0xff] }
  0x12   : > { %v447_v20 = vadd.f32 %v957_v1, %v312_v11  ;;  %v448_v21 = vadd.f32 %v957_v1, %v313_v12  ;;  %v449_v22 = vadd.f32 %v957_v1, %v314_v13  ;;  %v316_v23 = vmul.f32 %v947_v0, %v181_v15  ;;  %v186_v32 = vld [vmem:[%s952_s20 + $0x60] sm:$0xff]  ;;  %v187_v33 = vld [vmem:[%s952_s20 + $0x68] sm:$0xff]  ;;  %v188_v38 = vld [vmem:[%s952_s20 + $0x70] sm:$0xff] }
  0x13   : > { %v572_v27 = vmax.f32 %v444_v16, 0.0  ;;  %v573_v28 = vmax.f32 %v445_v17, 0.0  ;;  %v574_v29 = vmax.f32 %v446_v18, 0.0  ;;  %v450_v30 = vadd.f32 %v957_v1, %v315_v19  ;;  %v189_v43 = vld [vmem:[%s952_s20 + $0x78] sm:$0xff]  ;;  %v190_v56 = vld [vmem:[%s952_s20 + $0x80] sm:$0xff]  ;;  %v191_v57 = vld [vmem:[%s952_s20 + $0x88] sm:$0xff] }
  0x14   : > { %v575_v34 = vmax.f32 %v447_v20, 0.0  ;;  %v576_v35 = vmax.f32 %v448_v21, 0.0  ;;  %v577_v36 = vmax.f32 %v449_v22, 0.0  ;;  %v451_v37 = vadd.f32 %v957_v1, %v316_v23  ;;  %v192_v58 = vld [vmem:[%s952_s20 + $0x90] sm:$0xff]  ;;  %v193_v63 = vld [vmem:[%s952_s20 + $0x98] sm:$0xff]  ;;  %v194_v2 = vld [vmem:[%s952_s20 + $0xa0] sm:$0xff] }
  0x15   : > { %701 = vst.msk [vmem:[%s980_s25] sm:$0xff] %vm700_vm0, %v572_v27  ;;  %702 = vst.msk [vmem:[%s980_s25 + $0x8] sm:$0xff] %vm700_vm0, %v573_v28  ;;  %v578_v39 = vmax.f32 %v450_v30, 0.0  ;;  %v317_v40 = vmul.f32 %v947_v0, %v182_v24  ;;  %v318_v41 = vmul.f32 %v947_v0, %v183_v25  ;;  %v319_v42 = vmul.f32 %v947_v0, %v184_v26  ;;  %v195_v3 = vld [vmem:[%s952_s20 + $0xa8] sm:$0xff]  ;;  %v196_v8 = vld [vmem:[%s952_s20 + $0xb0] sm:$0xff] }
  0x16   : > { %703 = vst.msk [vmem:[%s980_s25 + $0x10] sm:$0xff] %vm700_vm0, %v574_v29  ;;  %704 = vst.msk [vmem:[%s980_s25 + $0x18] sm:$0xff] %vm700_vm0, %v575_v34  ;;  %v579_v44 = vmax.f32 %v451_v37, 0.0  ;;  %v320_v45 = vmul.f32 %v947_v0, %v185_v31  ;;  %v321_v46 = vmul.f32 %v947_v0, %v186_v32  ;;  %v322_v47 = vmul.f32 %v947_v0, %v187_v33  ;;  %v197_v13 = vld [vmem:[%s952_s20 + $0xb8] sm:$0xff]  ;;  %v198_v26 = vld [vmem:[%s952_s20 + $0xc0] sm:$0xff] }
  0x17   : > { %705 = vst.msk [vmem:[%s980_s25 + $0x20] sm:$0xff] %vm700_vm0, %v576_v35  ;;  %706 = vst.msk [vmem:[%s980_s25 + $0x28] sm:$0xff] %vm700_vm0, %v577_v36  ;;  %v452_v48 = vadd.f32 %v957_v1, %v317_v40  ;;  %v453_v49 = vadd.f32 %v957_v1, %v318_v41  ;;  %v454_v50 = vadd.f32 %v957_v1, %v319_v42  ;;  %v199_v27 = vld [vmem:[%s952_s20 + $0xc8] sm:$0xff]  ;;  %v200_v28 = vld [vmem:[%s952_s20 + $0xd0] sm:$0xff] }
  0x18   : > { %707 = vst.msk [vmem:[%s980_s25 + $0x30] sm:$0xff] %vm700_vm0, %v578_v39  ;;  %v323_v51 = vmul.f32 %v947_v0, %v188_v38  ;;  %708 = vst.msk [vmem:[%s980_s25 + $0x38] sm:$0xff] %vm700_vm0, %v579_v44  ;;  %v455_v52 = vadd.f32 %v957_v1, %v320_v45  ;;  %v456_v53 = vadd.f32 %v957_v1, %v321_v46  ;;  %v201_v33 = vld [vmem:[%s952_s20 + $0xd8] sm:$0xff]  ;;  %v202_v34 = vld [vmem:[%s952_s20 + $0xe0] sm:$0xff] }
  0x19   : > { %v457_v54 = vadd.f32 %v957_v1, %v322_v47  ;;  %v324_v55 = vmul.f32 %v947_v0, %v189_v43  ;;  %v580_v59 = vmax.f32 %v452_v48, 0.0  ;;  %v581_v60 = vmax.f32 %v453_v49, 0.0  ;;  %v203_v35 = vld [vmem:[%s952_s20 + $0xe8] sm:$0xff]  ;;  %v204_v40 = vld [vmem:[%s952_s20 + $0xf0] sm:$0xff]  ;;  %v205_v45 = vld [vmem:[%s952_s20 + $0xf8] sm:$0xff] }
  0x1a   : > { %v582_v61 = vmax.f32 %v454_v50, 0.0  ;;  %v458_v62 = vadd.f32 %v957_v1, %v323_v51  ;;  %v583_v4 = vmax.f32 %v455_v52, 0.0  ;;  %v584_v5 = vmax.f32 %v456_v53, 0.0 }
  0x1b   : > { %v585_v6 = vmax.f32 %v457_v54, 0.0  ;;  %v459_v7 = vadd.f32 %v957_v1, %v324_v55  ;;  %709 = vst.msk [vmem:[%s980_s25 + $0x40] sm:$0xff] %vm700_vm0, %v580_v59  ;;  %710 = vst.msk [vmem:[%s980_s25 + $0x48] sm:$0xff] %vm700_vm0, %v581_v60  ;;  %v325_v10 = vmul.f32 %v947_v0, %v190_v56  ;;  %v326_v11 = vmul.f32 %v947_v0, %v191_v57  ;;  %v207_v59 = vld [vmem:[%s952_s20 + $0x108] sm:$0xff]  ;;  %v208_v60 = vld [vmem:[%s952_s20 + $0x110] sm:$0xff] }
  0x1c   : > { %711 = vst.msk [vmem:[%s980_s25 + $0x50] sm:$0xff] %vm700_vm0, %v582_v61  ;;  %v586_v9 = vmax.f32 %v458_v62, 0.0  ;;  %v327_v12 = vmul.f32 %v947_v0, %v192_v58  ;;  %712 = vst.msk [vmem:[%s980_s25 + $0x58] sm:$0xff] %vm700_vm0, %v583_v4  ;;  %v328_v15 = vmul.f32 %v947_v0, %v193_v63  ;;  %v329_v16 = vmul.f32 %v947_v0, %v194_v2  ;;  %v206_v58 = vld [vmem:[%s952_s20 + $0x100] sm:$0xff] }
  0x1d   : > { %713 = vst.msk [vmem:[%s980_s25 + $0x60] sm:$0xff] %vm700_vm0, %v584_v5  ;;  %714 = vst.msk [vmem:[%s980_s25 + $0x68] sm:$0xff] %vm700_vm0, %v585_v6  ;;  %v587_v14 = vmax.f32 %v459_v7, 0.0  ;;  %v330_v17 = vmul.f32 %v947_v0, %v195_v3  ;;  %v460_v18 = vadd.f32 %v957_v1, %v325_v10  ;;  %v461_v19 = vadd.f32 %v957_v1, %v326_v11  ;;  %v209_v3 = vld [vmem:[%s952_s20 + $0x118] sm:$0xff]  ;;  %v210_v4 = vld [vmem:[%s952_s20 + $0x120] sm:$0xff] }
  0x1e   : > { %715 = vst.msk [vmem:[%s980_s25 + $0x70] sm:$0xff] %vm700_vm0, %v586_v9  ;;  %v462_v20 = vadd.f32 %v957_v1, %v327_v12  ;;  %v331_v21 = vmul.f32 %v947_v0, %v196_v8  ;;  %v463_v22 = vadd.f32 %v957_v1, %v328_v15  ;;  %v464_v23 = vadd.f32 %v957_v1, %v329_v16  ;;  %v211_v5 = vld [vmem:[%s952_s20 + $0x128] sm:$0xff]  ;;  %v212_v10 = vld [vmem:[%s952_s20 + $0x130] sm:$0xff]  ;;  %v213_v15 = vld [vmem:[%s952_s20 + $0x138] sm:$0xff] }
  0x1f   : > { %716 = vst.msk [vmem:[%s980_s25 + $0x78] sm:$0xff] %vm700_vm0, %v587_v14  ;;  %v465_v24 = vadd.f32 %v957_v1, %v330_v17  ;;  %v332_v25 = vmul.f32 %v947_v0, %v197_v13  ;;  %v588_v29 = vmax.f32 %v460_v18, 0.0  ;;  %v589_v30 = vmax.f32 %v461_v19, 0.0 }
  0x20   : > { %v590_v31 = vmax.f32 %v462_v20, 0.0  ;;  %v466_v32 = vadd.f32 %v957_v1, %v331_v21  ;;  %v591_v36 = vmax.f32 %v463_v22, 0.0  ;;  %v592_v37 = vmax.f32 %v464_v23, 0.0 }
  0x21   : > { %v593_v38 = vmax.f32 %v465_v24, 0.0  ;;  %v467_v39 = vadd.f32 %v957_v1, %v332_v25  ;;  %717 = vst.msk [vmem:[%s980_s25 + $0x80] sm:$0xff] %vm700_vm0, %v588_v29  ;;  %718 = vst.msk [vmem:[%s980_s25 + $0x88] sm:$0xff] %vm700_vm0, %v589_v30  ;;  %v333_v42 = vmul.f32 %v947_v0, %v198_v26  ;;  %v334_v43 = vmul.f32 %v947_v0, %v199_v27  ;;  %v215_v29 = vld [vmem:[%s952_s20 + $0x148] sm:$0xff]  ;;  %v216_v30 = vld [vmem:[%s952_s20 + $0x150] sm:$0xff] }
  0x22   : > { %719 = vst.msk [vmem:[%s980_s25 + $0x90] sm:$0xff] %vm700_vm0, %v590_v31  ;;  %v594_v41 = vmax.f32 %v466_v32, 0.0  ;;  %v335_v44 = vmul.f32 %v947_v0, %v200_v28  ;;  %720 = vst.msk [vmem:[%s980_s25 + $0x98] sm:$0xff] %vm700_vm0, %v591_v36  ;;  %v336_v47 = vmul.f32 %v947_v0, %v201_v33  ;;  %v337_v48 = vmul.f32 %v947_v0, %v202_v34  ;;  %v214_v28 = vld [vmem:[%s952_s20 + $0x140] sm:$0xff] }
  0x23   : > { %721 = vst.msk [vmem:[%s980_s25 + $0xa0] sm:$0xff] %vm700_vm0, %v592_v37  ;;  %722 = vst.msk [vmem:[%s980_s25 + $0xa8] sm:$0xff] %vm700_vm0, %v593_v38  ;;  %v595_v46 = vmax.f32 %v467_v39, 0.0  ;;  %v338_v49 = vmul.f32 %v947_v0, %v203_v35  ;;  %v468_v50 = vadd.f32 %v957_v1, %v333_v42  ;;  %v469_v51 = vadd.f32 %v957_v1, %v334_v43  ;;  %v217_v35 = vld [vmem:[%s952_s20 + $0x158] sm:$0xff]  ;;  %v218_v36 = vld [vmem:[%s952_s20 + $0x160] sm:$0xff] }
  0x24   : > { %723 = vst.msk [vmem:[%s980_s25 + $0xb0] sm:$0xff] %vm700_vm0, %v594_v41  ;;  %v470_v52 = vadd.f32 %v957_v1, %v335_v44  ;;  %v339_v53 = vmul.f32 %v947_v0, %v204_v40  ;;  %v471_v54 = vadd.f32 %v957_v1, %v336_v47  ;;  %v472_v55 = vadd.f32 %v957_v1, %v337_v48  ;;  %v219_v37 = vld [vmem:[%s952_s20 + $0x168] sm:$0xff]  ;;  %v220_v42 = vld [vmem:[%s952_s20 + $0x170] sm:$0xff]  ;;  %v221_v47 = vld [vmem:[%s952_s20 + $0x178] sm:$0xff] }
  0x25   : > { %724 = vst.msk [vmem:[%s980_s25 + $0xb8] sm:$0xff] %vm700_vm0, %v595_v46  ;;  %v473_v56 = vadd.f32 %v957_v1, %v338_v49  ;;  %v340_v57 = vmul.f32 %v947_v0, %v205_v45  ;;  %v596_v61 = vmax.f32 %v468_v50, 0.0  ;;  %v597_v62 = vmax.f32 %v469_v51, 0.0 }
  0x26   : > { %v598_v63 = vmax.f32 %v470_v52, 0.0  ;;  %v474_v2 = vadd.f32 %v957_v1, %v339_v53  ;;  %v599_v6 = vmax.f32 %v471_v54, 0.0  ;;  %v600_v7 = vmax.f32 %v472_v55, 0.0 }
  0x27   : > { %v601_v8 = vmax.f32 %v473_v56, 0.0  ;;  %v475_v9 = vadd.f32 %v957_v1, %v340_v57  ;;  %725 = vst.msk [vmem:[%s980_s25 + $0xc0] sm:$0xff] %vm700_vm0, %v596_v61  ;;  %726 = vst.msk [vmem:[%s980_s25 + $0xc8] sm:$0xff] %vm700_vm0, %v597_v62  ;;  %v341_v12 = vmul.f32 %v947_v0, %v206_v58  ;;  %v342_v13 = vmul.f32 %v947_v0, %v207_v59  ;;  %v223_v61 = vld [vmem:[%s952_s20 + $0x188] sm:$0xff]  ;;  %v224_v62 = vld [vmem:[%s952_s20 + $0x190] sm:$0xff] }
  0x28   : > { %727 = vst.msk [vmem:[%s980_s25 + $0xd0] sm:$0xff] %vm700_vm0, %v598_v63  ;;  %v602_v11 = vmax.f32 %v474_v2, 0.0  ;;  %v343_v14 = vmul.f32 %v947_v0, %v208_v60  ;;  %728 = vst.msk [vmem:[%s980_s25 + $0xd8] sm:$0xff] %vm700_vm0, %v599_v6  ;;  %v344_v17 = vmul.f32 %v947_v0, %v209_v3  ;;  %v345_v18 = vmul.f32 %v947_v0, %v210_v4  ;;  %v222_v60 = vld [vmem:[%s952_s20 + $0x180] sm:$0xff] }
  0x29   : > { %729 = vst.msk [vmem:[%s980_s25 + $0xe0] sm:$0xff] %vm700_vm0, %v600_v7  ;;  %730 = vst.msk [vmem:[%s980_s25 + $0xe8] sm:$0xff] %vm700_vm0, %v601_v8  ;;  %v603_v16 = vmax.f32 %v475_v9, 0.0  ;;  %v346_v19 = vmul.f32 %v947_v0, %v211_v5  ;;  %v476_v20 = vadd.f32 %v957_v1, %v341_v12  ;;  %v477_v21 = vadd.f32 %v957_v1, %v342_v13  ;;  %v225_v5 = vld [vmem:[%s952_s20 + $0x198] sm:$0xff]  ;;  %v226_v6 = vld [vmem:[%s952_s20 + $0x1a0] sm:$0xff] }
  0x2a   : > { %731 = vst.msk [vmem:[%s980_s25 + $0xf0] sm:$0xff] %vm700_vm0, %v602_v11  ;;  %v478_v22 = vadd.f32 %v957_v1, %v343_v14  ;;  %v347_v23 = vmul.f32 %v947_v0, %v212_v10  ;;  %v479_v24 = vadd.f32 %v957_v1, %v344_v17  ;;  %v480_v25 = vadd.f32 %v957_v1, %v345_v18  ;;  %v227_v7 = vld [vmem:[%s952_s20 + $0x1a8] sm:$0xff]  ;;  %v228_v12 = vld [vmem:[%s952_s20 + $0x1b0] sm:$0xff]  ;;  %v229_v17 = vld [vmem:[%s952_s20 + $0x1b8] sm:$0xff] }
  0x2b   : > { %732 = vst.msk [vmem:[%s980_s25 + $0xf8] sm:$0xff] %vm700_vm0, %v603_v16  ;;  %v481_v26 = vadd.f32 %v957_v1, %v346_v19  ;;  %v348_v27 = vmul.f32 %v947_v0, %v213_v15  ;;  %v604_v31 = vmax.f32 %v476_v20, 0.0  ;;  %v605_v32 = vmax.f32 %v477_v21, 0.0 }
  0x2c   : > { %v606_v33 = vmax.f32 %v478_v22, 0.0  ;;  %v482_v34 = vadd.f32 %v957_v1, %v347_v23  ;;  %v607_v38 = vmax.f32 %v479_v24, 0.0  ;;  %v608_v39 = vmax.f32 %v480_v25, 0.0 }
  0x2d   : > { %v609_v40 = vmax.f32 %v481_v26, 0.0  ;;  %v483_v41 = vadd.f32 %v957_v1, %v348_v27  ;;  %733 = vst.msk [vmem:[%s980_s25 + $0x100] sm:$0xff] %vm700_vm0, %v604_v31  ;;  %734 = vst.msk [vmem:[%s980_s25 + $0x108] sm:$0xff] %vm700_vm0, %v605_v32  ;;  %v349_v44 = vmul.f32 %v947_v0, %v214_v28  ;;  %v350_v45 = vmul.f32 %v947_v0, %v215_v29  ;;  %v231_v31 = vld [vmem:[%s952_s20 + $0x1c8] sm:$0xff]  ;;  %v232_v32 = vld [vmem:[%s952_s20 + $0x1d0] sm:$0xff] }
  0x2e   : > { %735 = vst.msk [vmem:[%s980_s25 + $0x110] sm:$0xff] %vm700_vm0, %v606_v33  ;;  %v610_v43 = vmax.f32 %v482_v34, 0.0  ;;  %v351_v46 = vmul.f32 %v947_v0, %v216_v30  ;;  %736 = vst.msk [vmem:[%s980_s25 + $0x118] sm:$0xff] %vm700_vm0, %v607_v38  ;;  %v352_v49 = vmul.f32 %v947_v0, %v217_v35  ;;  %v353_v50 = vmul.f32 %v947_v0, %v218_v36  ;;  %v230_v30 = vld [vmem:[%s952_s20 + $0x1c0] sm:$0xff] }
  0x2f   : > { %737 = vst.msk [vmem:[%s980_s25 + $0x120] sm:$0xff] %vm700_vm0, %v608_v39  ;;  %738 = vst.msk [vmem:[%s980_s25 + $0x128] sm:$0xff] %vm700_vm0, %v609_v40  ;;  %v611_v48 = vmax.f32 %v483_v41, 0.0  ;;  %v354_v51 = vmul.f32 %v947_v0, %v219_v37  ;;  %v484_v52 = vadd.f32 %v957_v1, %v349_v44  ;;  %v485_v53 = vadd.f32 %v957_v1, %v350_v45  ;;  %v233_v37 = vld [vmem:[%s952_s20 + $0x1d8] sm:$0xff]  ;;  %v234_v38 = vld [vmem:[%s952_s20 + $0x1e0] sm:$0xff] }
  0x30   : > { %739 = vst.msk [vmem:[%s980_s25 + $0x130] sm:$0xff] %vm700_vm0, %v610_v43  ;;  %v486_v54 = vadd.f32 %v957_v1, %v351_v46  ;;  %v355_v55 = vmul.f32 %v947_v0, %v220_v42  ;;  %v487_v56 = vadd.f32 %v957_v1, %v352_v49  ;;  %v488_v57 = vadd.f32 %v957_v1, %v353_v50  ;;  %v235_v39 = vld [vmem:[%s952_s20 + $0x1e8] sm:$0xff]  ;;  %v236_v44 = vld [vmem:[%s952_s20 + $0x1f0] sm:$0xff]  ;;  %v237_v49 = vld [vmem:[%s952_s20 + $0x1f8] sm:$0xff] }
  0x31   : > { %740 = vst.msk [vmem:[%s980_s25 + $0x138] sm:$0xff] %vm700_vm0, %v611_v48  ;;  %v489_v58 = vadd.f32 %v957_v1, %v354_v51  ;;  %v356_v59 = vmul.f32 %v947_v0, %v221_v47  ;;  %v612_v63 = vmax.f32 %v484_v52, 0.0  ;;  %v613_v2 = vmax.f32 %v485_v53, 0.0 }
  0x32   : > { %v614_v3 = vmax.f32 %v486_v54, 0.0  ;;  %v490_v4 = vadd.f32 %v957_v1, %v355_v55  ;;  %v615_v8 = vmax.f32 %v487_v56, 0.0  ;;  %v616_v9 = vmax.f32 %v488_v57, 0.0 }
  0x33   : > { %v617_v10 = vmax.f32 %v489_v58, 0.0  ;;  %v491_v11 = vadd.f32 %v957_v1, %v356_v59  ;;  %741 = vst.msk [vmem:[%s980_s25 + $0x140] sm:$0xff] %vm700_vm0, %v612_v63  ;;  %742 = vst.msk [vmem:[%s980_s25 + $0x148] sm:$0xff] %vm700_vm0, %v613_v2  ;;  %v357_v14 = vmul.f32 %v947_v0, %v222_v60  ;;  %v358_v15 = vmul.f32 %v947_v0, %v223_v61  ;;  %v239_v63 = vld [vmem:[%s952_s20 + $0x208] sm:$0xff]  ;;  %v240_v2 = vld [vmem:[%s952_s20 + $0x210] sm:$0xff] }
  0x34   : > { %743 = vst.msk [vmem:[%s980_s25 + $0x150] sm:$0xff] %vm700_vm0, %v614_v3  ;;  %v618_v13 = vmax.f32 %v490_v4, 0.0  ;;  %v359_v16 = vmul.f32 %v947_v0, %v224_v62  ;;  %744 = vst.msk [vmem:[%s980_s25 + $0x158] sm:$0xff] %vm700_vm0, %v615_v8  ;;  %v360_v19 = vmul.f32 %v947_v0, %v225_v5  ;;  %v361_v20 = vmul.f32 %v947_v0, %v226_v6  ;;  %v238_v62 = vld [vmem:[%s952_s20 + $0x200] sm:$0xff] }
  0x35   : > { %745 = vst.msk [vmem:[%s980_s25 + $0x160] sm:$0xff] %vm700_vm0, %v616_v9  ;;  %746 = vst.msk [vmem:[%s980_s25 + $0x168] sm:$0xff] %vm700_vm0, %v617_v10  ;;  %v619_v18 = vmax.f32 %v491_v11, 0.0  ;;  %v362_v21 = vmul.f32 %v947_v0, %v227_v7  ;;  %v492_v22 = vadd.f32 %v957_v1, %v357_v14  ;;  %v493_v23 = vadd.f32 %v957_v1, %v358_v15  ;;  %v241_v7 = vld [vmem:[%s952_s20 + $0x218] sm:$0xff]  ;;  %v242_v8 = vld [vmem:[%s952_s20 + $0x220] sm:$0xff] }
  0x36   : > { %747 = vst.msk [vmem:[%s980_s25 + $0x170] sm:$0xff] %vm700_vm0, %v618_v13  ;;  %v494_v24 = vadd.f32 %v957_v1, %v359_v16  ;;  %v363_v25 = vmul.f32 %v947_v0, %v228_v12  ;;  %v495_v26 = vadd.f32 %v957_v1, %v360_v19  ;;  %v496_v27 = vadd.f32 %v957_v1, %v361_v20  ;;  %v243_v9 = vld [vmem:[%s952_s20 + $0x228] sm:$0xff]  ;;  %v244_v14 = vld [vmem:[%s952_s20 + $0x230] sm:$0xff]  ;;  %v245_v19 = vld [vmem:[%s952_s20 + $0x238] sm:$0xff] }
  0x37   : > { %748 = vst.msk [vmem:[%s980_s25 + $0x178] sm:$0xff] %vm700_vm0, %v619_v18  ;;  %v497_v28 = vadd.f32 %v957_v1, %v362_v21  ;;  %v364_v29 = vmul.f32 %v947_v0, %v229_v17  ;;  %v620_v33 = vmax.f32 %v492_v22, 0.0  ;;  %v621_v34 = vmax.f32 %v493_v23, 0.0 }
  0x38   : > { %v622_v35 = vmax.f32 %v494_v24, 0.0  ;;  %v498_v36 = vadd.f32 %v957_v1, %v363_v25  ;;  %v623_v40 = vmax.f32 %v495_v26, 0.0  ;;  %v624_v41 = vmax.f32 %v496_v27, 0.0 }
  0x39   : > { %v625_v42 = vmax.f32 %v497_v28, 0.0  ;;  %v499_v43 = vadd.f32 %v957_v1, %v364_v29  ;;  %749 = vst.msk [vmem:[%s980_s25 + $0x180] sm:$0xff] %vm700_vm0, %v620_v33  ;;  %750 = vst.msk [vmem:[%s980_s25 + $0x188] sm:$0xff] %vm700_vm0, %v621_v34  ;;  %v365_v46 = vmul.f32 %v947_v0, %v230_v30  ;;  %v366_v47 = vmul.f32 %v947_v0, %v231_v31  ;;  %v247_v33 = vld [vmem:[%s952_s20 + $0x248] sm:$0xff]  ;;  %v248_v34 = vld [vmem:[%s952_s20 + $0x250] sm:$0xff] }
  0x3a   : > { %751 = vst.msk [vmem:[%s980_s25 + $0x190] sm:$0xff] %vm700_vm0, %v622_v35  ;;  %v626_v45 = vmax.f32 %v498_v36, 0.0  ;;  %v367_v48 = vmul.f32 %v947_v0, %v232_v32  ;;  %752 = vst.msk [vmem:[%s980_s25 + $0x198] sm:$0xff] %vm700_vm0, %v623_v40  ;;  %v368_v51 = vmul.f32 %v947_v0, %v233_v37  ;;  %v369_v52 = vmul.f32 %v947_v0, %v234_v38  ;;  %v246_v32 = vld [vmem:[%s952_s20 + $0x240] sm:$0xff] }
  0x3b   : > { %753 = vst.msk [vmem:[%s980_s25 + $0x1a0] sm:$0xff] %vm700_vm0, %v624_v41  ;;  %754 = vst.msk [vmem:[%s980_s25 + $0x1a8] sm:$0xff] %vm700_vm0, %v625_v42  ;;  %v627_v50 = vmax.f32 %v499_v43, 0.0  ;;  %v370_v53 = vmul.f32 %v947_v0, %v235_v39  ;;  %v500_v54 = vadd.f32 %v957_v1, %v365_v46  ;;  %v501_v55 = vadd.f32 %v957_v1, %v366_v47  ;;  %v249_v39 = vld [vmem:[%s952_s20 + $0x258] sm:$0xff]  ;;  %v250_v40 = vld [vmem:[%s952_s20 + $0x260] sm:$0xff] }
  0x3c   : > { %755 = vst.msk [vmem:[%s980_s25 + $0x1b0] sm:$0xff] %vm700_vm0, %v626_v45  ;;  %v502_v56 = vadd.f32 %v957_v1, %v367_v48  ;;  %v371_v57 = vmul.f32 %v947_v0, %v236_v44  ;;  %v503_v58 = vadd.f32 %v957_v1, %v368_v51  ;;  %v504_v59 = vadd.f32 %v957_v1, %v369_v52  ;;  %v251_v41 = vld [vmem:[%s952_s20 + $0x268] sm:$0xff]  ;;  %v252_v46 = vld [vmem:[%s952_s20 + $0x270] sm:$0xff]  ;;  %v253_v51 = vld [vmem:[%s952_s20 + $0x278] sm:$0xff] }
  0x3d   : > { %756 = vst.msk [vmem:[%s980_s25 + $0x1b8] sm:$0xff] %vm700_vm0, %v627_v50  ;;  %v505_v60 = vadd.f32 %v957_v1, %v370_v53  ;;  %v372_v61 = vmul.f32 %v947_v0, %v237_v49  ;;  %v628_v3 = vmax.f32 %v500_v54, 0.0  ;;  %v629_v4 = vmax.f32 %v501_v55, 0.0 }
  0x3e   : > { %v630_v5 = vmax.f32 %v502_v56, 0.0  ;;  %v506_v6 = vadd.f32 %v957_v1, %v371_v57  ;;  %v631_v10 = vmax.f32 %v503_v58, 0.0  ;;  %v632_v11 = vmax.f32 %v504_v59, 0.0 }
  0x3f   : > { %v633_v12 = vmax.f32 %v505_v60, 0.0  ;;  %v507_v13 = vadd.f32 %v957_v1, %v372_v61  ;;  %757 = vst.msk [vmem:[%s980_s25 + $0x1c0] sm:$0xff] %vm700_vm0, %v628_v3  ;;  %758 = vst.msk [vmem:[%s980_s25 + $0x1c8] sm:$0xff] %vm700_vm0, %v629_v4  ;;  %v373_v16 = vmul.f32 %v947_v0, %v238_v62  ;;  %v374_v17 = vmul.f32 %v947_v0, %v239_v63  ;;  %v255_v3 = vld [vmem:[%s952_s20 + $0x288] sm:$0xff]  ;;  %v256_v4 = vld [vmem:[%s952_s20 + $0x290] sm:$0xff] }
  0x40   : > { %759 = vst.msk [vmem:[%s980_s25 + $0x1d0] sm:$0xff] %vm700_vm0, %v630_v5  ;;  %v634_v15 = vmax.f32 %v506_v6, 0.0  ;;  %v375_v18 = vmul.f32 %v947_v0, %v240_v2  ;;  %760 = vst.msk [vmem:[%s980_s25 + $0x1d8] sm:$0xff] %vm700_vm0, %v631_v10  ;;  %v376_v21 = vmul.f32 %v947_v0, %v241_v7  ;;  %v377_v22 = vmul.f32 %v947_v0, %v242_v8  ;;  %v254_v2 = vld [vmem:[%s952_s20 + $0x280] sm:$0xff] }
  0x41   : > { %761 = vst.msk [vmem:[%s980_s25 + $0x1e0] sm:$0xff] %vm700_vm0, %v632_v11  ;;  %762 = vst.msk [vmem:[%s980_s25 + $0x1e8] sm:$0xff] %vm700_vm0, %v633_v12  ;;  %v635_v20 = vmax.f32 %v507_v13, 0.0  ;;  %v378_v23 = vmul.f32 %v947_v0, %v243_v9  ;;  %v508_v24 = vadd.f32 %v957_v1, %v373_v16  ;;  %v509_v25 = vadd.f32 %v957_v1, %v374_v17  ;;  %v257_v9 = vld [vmem:[%s952_s20 + $0x298] sm:$0xff]  ;;  %v258_v10 = vld [vmem:[%s952_s20 + $0x2a0] sm:$0xff] }
  0x42   : > { %763 = vst.msk [vmem:[%s980_s25 + $0x1f0] sm:$0xff] %vm700_vm0, %v634_v15  ;;  %v510_v26 = vadd.f32 %v957_v1, %v375_v18  ;;  %v379_v27 = vmul.f32 %v947_v0, %v244_v14  ;;  %v511_v28 = vadd.f32 %v957_v1, %v376_v21  ;;  %v512_v29 = vadd.f32 %v957_v1, %v377_v22  ;;  %v259_v11 = vld [vmem:[%s952_s20 + $0x2a8] sm:$0xff]  ;;  %v260_v16 = vld [vmem:[%s952_s20 + $0x2b0] sm:$0xff]  ;;  %v261_v21 = vld [vmem:[%s952_s20 + $0x2b8] sm:$0xff] }
  0x43   : > { %764 = vst.msk [vmem:[%s980_s25 + $0x1f8] sm:$0xff] %vm700_vm0, %v635_v20  ;;  %v513_v30 = vadd.f32 %v957_v1, %v378_v23  ;;  %v380_v31 = vmul.f32 %v947_v0, %v245_v19  ;;  %v636_v35 = vmax.f32 %v508_v24, 0.0  ;;  %v637_v36 = vmax.f32 %v509_v25, 0.0 }
  0x44   : > { %v638_v37 = vmax.f32 %v510_v26, 0.0  ;;  %v514_v38 = vadd.f32 %v957_v1, %v379_v27  ;;  %v639_v42 = vmax.f32 %v511_v28, 0.0  ;;  %v640_v43 = vmax.f32 %v512_v29, 0.0 }
  0x45   : > { %v641_v44 = vmax.f32 %v513_v30, 0.0  ;;  %v515_v45 = vadd.f32 %v957_v1, %v380_v31  ;;  %765 = vst.msk [vmem:[%s980_s25 + $0x200] sm:$0xff] %vm700_vm0, %v636_v35  ;;  %766 = vst.msk [vmem:[%s980_s25 + $0x208] sm:$0xff] %vm700_vm0, %v637_v36  ;;  %v381_v48 = vmul.f32 %v947_v0, %v246_v32  ;;  %v382_v49 = vmul.f32 %v947_v0, %v247_v33  ;;  %v263_v35 = vld [vmem:[%s952_s20 + $0x2c8] sm:$0xff]  ;;  %v264_v36 = vld [vmem:[%s952_s20 + $0x2d0] sm:$0xff] }
  0x46   : > { %767 = vst.msk [vmem:[%s980_s25 + $0x210] sm:$0xff] %vm700_vm0, %v638_v37  ;;  %v642_v47 = vmax.f32 %v514_v38, 0.0  ;;  %v383_v50 = vmul.f32 %v947_v0, %v248_v34  ;;  %768 = vst.msk [vmem:[%s980_s25 + $0x218] sm:$0xff] %vm700_vm0, %v639_v42  ;;  %v384_v53 = vmul.f32 %v947_v0, %v249_v39  ;;  %v385_v54 = vmul.f32 %v947_v0, %v250_v40  ;;  %v262_v34 = vld [vmem:[%s952_s20 + $0x2c0] sm:$0xff] }
  0x47   : > { %769 = vst.msk [vmem:[%s980_s25 + $0x220] sm:$0xff] %vm700_vm0, %v640_v43  ;;  %770 = vst.msk [vmem:[%s980_s25 + $0x228] sm:$0xff] %vm700_vm0, %v641_v44  ;;  %v643_v52 = vmax.f32 %v515_v45, 0.0  ;;  %v386_v55 = vmul.f32 %v947_v0, %v251_v41  ;;  %v516_v56 = vadd.f32 %v957_v1, %v381_v48  ;;  %v517_v57 = vadd.f32 %v957_v1, %v382_v49  ;;  %v265_v41 = vld [vmem:[%s952_s20 + $0x2d8] sm:$0xff]  ;;  %v266_v42 = vld [vmem:[%s952_s20 + $0x2e0] sm:$0xff] }
  0x48   : > { %771 = vst.msk [vmem:[%s980_s25 + $0x230] sm:$0xff] %vm700_vm0, %v642_v47  ;;  %v518_v58 = vadd.f32 %v957_v1, %v383_v50  ;;  %v387_v59 = vmul.f32 %v947_v0, %v252_v46  ;;  %v519_v60 = vadd.f32 %v957_v1, %v384_v53  ;;  %v520_v61 = vadd.f32 %v957_v1, %v385_v54  ;;  %v267_v43 = vld [vmem:[%s952_s20 + $0x2e8] sm:$0xff]  ;;  %v268_v48 = vld [vmem:[%s952_s20 + $0x2f0] sm:$0xff]  ;;  %v269_v53 = vld [vmem:[%s952_s20 + $0x2f8] sm:$0xff] }
  0x49   : > { %772 = vst.msk [vmem:[%s980_s25 + $0x238] sm:$0xff] %vm700_vm0, %v643_v52  ;;  %v521_v62 = vadd.f32 %v957_v1, %v386_v55  ;;  %v388_v63 = vmul.f32 %v947_v0, %v253_v51  ;;  %v644_v5 = vmax.f32 %v516_v56, 0.0  ;;  %v645_v6 = vmax.f32 %v517_v57, 0.0 }
  0x4a   : > { %v646_v7 = vmax.f32 %v518_v58, 0.0  ;;  %v522_v8 = vadd.f32 %v957_v1, %v387_v59  ;;  %v647_v12 = vmax.f32 %v519_v60, 0.0  ;;  %v648_v13 = vmax.f32 %v520_v61, 0.0 }
  0x4b   : > { %v649_v14 = vmax.f32 %v521_v62, 0.0  ;;  %v523_v15 = vadd.f32 %v957_v1, %v388_v63  ;;  %773 = vst.msk [vmem:[%s980_s25 + $0x240] sm:$0xff] %vm700_vm0, %v644_v5  ;;  %774 = vst.msk [vmem:[%s980_s25 + $0x248] sm:$0xff] %vm700_vm0, %v645_v6  ;;  %v389_v18 = vmul.f32 %v947_v0, %v254_v2  ;;  %v390_v19 = vmul.f32 %v947_v0, %v255_v3  ;;  %v271_v5 = vld [vmem:[%s952_s20 + $0x308] sm:$0xff]  ;;  %v272_v6 = vld [vmem:[%s952_s20 + $0x310] sm:$0xff] }
  0x4c   : > { %775 = vst.msk [vmem:[%s980_s25 + $0x250] sm:$0xff] %vm700_vm0, %v646_v7  ;;  %v650_v17 = vmax.f32 %v522_v8, 0.0  ;;  %v391_v20 = vmul.f32 %v947_v0, %v256_v4  ;;  %776 = vst.msk [vmem:[%s980_s25 + $0x258] sm:$0xff] %vm700_vm0, %v647_v12  ;;  %v392_v23 = vmul.f32 %v947_v0, %v257_v9  ;;  %v393_v24 = vmul.f32 %v947_v0, %v258_v10  ;;  %v270_v4 = vld [vmem:[%s952_s20 + $0x300] sm:$0xff] }
  0x4d   : > { %777 = vst.msk [vmem:[%s980_s25 + $0x260] sm:$0xff] %vm700_vm0, %v648_v13  ;;  %778 = vst.msk [vmem:[%s980_s25 + $0x268] sm:$0xff] %vm700_vm0, %v649_v14  ;;  %v651_v22 = vmax.f32 %v523_v15, 0.0  ;;  %v394_v25 = vmul.f32 %v947_v0, %v259_v11  ;;  %v524_v26 = vadd.f32 %v957_v1, %v389_v18  ;;  %v525_v27 = vadd.f32 %v957_v1, %v390_v19  ;;  %v273_v11 = vld [vmem:[%s952_s20 + $0x318] sm:$0xff]  ;;  %v274_v12 = vld [vmem:[%s952_s20 + $0x320] sm:$0xff] }
  0x4e   : > { %779 = vst.msk [vmem:[%s980_s25 + $0x270] sm:$0xff] %vm700_vm0, %v650_v17  ;;  %v526_v28 = vadd.f32 %v957_v1, %v391_v20  ;;  %v395_v29 = vmul.f32 %v947_v0, %v260_v16  ;;  %v527_v30 = vadd.f32 %v957_v1, %v392_v23  ;;  %v528_v31 = vadd.f32 %v957_v1, %v393_v24  ;;  %v275_v13 = vld [vmem:[%s952_s20 + $0x328] sm:$0xff]  ;;  %v276_v18 = vld [vmem:[%s952_s20 + $0x330] sm:$0xff]  ;;  %v277_v23 = vld [vmem:[%s952_s20 + $0x338] sm:$0xff] }
  0x4f   : > { %780 = vst.msk [vmem:[%s980_s25 + $0x278] sm:$0xff] %vm700_vm0, %v651_v22  ;;  %v529_v32 = vadd.f32 %v957_v1, %v394_v25  ;;  %v396_v33 = vmul.f32 %v947_v0, %v261_v21  ;;  %v652_v37 = vmax.f32 %v524_v26, 0.0  ;;  %v653_v38 = vmax.f32 %v525_v27, 0.0 }
  0x50   : > { %v654_v39 = vmax.f32 %v526_v28, 0.0  ;;  %v530_v40 = vadd.f32 %v957_v1, %v395_v29  ;;  %v655_v44 = vmax.f32 %v527_v30, 0.0  ;;  %v656_v45 = vmax.f32 %v528_v31, 0.0 }
  0x51   : > { %v657_v46 = vmax.f32 %v529_v32, 0.0  ;;  %v531_v47 = vadd.f32 %v957_v1, %v396_v33  ;;  %781 = vst.msk [vmem:[%s980_s25 + $0x280] sm:$0xff] %vm700_vm0, %v652_v37  ;;  %782 = vst.msk [vmem:[%s980_s25 + $0x288] sm:$0xff] %vm700_vm0, %v653_v38  ;;  %v397_v50 = vmul.f32 %v947_v0, %v262_v34  ;;  %v398_v51 = vmul.f32 %v947_v0, %v263_v35  ;;  %v279_v37 = vld [vmem:[%s952_s20 + $0x348] sm:$0xff]  ;;  %v280_v38 = vld [vmem:[%s952_s20 + $0x350] sm:$0xff] }
  0x52   : > { %783 = vst.msk [vmem:[%s980_s25 + $0x290] sm:$0xff] %vm700_vm0, %v654_v39  ;;  %v658_v49 = vmax.f32 %v530_v40, 0.0  ;;  %v399_v52 = vmul.f32 %v947_v0, %v264_v36  ;;  %784 = vst.msk [vmem:[%s980_s25 + $0x298] sm:$0xff] %vm700_vm0, %v655_v44  ;;  %v400_v55 = vmul.f32 %v947_v0, %v265_v41  ;;  %v401_v56 = vmul.f32 %v947_v0, %v266_v42  ;;  %v278_v36 = vld [vmem:[%s952_s20 + $0x340] sm:$0xff] }
  0x53   : > { %785 = vst.msk [vmem:[%s980_s25 + $0x2a0] sm:$0xff] %vm700_vm0, %v656_v45  ;;  %786 = vst.msk [vmem:[%s980_s25 + $0x2a8] sm:$0xff] %vm700_vm0, %v657_v46  ;;  %v659_v54 = vmax.f32 %v531_v47, 0.0  ;;  %v402_v57 = vmul.f32 %v947_v0, %v267_v43  ;;  %v532_v58 = vadd.f32 %v957_v1, %v397_v50  ;;  %v533_v59 = vadd.f32 %v957_v1, %v398_v51  ;;  %v281_v43 = vld [vmem:[%s952_s20 + $0x358] sm:$0xff]  ;;  %v282_v44 = vld [vmem:[%s952_s20 + $0x360] sm:$0xff] }
  0x54   : > { %787 = vst.msk [vmem:[%s980_s25 + $0x2b0] sm:$0xff] %vm700_vm0, %v658_v49  ;;  %v534_v60 = vadd.f32 %v957_v1, %v399_v52  ;;  %v403_v61 = vmul.f32 %v947_v0, %v268_v48  ;;  %v535_v62 = vadd.f32 %v957_v1, %v400_v55  ;;  %v536_v63 = vadd.f32 %v957_v1, %v401_v56  ;;  %v283_v45 = vld [vmem:[%s952_s20 + $0x368] sm:$0xff]  ;;  %v1476_v48 = vld [vmem:[%s1619_s2] ss:$0 sm:$0xff]  ;;  %v284_v50 = vld [vmem:[%s952_s20 + $0x370] sm:$0xff] }
  0x55   : > { %788 = vst.msk [vmem:[%s980_s25 + $0x2b8] sm:$0xff] %vm700_vm0, %v659_v54  ;;  %v537_v2 = vadd.f32 %v957_v1, %v402_v57  ;;  %v404_v3 = vmul.f32 %v947_v0, %v269_v53  ;;  %v660_v7 = vmax.f32 %v532_v58, 0.0  ;;  %v661_v8 = vmax.f32 %v533_v59, 0.0  ;;  %v1489_v51 = vld [vmem:[%s1618_s1] ss:$0 sm:$0xff]  ;;  %v285_v55 = vld [vmem:[%s952_s20 + $0x378] sm:$0xff] }
  0x56   : > { %v662_v9 = vmax.f32 %v534_v60, 0.0  ;;  %v538_v10 = vadd.f32 %v957_v1, %v403_v61  ;;  %v663_v14 = vmax.f32 %v535_v62, 0.0  ;;  %v664_v15 = vmax.f32 %v536_v63, 0.0 }
  0x57   : > { %v665_v16 = vmax.f32 %v537_v2, 0.0  ;;  %v539_v17 = vadd.f32 %v957_v1, %v404_v3  ;;  %789 = vst.msk [vmem:[%s980_s25 + $0x2c0] sm:$0xff] %vm700_vm0, %v660_v7  ;;  %790 = vst.msk [vmem:[%s980_s25 + $0x2c8] sm:$0xff] %vm700_vm0, %v661_v8  ;;  %v405_v20 = vmul.f32 %v947_v0, %v270_v4  ;;  %v406_v21 = vmul.f32 %v947_v0, %v271_v5  ;;  %v287_v7 = vld [vmem:[%s952_s20 + $0x388] sm:$0xff]  ;;  %v288_v8 = vld [vmem:[%s952_s20 + $0x390] sm:$0xff] }
  0x58   : > { %791 = vst.msk [vmem:[%s980_s25 + $0x2d0] sm:$0xff] %vm700_vm0, %v662_v9  ;;  %v666_v19 = vmax.f32 %v538_v10, 0.0  ;;  %v407_v22 = vmul.f32 %v947_v0, %v272_v6  ;;  %792 = vst.msk [vmem:[%s980_s25 + $0x2d8] sm:$0xff] %vm700_vm0, %v663_v14  ;;  %v408_v25 = vmul.f32 %v947_v0, %v273_v11  ;;  %v409_v26 = vmul.f32 %v947_v0, %v274_v12  ;;  %v286_v6 = vld [vmem:[%s952_s20 + $0x380] sm:$0xff] }
  0x59   : > { %793 = vst.msk [vmem:[%s980_s25 + $0x2e0] sm:$0xff] %vm700_vm0, %v664_v15  ;;  %794 = vst.msk [vmem:[%s980_s25 + $0x2e8] sm:$0xff] %vm700_vm0, %v665_v16  ;;  %v667_v24 = vmax.f32 %v539_v17, 0.0  ;;  %v410_v27 = vmul.f32 %v947_v0, %v275_v13  ;;  %v540_v28 = vadd.f32 %v957_v1, %v405_v20  ;;  %v541_v29 = vadd.f32 %v957_v1, %v406_v21  ;;  %v289_v13 = vld [vmem:[%s952_s20 + $0x398] sm:$0xff]  ;;  %v290_v14 = vld [vmem:[%s952_s20 + $0x3a0] sm:$0xff] }
  0x5a   : > { %795 = vst.msk [vmem:[%s980_s25 + $0x2f0] sm:$0xff] %vm700_vm0, %v666_v19  ;;  %v542_v30 = vadd.f32 %v957_v1, %v407_v22  ;;  %v411_v31 = vmul.f32 %v947_v0, %v276_v18  ;;  %v543_v32 = vadd.f32 %v957_v1, %v408_v25  ;;  %v544_v33 = vadd.f32 %v957_v1, %v409_v26  ;;  %v291_v15 = vld [vmem:[%s952_s20 + $0x3a8] sm:$0xff]  ;;  %v292_v20 = vld [vmem:[%s952_s20 + $0x3b0] sm:$0xff]  ;;  %v293_v25 = vld [vmem:[%s952_s20 + $0x3b8] sm:$0xff] }
  0x5b   : > { %796 = vst.msk [vmem:[%s980_s25 + $0x2f8] sm:$0xff] %vm700_vm0, %v667_v24  ;;  %v545_v34 = vadd.f32 %v957_v1, %v410_v27  ;;  %v412_v35 = vmul.f32 %v947_v0, %v277_v23  ;;  %v668_v39 = vmax.f32 %v540_v28, 0.0  ;;  %v669_v40 = vmax.f32 %v541_v29, 0.0 }
  0x5c   : > { %v670_v41 = vmax.f32 %v542_v30, 0.0  ;;  %v546_v42 = vadd.f32 %v957_v1, %v411_v31  ;;  %v671_v46 = vmax.f32 %v543_v32, 0.0  ;;  %v672_v0 = vmax.f32 %v544_v33, 0.0 }
  0x5d   : > { %v673_v47 = vmax.f32 %v545_v34, 0.0  ;;  %v547_v49 = vadd.f32 %v1476_v48, %v412_v35  ;;  %797 = vst.msk [vmem:[%s980_s25 + $0x300] sm:$0xff] %vm700_vm0, %v668_v39  ;;  %798 = vst.msk [vmem:[%s980_s25 + $0x308] sm:$0xff] %vm700_vm0, %v669_v40  ;;  %v413_v52 = vmul.f32 %v1489_v51, %v278_v36  ;;  %v414_v53 = vmul.f32 %v1489_v51, %v279_v37  ;;  %v295_v39 = vld [vmem:[%s952_s20 + $0x3c8] sm:$0xff]  ;;  %v296_v40 = vld [vmem:[%s952_s20 + $0x3d0] sm:$0xff] }
  0x5e   : > { %799 = vst.msk [vmem:[%s980_s25 + $0x310] sm:$0xff] %vm700_vm0, %v670_v41  ;;  %v674_v1 = vmax.f32 %v546_v42, 0.0  ;;  %v415_v54 = vmul.f32 %v1489_v51, %v280_v38  ;;  %800 = vst.msk [vmem:[%s980_s25 + $0x318] sm:$0xff] %vm700_vm0, %v671_v46  ;;  %v416_v57 = vmul.f32 %v1489_v51, %v281_v43  ;;  %v417_v58 = vmul.f32 %v1489_v51, %v282_v44  ;;  %v294_v38 = vld [vmem:[%s952_s20 + $0x3c0] sm:$0xff] }
  0x5f   : > { %801 = vst.msk [vmem:[%s980_s25 + $0x320] sm:$0xff] %vm700_vm0, %v672_v0  ;;  %802 = vst.msk [vmem:[%s980_s25 + $0x328] sm:$0xff] %vm700_vm0, %v673_v47  ;;  %v675_v56 = vmax.f32 %v547_v49, 0.0  ;;  %v418_v59 = vmul.f32 %v1489_v51, %v283_v45  ;;  %v548_v60 = vadd.f32 %v1476_v48, %v413_v52  ;;  %v549_v61 = vadd.f32 %v1476_v48, %v414_v53  ;;  %v297_v45 = vld [vmem:[%s952_s20 + $0x3d8] sm:$0xff]  ;;  %v298_v46 = vld [vmem:[%s952_s20 + $0x3e0] sm:$0xff] }
  0x60   : > { %803 = vst.msk [vmem:[%s980_s25 + $0x330] sm:$0xff] %vm700_vm0, %v674_v1  ;;  %v550_v62 = vadd.f32 %v1476_v48, %v415_v54  ;;  %v419_v63 = vmul.f32 %v1489_v51, %v284_v50  ;;  %v551_v2 = vadd.f32 %v1476_v48, %v416_v57  ;;  %v552_v3 = vadd.f32 %v1476_v48, %v417_v58  ;;  %v299_v0 = vld [vmem:[%s952_s20 + $0x3e8] sm:$0xff]  ;;  %v300_v52 = vld [vmem:[%s952_s20 + $0x3f0] sm:$0xff]  ;;  %v301_v57 = vld [vmem:[%s952_s20 + $0x3f8] sm:$0xff] }
  0x61   : > { %804 = vst.msk [vmem:[%s980_s25 + $0x338] sm:$0xff] %vm700_vm0, %v675_v56  ;;  %v553_v4 = vadd.f32 %v1476_v48, %v418_v59  ;;  %v420_v5 = vmul.f32 %v1489_v51, %v285_v55  ;;  %v676_v9 = vmax.f32 %v548_v60, 0.0  ;;  %v677_v10 = vmax.f32 %v549_v61, 0.0 }
  0x62   : > { %v678_v11 = vmax.f32 %v550_v62, 0.0  ;;  %v554_v12 = vadd.f32 %v1476_v48, %v419_v63  ;;  %v679_v16 = vmax.f32 %v551_v2, 0.0  ;;  %v680_v17 = vmax.f32 %v552_v3, 0.0 }
  0x63   : > { %v681_v18 = vmax.f32 %v553_v4, 0.0  ;;  %v555_v19 = vadd.f32 %v1476_v48, %v420_v5  ;;  %805 = vst.msk [vmem:[%s980_s25 + $0x340] sm:$0xff] %vm700_vm0, %v676_v9  ;;  %806 = vst.msk [vmem:[%s980_s25 + $0x348] sm:$0xff] %vm700_vm0, %v677_v10  ;;  %v421_v22 = vmul.f32 %v1489_v51, %v286_v6  ;;  %v422_v23 = vmul.f32 %v1489_v51, %v287_v7 }
  0x64   : > { %807 = vst.msk [vmem:[%s980_s25 + $0x350] sm:$0xff] %vm700_vm0, %v678_v11  ;;  %v682_v21 = vmax.f32 %v554_v12, 0.0  ;;  %v423_v24 = vmul.f32 %v1489_v51, %v288_v8  ;;  %808 = vst.msk [vmem:[%s980_s25 + $0x358] sm:$0xff] %vm700_vm0, %v679_v16  ;;  %v424_v27 = vmul.f32 %v1489_v51, %v289_v13  ;;  %v425_v28 = vmul.f32 %v1489_v51, %v290_v14 }
  0x65   : > { %809 = vst.msk [vmem:[%s980_s25 + $0x360] sm:$0xff] %vm700_vm0, %v680_v17  ;;  %810 = vst.msk [vmem:[%s980_s25 + $0x368] sm:$0xff] %vm700_vm0, %v681_v18  ;;  %v683_v26 = vmax.f32 %v555_v19, 0.0  ;;  %v426_v29 = vmul.f32 %v1489_v51, %v291_v15  ;;  %v556_v30 = vadd.f32 %v1476_v48, %v421_v22  ;;  %v557_v31 = vadd.f32 %v1476_v48, %v422_v23 }
  0x66   : > { %811 = vst.msk [vmem:[%s980_s25 + $0x370] sm:$0xff] %vm700_vm0, %v682_v21  ;;  %v558_v32 = vadd.f32 %v1476_v48, %v423_v24  ;;  %v427_v33 = vmul.f32 %v1489_v51, %v292_v20  ;;  %v559_v34 = vadd.f32 %v1476_v48, %v424_v27  ;;  %v560_v35 = vadd.f32 %v1476_v48, %v425_v28 }
  0x67   : > { %812 = vst.msk [vmem:[%s980_s25 + $0x378] sm:$0xff] %vm700_vm0, %v683_v26  ;;  %v561_v36 = vadd.f32 %v1476_v48, %v426_v29  ;;  %v428_v37 = vmul.f32 %v1489_v51, %v293_v25  ;;  %v684_v41 = vmax.f32 %v556_v30, 0.0  ;;  %v685_v42 = vmax.f32 %v557_v31, 0.0 }
  0x68   : > { %v686_v43 = vmax.f32 %v558_v32, 0.0  ;;  %v562_v44 = vadd.f32 %v1476_v48, %v427_v33  ;;  %v687_v47 = vmax.f32 %v559_v34, 0.0  ;;  %v688_v49 = vmax.f32 %v560_v35, 0.0 }
  0x69   : > { %v689_v50 = vmax.f32 %v561_v36, 0.0  ;;  %v563_v1 = vadd.f32 %v1476_v48, %v428_v37  ;;  %813 = vst.msk [vmem:[%s980_s25 + $0x380] sm:$0xff] %vm700_vm0, %v684_v41  ;;  %814 = vst.msk [vmem:[%s980_s25 + $0x388] sm:$0xff] %vm700_vm0, %v685_v42  ;;  %v429_v54 = vmul.f32 %v1489_v51, %v294_v38  ;;  %v430_v55 = vmul.f32 %v1489_v51, %v295_v39 }
  0x6a   : > { %815 = vst.msk [vmem:[%s980_s25 + $0x390] sm:$0xff] %vm700_vm0, %v686_v43  ;;  %v690_v53 = vmax.f32 %v562_v44, 0.0  ;;  %v431_v56 = vmul.f32 %v1489_v51, %v296_v40  ;;  %816 = vst.msk [vmem:[%s980_s25 + $0x398] sm:$0xff] %vm700_vm0, %v687_v47  ;;  %v432_v59 = vmul.f32 %v1489_v51, %v297_v45  ;;  %v433_v60 = vmul.f32 %v1489_v51, %v298_v46 }
  0x6b   : > { %817 = vst.msk [vmem:[%s980_s25 + $0x3a0] sm:$0xff] %vm700_vm0, %v688_v49  ;;  %818 = vst.msk [vmem:[%s980_s25 + $0x3a8] sm:$0xff] %vm700_vm0, %v689_v50  ;;  %v691_v58 = vmax.f32 %v563_v1, 0.0  ;;  %v434_v61 = vmul.f32 %v1489_v51, %v299_v0  ;;  %v564_v62 = vadd.f32 %v1476_v48, %v429_v54  ;;  %v565_v63 = vadd.f32 %v1476_v48, %v430_v55 }
  0x6c   : > { %819 = vst.msk [vmem:[%s980_s25 + $0x3b0] sm:$0xff] %vm700_vm0, %v690_v53  ;;  %v566_v2 = vadd.f32 %v1476_v48, %v431_v56  ;;  %v435_v3 = vmul.f32 %v1489_v51, %v300_v52  ;;  %v567_v4 = vadd.f32 %v1476_v48, %v432_v59  ;;  %v568_v5 = vadd.f32 %v1476_v48, %v433_v60 }
  0x6d   : > { %820 = vst.msk [vmem:[%s980_s25 + $0x3b8] sm:$0xff] %vm700_vm0, %v691_v58  ;;  %v569_v6 = vadd.f32 %v1476_v48, %v434_v61  ;;  %v436_v7 = vmul.f32 %v1489_v51, %v301_v57  ;;  %v692_v8 = vmax.f32 %v564_v62, 0.0  ;;  %v693_v9 = vmax.f32 %v565_v63, 0.0 }
  0x6e   : > { %v694_v10 = vmax.f32 %v566_v2, 0.0  ;;  %v570_v11 = vadd.f32 %v1476_v48, %v435_v3  ;;  %v695_v12 = vmax.f32 %v567_v4, 0.0  ;;  %v696_v13 = vmax.f32 %v568_v5, 0.0 }
  0x6f   : > { %v697_v14 = vmax.f32 %v569_v6, 0.0  ;;  %v571_v15 = vadd.f32 %v1476_v48, %v436_v7  ;;  %821 = vst.msk [vmem:[%s980_s25 + $0x3c0] sm:$0xff] %vm700_vm0, %v692_v8  ;;  %822 = vst.msk [vmem:[%s980_s25 + $0x3c8] sm:$0xff] %vm700_vm0, %v693_v9 }
  0x70   : > { %823 = vst.msk [vmem:[%s980_s25 + $0x3d0] sm:$0xff] %vm700_vm0, %v694_v10  ;;  %v698_v16 = vmax.f32 %v570_v11, 0.0  ;;  %824 = vst.msk [vmem:[%s980_s25 + $0x3d8] sm:$0xff] %vm700_vm0, %v695_v12 }
  0x71   : > { %825 = vst.msk [vmem:[%s980_s25 + $0x3e0] sm:$0xff] %vm700_vm0, %v696_v13  ;;  %826 = vst.msk [vmem:[%s980_s25 + $0x3e8] sm:$0xff] %vm700_vm0, %v697_v14  ;;  %v699_v51 = vmax.f32 %v571_v15, 0.0 }
  0x72   : > { %827 = vst.msk [vmem:[%s980_s25 + $0x3f0] sm:$0xff] %vm700_vm0, %v698_v16 }
  0x73   : > { %828 = vst.msk [vmem:[%s980_s25 + $0x3f8] sm:$0xff] %vm700_vm0, %v699_v51 }
  0x74 PF: > { %s13_s12 = sadd.s32 1, %s914_s12  }
  0x75   : > { %p10_p4 = scmp.ge.s32.totalorder %s13_s12, 14  }
  0x77   :  { %12 = sbr.rel (!%p10_p4) target bundleno = 1 (0x1), region = 62 }

// kernel: an3ddr_forward.27
= control target key start
LH: loop header
LB: loop body
LE: loop exit
PB: predicated region body
PF: predicated region fallthrough
CT: control target
= control target key end

     0   :  { %s1117_s12 = smov 0   ;;  %s1660_s0 = inlined_call_operand.vmem [shape: f32[2048,128], index: 0, kind: input, shape index: {}]   ;;  %s1661_s1 = inlined_call_operand.vmem [shape: f32[2048,128], index: 1, kind: input, shape index: {}]   ;;  %s1662_s2 = inlined_call_operand.vmem [shape: f32[2048,128], index: 2, kind: input, shape index: {}]   ;;  %s1663_s3 = inlined_call_operand.vmem [shape: f32[2048,128], index: 3, kind: output, shape index: {}]  }
   0x1 LB: > { %s1066_s13 = sadd.s32 4294967295, %s1095_s12   ;;  %p1070_p0 = scmp.ge.s32.totalorder %s1095_s12, 1  ;;  %s1095_s12 = sphi %s1117_s12, %s13_s12  }
   0x2   : > { %p160_p1 = scmp.lt.s32.totalorder %s1095_s12, 3 }
   0x4   : > { %p161_p2 = pnand %p1070_p0, %p160_p1 }
   0x5   : > { %s1071_s14 = sshll.u32 (!%p161_p2), %s1066_s13, 7 }
   0x6   : > { %164 = sbr.rel (%p161_p2) target bundleno = 161 (0xa1), region = 32  ;;  %p195_p3 = scmp.lt.s32.totalorder (!%p161_p2), %s1071_s14, 255 }
   0xb   : > { %s1665_s14 = smov (!%p195_p3, %s1071_s14), 255 }
   0xc   : > { %s1072_s15 = sshll.u32 %s1665_s14, 3 }
   0xd   : > { %s1128_s18 = scalar_lea.vmem %s1660_s0, %s1072_s15  ;;  %s1133_s21 = scalar_lea.vmem %s1661_s1, %s1072_s15 }
   0xe   : > { %s1138_s24 = scalar_lea.vmem %s1662_s2, %s1072_s15  ;;  %v218_v0 = vld [vmem:[%s1128_s18] sm:$0xff]  ;;  %v219_v2 = vld [vmem:[%s1128_s18 + $0x8] sm:$0xff]  ;;  %s1149_s27 = scalar_lea.vmem %s1663_s3, %s1072_s15  ;;  %v220_v8 = vld [vmem:[%s1128_s18 + $0x10] sm:$0xff] }
   0xf   : > { %v346_v1 = vld [vmem:[%s1133_s21] sm:$0xff]  ;;  %v347_v5 = vld [vmem:[%s1133_s21 + $0x8] sm:$0xff]  ;;  %v348_v9 = vld [vmem:[%s1133_s21 + $0x10] sm:$0xff] }
  0x10   : > { %v474_v3 = vmax.f32 %v218_v0, %v346_v1  ;;  %v602_v4 = vld [vmem:[%s1138_s24] sm:$0xff]  ;;  %v603_v6 = vld [vmem:[%s1138_s24 + $0x8] sm:$0xff]  ;;  %v475_v7 = vmax.f32 %v219_v2, %v347_v5  ;;  %v604_v10 = vld [vmem:[%s1138_s24 + $0x10] sm:$0xff]  ;;  %v476_v12 = vmax.f32 %v220_v8, %v348_v9 }
  0x11   : > { %v221_v13 = vld [vmem:[%s1128_s18 + $0x18] sm:$0xff]  ;;  %v222_v18 = vld [vmem:[%s1128_s18 + $0x20] sm:$0xff]  ;;  %v223_v23 = vld [vmem:[%s1128_s18 + $0x28] sm:$0xff] }
  0x12   : > { %v730_v11 = vmax.f32 %v474_v3, %v602_v4  ;;  %v349_v14 = vld [vmem:[%s1133_s21 + $0x18] sm:$0xff]  ;;  %v731_v16 = vmax.f32 %v475_v7, %v603_v6  ;;  %v350_v19 = vld [vmem:[%s1133_s21 + $0x20] sm:$0xff]  ;;  %v732_v21 = vmax.f32 %v476_v12, %v604_v10  ;;  %v351_v24 = vld [vmem:[%s1133_s21 + $0x28] sm:$0xff] }
  0x13   : > { %v605_v15 = vld [vmem:[%s1138_s24 + $0x18] sm:$0xff]  ;;  %v477_v17 = vmax.f32 %v221_v13, %v349_v14  ;;  %v606_v20 = vld [vmem:[%s1138_s24 + $0x20] sm:$0xff]  ;;  %v478_v22 = vmax.f32 %v222_v18, %v350_v19  ;;  %v607_v25 = vld [vmem:[%s1138_s24 + $0x28] sm:$0xff]  ;;  %v479_v27 = vmax.f32 %v223_v23, %v351_v24 }
  0x14   : > { %858 = vst [vmem:[%s1149_s27] sm:$0xff] %v730_v11  ;;  %859 = vst [vmem:[%s1149_s27 + $0x8] sm:$0xff] %v731_v16  ;;  %v224_v28 = vld [vmem:[%s1128_s18 + $0x30] sm:$0xff]  ;;  %v225_v33 = vld [vmem:[%s1128_s18 + $0x38] sm:$0xff] }
  0x15   : > { %v733_v26 = vmax.f32 %v477_v17, %v605_v15  ;;  %v352_v29 = vld [vmem:[%s1133_s21 + $0x30] sm:$0xff]  ;;  %860 = vst [vmem:[%s1149_s27 + $0x10] sm:$0xff] %v732_v21  ;;  %v734_v31 = vmax.f32 %v478_v22, %v606_v20  ;;  %v353_v34 = vld [vmem:[%s1133_s21 + $0x38] sm:$0xff]  ;;  %v735_v36 = vmax.f32 %v479_v27, %v607_v25  ;;  %v226_v38 = vld [vmem:[%s1128_s18 + $0x40] sm:$0xff] }
  0x16   : > { %v608_v30 = vld [vmem:[%s1138_s24 + $0x30] sm:$0xff]  ;;  %v480_v32 = vmax.f32 %v224_v28, %v352_v29  ;;  %v609_v35 = vld [vmem:[%s1138_s24 + $0x38] sm:$0xff]  ;;  %v481_v37 = vmax.f32 %v225_v33, %v353_v34  ;;  %v354_v39 = vld [vmem:[%s1133_s21 + $0x40] sm:$0xff] }
  0x17   : > { %861 = vst [vmem:[%s1149_s27 + $0x18] sm:$0xff] %v733_v26  ;;  %v610_v40 = vld [vmem:[%s1138_s24 + $0x40] sm:$0xff]  ;;  %862 = vst [vmem:[%s1149_s27 + $0x20] sm:$0xff] %v734_v31  ;;  %v482_v42 = vmax.f32 %v226_v38, %v354_v39  ;;  %v227_v43 = vld [vmem:[%s1128_s18 + $0x48] sm:$0xff] }
  0x18   : > { %v736_v41 = vmax.f32 %v480_v32, %v608_v30  ;;  %v355_v44 = vld [vmem:[%s1133_s21 + $0x48] sm:$0xff]  ;;  %863 = vst [vmem:[%s1149_s27 + $0x28] sm:$0xff] %v735_v36  ;;  %v737_v46 = vmax.f32 %v481_v37, %v609_v35  ;;  %v228_v48 = vld [vmem:[%s1128_s18 + $0x50] sm:$0xff]  ;;  %v229_v53 = vld [vmem:[%s1128_s18 + $0x58] sm:$0xff] }
  0x19   : > { %v611_v45 = vld [vmem:[%s1138_s24 + $0x48] sm:$0xff]  ;;  %v483_v47 = vmax.f32 %v227_v43, %v355_v44  ;;  %v356_v49 = vld [vmem:[%s1133_s21 + $0x50] sm:$0xff]  ;;  %v738_v51 = vmax.f32 %v482_v42, %v610_v40  ;;  %v357_v54 = vld [vmem:[%s1133_s21 + $0x58] sm:$0xff] }
  0x1a   : > { %v612_v50 = vld [vmem:[%s1138_s24 + $0x50] sm:$0xff]  ;;  %864 = vst [vmem:[%s1149_s27 + $0x30] sm:$0xff] %v736_v41  ;;  %v484_v52 = vmax.f32 %v228_v48, %v356_v49  ;;  %v613_v55 = vld [vmem:[%s1138_s24 + $0x58] sm:$0xff]  ;;  %865 = vst [vmem:[%s1149_s27 + $0x38] sm:$0xff] %v737_v46  ;;  %v485_v57 = vmax.f32 %v229_v53, %v357_v54 }
  0x1b   : > { %v739_v56 = vmax.f32 %v483_v47, %v611_v45  ;;  %v230_v58 = vld [vmem:[%s1128_s18 + $0x60] sm:$0xff]  ;;  %866 = vst [vmem:[%s1149_s27 + $0x40] sm:$0xff] %v738_v51  ;;  %v231_v63 = vld [vmem:[%s1128_s18 + $0x68] sm:$0xff]  ;;  %v232_v4 = vld [vmem:[%s1128_s18 + $0x70] sm:$0xff] }
  0x1c   : > { %v358_v59 = vld [vmem:[%s1133_s21 + $0x60] sm:$0xff]  ;;  %v740_v61 = vmax.f32 %v484_v52, %v612_v50  ;;  %v359_v0 = vld [vmem:[%s1133_s21 + $0x68] sm:$0xff]  ;;  %v741_v2 = vmax.f32 %v485_v57, %v613_v55  ;;  %v360_v5 = vld [vmem:[%s1133_s21 + $0x70] sm:$0xff] }
  0x1d   : > { %v614_v60 = vld [vmem:[%s1138_s24 + $0x60] sm:$0xff]  ;;  %v486_v62 = vmax.f32 %v230_v58, %v358_v59  ;;  %v615_v1 = vld [vmem:[%s1138_s24 + $0x68] sm:$0xff]  ;;  %867 = vst [vmem:[%s1149_s27 + $0x48] sm:$0xff] %v739_v56  ;;  %v487_v3 = vmax.f32 %v231_v63, %v359_v0  ;;  %v616_v6 = vld [vmem:[%s1138_s24 + $0x70] sm:$0xff]  ;;  %v488_v8 = vmax.f32 %v232_v4, %v360_v5 }
  0x1e   : > { %868 = vst [vmem:[%s1149_s27 + $0x50] sm:$0xff] %v740_v61  ;;  %v233_v9 = vld [vmem:[%s1128_s18 + $0x78] sm:$0xff]  ;;  %869 = vst [vmem:[%s1149_s27 + $0x58] sm:$0xff] %v741_v2  ;;  %v234_v14 = vld [vmem:[%s1128_s18 + $0x80] sm:$0xff] }
  0x1f   : > { %v742_v7 = vmax.f32 %v486_v62, %v614_v60  ;;  %v361_v10 = vld [vmem:[%s1133_s21 + $0x78] sm:$0xff]  ;;  %v743_v12 = vmax.f32 %v487_v3, %v615_v1  ;;  %v362_v15 = vld [vmem:[%s1133_s21 + $0x80] sm:$0xff]  ;;  %v744_v17 = vmax.f32 %v488_v8, %v616_v6  ;;  %v235_v19 = vld [vmem:[%s1128_s18 + $0x88] sm:$0xff] }
  0x20   : > { %v617_v11 = vld [vmem:[%s1138_s24 + $0x78] sm:$0xff]  ;;  %v489_v13 = vmax.f32 %v233_v9, %v361_v10  ;;  %v618_v16 = vld [vmem:[%s1138_s24 + $0x80] sm:$0xff]  ;;  %v490_v18 = vmax.f32 %v234_v14, %v362_v15  ;;  %v363_v20 = vld [vmem:[%s1133_s21 + $0x88] sm:$0xff] }
  0x21   : > { %870 = vst [vmem:[%s1149_s27 + $0x60] sm:$0xff] %v742_v7  ;;  %v619_v21 = vld [vmem:[%s1138_s24 + $0x88] sm:$0xff]  ;;  %871 = vst [vmem:[%s1149_s27 + $0x68] sm:$0xff] %v743_v12  ;;  %v491_v23 = vmax.f32 %v235_v19, %v363_v20  ;;  %v236_v24 = vld [vmem:[%s1128_s18 + $0x90] sm:$0xff] }
  0x22   : > { %v745_v22 = vmax.f32 %v489_v13, %v617_v11  ;;  %v364_v25 = vld [vmem:[%s1133_s21 + $0x90] sm:$0xff]  ;;  %872 = vst [vmem:[%s1149_s27 + $0x70] sm:$0xff] %v744_v17  ;;  %v746_v27 = vmax.f32 %v490_v18, %v618_v16  ;;  %v237_v29 = vld [vmem:[%s1128_s18 + $0x98] sm:$0xff]  ;;  %v238_v34 = vld [vmem:[%s1128_s18 + $0xa0] sm:$0xff] }
  0x23   : > { %v620_v26 = vld [vmem:[%s1138_s24 + $0x90] sm:$0xff]  ;;  %v492_v28 = vmax.f32 %v236_v24, %v364_v25  ;;  %v365_v30 = vld [vmem:[%s1133_s21 + $0x98] sm:$0xff]  ;;  %v747_v32 = vmax.f32 %v491_v23, %v619_v21  ;;  %v366_v35 = vld [vmem:[%s1133_s21 + $0xa0] sm:$0xff] }
  0x24   : > { %v621_v31 = vld [vmem:[%s1138_s24 + $0x98] sm:$0xff]  ;;  %873 = vst [vmem:[%s1149_s27 + $0x78] sm:$0xff] %v745_v22  ;;  %v493_v33 = vmax.f32 %v237_v29, %v365_v30  ;;  %v622_v36 = vld [vmem:[%s1138_s24 + $0xa0] sm:$0xff]  ;;  %874 = vst [vmem:[%s1149_s27 + $0x80] sm:$0xff] %v746_v27  ;;  %v494_v38 = vmax.f32 %v238_v34, %v366_v35 }
  0x25   : > { %v748_v37 = vmax.f32 %v492_v28, %v620_v26  ;;  %v239_v39 = vld [vmem:[%s1128_s18 + $0xa8] sm:$0xff]  ;;  %875 = vst [vmem:[%s1149_s27 + $0x88] sm:$0xff] %v747_v32  ;;  %v240_v44 = vld [vmem:[%s1128_s18 + $0xb0] sm:$0xff]  ;;  %v241_v49 = vld [vmem:[%s1128_s18 + $0xb8] sm:$0xff] }
  0x26   : > { %v367_v40 = vld [vmem:[%s1133_s21 + $0xa8] sm:$0xff]  ;;  %v749_v42 = vmax.f32 %v493_v33, %v621_v31  ;;  %v368_v45 = vld [vmem:[%s1133_s21 + $0xb0] sm:$0xff]  ;;  %v750_v47 = vmax.f32 %v494_v38, %v622_v36  ;;  %v369_v50 = vld [vmem:[%s1133_s21 + $0xb8] sm:$0xff] }
  0x27   : > { %v623_v41 = vld [vmem:[%s1138_s24 + $0xa8] sm:$0xff]  ;;  %v495_v43 = vmax.f32 %v239_v39, %v367_v40  ;;  %v624_v46 = vld [vmem:[%s1138_s24 + $0xb0] sm:$0xff]  ;;  %876 = vst [vmem:[%s1149_s27 + $0x90] sm:$0xff] %v748_v37  ;;  %v496_v48 = vmax.f32 %v240_v44, %v368_v45  ;;  %v625_v51 = vld [vmem:[%s1138_s24 + $0xb8] sm:$0xff]  ;;  %v497_v53 = vmax.f32 %v241_v49, %v369_v50 }
  0x28   : > { %877 = vst [vmem:[%s1149_s27 + $0x98] sm:$0xff] %v749_v42  ;;  %v242_v54 = vld [vmem:[%s1128_s18 + $0xc0] sm:$0xff]  ;;  %878 = vst [vmem:[%s1149_s27 + $0xa0] sm:$0xff] %v750_v47  ;;  %v243_v59 = vld [vmem:[%s1128_s18 + $0xc8] sm:$0xff] }
  0x29   : > { %v751_v52 = vmax.f32 %v495_v43, %v623_v41  ;;  %v370_v55 = vld [vmem:[%s1133_s21 + $0xc0] sm:$0xff]  ;;  %v752_v57 = vmax.f32 %v496_v48, %v624_v46  ;;  %v371_v60 = vld [vmem:[%s1133_s21 + $0xc8] sm:$0xff]  ;;  %v753_v62 = vmax.f32 %v497_v53, %v625_v51  ;;  %v244_v0 = vld [vmem:[%s1128_s18 + $0xd0] sm:$0xff] }
  0x2a   : > { %v626_v56 = vld [vmem:[%s1138_s24 + $0xc0] sm:$0xff]  ;;  %v498_v58 = vmax.f32 %v242_v54, %v370_v55  ;;  %v627_v61 = vld [vmem:[%s1138_s24 + $0xc8] sm:$0xff]  ;;  %v499_v63 = vmax.f32 %v243_v59, %v371_v60  ;;  %v372_v1 = vld [vmem:[%s1133_s21 + $0xd0] sm:$0xff] }
  0x2b   : > { %879 = vst [vmem:[%s1149_s27 + $0xa8] sm:$0xff] %v751_v52  ;;  %v628_v2 = vld [vmem:[%s1138_s24 + $0xd0] sm:$0xff]  ;;  %880 = vst [vmem:[%s1149_s27 + $0xb0] sm:$0xff] %v752_v57  ;;  %v500_v4 = vmax.f32 %v244_v0, %v372_v1  ;;  %v245_v5 = vld [vmem:[%s1128_s18 + $0xd8] sm:$0xff] }
  0x2c   : > { %v754_v3 = vmax.f32 %v498_v58, %v626_v56  ;;  %v373_v6 = vld [vmem:[%s1133_s21 + $0xd8] sm:$0xff]  ;;  %881 = vst [vmem:[%s1149_s27 + $0xb8] sm:$0xff] %v753_v62  ;;  %v755_v8 = vmax.f32 %v499_v63, %v627_v61  ;;  %v246_v10 = vld [vmem:[%s1128_s18 + $0xe0] sm:$0xff]  ;;  %v247_v15 = vld [vmem:[%s1128_s18 + $0xe8] sm:$0xff] }
  0x2d   : > { %v629_v7 = vld [vmem:[%s1138_s24 + $0xd8] sm:$0xff]  ;;  %v501_v9 = vmax.f32 %v245_v5, %v373_v6  ;;  %v374_v11 = vld [vmem:[%s1133_s21 + $0xe0] sm:$0xff]  ;;  %v756_v13 = vmax.f32 %v500_v4, %v628_v2  ;;  %v375_v16 = vld [vmem:[%s1133_s21 + $0xe8] sm:$0xff] }
  0x2e   : > { %v630_v12 = vld [vmem:[%s1138_s24 + $0xe0] sm:$0xff]  ;;  %882 = vst [vmem:[%s1149_s27 + $0xc0] sm:$0xff] %v754_v3  ;;  %v502_v14 = vmax.f32 %v246_v10, %v374_v11  ;;  %v631_v17 = vld [vmem:[%s1138_s24 + $0xe8] sm:$0xff]  ;;  %883 = vst [vmem:[%s1149_s27 + $0xc8] sm:$0xff] %v755_v8  ;;  %v503_v19 = vmax.f32 %v247_v15, %v375_v16 }
  0x2f   : > { %v757_v18 = vmax.f32 %v501_v9, %v629_v7  ;;  %v248_v20 = vld [vmem:[%s1128_s18 + $0xf0] sm:$0xff]  ;;  %884 = vst [vmem:[%s1149_s27 + $0xd0] sm:$0xff] %v756_v13  ;;  %v249_v25 = vld [vmem:[%s1128_s18 + $0xf8] sm:$0xff]  ;;  %v250_v30 = vld [vmem:[%s1128_s18 + $0x100] sm:$0xff] }
  0x30   : > { %v376_v21 = vld [vmem:[%s1133_s21 + $0xf0] sm:$0xff]  ;;  %v758_v23 = vmax.f32 %v502_v14, %v630_v12  ;;  %v377_v26 = vld [vmem:[%s1133_s21 + $0xf8] sm:$0xff]  ;;  %v759_v28 = vmax.f32 %v503_v19, %v631_v17  ;;  %v378_v31 = vld [vmem:[%s1133_s21 + $0x100] sm:$0xff] }
  0x31   : > { %v632_v22 = vld [vmem:[%s1138_s24 + $0xf0] sm:$0xff]  ;;  %v504_v24 = vmax.f32 %v248_v20, %v376_v21  ;;  %v633_v27 = vld [vmem:[%s1138_s24 + $0xf8] sm:$0xff]  ;;  %885 = vst [vmem:[%s1149_s27 + $0xd8] sm:$0xff] %v757_v18  ;;  %v505_v29 = vmax.f32 %v249_v25, %v377_v26  ;;  %v634_v32 = vld [vmem:[%s1138_s24 + $0x100] sm:$0xff]  ;;  %v506_v34 = vmax.f32 %v250_v30, %v378_v31 }
  0x32   : > { %886 = vst [vmem:[%s1149_s27 + $0xe0] sm:$0xff] %v758_v23  ;;  %v251_v35 = vld [vmem:[%s1128_s18 + $0x108] sm:$0xff]  ;;  %887 = vst [vmem:[%s1149_s27 + $0xe8] sm:$0xff] %v759_v28  ;;  %v252_v40 = vld [vmem:[%s1128_s18 + $0x110] sm:$0xff] }
  0x33   : > { %v760_v33 = vmax.f32 %v504_v24, %v632_v22  ;;  %v379_v36 = vld [vmem:[%s1133_s21 + $0x108] sm:$0xff]  ;;  %v761_v38 = vmax.f32 %v505_v29, %v633_v27  ;;  %v380_v41 = vld [vmem:[%s1133_s21 + $0x110] sm:$0xff]  ;;  %v762_v43 = vmax.f32 %v506_v34, %v634_v32  ;;  %v253_v45 = vld [vmem:[%s1128_s18 + $0x118] sm:$0xff] }
  0x34   : > { %v635_v37 = vld [vmem:[%s1138_s24 + $0x108] sm:$0xff]  ;;  %v507_v39 = vmax.f32 %v251_v35, %v379_v36  ;;  %v636_v42 = vld [vmem:[%s1138_s24 + $0x110] sm:$0xff]  ;;  %v508_v44 = vmax.f32 %v252_v40, %v380_v41  ;;  %v381_v46 = vld [vmem:[%s1133_s21 + $0x118] sm:$0xff] }
  0x35   : > { %888 = vst [vmem:[%s1149_s27 + $0xf0] sm:$0xff] %v760_v33  ;;  %v637_v47 = vld [vmem:[%s1138_s24 + $0x118] sm:$0xff]  ;;  %889 = vst [vmem:[%s1149_s27 + $0xf8] sm:$0xff] %v761_v38  ;;  %v509_v49 = vmax.f32 %v253_v45, %v381_v46  ;;  %v254_v50 = vld [vmem:[%s1128_s18 + $0x120] sm:$0xff] }
  0x36   : > { %v763_v48 = vmax.f32 %v507_v39, %v635_v37  ;;  %v382_v51 = vld [vmem:[%s1133_s21 + $0x120] sm:$0xff]  ;;  %890 = vst [vmem:[%s1149_s27 + $0x100] sm:$0xff] %v762_v43  ;;  %v764_v53 = vmax.f32 %v508_v44, %v636_v42  ;;  %v255_v55 = vld [vmem:[%s1128_s18 + $0x128] sm:$0xff]  ;;  %v256_v60 = vld [vmem:[%s1128_s18 + $0x130] sm:$0xff] }
  0x37   : > { %v638_v52 = vld [vmem:[%s1138_s24 + $0x120] sm:$0xff]  ;;  %v510_v54 = vmax.f32 %v254_v50, %v382_v51  ;;  %v383_v56 = vld [vmem:[%s1133_s21 + $0x128] sm:$0xff]  ;;  %v765_v58 = vmax.f32 %v509_v49, %v637_v47  ;;  %v384_v61 = vld [vmem:[%s1133_s21 + $0x130] sm:$0xff] }
  0x38   : > { %v639_v57 = vld [vmem:[%s1138_s24 + $0x128] sm:$0xff]  ;;  %891 = vst [vmem:[%s1149_s27 + $0x108] sm:$0xff] %v763_v48  ;;  %v511_v59 = vmax.f32 %v255_v55, %v383_v56  ;;  %v640_v62 = vld [vmem:[%s1138_s24 + $0x130] sm:$0xff]  ;;  %892 = vst [vmem:[%s1149_s27 + $0x110] sm:$0xff] %v764_v53  ;;  %v512_v0 = vmax.f32 %v256_v60, %v384_v61 }
  0x39   : > { %v766_v63 = vmax.f32 %v510_v54, %v638_v52  ;;  %v257_v1 = vld [vmem:[%s1128_s18 + $0x138] sm:$0xff]  ;;  %893 = vst [vmem:[%s1149_s27 + $0x118] sm:$0xff] %v765_v58  ;;  %v258_v6 = vld [vmem:[%s1128_s18 + $0x140] sm:$0xff]  ;;  %v259_v11 = vld [vmem:[%s1128_s18 + $0x148] sm:$0xff] }
  0x3a   : > { %v385_v2 = vld [vmem:[%s1133_s21 + $0x138] sm:$0xff]  ;;  %v767_v4 = vmax.f32 %v511_v59, %v639_v57  ;;  %v386_v7 = vld [vmem:[%s1133_s21 + $0x140] sm:$0xff]  ;;  %v768_v9 = vmax.f32 %v512_v0, %v640_v62  ;;  %v387_v12 = vld [vmem:[%s1133_s21 + $0x148] sm:$0xff] }
  0x3b   : > { %v641_v3 = vld [vmem:[%s1138_s24 + $0x138] sm:$0xff]  ;;  %v513_v5 = vmax.f32 %v257_v1, %v385_v2  ;;  %v642_v8 = vld [vmem:[%s1138_s24 + $0x140] sm:$0xff]  ;;  %894 = vst [vmem:[%s1149_s27 + $0x120] sm:$0xff] %v766_v63  ;;  %v514_v10 = vmax.f32 %v258_v6, %v386_v7  ;;  %v643_v13 = vld [vmem:[%s1138_s24 + $0x148] sm:$0xff]  ;;  %v515_v15 = vmax.f32 %v259_v11, %v387_v12 }
  0x3c   : > { %895 = vst [vmem:[%s1149_s27 + $0x128] sm:$0xff] %v767_v4  ;;  %v260_v16 = vld [vmem:[%s1128_s18 + $0x150] sm:$0xff]  ;;  %896 = vst [vmem:[%s1149_s27 + $0x130] sm:$0xff] %v768_v9  ;;  %v261_v21 = vld [vmem:[%s1128_s18 + $0x158] sm:$0xff] }
  0x3d   : > { %v769_v14 = vmax.f32 %v513_v5, %v641_v3  ;;  %v388_v17 = vld [vmem:[%s1133_s21 + $0x150] sm:$0xff]  ;;  %v770_v19 = vmax.f32 %v514_v10, %v642_v8  ;;  %v389_v22 = vld [vmem:[%s1133_s21 + $0x158] sm:$0xff]  ;;  %v771_v24 = vmax.f32 %v515_v15, %v643_v13  ;;  %v262_v26 = vld [vmem:[%s1128_s18 + $0x160] sm:$0xff] }
  0x3e   : > { %v644_v18 = vld [vmem:[%s1138_s24 + $0x150] sm:$0xff]  ;;  %v516_v20 = vmax.f32 %v260_v16, %v388_v17  ;;  %v645_v23 = vld [vmem:[%s1138_s24 + $0x158] sm:$0xff]  ;;  %v517_v25 = vmax.f32 %v261_v21, %v389_v22  ;;  %v390_v27 = vld [vmem:[%s1133_s21 + $0x160] sm:$0xff] }
  0x3f   : > { %897 = vst [vmem:[%s1149_s27 + $0x138] sm:$0xff] %v769_v14  ;;  %v646_v28 = vld [vmem:[%s1138_s24 + $0x160] sm:$0xff]  ;;  %898 = vst [vmem:[%s1149_s27 + $0x140] sm:$0xff] %v770_v19  ;;  %v518_v30 = vmax.f32 %v262_v26, %v390_v27  ;;  %v263_v31 = vld [vmem:[%s1128_s18 + $0x168] sm:$0xff] }
  0x40   : > { %v772_v29 = vmax.f32 %v516_v20, %v644_v18  ;;  %v391_v32 = vld [vmem:[%s1133_s21 + $0x168] sm:$0xff]  ;;  %899 = vst [vmem:[%s1149_s27 + $0x148] sm:$0xff] %v771_v24  ;;  %v773_v34 = vmax.f32 %v517_v25, %v645_v23  ;;  %v264_v36 = vld [vmem:[%s1128_s18 + $0x170] sm:$0xff]  ;;  %v265_v41 = vld [vmem:[%s1128_s18 + $0x178] sm:$0xff] }
  0x41   : > { %v647_v33 = vld [vmem:[%s1138_s24 + $0x168] sm:$0xff]  ;;  %v519_v35 = vmax.f32 %v263_v31, %v391_v32  ;;  %v392_v37 = vld [vmem:[%s1133_s21 + $0x170] sm:$0xff]  ;;  %v774_v39 = vmax.f32 %v518_v30, %v646_v28  ;;  %v393_v42 = vld [vmem:[%s1133_s21 + $0x178] sm:$0xff] }
  0x42   : > { %v648_v38 = vld [vmem:[%s1138_s24 + $0x170] sm:$0xff]  ;;  %900 = vst [vmem:[%s1149_s27 + $0x150] sm:$0xff] %v772_v29  ;;  %v520_v40 = vmax.f32 %v264_v36, %v392_v37  ;;  %v649_v43 = vld [vmem:[%s1138_s24 + $0x178] sm:$0xff]  ;;  %901 = vst [vmem:[%s1149_s27 + $0x158] sm:$0xff] %v773_v34  ;;  %v521_v45 = vmax.f32 %v265_v41, %v393_v42 }
  0x43   : > { %v775_v44 = vmax.f32 %v519_v35, %v647_v33  ;;  %v266_v46 = vld [vmem:[%s1128_s18 + $0x180] sm:$0xff]  ;;  %902 = vst [vmem:[%s1149_s27 + $0x160] sm:$0xff] %v774_v39  ;;  %v267_v51 = vld [vmem:[%s1128_s18 + $0x188] sm:$0xff]  ;;  %v268_v56 = vld [vmem:[%s1128_s18 + $0x190] sm:$0xff] }
  0x44   : > { %v394_v47 = vld [vmem:[%s1133_s21 + $0x180] sm:$0xff]  ;;  %v776_v49 = vmax.f32 %v520_v40, %v648_v38  ;;  %v395_v52 = vld [vmem:[%s1133_s21 + $0x188] sm:$0xff]  ;;  %v777_v54 = vmax.f32 %v521_v45, %v649_v43  ;;  %v396_v57 = vld [vmem:[%s1133_s21 + $0x190] sm:$0xff] }
  0x45   : > { %v650_v48 = vld [vmem:[%s1138_s24 + $0x180] sm:$0xff]  ;;  %v522_v50 = vmax.f32 %v266_v46, %v394_v47  ;;  %v651_v53 = vld [vmem:[%s1138_s24 + $0x188] sm:$0xff]  ;;  %903 = vst [vmem:[%s1149_s27 + $0x168] sm:$0xff] %v775_v44  ;;  %v523_v55 = vmax.f32 %v267_v51, %v395_v52  ;;  %v652_v58 = vld [vmem:[%s1138_s24 + $0x190] sm:$0xff]  ;;  %v524_v60 = vmax.f32 %v268_v56, %v396_v57 }
  0x46   : > { %904 = vst [vmem:[%s1149_s27 + $0x170] sm:$0xff] %v776_v49  ;;  %v269_v61 = vld [vmem:[%s1128_s18 + $0x198] sm:$0xff]  ;;  %905 = vst [vmem:[%s1149_s27 + $0x178] sm:$0xff] %v777_v54  ;;  %v270_v2 = vld [vmem:[%s1128_s18 + $0x1a0] sm:$0xff] }
  0x47   : > { %v778_v59 = vmax.f32 %v522_v50, %v650_v48  ;;  %v397_v62 = vld [vmem:[%s1133_s21 + $0x198] sm:$0xff]  ;;  %v779_v0 = vmax.f32 %v523_v55, %v651_v53  ;;  %v398_v3 = vld [vmem:[%s1133_s21 + $0x1a0] sm:$0xff]  ;;  %v780_v5 = vmax.f32 %v524_v60, %v652_v58  ;;  %v271_v7 = vld [vmem:[%s1128_s18 + $0x1a8] sm:$0xff] }
  0x48   : > { %v653_v63 = vld [vmem:[%s1138_s24 + $0x198] sm:$0xff]  ;;  %v525_v1 = vmax.f32 %v269_v61, %v397_v62  ;;  %v654_v4 = vld [vmem:[%s1138_s24 + $0x1a0] sm:$0xff]  ;;  %v526_v6 = vmax.f32 %v270_v2, %v398_v3  ;;  %v399_v8 = vld [vmem:[%s1133_s21 + $0x1a8] sm:$0xff] }
  0x49   : > { %906 = vst [vmem:[%s1149_s27 + $0x180] sm:$0xff] %v778_v59  ;;  %v655_v9 = vld [vmem:[%s1138_s24 + $0x1a8] sm:$0xff]  ;;  %907 = vst [vmem:[%s1149_s27 + $0x188] sm:$0xff] %v779_v0  ;;  %v527_v11 = vmax.f32 %v271_v7, %v399_v8  ;;  %v272_v12 = vld [vmem:[%s1128_s18 + $0x1b0] sm:$0xff] }
  0x4a   : > { %v781_v10 = vmax.f32 %v525_v1, %v653_v63  ;;  %v400_v13 = vld [vmem:[%s1133_s21 + $0x1b0] sm:$0xff]  ;;  %908 = vst [vmem:[%s1149_s27 + $0x190] sm:$0xff] %v780_v5  ;;  %v782_v15 = vmax.f32 %v526_v6, %v654_v4  ;;  %v273_v17 = vld [vmem:[%s1128_s18 + $0x1b8] sm:$0xff]  ;;  %v274_v22 = vld [vmem:[%s1128_s18 + $0x1c0] sm:$0xff] }
  0x4b   : > { %v656_v14 = vld [vmem:[%s1138_s24 + $0x1b0] sm:$0xff]  ;;  %v528_v16 = vmax.f32 %v272_v12, %v400_v13  ;;  %v401_v18 = vld [vmem:[%s1133_s21 + $0x1b8] sm:$0xff]  ;;  %v783_v20 = vmax.f32 %v527_v11, %v655_v9  ;;  %v402_v23 = vld [vmem:[%s1133_s21 + $0x1c0] sm:$0xff] }
  0x4c   : > { %v657_v19 = vld [vmem:[%s1138_s24 + $0x1b8] sm:$0xff]  ;;  %909 = vst [vmem:[%s1149_s27 + $0x198] sm:$0xff] %v781_v10  ;;  %v529_v21 = vmax.f32 %v273_v17, %v401_v18  ;;  %v658_v24 = vld [vmem:[%s1138_s24 + $0x1c0] sm:$0xff]  ;;  %910 = vst [vmem:[%s1149_s27 + $0x1a0] sm:$0xff] %v782_v15  ;;  %v530_v26 = vmax.f32 %v274_v22, %v402_v23 }
  0x4d   : > { %v784_v25 = vmax.f32 %v528_v16, %v656_v14  ;;  %v275_v27 = vld [vmem:[%s1128_s18 + $0x1c8] sm:$0xff]  ;;  %911 = vst [vmem:[%s1149_s27 + $0x1a8] sm:$0xff] %v783_v20  ;;  %v276_v32 = vld [vmem:[%s1128_s18 + $0x1d0] sm:$0xff]  ;;  %v277_v37 = vld [vmem:[%s1128_s18 + $0x1d8] sm:$0xff] }
  0x4e   : > { %v403_v28 = vld [vmem:[%s1133_s21 + $0x1c8] sm:$0xff]  ;;  %v785_v30 = vmax.f32 %v529_v21, %v657_v19  ;;  %v404_v33 = vld [vmem:[%s1133_s21 + $0x1d0] sm:$0xff]  ;;  %v786_v35 = vmax.f32 %v530_v26, %v658_v24  ;;  %v405_v38 = vld [vmem:[%s1133_s21 + $0x1d8] sm:$0xff] }
  0x4f   : > { %v659_v29 = vld [vmem:[%s1138_s24 + $0x1c8] sm:$0xff]  ;;  %v531_v31 = vmax.f32 %v275_v27, %v403_v28  ;;  %v660_v34 = vld [vmem:[%s1138_s24 + $0x1d0] sm:$0xff]  ;;  %912 = vst [vmem:[%s1149_s27 + $0x1b0] sm:$0xff] %v784_v25  ;;  %v532_v36 = vmax.f32 %v276_v32, %v404_v33  ;;  %v661_v39 = vld [vmem:[%s1138_s24 + $0x1d8] sm:$0xff]  ;;  %v533_v41 = vmax.f32 %v277_v37, %v405_v38 }
  0x50   : > { %913 = vst [vmem:[%s1149_s27 + $0x1b8] sm:$0xff] %v785_v30  ;;  %v278_v42 = vld [vmem:[%s1128_s18 + $0x1e0] sm:$0xff]  ;;  %914 = vst [vmem:[%s1149_s27 + $0x1c0] sm:$0xff] %v786_v35  ;;  %v279_v47 = vld [vmem:[%s1128_s18 + $0x1e8] sm:$0xff] }
  0x51   : > { %v787_v40 = vmax.f32 %v531_v31, %v659_v29  ;;  %v406_v43 = vld [vmem:[%s1133_s21 + $0x1e0] sm:$0xff]  ;;  %v788_v45 = vmax.f32 %v532_v36, %v660_v34  ;;  %v407_v48 = vld [vmem:[%s1133_s21 + $0x1e8] sm:$0xff]  ;;  %v789_v50 = vmax.f32 %v533_v41, %v661_v39  ;;  %v280_v52 = vld [vmem:[%s1128_s18 + $0x1f0] sm:$0xff] }
  0x52   : > { %v662_v44 = vld [vmem:[%s1138_s24 + $0x1e0] sm:$0xff]  ;;  %v534_v46 = vmax.f32 %v278_v42, %v406_v43  ;;  %v663_v49 = vld [vmem:[%s1138_s24 + $0x1e8] sm:$0xff]  ;;  %v535_v51 = vmax.f32 %v279_v47, %v407_v48  ;;  %v408_v53 = vld [vmem:[%s1133_s21 + $0x1f0] sm:$0xff] }
  0x53   : > { %915 = vst [vmem:[%s1149_s27 + $0x1c8] sm:$0xff] %v787_v40  ;;  %v664_v54 = vld [vmem:[%s1138_s24 + $0x1f0] sm:$0xff]  ;;  %916 = vst [vmem:[%s1149_s27 + $0x1d0] sm:$0xff] %v788_v45  ;;  %v536_v56 = vmax.f32 %v280_v52, %v408_v53  ;;  %v281_v57 = vld [vmem:[%s1128_s18 + $0x1f8] sm:$0xff] }
  0x54   : > { %v790_v55 = vmax.f32 %v534_v46, %v662_v44  ;;  %v409_v58 = vld [vmem:[%s1133_s21 + $0x1f8] sm:$0xff]  ;;  %917 = vst [vmem:[%s1149_s27 + $0x1d8] sm:$0xff] %v789_v50  ;;  %v791_v60 = vmax.f32 %v535_v51, %v663_v49  ;;  %v282_v62 = vld [vmem:[%s1128_s18 + $0x200] sm:$0xff]  ;;  %v283_v3 = vld [vmem:[%s1128_s18 + $0x208] sm:$0xff] }
  0x55   : > { %v665_v59 = vld [vmem:[%s1138_s24 + $0x1f8] sm:$0xff]  ;;  %v537_v61 = vmax.f32 %v281_v57, %v409_v58  ;;  %v410_v63 = vld [vmem:[%s1133_s21 + $0x200] sm:$0xff]  ;;  %v792_v1 = vmax.f32 %v536_v56, %v664_v54  ;;  %v411_v4 = vld [vmem:[%s1133_s21 + $0x208] sm:$0xff] }
  0x56   : > { %v666_v0 = vld [vmem:[%s1138_s24 + $0x200] sm:$0xff]  ;;  %918 = vst [vmem:[%s1149_s27 + $0x1e0] sm:$0xff] %v790_v55  ;;  %v538_v2 = vmax.f32 %v282_v62, %v410_v63  ;;  %v667_v5 = vld [vmem:[%s1138_s24 + $0x208] sm:$0xff]  ;;  %919 = vst [vmem:[%s1149_s27 + $0x1e8] sm:$0xff] %v791_v60  ;;  %v539_v7 = vmax.f32 %v283_v3, %v411_v4 }
  0x57   : > { %v793_v6 = vmax.f32 %v537_v61, %v665_v59  ;;  %v284_v8 = vld [vmem:[%s1128_s18 + $0x210] sm:$0xff]  ;;  %920 = vst [vmem:[%s1149_s27 + $0x1f0] sm:$0xff] %v792_v1  ;;  %v285_v13 = vld [vmem:[%s1128_s18 + $0x218] sm:$0xff]  ;;  %v286_v18 = vld [vmem:[%s1128_s18 + $0x220] sm:$0xff] }
  0x58   : > { %v412_v9 = vld [vmem:[%s1133_s21 + $0x210] sm:$0xff]  ;;  %v794_v11 = vmax.f32 %v538_v2, %v666_v0  ;;  %v413_v14 = vld [vmem:[%s1133_s21 + $0x218] sm:$0xff]  ;;  %v795_v16 = vmax.f32 %v539_v7, %v667_v5  ;;  %v414_v19 = vld [vmem:[%s1133_s21 + $0x220] sm:$0xff] }
  0x59   : > { %v668_v10 = vld [vmem:[%s1138_s24 + $0x210] sm:$0xff]  ;;  %v540_v12 = vmax.f32 %v284_v8, %v412_v9  ;;  %v669_v15 = vld [vmem:[%s1138_s24 + $0x218] sm:$0xff]  ;;  %921 = vst [vmem:[%s1149_s27 + $0x1f8] sm:$0xff] %v793_v6  ;;  %v541_v17 = vmax.f32 %v285_v13, %v413_v14  ;;  %v670_v20 = vld [vmem:[%s1138_s24 + $0x220] sm:$0xff]  ;;  %v542_v22 = vmax.f32 %v286_v18, %v414_v19 }
  0x5a   : > { %922 = vst [vmem:[%s1149_s27 + $0x200] sm:$0xff] %v794_v11  ;;  %v287_v23 = vld [vmem:[%s1128_s18 + $0x228] sm:$0xff]  ;;  %923 = vst [vmem:[%s1149_s27 + $0x208] sm:$0xff] %v795_v16  ;;  %v288_v28 = vld [vmem:[%s1128_s18 + $0x230] sm:$0xff] }
  0x5b   : > { %v796_v21 = vmax.f32 %v540_v12, %v668_v10  ;;  %v415_v24 = vld [vmem:[%s1133_s21 + $0x228] sm:$0xff]  ;;  %v797_v26 = vmax.f32 %v541_v17, %v669_v15  ;;  %v416_v29 = vld [vmem:[%s1133_s21 + $0x230] sm:$0xff]  ;;  %v798_v31 = vmax.f32 %v542_v22, %v670_v20  ;;  %v289_v33 = vld [vmem:[%s1128_s18 + $0x238] sm:$0xff] }
  0x5c   : > { %v671_v25 = vld [vmem:[%s1138_s24 + $0x228] sm:$0xff]  ;;  %v543_v27 = vmax.f32 %v287_v23, %v415_v24  ;;  %v672_v30 = vld [vmem:[%s1138_s24 + $0x230] sm:$0xff]  ;;  %v544_v32 = vmax.f32 %v288_v28, %v416_v29  ;;  %v417_v34 = vld [vmem:[%s1133_s21 + $0x238] sm:$0xff] }
  0x5d   : > { %924 = vst [vmem:[%s1149_s27 + $0x210] sm:$0xff] %v796_v21  ;;  %v673_v35 = vld [vmem:[%s1138_s24 + $0x238] sm:$0xff]  ;;  %925 = vst [vmem:[%s1149_s27 + $0x218] sm:$0xff] %v797_v26  ;;  %v545_v37 = vmax.f32 %v289_v33, %v417_v34  ;;  %v290_v38 = vld [vmem:[%s1128_s18 + $0x240] sm:$0xff] }
  0x5e   : > { %v799_v36 = vmax.f32 %v543_v27, %v671_v25  ;;  %v418_v39 = vld [vmem:[%s1133_s21 + $0x240] sm:$0xff]  ;;  %926 = vst [vmem:[%s1149_s27 + $0x220] sm:$0xff] %v798_v31  ;;  %v800_v41 = vmax.f32 %v544_v32, %v672_v30  ;;  %v291_v43 = vld [vmem:[%s1128_s18 + $0x248] sm:$0xff]  ;;  %v292_v48 = vld [vmem:[%s1128_s18 + $0x250] sm:$0xff] }
  0x5f   : > { %v674_v40 = vld [vmem:[%s1138_s24 + $0x240] sm:$0xff]  ;;  %v546_v42 = vmax.f32 %v290_v38, %v418_v39  ;;  %v419_v44 = vld [vmem:[%s1133_s21 + $0x248] sm:$0xff]  ;;  %v801_v46 = vmax.f32 %v545_v37, %v673_v35  ;;  %v420_v49 = vld [vmem:[%s1133_s21 + $0x250] sm:$0xff] }
  0x60   : > { %v675_v45 = vld [vmem:[%s1138_s24 + $0x248] sm:$0xff]  ;;  %927 = vst [vmem:[%s1149_s27 + $0x228] sm:$0xff] %v799_v36  ;;  %v547_v47 = vmax.f32 %v291_v43, %v419_v44  ;;  %v676_v50 = vld [vmem:[%s1138_s24 + $0x250] sm:$0xff]  ;;  %928 = vst [vmem:[%s1149_s27 + $0x230] sm:$0xff] %v800_v41  ;;  %v548_v52 = vmax.f32 %v292_v48, %v420_v49 }
  0x61   : > { %v802_v51 = vmax.f32 %v546_v42, %v674_v40  ;;  %v293_v53 = vld [vmem:[%s1128_s18 + $0x258] sm:$0xff]  ;;  %929 = vst [vmem:[%s1149_s27 + $0x238] sm:$0xff] %v801_v46  ;;  %v294_v58 = vld [vmem:[%s1128_s18 + $0x260] sm:$0xff]  ;;  %v295_v63 = vld [vmem:[%s1128_s18 + $0x268] sm:$0xff] }
  0x62   : > { %v421_v54 = vld [vmem:[%s1133_s21 + $0x258] sm:$0xff]  ;;  %v803_v56 = vmax.f32 %v547_v47, %v675_v45  ;;  %v422_v59 = vld [vmem:[%s1133_s21 + $0x260] sm:$0xff]  ;;  %v804_v61 = vmax.f32 %v548_v52, %v676_v50  ;;  %v423_v0 = vld [vmem:[%s1133_s21 + $0x268] sm:$0xff] }
  0x63   : > { %v677_v55 = vld [vmem:[%s1138_s24 + $0x258] sm:$0xff]  ;;  %v549_v57 = vmax.f32 %v293_v53, %v421_v54  ;;  %v678_v60 = vld [vmem:[%s1138_s24 + $0x260] sm:$0xff]  ;;  %930 = vst [vmem:[%s1149_s27 + $0x240] sm:$0xff] %v802_v51  ;;  %v550_v62 = vmax.f32 %v294_v58, %v422_v59  ;;  %v679_v1 = vld [vmem:[%s1138_s24 + $0x268] sm:$0xff]  ;;  %v551_v3 = vmax.f32 %v295_v63, %v423_v0 }
  0x64   : > { %931 = vst [vmem:[%s1149_s27 + $0x248] sm:$0xff] %v803_v56  ;;  %v296_v4 = vld [vmem:[%s1128_s18 + $0x270] sm:$0xff]  ;;  %932 = vst [vmem:[%s1149_s27 + $0x250] sm:$0xff] %v804_v61  ;;  %v297_v9 = vld [vmem:[%s1128_s18 + $0x278] sm:$0xff] }
  0x65   : > { %v805_v2 = vmax.f32 %v549_v57, %v677_v55  ;;  %v424_v5 = vld [vmem:[%s1133_s21 + $0x270] sm:$0xff]  ;;  %v806_v7 = vmax.f32 %v550_v62, %v678_v60  ;;  %v425_v10 = vld [vmem:[%s1133_s21 + $0x278] sm:$0xff]  ;;  %v807_v12 = vmax.f32 %v551_v3, %v679_v1  ;;  %v298_v14 = vld [vmem:[%s1128_s18 + $0x280] sm:$0xff] }
  0x66   : > { %v680_v6 = vld [vmem:[%s1138_s24 + $0x270] sm:$0xff]  ;;  %v552_v8 = vmax.f32 %v296_v4, %v424_v5  ;;  %v681_v11 = vld [vmem:[%s1138_s24 + $0x278] sm:$0xff]  ;;  %v553_v13 = vmax.f32 %v297_v9, %v425_v10  ;;  %v426_v15 = vld [vmem:[%s1133_s21 + $0x280] sm:$0xff] }
  0x67   : > { %933 = vst [vmem:[%s1149_s27 + $0x258] sm:$0xff] %v805_v2  ;;  %v682_v16 = vld [vmem:[%s1138_s24 + $0x280] sm:$0xff]  ;;  %934 = vst [vmem:[%s1149_s27 + $0x260] sm:$0xff] %v806_v7  ;;  %v554_v18 = vmax.f32 %v298_v14, %v426_v15  ;;  %v299_v19 = vld [vmem:[%s1128_s18 + $0x288] sm:$0xff] }
  0x68   : > { %v808_v17 = vmax.f32 %v552_v8, %v680_v6  ;;  %v427_v20 = vld [vmem:[%s1133_s21 + $0x288] sm:$0xff]  ;;  %935 = vst [vmem:[%s1149_s27 + $0x268] sm:$0xff] %v807_v12  ;;  %v809_v22 = vmax.f32 %v553_v13, %v681_v11  ;;  %v300_v24 = vld [vmem:[%s1128_s18 + $0x290] sm:$0xff]  ;;  %v301_v29 = vld [vmem:[%s1128_s18 + $0x298] sm:$0xff] }
  0x69   : > { %v683_v21 = vld [vmem:[%s1138_s24 + $0x288] sm:$0xff]  ;;  %v555_v23 = vmax.f32 %v299_v19, %v427_v20  ;;  %v428_v25 = vld [vmem:[%s1133_s21 + $0x290] sm:$0xff]  ;;  %v810_v27 = vmax.f32 %v554_v18, %v682_v16  ;;  %v429_v30 = vld [vmem:[%s1133_s21 + $0x298] sm:$0xff] }
  0x6a   : > { %v684_v26 = vld [vmem:[%s1138_s24 + $0x290] sm:$0xff]  ;;  %936 = vst [vmem:[%s1149_s27 + $0x270] sm:$0xff] %v808_v17  ;;  %v556_v28 = vmax.f32 %v300_v24, %v428_v25  ;;  %v685_v31 = vld [vmem:[%s1138_s24 + $0x298] sm:$0xff]  ;;  %937 = vst [vmem:[%s1149_s27 + $0x278] sm:$0xff] %v809_v22  ;;  %v557_v33 = vmax.f32 %v301_v29, %v429_v30 }
  0x6b   : > { %v811_v32 = vmax.f32 %v555_v23, %v683_v21  ;;  %v302_v34 = vld [vmem:[%s1128_s18 + $0x2a0] sm:$0xff]  ;;  %938 = vst [vmem:[%s1149_s27 + $0x280] sm:$0xff] %v810_v27  ;;  %v303_v39 = vld [vmem:[%s1128_s18 + $0x2a8] sm:$0xff]  ;;  %v304_v44 = vld [vmem:[%s1128_s18 + $0x2b0] sm:$0xff] }
  0x6c   : > { %v430_v35 = vld [vmem:[%s1133_s21 + $0x2a0] sm:$0xff]  ;;  %v812_v37 = vmax.f32 %v556_v28, %v684_v26  ;;  %v431_v40 = vld [vmem:[%s1133_s21 + $0x2a8] sm:$0xff]  ;;  %v813_v42 = vmax.f32 %v557_v33, %v685_v31  ;;  %v432_v45 = vld [vmem:[%s1133_s21 + $0x2b0] sm:$0xff] }
  0x6d   : > { %v686_v36 = vld [vmem:[%s1138_s24 + $0x2a0] sm:$0xff]  ;;  %v558_v38 = vmax.f32 %v302_v34, %v430_v35  ;;  %v687_v41 = vld [vmem:[%s1138_s24 + $0x2a8] sm:$0xff]  ;;  %939 = vst [vmem:[%s1149_s27 + $0x288] sm:$0xff] %v811_v32  ;;  %v559_v43 = vmax.f32 %v303_v39, %v431_v40  ;;  %v688_v46 = vld [vmem:[%s1138_s24 + $0x2b0] sm:$0xff]  ;;  %v560_v48 = vmax.f32 %v304_v44, %v432_v45 }
  0x6e   : > { %940 = vst [vmem:[%s1149_s27 + $0x290] sm:$0xff] %v812_v37  ;;  %v305_v49 = vld [vmem:[%s1128_s18 + $0x2b8] sm:$0xff]  ;;  %941 = vst [vmem:[%s1149_s27 + $0x298] sm:$0xff] %v813_v42  ;;  %v306_v54 = vld [vmem:[%s1128_s18 + $0x2c0] sm:$0xff] }
  0x6f   : > { %v814_v47 = vmax.f32 %v558_v38, %v686_v36  ;;  %v433_v50 = vld [vmem:[%s1133_s21 + $0x2b8] sm:$0xff]  ;;  %v815_v52 = vmax.f32 %v559_v43, %v687_v41  ;;  %v434_v55 = vld [vmem:[%s1133_s21 + $0x2c0] sm:$0xff]  ;;  %v816_v57 = vmax.f32 %v560_v48, %v688_v46  ;;  %v307_v59 = vld [vmem:[%s1128_s18 + $0x2c8] sm:$0xff] }
  0x70   : > { %v689_v51 = vld [vmem:[%s1138_s24 + $0x2b8] sm:$0xff]  ;;  %v561_v53 = vmax.f32 %v305_v49, %v433_v50  ;;  %v690_v56 = vld [vmem:[%s1138_s24 + $0x2c0] sm:$0xff]  ;;  %v562_v58 = vmax.f32 %v306_v54, %v434_v55  ;;  %v435_v60 = vld [vmem:[%s1133_s21 + $0x2c8] sm:$0xff] }
  0x71   : > { %942 = vst [vmem:[%s1149_s27 + $0x2a0] sm:$0xff] %v814_v47  ;;  %v691_v61 = vld [vmem:[%s1138_s24 + $0x2c8] sm:$0xff]  ;;  %943 = vst [vmem:[%s1149_s27 + $0x2a8] sm:$0xff] %v815_v52  ;;  %v563_v63 = vmax.f32 %v307_v59, %v435_v60  ;;  %v308_v0 = vld [vmem:[%s1128_s18 + $0x2d0] sm:$0xff] }
  0x72   : > { %v817_v62 = vmax.f32 %v561_v53, %v689_v51  ;;  %v436_v1 = vld [vmem:[%s1133_s21 + $0x2d0] sm:$0xff]  ;;  %944 = vst [vmem:[%s1149_s27 + $0x2b0] sm:$0xff] %v816_v57  ;;  %v818_v3 = vmax.f32 %v562_v58, %v690_v56  ;;  %v309_v5 = vld [vmem:[%s1128_s18 + $0x2d8] sm:$0xff]  ;;  %v310_v10 = vld [vmem:[%s1128_s18 + $0x2e0] sm:$0xff] }
  0x73   : > { %v692_v2 = vld [vmem:[%s1138_s24 + $0x2d0] sm:$0xff]  ;;  %v564_v4 = vmax.f32 %v308_v0, %v436_v1  ;;  %v437_v6 = vld [vmem:[%s1133_s21 + $0x2d8] sm:$0xff]  ;;  %v819_v8 = vmax.f32 %v563_v63, %v691_v61  ;;  %v438_v11 = vld [vmem:[%s1133_s21 + $0x2e0] sm:$0xff] }
  0x74   : > { %v693_v7 = vld [vmem:[%s1138_s24 + $0x2d8] sm:$0xff]  ;;  %945 = vst [vmem:[%s1149_s27 + $0x2b8] sm:$0xff] %v817_v62  ;;  %v565_v9 = vmax.f32 %v309_v5, %v437_v6  ;;  %v694_v12 = vld [vmem:[%s1138_s24 + $0x2e0] sm:$0xff]  ;;  %946 = vst [vmem:[%s1149_s27 + $0x2c0] sm:$0xff] %v818_v3  ;;  %v566_v14 = vmax.f32 %v310_v10, %v438_v11 }
  0x75   : > { %v820_v13 = vmax.f32 %v564_v4, %v692_v2  ;;  %v311_v15 = vld [vmem:[%s1128_s18 + $0x2e8] sm:$0xff]  ;;  %947 = vst [vmem:[%s1149_s27 + $0x2c8] sm:$0xff] %v819_v8  ;;  %v312_v20 = vld [vmem:[%s1128_s18 + $0x2f0] sm:$0xff]  ;;  %v313_v25 = vld [vmem:[%s1128_s18 + $0x2f8] sm:$0xff] }
  0x76   : > { %v439_v16 = vld [vmem:[%s1133_s21 + $0x2e8] sm:$0xff]  ;;  %v821_v18 = vmax.f32 %v565_v9, %v693_v7  ;;  %v440_v21 = vld [vmem:[%s1133_s21 + $0x2f0] sm:$0xff]  ;;  %v822_v23 = vmax.f32 %v566_v14, %v694_v12  ;;  %v441_v26 = vld [vmem:[%s1133_s21 + $0x2f8] sm:$0xff] }
  0x77   : > { %v695_v17 = vld [vmem:[%s1138_s24 + $0x2e8] sm:$0xff]  ;;  %v567_v19 = vmax.f32 %v311_v15, %v439_v16  ;;  %v696_v22 = vld [vmem:[%s1138_s24 + $0x2f0] sm:$0xff]  ;;  %948 = vst [vmem:[%s1149_s27 + $0x2d0] sm:$0xff] %v820_v13  ;;  %v568_v24 = vmax.f32 %v312_v20, %v440_v21  ;;  %v697_v27 = vld [vmem:[%s1138_s24 + $0x2f8] sm:$0xff]  ;;  %v569_v29 = vmax.f32 %v313_v25, %v441_v26 }
  0x78   : > { %949 = vst [vmem:[%s1149_s27 + $0x2d8] sm:$0xff] %v821_v18  ;;  %v314_v30 = vld [vmem:[%s1128_s18 + $0x300] sm:$0xff]  ;;  %950 = vst [vmem:[%s1149_s27 + $0x2e0] sm:$0xff] %v822_v23  ;;  %v315_v35 = vld [vmem:[%s1128_s18 + $0x308] sm:$0xff] }
  0x79   : > { %v823_v28 = vmax.f32 %v567_v19, %v695_v17  ;;  %v442_v31 = vld [vmem:[%s1133_s21 + $0x300] sm:$0xff]  ;;  %v824_v33 = vmax.f32 %v568_v24, %v696_v22  ;;  %v443_v36 = vld [vmem:[%s1133_s21 + $0x308] sm:$0xff]  ;;  %v825_v38 = vmax.f32 %v569_v29, %v697_v27  ;;  %v316_v40 = vld [vmem:[%s1128_s18 + $0x310] sm:$0xff] }
  0x7a   : > { %v698_v32 = vld [vmem:[%s1138_s24 + $0x300] sm:$0xff]  ;;  %v570_v34 = vmax.f32 %v314_v30, %v442_v31  ;;  %v699_v37 = vld [vmem:[%s1138_s24 + $0x308] sm:$0xff]  ;;  %v571_v39 = vmax.f32 %v315_v35, %v443_v36  ;;  %v444_v41 = vld [vmem:[%s1133_s21 + $0x310] sm:$0xff] }
  0x7b   : > { %951 = vst [vmem:[%s1149_s27 + $0x2e8] sm:$0xff] %v823_v28  ;;  %v700_v42 = vld [vmem:[%s1138_s24 + $0x310] sm:$0xff]  ;;  %952 = vst [vmem:[%s1149_s27 + $0x2f0] sm:$0xff] %v824_v33  ;;  %v572_v44 = vmax.f32 %v316_v40, %v444_v41  ;;  %v317_v45 = vld [vmem:[%s1128_s18 + $0x318] sm:$0xff] }
  0x7c   : > { %v826_v43 = vmax.f32 %v570_v34, %v698_v32  ;;  %v445_v46 = vld [vmem:[%s1133_s21 + $0x318] sm:$0xff]  ;;  %953 = vst [vmem:[%s1149_s27 + $0x2f8] sm:$0xff] %v825_v38  ;;  %v827_v48 = vmax.f32 %v571_v39, %v699_v37  ;;  %v318_v50 = vld [vmem:[%s1128_s18 + $0x320] sm:$0xff]  ;;  %v319_v55 = vld [vmem:[%s1128_s18 + $0x328] sm:$0xff] }
  0x7d   : > { %v701_v47 = vld [vmem:[%s1138_s24 + $0x318] sm:$0xff]  ;;  %v573_v49 = vmax.f32 %v317_v45, %v445_v46  ;;  %v446_v51 = vld [vmem:[%s1133_s21 + $0x320] sm:$0xff]  ;;  %v828_v53 = vmax.f32 %v572_v44, %v700_v42  ;;  %v447_v56 = vld [vmem:[%s1133_s21 + $0x328] sm:$0xff] }
  0x7e   : > { %v702_v52 = vld [vmem:[%s1138_s24 + $0x320] sm:$0xff]  ;;  %954 = vst [vmem:[%s1149_s27 + $0x300] sm:$0xff] %v826_v43  ;;  %v574_v54 = vmax.f32 %v318_v50, %v446_v51  ;;  %v703_v57 = vld [vmem:[%s1138_s24 + $0x328] sm:$0xff]  ;;  %955 = vst [vmem:[%s1149_s27 + $0x308] sm:$0xff] %v827_v48  ;;  %v575_v59 = vmax.f32 %v319_v55, %v447_v56 }
  0x7f   : > { %v829_v58 = vmax.f32 %v573_v49, %v701_v47  ;;  %v320_v60 = vld [vmem:[%s1128_s18 + $0x330] sm:$0xff]  ;;  %956 = vst [vmem:[%s1149_s27 + $0x310] sm:$0xff] %v828_v53  ;;  %v321_v1 = vld [vmem:[%s1128_s18 + $0x338] sm:$0xff]  ;;  %v322_v6 = vld [vmem:[%s1128_s18 + $0x340] sm:$0xff] }
  0x80   : > { %v448_v61 = vld [vmem:[%s1133_s21 + $0x330] sm:$0xff]  ;;  %v830_v63 = vmax.f32 %v574_v54, %v702_v52  ;;  %v449_v2 = vld [vmem:[%s1133_s21 + $0x338] sm:$0xff]  ;;  %v831_v4 = vmax.f32 %v575_v59, %v703_v57  ;;  %v450_v7 = vld [vmem:[%s1133_s21 + $0x340] sm:$0xff] }
  0x81   : > { %v704_v62 = vld [vmem:[%s1138_s24 + $0x330] sm:$0xff]  ;;  %v576_v0 = vmax.f32 %v320_v60, %v448_v61  ;;  %v705_v3 = vld [vmem:[%s1138_s24 + $0x338] sm:$0xff]  ;;  %957 = vst [vmem:[%s1149_s27 + $0x318] sm:$0xff] %v829_v58  ;;  %v577_v5 = vmax.f32 %v321_v1, %v449_v2  ;;  %v706_v8 = vld [vmem:[%s1138_s24 + $0x340] sm:$0xff]  ;;  %v578_v10 = vmax.f32 %v322_v6, %v450_v7 }
  0x82   : > { %958 = vst [vmem:[%s1149_s27 + $0x320] sm:$0xff] %v830_v63  ;;  %v323_v11 = vld [vmem:[%s1128_s18 + $0x348] sm:$0xff]  ;;  %959 = vst [vmem:[%s1149_s27 + $0x328] sm:$0xff] %v831_v4  ;;  %v324_v16 = vld [vmem:[%s1128_s18 + $0x350] sm:$0xff] }
  0x83   : > { %v832_v9 = vmax.f32 %v576_v0, %v704_v62  ;;  %v451_v12 = vld [vmem:[%s1133_s21 + $0x348] sm:$0xff]  ;;  %v833_v14 = vmax.f32 %v577_v5, %v705_v3  ;;  %v452_v17 = vld [vmem:[%s1133_s21 + $0x350] sm:$0xff]  ;;  %v834_v19 = vmax.f32 %v578_v10, %v706_v8  ;;  %v325_v21 = vld [vmem:[%s1128_s18 + $0x358] sm:$0xff] }
  0x84   : > { %v707_v13 = vld [vmem:[%s1138_s24 + $0x348] sm:$0xff]  ;;  %v579_v15 = vmax.f32 %v323_v11, %v451_v12  ;;  %v708_v18 = vld [vmem:[%s1138_s24 + $0x350] sm:$0xff]  ;;  %v580_v20 = vmax.f32 %v324_v16, %v452_v17  ;;  %v453_v22 = vld [vmem:[%s1133_s21 + $0x358] sm:$0xff] }
  0x85   : > { %960 = vst [vmem:[%s1149_s27 + $0x330] sm:$0xff] %v832_v9  ;;  %v709_v23 = vld [vmem:[%s1138_s24 + $0x358] sm:$0xff]  ;;  %961 = vst [vmem:[%s1149_s27 + $0x338] sm:$0xff] %v833_v14  ;;  %v581_v25 = vmax.f32 %v325_v21, %v453_v22  ;;  %v326_v26 = vld [vmem:[%s1128_s18 + $0x360] sm:$0xff] }
  0x86   : > { %v835_v24 = vmax.f32 %v579_v15, %v707_v13  ;;  %v454_v27 = vld [vmem:[%s1133_s21 + $0x360] sm:$0xff]  ;;  %962 = vst [vmem:[%s1149_s27 + $0x340] sm:$0xff] %v834_v19  ;;  %v836_v29 = vmax.f32 %v580_v20, %v708_v18  ;;  %v327_v31 = vld [vmem:[%s1128_s18 + $0x368] sm:$0xff]  ;;  %v328_v36 = vld [vmem:[%s1128_s18 + $0x370] sm:$0xff] }
  0x87   : > { %v710_v28 = vld [vmem:[%s1138_s24 + $0x360] sm:$0xff]  ;;  %v582_v30 = vmax.f32 %v326_v26, %v454_v27  ;;  %v455_v32 = vld [vmem:[%s1133_s21 + $0x368] sm:$0xff]  ;;  %v837_v34 = vmax.f32 %v581_v25, %v709_v23  ;;  %v456_v37 = vld [vmem:[%s1133_s21 + $0x370] sm:$0xff] }
  0x88   : > { %v711_v33 = vld [vmem:[%s1138_s24 + $0x368] sm:$0xff]  ;;  %963 = vst [vmem:[%s1149_s27 + $0x348] sm:$0xff] %v835_v24  ;;  %v583_v35 = vmax.f32 %v327_v31, %v455_v32  ;;  %v712_v38 = vld [vmem:[%s1138_s24 + $0x370] sm:$0xff]  ;;  %964 = vst [vmem:[%s1149_s27 + $0x350] sm:$0xff] %v836_v29  ;;  %v584_v40 = vmax.f32 %v328_v36, %v456_v37 }
  0x89   : > { %v838_v39 = vmax.f32 %v582_v30, %v710_v28  ;;  %v329_v41 = vld [vmem:[%s1128_s18 + $0x378] sm:$0xff]  ;;  %965 = vst [vmem:[%s1149_s27 + $0x358] sm:$0xff] %v837_v34  ;;  %v330_v46 = vld [vmem:[%s1128_s18 + $0x380] sm:$0xff]  ;;  %v331_v51 = vld [vmem:[%s1128_s18 + $0x388] sm:$0xff] }
  0x8a   : > { %v457_v42 = vld [vmem:[%s1133_s21 + $0x378] sm:$0xff]  ;;  %v839_v44 = vmax.f32 %v583_v35, %v711_v33  ;;  %v458_v47 = vld [vmem:[%s1133_s21 + $0x380] sm:$0xff]  ;;  %v840_v49 = vmax.f32 %v584_v40, %v712_v38  ;;  %v459_v52 = vld [vmem:[%s1133_s21 + $0x388] sm:$0xff] }
  0x8b   : > { %v713_v43 = vld [vmem:[%s1138_s24 + $0x378] sm:$0xff]  ;;  %v585_v45 = vmax.f32 %v329_v41, %v457_v42  ;;  %v714_v48 = vld [vmem:[%s1138_s24 + $0x380] sm:$0xff]  ;;  %966 = vst [vmem:[%s1149_s27 + $0x360] sm:$0xff] %v838_v39  ;;  %v586_v50 = vmax.f32 %v330_v46, %v458_v47  ;;  %v715_v53 = vld [vmem:[%s1138_s24 + $0x388] sm:$0xff]  ;;  %v587_v55 = vmax.f32 %v331_v51, %v459_v52 }
  0x8c   : > { %967 = vst [vmem:[%s1149_s27 + $0x368] sm:$0xff] %v839_v44  ;;  %v332_v56 = vld [vmem:[%s1128_s18 + $0x390] sm:$0xff]  ;;  %968 = vst [vmem:[%s1149_s27 + $0x370] sm:$0xff] %v840_v49  ;;  %v333_v61 = vld [vmem:[%s1128_s18 + $0x398] sm:$0xff] }
  0x8d   : > { %v841_v54 = vmax.f32 %v585_v45, %v713_v43  ;;  %v460_v57 = vld [vmem:[%s1133_s21 + $0x390] sm:$0xff]  ;;  %v842_v59 = vmax.f32 %v586_v50, %v714_v48  ;;  %v461_v62 = vld [vmem:[%s1133_s21 + $0x398] sm:$0xff]  ;;  %v843_v0 = vmax.f32 %v587_v55, %v715_v53  ;;  %v334_v2 = vld [vmem:[%s1128_s18 + $0x3a0] sm:$0xff] }
  0x8e   : > { %v716_v58 = vld [vmem:[%s1138_s24 + $0x390] sm:$0xff]  ;;  %v588_v60 = vmax.f32 %v332_v56, %v460_v57  ;;  %v717_v63 = vld [vmem:[%s1138_s24 + $0x398] sm:$0xff]  ;;  %v589_v1 = vmax.f32 %v333_v61, %v461_v62  ;;  %v462_v3 = vld [vmem:[%s1133_s21 + $0x3a0] sm:$0xff] }
  0x8f   : > { %969 = vst [vmem:[%s1149_s27 + $0x378] sm:$0xff] %v841_v54  ;;  %v718_v4 = vld [vmem:[%s1138_s24 + $0x3a0] sm:$0xff]  ;;  %970 = vst [vmem:[%s1149_s27 + $0x380] sm:$0xff] %v842_v59  ;;  %v590_v6 = vmax.f32 %v334_v2, %v462_v3  ;;  %v335_v7 = vld [vmem:[%s1128_s18 + $0x3a8] sm:$0xff] }
  0x90   : > { %v844_v5 = vmax.f32 %v588_v60, %v716_v58  ;;  %v463_v8 = vld [vmem:[%s1133_s21 + $0x3a8] sm:$0xff]  ;;  %971 = vst [vmem:[%s1149_s27 + $0x388] sm:$0xff] %v843_v0  ;;  %v845_v10 = vmax.f32 %v589_v1, %v717_v63  ;;  %v336_v12 = vld [vmem:[%s1128_s18 + $0x3b0] sm:$0xff]  ;;  %v337_v17 = vld [vmem:[%s1128_s18 + $0x3b8] sm:$0xff] }
  0x91   : > { %v719_v9 = vld [vmem:[%s1138_s24 + $0x3a8] sm:$0xff]  ;;  %v591_v11 = vmax.f32 %v335_v7, %v463_v8  ;;  %v464_v13 = vld [vmem:[%s1133_s21 + $0x3b0] sm:$0xff]  ;;  %v846_v15 = vmax.f32 %v590_v6, %v718_v4  ;;  %v465_v18 = vld [vmem:[%s1133_s21 + $0x3b8] sm:$0xff] }
  0x92   : > { %v720_v14 = vld [vmem:[%s1138_s24 + $0x3b0] sm:$0xff]  ;;  %972 = vst [vmem:[%s1149_s27 + $0x390] sm:$0xff] %v844_v5  ;;  %v592_v16 = vmax.f32 %v336_v12, %v464_v13  ;;  %v721_v19 = vld [vmem:[%s1138_s24 + $0x3b8] sm:$0xff]  ;;  %973 = vst [vmem:[%s1149_s27 + $0x398] sm:$0xff] %v845_v10  ;;  %v593_v21 = vmax.f32 %v337_v17, %v465_v18 }
  0x93   : > { %v847_v20 = vmax.f32 %v591_v11, %v719_v9  ;;  %v338_v22 = vld [vmem:[%s1128_s18 + $0x3c0] sm:$0xff]  ;;  %974 = vst [vmem:[%s1149_s27 + $0x3a0] sm:$0xff] %v846_v15  ;;  %v339_v27 = vld [vmem:[%s1128_s18 + $0x3c8] sm:$0xff]  ;;  %v340_v32 = vld [vmem:[%s1128_s18 + $0x3d0] sm:$0xff] }
  0x94   : > { %v466_v23 = vld [vmem:[%s1133_s21 + $0x3c0] sm:$0xff]  ;;  %v848_v25 = vmax.f32 %v592_v16, %v720_v14  ;;  %v467_v28 = vld [vmem:[%s1133_s21 + $0x3c8] sm:$0xff]  ;;  %v849_v30 = vmax.f32 %v593_v21, %v721_v19  ;;  %v468_v33 = vld [vmem:[%s1133_s21 + $0x3d0] sm:$0xff] }
  0x95   : > { %v722_v24 = vld [vmem:[%s1138_s24 + $0x3c0] sm:$0xff]  ;;  %v594_v26 = vmax.f32 %v338_v22, %v466_v23  ;;  %v723_v29 = vld [vmem:[%s1138_s24 + $0x3c8] sm:$0xff]  ;;  %975 = vst [vmem:[%s1149_s27 + $0x3a8] sm:$0xff] %v847_v20  ;;  %v595_v31 = vmax.f32 %v339_v27, %v467_v28  ;;  %v724_v34 = vld [vmem:[%s1138_s24 + $0x3d0] sm:$0xff]  ;;  %v596_v36 = vmax.f32 %v340_v32, %v468_v33 }
  0x96   : > { %976 = vst [vmem:[%s1149_s27 + $0x3b0] sm:$0xff] %v848_v25  ;;  %v341_v37 = vld [vmem:[%s1128_s18 + $0x3d8] sm:$0xff]  ;;  %977 = vst [vmem:[%s1149_s27 + $0x3b8] sm:$0xff] %v849_v30  ;;  %v342_v42 = vld [vmem:[%s1128_s18 + $0x3e0] sm:$0xff] }
  0x97   : > { %v850_v35 = vmax.f32 %v594_v26, %v722_v24  ;;  %v469_v38 = vld [vmem:[%s1133_s21 + $0x3d8] sm:$0xff]  ;;  %v851_v40 = vmax.f32 %v595_v31, %v723_v29  ;;  %v470_v43 = vld [vmem:[%s1133_s21 + $0x3e0] sm:$0xff]  ;;  %v852_v45 = vmax.f32 %v596_v36, %v724_v34  ;;  %v343_v47 = vld [vmem:[%s1128_s18 + $0x3e8] sm:$0xff] }
  0x98   : > { %v725_v39 = vld [vmem:[%s1138_s24 + $0x3d8] sm:$0xff]  ;;  %v597_v41 = vmax.f32 %v341_v37, %v469_v38  ;;  %v726_v44 = vld [vmem:[%s1138_s24 + $0x3e0] sm:$0xff]  ;;  %v598_v46 = vmax.f32 %v342_v42, %v470_v43  ;;  %v471_v48 = vld [vmem:[%s1133_s21 + $0x3e8] sm:$0xff] }
  0x99   : > { %978 = vst [vmem:[%s1149_s27 + $0x3c0] sm:$0xff] %v850_v35  ;;  %v727_v49 = vld [vmem:[%s1138_s24 + $0x3e8] sm:$0xff]  ;;  %979 = vst [vmem:[%s1149_s27 + $0x3c8] sm:$0xff] %v851_v40  ;;  %v599_v51 = vmax.f32 %v343_v47, %v471_v48  ;;  %v344_v52 = vld [vmem:[%s1128_s18 + $0x3f0] sm:$0xff] }
  0x9a   : > { %v853_v50 = vmax.f32 %v597_v41, %v725_v39  ;;  %v472_v53 = vld [vmem:[%s1133_s21 + $0x3f0] sm:$0xff]  ;;  %980 = vst [vmem:[%s1149_s27 + $0x3d0] sm:$0xff] %v852_v45  ;;  %v854_v55 = vmax.f32 %v598_v46, %v726_v44  ;;  %v345_v57 = vld [vmem:[%s1128_s18 + $0x3f8] sm:$0xff] }
  0x9b   : > { %v728_v54 = vld [vmem:[%s1138_s24 + $0x3f0] sm:$0xff]  ;;  %v600_v56 = vmax.f32 %v344_v52, %v472_v53  ;;  %v473_v58 = vld [vmem:[%s1133_s21 + $0x3f8] sm:$0xff]  ;;  %v855_v60 = vmax.f32 %v599_v51, %v727_v49 }
  0x9c   : > { %v729_v59 = vld [vmem:[%s1138_s24 + $0x3f8] sm:$0xff]  ;;  %981 = vst [vmem:[%s1149_s27 + $0x3d8] sm:$0xff] %v853_v50  ;;  %v601_v61 = vmax.f32 %v345_v57, %v473_v58  ;;  %982 = vst [vmem:[%s1149_s27 + $0x3e0] sm:$0xff] %v854_v55 }
  0x9d   : > { %v856_v62 = vmax.f32 %v600_v56, %v728_v54  ;;  %983 = vst [vmem:[%s1149_s27 + $0x3e8] sm:$0xff] %v855_v60 }
  0x9e   : > { %v857_v63 = vmax.f32 %v601_v61, %v729_v59 }
  0x9f   : > { %984 = vst [vmem:[%s1149_s27 + $0x3f0] sm:$0xff] %v856_v62 }
  0xa0   : > { %985 = vst [vmem:[%s1149_s27 + $0x3f8] sm:$0xff] %v857_v63 }
  0xa1 PF: > { %s13_s12 = sadd.s32 1, %s1095_s12  }
  0xa2   : > { %p10_p4 = scmp.ge.s32.totalorder %s13_s12, 4  }
  0xa4   :  { %12 = sbr.rel (!%p10_p4) target bundleno = 1 (0x1), region = 68 }

// kernel: an3ddr_forward.28
= control target key start
LH: loop header
LB: loop body
LE: loop exit
PB: predicated region body
PF: predicated region fallthrough
CT: control target
= control target key end

     0   :  { %s1496_s0 = inlined_call_operand.vmem [shape: f32[648,128], index: 0, kind: input, shape index: {}]   ;;  %s1497_s1 = inlined_call_operand.vmem [shape: f32[648,128], index: 1, kind: input, shape index: {}]   ;;  %s1498_s2 = inlined_call_operand.vmem [shape: f32[648,128], index: 2, kind: input, shape index: {}]   ;;  %s1499_s3 = inlined_call_operand.vmem [shape: f32[648,128], index: 3, kind: output, shape index: {}]  }
   0x1   :  { %v14_v0 = vld [vmem:[%s1496_s0] sm:$0xff]  ;;  %v15_v4 = vld [vmem:[%s1496_s0 + $0x8] sm:$0xff]  ;;  %v16_v8 = vld [vmem:[%s1496_s0 + $0x10] sm:$0xff] }
   0x2   :  { %v95_v1 = vld [vmem:[%s1497_s1] sm:$0xff]  ;;  %v96_v5 = vld [vmem:[%s1497_s1 + $0x8] sm:$0xff]  ;;  %v97_v9 = vld [vmem:[%s1497_s1 + $0x10] sm:$0xff] }
   0x3   :  { %v257_v2 = vld [vmem:[%s1498_s2] sm:$0xff]  ;;  %v176_v3 = vmax.f32 %v14_v0, %v95_v1  ;;  %v258_v6 = vld [vmem:[%s1498_s2 + $0x8] sm:$0xff]  ;;  %v177_v7 = vmax.f32 %v15_v4, %v96_v5  ;;  %v259_v10 = vld [vmem:[%s1498_s2 + $0x10] sm:$0xff]  ;;  %v178_v12 = vmax.f32 %v16_v8, %v97_v9 }
   0x4   :  { %v17_v13 = vld [vmem:[%s1496_s0 + $0x18] sm:$0xff]  ;;  %v18_v18 = vld [vmem:[%s1496_s0 + $0x20] sm:$0xff]  ;;  %v19_v23 = vld [vmem:[%s1496_s0 + $0x28] sm:$0xff] }
   0x5   :  { %v338_v11 = vmax.f32 %v176_v3, %v257_v2  ;;  %v98_v14 = vld [vmem:[%s1497_s1 + $0x18] sm:$0xff]  ;;  %v339_v16 = vmax.f32 %v177_v7, %v258_v6  ;;  %v99_v19 = vld [vmem:[%s1497_s1 + $0x20] sm:$0xff]  ;;  %v340_v21 = vmax.f32 %v178_v12, %v259_v10  ;;  %v100_v24 = vld [vmem:[%s1497_s1 + $0x28] sm:$0xff] }
   0x6   :  { %v260_v15 = vld [vmem:[%s1498_s2 + $0x18] sm:$0xff]  ;;  %v179_v17 = vmax.f32 %v17_v13, %v98_v14  ;;  %v261_v20 = vld [vmem:[%s1498_s2 + $0x20] sm:$0xff]  ;;  %v180_v22 = vmax.f32 %v18_v18, %v99_v19  ;;  %v262_v25 = vld [vmem:[%s1498_s2 + $0x28] sm:$0xff]  ;;  %v181_v27 = vmax.f32 %v19_v23, %v100_v24 }
   0x7   :  { %419 = vst [vmem:[%s1499_s3] sm:$0xff] %v338_v11  ;;  %420 = vst [vmem:[%s1499_s3 + $0x8] sm:$0xff] %v339_v16  ;;  %v20_v28 = vld [vmem:[%s1496_s0 + $0x30] sm:$0xff]  ;;  %v21_v33 = vld [vmem:[%s1496_s0 + $0x38] sm:$0xff] }
   0x8   :  { %v341_v26 = vmax.f32 %v179_v17, %v260_v15  ;;  %v101_v29 = vld [vmem:[%s1497_s1 + $0x30] sm:$0xff]  ;;  %421 = vst [vmem:[%s1499_s3 + $0x10] sm:$0xff] %v340_v21  ;;  %v342_v31 = vmax.f32 %v180_v22, %v261_v20  ;;  %v102_v34 = vld [vmem:[%s1497_s1 + $0x38] sm:$0xff]  ;;  %v343_v36 = vmax.f32 %v181_v27, %v262_v25  ;;  %v22_v38 = vld [vmem:[%s1496_s0 + $0x40] sm:$0xff] }
   0x9   :  { %v263_v30 = vld [vmem:[%s1498_s2 + $0x30] sm:$0xff]  ;;  %v182_v32 = vmax.f32 %v20_v28, %v101_v29  ;;  %v264_v35 = vld [vmem:[%s1498_s2 + $0x38] sm:$0xff]  ;;  %v183_v37 = vmax.f32 %v21_v33, %v102_v34  ;;  %v103_v39 = vld [vmem:[%s1497_s1 + $0x40] sm:$0xff] }
   0xa   :  { %422 = vst [vmem:[%s1499_s3 + $0x18] sm:$0xff] %v341_v26  ;;  %v265_v40 = vld [vmem:[%s1498_s2 + $0x40] sm:$0xff]  ;;  %423 = vst [vmem:[%s1499_s3 + $0x20] sm:$0xff] %v342_v31  ;;  %v184_v42 = vmax.f32 %v22_v38, %v103_v39  ;;  %v23_v43 = vld [vmem:[%s1496_s0 + $0x48] sm:$0xff] }
   0xb   :  { %v344_v41 = vmax.f32 %v182_v32, %v263_v30  ;;  %v104_v44 = vld [vmem:[%s1497_s1 + $0x48] sm:$0xff]  ;;  %424 = vst [vmem:[%s1499_s3 + $0x28] sm:$0xff] %v343_v36  ;;  %v345_v46 = vmax.f32 %v183_v37, %v264_v35  ;;  %v24_v48 = vld [vmem:[%s1496_s0 + $0x50] sm:$0xff]  ;;  %v25_v53 = vld [vmem:[%s1496_s0 + $0x58] sm:$0xff] }
   0xc   :  { %v266_v45 = vld [vmem:[%s1498_s2 + $0x48] sm:$0xff]  ;;  %v185_v47 = vmax.f32 %v23_v43, %v104_v44  ;;  %v105_v49 = vld [vmem:[%s1497_s1 + $0x50] sm:$0xff]  ;;  %v346_v51 = vmax.f32 %v184_v42, %v265_v40  ;;  %v106_v54 = vld [vmem:[%s1497_s1 + $0x58] sm:$0xff] }
   0xd   :  { %v267_v50 = vld [vmem:[%s1498_s2 + $0x50] sm:$0xff]  ;;  %425 = vst [vmem:[%s1499_s3 + $0x30] sm:$0xff] %v344_v41  ;;  %v186_v52 = vmax.f32 %v24_v48, %v105_v49  ;;  %v268_v55 = vld [vmem:[%s1498_s2 + $0x58] sm:$0xff]  ;;  %426 = vst [vmem:[%s1499_s3 + $0x38] sm:$0xff] %v345_v46  ;;  %v187_v57 = vmax.f32 %v25_v53, %v106_v54 }
   0xe   :  { %v347_v56 = vmax.f32 %v185_v47, %v266_v45  ;;  %v26_v58 = vld [vmem:[%s1496_s0 + $0x60] sm:$0xff]  ;;  %427 = vst [vmem:[%s1499_s3 + $0x40] sm:$0xff] %v346_v51  ;;  %v27_v63 = vld [vmem:[%s1496_s0 + $0x68] sm:$0xff]  ;;  %v28_v4 = vld [vmem:[%s1496_s0 + $0x70] sm:$0xff] }
   0xf   :  { %v107_v59 = vld [vmem:[%s1497_s1 + $0x60] sm:$0xff]  ;;  %v348_v61 = vmax.f32 %v186_v52, %v267_v50  ;;  %v108_v0 = vld [vmem:[%s1497_s1 + $0x68] sm:$0xff]  ;;  %v349_v2 = vmax.f32 %v187_v57, %v268_v55  ;;  %v109_v5 = vld [vmem:[%s1497_s1 + $0x70] sm:$0xff] }
  0x10   :  { %v269_v60 = vld [vmem:[%s1498_s2 + $0x60] sm:$0xff]  ;;  %v188_v62 = vmax.f32 %v26_v58, %v107_v59  ;;  %v270_v1 = vld [vmem:[%s1498_s2 + $0x68] sm:$0xff]  ;;  %428 = vst [vmem:[%s1499_s3 + $0x48] sm:$0xff] %v347_v56  ;;  %v189_v3 = vmax.f32 %v27_v63, %v108_v0  ;;  %v271_v6 = vld [vmem:[%s1498_s2 + $0x70] sm:$0xff]  ;;  %v190_v8 = vmax.f32 %v28_v4, %v109_v5 }
  0x11   :  { %429 = vst [vmem:[%s1499_s3 + $0x50] sm:$0xff] %v348_v61  ;;  %v29_v9 = vld [vmem:[%s1496_s0 + $0x78] sm:$0xff]  ;;  %430 = vst [vmem:[%s1499_s3 + $0x58] sm:$0xff] %v349_v2  ;;  %v30_v14 = vld [vmem:[%s1496_s0 + $0x80] sm:$0xff] }
  0x12   :  { %v350_v7 = vmax.f32 %v188_v62, %v269_v60  ;;  %v110_v10 = vld [vmem:[%s1497_s1 + $0x78] sm:$0xff]  ;;  %v351_v12 = vmax.f32 %v189_v3, %v270_v1  ;;  %v111_v15 = vld [vmem:[%s1497_s1 + $0x80] sm:$0xff]  ;;  %v352_v17 = vmax.f32 %v190_v8, %v271_v6  ;;  %v31_v19 = vld [vmem:[%s1496_s0 + $0x88] sm:$0xff] }
  0x13   :  { %v272_v11 = vld [vmem:[%s1498_s2 + $0x78] sm:$0xff]  ;;  %v191_v13 = vmax.f32 %v29_v9, %v110_v10  ;;  %v273_v16 = vld [vmem:[%s1498_s2 + $0x80] sm:$0xff]  ;;  %v192_v18 = vmax.f32 %v30_v14, %v111_v15  ;;  %v112_v20 = vld [vmem:[%s1497_s1 + $0x88] sm:$0xff] }
  0x14   :  { %431 = vst [vmem:[%s1499_s3 + $0x60] sm:$0xff] %v350_v7  ;;  %v274_v21 = vld [vmem:[%s1498_s2 + $0x88] sm:$0xff]  ;;  %432 = vst [vmem:[%s1499_s3 + $0x68] sm:$0xff] %v351_v12  ;;  %v193_v23 = vmax.f32 %v31_v19, %v112_v20  ;;  %v32_v24 = vld [vmem:[%s1496_s0 + $0x90] sm:$0xff] }
  0x15   :  { %v353_v22 = vmax.f32 %v191_v13, %v272_v11  ;;  %v113_v25 = vld [vmem:[%s1497_s1 + $0x90] sm:$0xff]  ;;  %433 = vst [vmem:[%s1499_s3 + $0x70] sm:$0xff] %v352_v17  ;;  %v354_v27 = vmax.f32 %v192_v18, %v273_v16  ;;  %v33_v29 = vld [vmem:[%s1496_s0 + $0x98] sm:$0xff]  ;;  %v34_v34 = vld [vmem:[%s1496_s0 + $0xa0] sm:$0xff] }
  0x16   :  { %v275_v26 = vld [vmem:[%s1498_s2 + $0x90] sm:$0xff]  ;;  %v194_v28 = vmax.f32 %v32_v24, %v113_v25  ;;  %v114_v30 = vld [vmem:[%s1497_s1 + $0x98] sm:$0xff]  ;;  %v355_v32 = vmax.f32 %v193_v23, %v274_v21  ;;  %v115_v35 = vld [vmem:[%s1497_s1 + $0xa0] sm:$0xff] }
  0x17   :  { %v276_v31 = vld [vmem:[%s1498_s2 + $0x98] sm:$0xff]  ;;  %434 = vst [vmem:[%s1499_s3 + $0x78] sm:$0xff] %v353_v22  ;;  %v195_v33 = vmax.f32 %v33_v29, %v114_v30  ;;  %v277_v36 = vld [vmem:[%s1498_s2 + $0xa0] sm:$0xff]  ;;  %435 = vst [vmem:[%s1499_s3 + $0x80] sm:$0xff] %v354_v27  ;;  %v196_v38 = vmax.f32 %v34_v34, %v115_v35 }
  0x18   :  { %v356_v37 = vmax.f32 %v194_v28, %v275_v26  ;;  %v35_v39 = vld [vmem:[%s1496_s0 + $0xa8] sm:$0xff]  ;;  %436 = vst [vmem:[%s1499_s3 + $0x88] sm:$0xff] %v355_v32  ;;  %v36_v44 = vld [vmem:[%s1496_s0 + $0xb0] sm:$0xff]  ;;  %v37_v49 = vld [vmem:[%s1496_s0 + $0xb8] sm:$0xff] }
  0x19   :  { %v116_v40 = vld [vmem:[%s1497_s1 + $0xa8] sm:$0xff]  ;;  %v357_v42 = vmax.f32 %v195_v33, %v276_v31  ;;  %v117_v45 = vld [vmem:[%s1497_s1 + $0xb0] sm:$0xff]  ;;  %v358_v47 = vmax.f32 %v196_v38, %v277_v36  ;;  %v118_v50 = vld [vmem:[%s1497_s1 + $0xb8] sm:$0xff] }
  0x1a   :  { %v278_v41 = vld [vmem:[%s1498_s2 + $0xa8] sm:$0xff]  ;;  %v197_v43 = vmax.f32 %v35_v39, %v116_v40  ;;  %v279_v46 = vld [vmem:[%s1498_s2 + $0xb0] sm:$0xff]  ;;  %437 = vst [vmem:[%s1499_s3 + $0x90] sm:$0xff] %v356_v37  ;;  %v198_v48 = vmax.f32 %v36_v44, %v117_v45  ;;  %v280_v51 = vld [vmem:[%s1498_s2 + $0xb8] sm:$0xff]  ;;  %v199_v53 = vmax.f32 %v37_v49, %v118_v50 }
  0x1b   :  { %438 = vst [vmem:[%s1499_s3 + $0x98] sm:$0xff] %v357_v42  ;;  %v38_v54 = vld [vmem:[%s1496_s0 + $0xc0] sm:$0xff]  ;;  %439 = vst [vmem:[%s1499_s3 + $0xa0] sm:$0xff] %v358_v47  ;;  %v39_v59 = vld [vmem:[%s1496_s0 + $0xc8] sm:$0xff] }
  0x1c   :  { %v359_v52 = vmax.f32 %v197_v43, %v278_v41  ;;  %v119_v55 = vld [vmem:[%s1497_s1 + $0xc0] sm:$0xff]  ;;  %v360_v57 = vmax.f32 %v198_v48, %v279_v46  ;;  %v120_v60 = vld [vmem:[%s1497_s1 + $0xc8] sm:$0xff]  ;;  %v361_v62 = vmax.f32 %v199_v53, %v280_v51  ;;  %v40_v0 = vld [vmem:[%s1496_s0 + $0xd0] sm:$0xff] }
  0x1d   :  { %v281_v56 = vld [vmem:[%s1498_s2 + $0xc0] sm:$0xff]  ;;  %v200_v58 = vmax.f32 %v38_v54, %v119_v55  ;;  %v282_v61 = vld [vmem:[%s1498_s2 + $0xc8] sm:$0xff]  ;;  %v201_v63 = vmax.f32 %v39_v59, %v120_v60  ;;  %v121_v1 = vld [vmem:[%s1497_s1 + $0xd0] sm:$0xff] }
  0x1e   :  { %440 = vst [vmem:[%s1499_s3 + $0xa8] sm:$0xff] %v359_v52  ;;  %v283_v2 = vld [vmem:[%s1498_s2 + $0xd0] sm:$0xff]  ;;  %441 = vst [vmem:[%s1499_s3 + $0xb0] sm:$0xff] %v360_v57  ;;  %v202_v4 = vmax.f32 %v40_v0, %v121_v1  ;;  %v41_v5 = vld [vmem:[%s1496_s0 + $0xd8] sm:$0xff] }
  0x1f   :  { %v362_v3 = vmax.f32 %v200_v58, %v281_v56  ;;  %v122_v6 = vld [vmem:[%s1497_s1 + $0xd8] sm:$0xff]  ;;  %442 = vst [vmem:[%s1499_s3 + $0xb8] sm:$0xff] %v361_v62  ;;  %v363_v8 = vmax.f32 %v201_v63, %v282_v61  ;;  %v42_v10 = vld [vmem:[%s1496_s0 + $0xe0] sm:$0xff]  ;;  %v43_v15 = vld [vmem:[%s1496_s0 + $0xe8] sm:$0xff] }
  0x20   :  { %v284_v7 = vld [vmem:[%s1498_s2 + $0xd8] sm:$0xff]  ;;  %v203_v9 = vmax.f32 %v41_v5, %v122_v6  ;;  %v123_v11 = vld [vmem:[%s1497_s1 + $0xe0] sm:$0xff]  ;;  %v364_v13 = vmax.f32 %v202_v4, %v283_v2  ;;  %v124_v16 = vld [vmem:[%s1497_s1 + $0xe8] sm:$0xff] }
  0x21   :  { %v285_v12 = vld [vmem:[%s1498_s2 + $0xe0] sm:$0xff]  ;;  %443 = vst [vmem:[%s1499_s3 + $0xc0] sm:$0xff] %v362_v3  ;;  %v204_v14 = vmax.f32 %v42_v10, %v123_v11  ;;  %v286_v17 = vld [vmem:[%s1498_s2 + $0xe8] sm:$0xff]  ;;  %444 = vst [vmem:[%s1499_s3 + $0xc8] sm:$0xff] %v363_v8  ;;  %v205_v19 = vmax.f32 %v43_v15, %v124_v16 }
  0x22   :  { %v365_v18 = vmax.f32 %v203_v9, %v284_v7  ;;  %v44_v20 = vld [vmem:[%s1496_s0 + $0xf0] sm:$0xff]  ;;  %445 = vst [vmem:[%s1499_s3 + $0xd0] sm:$0xff] %v364_v13  ;;  %v45_v25 = vld [vmem:[%s1496_s0 + $0xf8] sm:$0xff]  ;;  %v46_v30 = vld [vmem:[%s1496_s0 + $0x100] sm:$0xff] }
  0x23   :  { %v125_v21 = vld [vmem:[%s1497_s1 + $0xf0] sm:$0xff]  ;;  %v366_v23 = vmax.f32 %v204_v14, %v285_v12  ;;  %v126_v26 = vld [vmem:[%s1497_s1 + $0xf8] sm:$0xff]  ;;  %v367_v28 = vmax.f32 %v205_v19, %v286_v17  ;;  %v127_v31 = vld [vmem:[%s1497_s1 + $0x100] sm:$0xff] }
  0x24   :  { %v287_v22 = vld [vmem:[%s1498_s2 + $0xf0] sm:$0xff]  ;;  %v206_v24 = vmax.f32 %v44_v20, %v125_v21  ;;  %v288_v27 = vld [vmem:[%s1498_s2 + $0xf8] sm:$0xff]  ;;  %446 = vst [vmem:[%s1499_s3 + $0xd8] sm:$0xff] %v365_v18  ;;  %v207_v29 = vmax.f32 %v45_v25, %v126_v26  ;;  %v289_v32 = vld [vmem:[%s1498_s2 + $0x100] sm:$0xff]  ;;  %v208_v34 = vmax.f32 %v46_v30, %v127_v31 }
  0x25   :  { %447 = vst [vmem:[%s1499_s3 + $0xe0] sm:$0xff] %v366_v23  ;;  %v47_v35 = vld [vmem:[%s1496_s0 + $0x108] sm:$0xff]  ;;  %448 = vst [vmem:[%s1499_s3 + $0xe8] sm:$0xff] %v367_v28  ;;  %v48_v40 = vld [vmem:[%s1496_s0 + $0x110] sm:$0xff] }
  0x26   :  { %v368_v33 = vmax.f32 %v206_v24, %v287_v22  ;;  %v128_v36 = vld [vmem:[%s1497_s1 + $0x108] sm:$0xff]  ;;  %v369_v38 = vmax.f32 %v207_v29, %v288_v27  ;;  %v129_v41 = vld [vmem:[%s1497_s1 + $0x110] sm:$0xff]  ;;  %v370_v43 = vmax.f32 %v208_v34, %v289_v32  ;;  %v49_v45 = vld [vmem:[%s1496_s0 + $0x118] sm:$0xff] }
  0x27   :  { %v290_v37 = vld [vmem:[%s1498_s2 + $0x108] sm:$0xff]  ;;  %v209_v39 = vmax.f32 %v47_v35, %v128_v36  ;;  %v291_v42 = vld [vmem:[%s1498_s2 + $0x110] sm:$0xff]  ;;  %v210_v44 = vmax.f32 %v48_v40, %v129_v41  ;;  %v130_v46 = vld [vmem:[%s1497_s1 + $0x118] sm:$0xff] }
  0x28   :  { %449 = vst [vmem:[%s1499_s3 + $0xf0] sm:$0xff] %v368_v33  ;;  %v292_v47 = vld [vmem:[%s1498_s2 + $0x118] sm:$0xff]  ;;  %450 = vst [vmem:[%s1499_s3 + $0xf8] sm:$0xff] %v369_v38  ;;  %v211_v49 = vmax.f32 %v49_v45, %v130_v46  ;;  %v50_v50 = vld [vmem:[%s1496_s0 + $0x120] sm:$0xff] }
  0x29   :  { %v371_v48 = vmax.f32 %v209_v39, %v290_v37  ;;  %v131_v51 = vld [vmem:[%s1497_s1 + $0x120] sm:$0xff]  ;;  %451 = vst [vmem:[%s1499_s3 + $0x100] sm:$0xff] %v370_v43  ;;  %v372_v53 = vmax.f32 %v210_v44, %v291_v42  ;;  %v51_v55 = vld [vmem:[%s1496_s0 + $0x128] sm:$0xff]  ;;  %v52_v60 = vld [vmem:[%s1496_s0 + $0x130] sm:$0xff] }
  0x2a   :  { %v293_v52 = vld [vmem:[%s1498_s2 + $0x120] sm:$0xff]  ;;  %v212_v54 = vmax.f32 %v50_v50, %v131_v51  ;;  %v132_v56 = vld [vmem:[%s1497_s1 + $0x128] sm:$0xff]  ;;  %v373_v58 = vmax.f32 %v211_v49, %v292_v47  ;;  %v133_v61 = vld [vmem:[%s1497_s1 + $0x130] sm:$0xff] }
  0x2b   :  { %v294_v57 = vld [vmem:[%s1498_s2 + $0x128] sm:$0xff]  ;;  %452 = vst [vmem:[%s1499_s3 + $0x108] sm:$0xff] %v371_v48  ;;  %v213_v59 = vmax.f32 %v51_v55, %v132_v56  ;;  %v295_v62 = vld [vmem:[%s1498_s2 + $0x130] sm:$0xff]  ;;  %453 = vst [vmem:[%s1499_s3 + $0x110] sm:$0xff] %v372_v53  ;;  %v214_v0 = vmax.f32 %v52_v60, %v133_v61 }
  0x2c   :  { %v374_v63 = vmax.f32 %v212_v54, %v293_v52  ;;  %v53_v1 = vld [vmem:[%s1496_s0 + $0x138] sm:$0xff]  ;;  %454 = vst [vmem:[%s1499_s3 + $0x118] sm:$0xff] %v373_v58  ;;  %v54_v6 = vld [vmem:[%s1496_s0 + $0x140] sm:$0xff]  ;;  %v55_v11 = vld [vmem:[%s1496_s0 + $0x148] sm:$0xff] }
  0x2d   :  { %v134_v2 = vld [vmem:[%s1497_s1 + $0x138] sm:$0xff]  ;;  %v375_v4 = vmax.f32 %v213_v59, %v294_v57  ;;  %v135_v7 = vld [vmem:[%s1497_s1 + $0x140] sm:$0xff]  ;;  %v376_v9 = vmax.f32 %v214_v0, %v295_v62  ;;  %v136_v12 = vld [vmem:[%s1497_s1 + $0x148] sm:$0xff] }
  0x2e   :  { %v296_v3 = vld [vmem:[%s1498_s2 + $0x138] sm:$0xff]  ;;  %v215_v5 = vmax.f32 %v53_v1, %v134_v2  ;;  %v297_v8 = vld [vmem:[%s1498_s2 + $0x140] sm:$0xff]  ;;  %455 = vst [vmem:[%s1499_s3 + $0x120] sm:$0xff] %v374_v63  ;;  %v216_v10 = vmax.f32 %v54_v6, %v135_v7  ;;  %v298_v13 = vld [vmem:[%s1498_s2 + $0x148] sm:$0xff]  ;;  %v217_v15 = vmax.f32 %v55_v11, %v136_v12 }
  0x2f   :  { %456 = vst [vmem:[%s1499_s3 + $0x128] sm:$0xff] %v375_v4  ;;  %v56_v16 = vld [vmem:[%s1496_s0 + $0x150] sm:$0xff]  ;;  %457 = vst [vmem:[%s1499_s3 + $0x130] sm:$0xff] %v376_v9  ;;  %v57_v21 = vld [vmem:[%s1496_s0 + $0x158] sm:$0xff] }
  0x30   :  { %v377_v14 = vmax.f32 %v215_v5, %v296_v3  ;;  %v137_v17 = vld [vmem:[%s1497_s1 + $0x150] sm:$0xff]  ;;  %v378_v19 = vmax.f32 %v216_v10, %v297_v8  ;;  %v138_v22 = vld [vmem:[%s1497_s1 + $0x158] sm:$0xff]  ;;  %v379_v24 = vmax.f32 %v217_v15, %v298_v13  ;;  %v58_v26 = vld [vmem:[%s1496_s0 + $0x160] sm:$0xff] }
  0x31   :  { %v299_v18 = vld [vmem:[%s1498_s2 + $0x150] sm:$0xff]  ;;  %v218_v20 = vmax.f32 %v56_v16, %v137_v17  ;;  %v300_v23 = vld [vmem:[%s1498_s2 + $0x158] sm:$0xff]  ;;  %v219_v25 = vmax.f32 %v57_v21, %v138_v22  ;;  %v139_v27 = vld [vmem:[%s1497_s1 + $0x160] sm:$0xff] }
  0x32   :  { %458 = vst [vmem:[%s1499_s3 + $0x138] sm:$0xff] %v377_v14  ;;  %v301_v28 = vld [vmem:[%s1498_s2 + $0x160] sm:$0xff]  ;;  %459 = vst [vmem:[%s1499_s3 + $0x140] sm:$0xff] %v378_v19  ;;  %v220_v30 = vmax.f32 %v58_v26, %v139_v27  ;;  %v59_v31 = vld [vmem:[%s1496_s0 + $0x168] sm:$0xff] }
  0x33   :  { %v380_v29 = vmax.f32 %v218_v20, %v299_v18  ;;  %v140_v32 = vld [vmem:[%s1497_s1 + $0x168] sm:$0xff]  ;;  %460 = vst [vmem:[%s1499_s3 + $0x148] sm:$0xff] %v379_v24  ;;  %v381_v34 = vmax.f32 %v219_v25, %v300_v23  ;;  %v60_v36 = vld [vmem:[%s1496_s0 + $0x170] sm:$0xff]  ;;  %v61_v41 = vld [vmem:[%s1496_s0 + $0x178] sm:$0xff] }
  0x34   :  { %v302_v33 = vld [vmem:[%s1498_s2 + $0x168] sm:$0xff]  ;;  %v221_v35 = vmax.f32 %v59_v31, %v140_v32  ;;  %v141_v37 = vld [vmem:[%s1497_s1 + $0x170] sm:$0xff]  ;;  %v382_v39 = vmax.f32 %v220_v30, %v301_v28  ;;  %v142_v42 = vld [vmem:[%s1497_s1 + $0x178] sm:$0xff] }
  0x35   :  { %v303_v38 = vld [vmem:[%s1498_s2 + $0x170] sm:$0xff]  ;;  %461 = vst [vmem:[%s1499_s3 + $0x150] sm:$0xff] %v380_v29  ;;  %v222_v40 = vmax.f32 %v60_v36, %v141_v37  ;;  %v304_v43 = vld [vmem:[%s1498_s2 + $0x178] sm:$0xff]  ;;  %462 = vst [vmem:[%s1499_s3 + $0x158] sm:$0xff] %v381_v34  ;;  %v223_v45 = vmax.f32 %v61_v41, %v142_v42 }
  0x36   :  { %v383_v44 = vmax.f32 %v221_v35, %v302_v33  ;;  %v62_v46 = vld [vmem:[%s1496_s0 + $0x180] sm:$0xff]  ;;  %463 = vst [vmem:[%s1499_s3 + $0x160] sm:$0xff] %v382_v39  ;;  %v63_v51 = vld [vmem:[%s1496_s0 + $0x188] sm:$0xff]  ;;  %v64_v56 = vld [vmem:[%s1496_s0 + $0x190] sm:$0xff] }
  0x37   :  { %v143_v47 = vld [vmem:[%s1497_s1 + $0x180] sm:$0xff]  ;;  %v384_v49 = vmax.f32 %v222_v40, %v303_v38  ;;  %v144_v52 = vld [vmem:[%s1497_s1 + $0x188] sm:$0xff]  ;;  %v385_v54 = vmax.f32 %v223_v45, %v304_v43  ;;  %v145_v57 = vld [vmem:[%s1497_s1 + $0x190] sm:$0xff] }
  0x38   :  { %v305_v48 = vld [vmem:[%s1498_s2 + $0x180] sm:$0xff]  ;;  %v224_v50 = vmax.f32 %v62_v46, %v143_v47  ;;  %v306_v53 = vld [vmem:[%s1498_s2 + $0x188] sm:$0xff]  ;;  %464 = vst [vmem:[%s1499_s3 + $0x168] sm:$0xff] %v383_v44  ;;  %v225_v55 = vmax.f32 %v63_v51, %v144_v52  ;;  %v307_v58 = vld [vmem:[%s1498_s2 + $0x190] sm:$0xff]  ;;  %v226_v60 = vmax.f32 %v64_v56, %v145_v57 }
  0x39   :  { %465 = vst [vmem:[%s1499_s3 + $0x170] sm:$0xff] %v384_v49  ;;  %v65_v61 = vld [vmem:[%s1496_s0 + $0x198] sm:$0xff]  ;;  %466 = vst [vmem:[%s1499_s3 + $0x178] sm:$0xff] %v385_v54  ;;  %v66_v2 = vld [vmem:[%s1496_s0 + $0x1a0] sm:$0xff] }
  0x3a   :  { %v386_v59 = vmax.f32 %v224_v50, %v305_v48  ;;  %v146_v62 = vld [vmem:[%s1497_s1 + $0x198] sm:$0xff]  ;;  %v387_v0 = vmax.f32 %v225_v55, %v306_v53  ;;  %v147_v3 = vld [vmem:[%s1497_s1 + $0x1a0] sm:$0xff]  ;;  %v388_v5 = vmax.f32 %v226_v60, %v307_v58  ;;  %v67_v7 = vld [vmem:[%s1496_s0 + $0x1a8] sm:$0xff] }
  0x3b   :  { %v308_v63 = vld [vmem:[%s1498_s2 + $0x198] sm:$0xff]  ;;  %v227_v1 = vmax.f32 %v65_v61, %v146_v62  ;;  %v309_v4 = vld [vmem:[%s1498_s2 + $0x1a0] sm:$0xff]  ;;  %v228_v6 = vmax.f32 %v66_v2, %v147_v3  ;;  %v148_v8 = vld [vmem:[%s1497_s1 + $0x1a8] sm:$0xff] }
  0x3c   :  { %467 = vst [vmem:[%s1499_s3 + $0x180] sm:$0xff] %v386_v59  ;;  %v310_v9 = vld [vmem:[%s1498_s2 + $0x1a8] sm:$0xff]  ;;  %468 = vst [vmem:[%s1499_s3 + $0x188] sm:$0xff] %v387_v0  ;;  %v229_v11 = vmax.f32 %v67_v7, %v148_v8  ;;  %v68_v12 = vld [vmem:[%s1496_s0 + $0x1b0] sm:$0xff] }
  0x3d   :  { %v389_v10 = vmax.f32 %v227_v1, %v308_v63  ;;  %v149_v13 = vld [vmem:[%s1497_s1 + $0x1b0] sm:$0xff]  ;;  %469 = vst [vmem:[%s1499_s3 + $0x190] sm:$0xff] %v388_v5  ;;  %v390_v15 = vmax.f32 %v228_v6, %v309_v4  ;;  %v69_v17 = vld [vmem:[%s1496_s0 + $0x1b8] sm:$0xff]  ;;  %v70_v22 = vld [vmem:[%s1496_s0 + $0x1c0] sm:$0xff] }
  0x3e   :  { %v311_v14 = vld [vmem:[%s1498_s2 + $0x1b0] sm:$0xff]  ;;  %v230_v16 = vmax.f32 %v68_v12, %v149_v13  ;;  %v150_v18 = vld [vmem:[%s1497_s1 + $0x1b8] sm:$0xff]  ;;  %v391_v20 = vmax.f32 %v229_v11, %v310_v9  ;;  %v151_v23 = vld [vmem:[%s1497_s1 + $0x1c0] sm:$0xff] }
  0x3f   :  { %v312_v19 = vld [vmem:[%s1498_s2 + $0x1b8] sm:$0xff]  ;;  %470 = vst [vmem:[%s1499_s3 + $0x198] sm:$0xff] %v389_v10  ;;  %v231_v21 = vmax.f32 %v69_v17, %v150_v18  ;;  %v313_v24 = vld [vmem:[%s1498_s2 + $0x1c0] sm:$0xff]  ;;  %471 = vst [vmem:[%s1499_s3 + $0x1a0] sm:$0xff] %v390_v15  ;;  %v232_v26 = vmax.f32 %v70_v22, %v151_v23 }
  0x40   :  { %v392_v25 = vmax.f32 %v230_v16, %v311_v14  ;;  %v71_v27 = vld [vmem:[%s1496_s0 + $0x1c8] sm:$0xff]  ;;  %472 = vst [vmem:[%s1499_s3 + $0x1a8] sm:$0xff] %v391_v20  ;;  %v72_v32 = vld [vmem:[%s1496_s0 + $0x1d0] sm:$0xff]  ;;  %v73_v37 = vld [vmem:[%s1496_s0 + $0x1d8] sm:$0xff] }
  0x41   :  { %v152_v28 = vld [vmem:[%s1497_s1 + $0x1c8] sm:$0xff]  ;;  %v393_v30 = vmax.f32 %v231_v21, %v312_v19  ;;  %v153_v33 = vld [vmem:[%s1497_s1 + $0x1d0] sm:$0xff]  ;;  %v394_v35 = vmax.f32 %v232_v26, %v313_v24  ;;  %v154_v38 = vld [vmem:[%s1497_s1 + $0x1d8] sm:$0xff] }
  0x42   :  { %v314_v29 = vld [vmem:[%s1498_s2 + $0x1c8] sm:$0xff]  ;;  %v233_v31 = vmax.f32 %v71_v27, %v152_v28  ;;  %v315_v34 = vld [vmem:[%s1498_s2 + $0x1d0] sm:$0xff]  ;;  %473 = vst [vmem:[%s1499_s3 + $0x1b0] sm:$0xff] %v392_v25  ;;  %v234_v36 = vmax.f32 %v72_v32, %v153_v33  ;;  %v316_v39 = vld [vmem:[%s1498_s2 + $0x1d8] sm:$0xff]  ;;  %v235_v41 = vmax.f32 %v73_v37, %v154_v38 }
  0x43   :  { %474 = vst [vmem:[%s1499_s3 + $0x1b8] sm:$0xff] %v393_v30  ;;  %v74_v42 = vld [vmem:[%s1496_s0 + $0x1e0] sm:$0xff]  ;;  %475 = vst [vmem:[%s1499_s3 + $0x1c0] sm:$0xff] %v394_v35  ;;  %v75_v47 = vld [vmem:[%s1496_s0 + $0x1e8] sm:$0xff] }
  0x44   :  { %v395_v40 = vmax.f32 %v233_v31, %v314_v29  ;;  %v155_v43 = vld [vmem:[%s1497_s1 + $0x1e0] sm:$0xff]  ;;  %v396_v45 = vmax.f32 %v234_v36, %v315_v34  ;;  %v156_v48 = vld [vmem:[%s1497_s1 + $0x1e8] sm:$0xff]  ;;  %v397_v50 = vmax.f32 %v235_v41, %v316_v39  ;;  %v76_v52 = vld [vmem:[%s1496_s0 + $0x1f0] sm:$0xff] }
  0x45   :  { %v317_v44 = vld [vmem:[%s1498_s2 + $0x1e0] sm:$0xff]  ;;  %v236_v46 = vmax.f32 %v74_v42, %v155_v43  ;;  %v318_v49 = vld [vmem:[%s1498_s2 + $0x1e8] sm:$0xff]  ;;  %v237_v51 = vmax.f32 %v75_v47, %v156_v48  ;;  %v157_v53 = vld [vmem:[%s1497_s1 + $0x1f0] sm:$0xff] }
  0x46   :  { %476 = vst [vmem:[%s1499_s3 + $0x1c8] sm:$0xff] %v395_v40  ;;  %v319_v54 = vld [vmem:[%s1498_s2 + $0x1f0] sm:$0xff]  ;;  %477 = vst [vmem:[%s1499_s3 + $0x1d0] sm:$0xff] %v396_v45  ;;  %v238_v56 = vmax.f32 %v76_v52, %v157_v53  ;;  %v77_v57 = vld [vmem:[%s1496_s0 + $0x1f8] sm:$0xff] }
  0x47   :  { %v398_v55 = vmax.f32 %v236_v46, %v317_v44  ;;  %v158_v58 = vld [vmem:[%s1497_s1 + $0x1f8] sm:$0xff]  ;;  %478 = vst [vmem:[%s1499_s3 + $0x1d8] sm:$0xff] %v397_v50  ;;  %v399_v60 = vmax.f32 %v237_v51, %v318_v49  ;;  %v78_v62 = vld [vmem:[%s1496_s0 + $0x200] sm:$0xff]  ;;  %v79_v3 = vld [vmem:[%s1496_s0 + $0x208] sm:$0xff] }
  0x48   :  { %v320_v59 = vld [vmem:[%s1498_s2 + $0x1f8] sm:$0xff]  ;;  %v239_v61 = vmax.f32 %v77_v57, %v158_v58  ;;  %v159_v63 = vld [vmem:[%s1497_s1 + $0x200] sm:$0xff]  ;;  %v400_v1 = vmax.f32 %v238_v56, %v319_v54  ;;  %v160_v4 = vld [vmem:[%s1497_s1 + $0x208] sm:$0xff] }
  0x49   :  { %v321_v0 = vld [vmem:[%s1498_s2 + $0x200] sm:$0xff]  ;;  %479 = vst [vmem:[%s1499_s3 + $0x1e0] sm:$0xff] %v398_v55  ;;  %v240_v2 = vmax.f32 %v78_v62, %v159_v63  ;;  %v322_v5 = vld [vmem:[%s1498_s2 + $0x208] sm:$0xff]  ;;  %480 = vst [vmem:[%s1499_s3 + $0x1e8] sm:$0xff] %v399_v60  ;;  %v241_v7 = vmax.f32 %v79_v3, %v160_v4 }
  0x4a   :  { %v401_v6 = vmax.f32 %v239_v61, %v320_v59  ;;  %v80_v8 = vld [vmem:[%s1496_s0 + $0x210] sm:$0xff]  ;;  %481 = vst [vmem:[%s1499_s3 + $0x1f0] sm:$0xff] %v400_v1  ;;  %v81_v13 = vld [vmem:[%s1496_s0 + $0x218] sm:$0xff]  ;;  %v82_v18 = vld [vmem:[%s1496_s0 + $0x220] sm:$0xff] }
  0x4b   :  { %v161_v9 = vld [vmem:[%s1497_s1 + $0x210] sm:$0xff]  ;;  %v402_v11 = vmax.f32 %v240_v2, %v321_v0  ;;  %v162_v14 = vld [vmem:[%s1497_s1 + $0x218] sm:$0xff]  ;;  %v403_v16 = vmax.f32 %v241_v7, %v322_v5  ;;  %v163_v19 = vld [vmem:[%s1497_s1 + $0x220] sm:$0xff] }
  0x4c   :  { %v323_v10 = vld [vmem:[%s1498_s2 + $0x210] sm:$0xff]  ;;  %v242_v12 = vmax.f32 %v80_v8, %v161_v9  ;;  %v324_v15 = vld [vmem:[%s1498_s2 + $0x218] sm:$0xff]  ;;  %482 = vst [vmem:[%s1499_s3 + $0x1f8] sm:$0xff] %v401_v6  ;;  %v243_v17 = vmax.f32 %v81_v13, %v162_v14  ;;  %v325_v20 = vld [vmem:[%s1498_s2 + $0x220] sm:$0xff]  ;;  %v244_v22 = vmax.f32 %v82_v18, %v163_v19 }
  0x4d   :  { %483 = vst [vmem:[%s1499_s3 + $0x200] sm:$0xff] %v402_v11  ;;  %v83_v23 = vld [vmem:[%s1496_s0 + $0x228] sm:$0xff]  ;;  %484 = vst [vmem:[%s1499_s3 + $0x208] sm:$0xff] %v403_v16  ;;  %v84_v28 = vld [vmem:[%s1496_s0 + $0x230] sm:$0xff] }
  0x4e   :  { %v404_v21 = vmax.f32 %v242_v12, %v323_v10  ;;  %v164_v24 = vld [vmem:[%s1497_s1 + $0x228] sm:$0xff]  ;;  %v405_v26 = vmax.f32 %v243_v17, %v324_v15  ;;  %v165_v29 = vld [vmem:[%s1497_s1 + $0x230] sm:$0xff]  ;;  %v406_v31 = vmax.f32 %v244_v22, %v325_v20  ;;  %v85_v33 = vld [vmem:[%s1496_s0 + $0x238] sm:$0xff] }
  0x4f   :  { %v326_v25 = vld [vmem:[%s1498_s2 + $0x228] sm:$0xff]  ;;  %v245_v27 = vmax.f32 %v83_v23, %v164_v24  ;;  %v327_v30 = vld [vmem:[%s1498_s2 + $0x230] sm:$0xff]  ;;  %v246_v32 = vmax.f32 %v84_v28, %v165_v29  ;;  %v166_v34 = vld [vmem:[%s1497_s1 + $0x238] sm:$0xff] }
  0x50   :  { %485 = vst [vmem:[%s1499_s3 + $0x210] sm:$0xff] %v404_v21  ;;  %v328_v35 = vld [vmem:[%s1498_s2 + $0x238] sm:$0xff]  ;;  %486 = vst [vmem:[%s1499_s3 + $0x218] sm:$0xff] %v405_v26  ;;  %v247_v37 = vmax.f32 %v85_v33, %v166_v34  ;;  %v86_v38 = vld [vmem:[%s1496_s0 + $0x240] sm:$0xff] }
  0x51   :  { %v407_v36 = vmax.f32 %v245_v27, %v326_v25  ;;  %v167_v39 = vld [vmem:[%s1497_s1 + $0x240] sm:$0xff]  ;;  %487 = vst [vmem:[%s1499_s3 + $0x220] sm:$0xff] %v406_v31  ;;  %v408_v41 = vmax.f32 %v246_v32, %v327_v30  ;;  %v87_v43 = vld [vmem:[%s1496_s0 + $0x248] sm:$0xff]  ;;  %v88_v48 = vld [vmem:[%s1496_s0 + $0x250] sm:$0xff] }
  0x52   :  { %v329_v40 = vld [vmem:[%s1498_s2 + $0x240] sm:$0xff]  ;;  %v248_v42 = vmax.f32 %v86_v38, %v167_v39  ;;  %v168_v44 = vld [vmem:[%s1497_s1 + $0x248] sm:$0xff]  ;;  %v409_v46 = vmax.f32 %v247_v37, %v328_v35  ;;  %v169_v49 = vld [vmem:[%s1497_s1 + $0x250] sm:$0xff] }
  0x53   :  { %v330_v45 = vld [vmem:[%s1498_s2 + $0x248] sm:$0xff]  ;;  %488 = vst [vmem:[%s1499_s3 + $0x228] sm:$0xff] %v407_v36  ;;  %v249_v47 = vmax.f32 %v87_v43, %v168_v44  ;;  %v331_v50 = vld [vmem:[%s1498_s2 + $0x250] sm:$0xff]  ;;  %489 = vst [vmem:[%s1499_s3 + $0x230] sm:$0xff] %v408_v41  ;;  %v250_v52 = vmax.f32 %v88_v48, %v169_v49 }
  0x54   :  { %v410_v51 = vmax.f32 %v248_v42, %v329_v40  ;;  %v89_v53 = vld [vmem:[%s1496_s0 + $0x258] sm:$0xff]  ;;  %490 = vst [vmem:[%s1499_s3 + $0x238] sm:$0xff] %v409_v46  ;;  %v90_v58 = vld [vmem:[%s1496_s0 + $0x260] sm:$0xff]  ;;  %v91_v63 = vld [vmem:[%s1496_s0 + $0x268] sm:$0xff] }
  0x55   :  { %v170_v54 = vld [vmem:[%s1497_s1 + $0x258] sm:$0xff]  ;;  %v411_v56 = vmax.f32 %v249_v47, %v330_v45  ;;  %v171_v59 = vld [vmem:[%s1497_s1 + $0x260] sm:$0xff]  ;;  %v412_v61 = vmax.f32 %v250_v52, %v331_v50  ;;  %v172_v0 = vld [vmem:[%s1497_s1 + $0x268] sm:$0xff] }
  0x56   :  { %v332_v55 = vld [vmem:[%s1498_s2 + $0x258] sm:$0xff]  ;;  %v251_v57 = vmax.f32 %v89_v53, %v170_v54  ;;  %v333_v60 = vld [vmem:[%s1498_s2 + $0x260] sm:$0xff]  ;;  %491 = vst [vmem:[%s1499_s3 + $0x240] sm:$0xff] %v410_v51  ;;  %v252_v62 = vmax.f32 %v90_v58, %v171_v59  ;;  %v334_v1 = vld [vmem:[%s1498_s2 + $0x268] sm:$0xff]  ;;  %v253_v3 = vmax.f32 %v91_v63, %v172_v0 }
  0x57   :  { %492 = vst [vmem:[%s1499_s3 + $0x248] sm:$0xff] %v411_v56  ;;  %v92_v4 = vld [vmem:[%s1496_s0 + $0x270] sm:$0xff]  ;;  %493 = vst [vmem:[%s1499_s3 + $0x250] sm:$0xff] %v412_v61  ;;  %v93_v9 = vld [vmem:[%s1496_s0 + $0x278] sm:$0xff] }
  0x58   :  { %v413_v2 = vmax.f32 %v251_v57, %v332_v55  ;;  %v173_v5 = vld [vmem:[%s1497_s1 + $0x270] sm:$0xff]  ;;  %v414_v7 = vmax.f32 %v252_v62, %v333_v60  ;;  %v174_v10 = vld [vmem:[%s1497_s1 + $0x278] sm:$0xff]  ;;  %v415_v12 = vmax.f32 %v253_v3, %v334_v1  ;;  %v94_v14 = vld [vmem:[%s1496_s0 + $0x280] sm:$0xff] }
  0x59   :  { %v335_v6 = vld [vmem:[%s1498_s2 + $0x270] sm:$0xff]  ;;  %v254_v8 = vmax.f32 %v92_v4, %v173_v5  ;;  %v336_v11 = vld [vmem:[%s1498_s2 + $0x278] sm:$0xff]  ;;  %v255_v13 = vmax.f32 %v93_v9, %v174_v10  ;;  %v175_v15 = vld [vmem:[%s1497_s1 + $0x280] sm:$0xff] }
  0x5a   :  { %494 = vst [vmem:[%s1499_s3 + $0x258] sm:$0xff] %v413_v2  ;;  %v337_v16 = vld [vmem:[%s1498_s2 + $0x280] sm:$0xff]  ;;  %495 = vst [vmem:[%s1499_s3 + $0x260] sm:$0xff] %v414_v7  ;;  %v256_v18 = vmax.f32 %v94_v14, %v175_v15 }
  0x5b   :  { %v416_v17 = vmax.f32 %v254_v8, %v335_v6  ;;  %496 = vst [vmem:[%s1499_s3 + $0x268] sm:$0xff] %v415_v12  ;;  %v417_v19 = vmax.f32 %v255_v13, %v336_v11 }
  0x5c   :  { %v418_v20 = vmax.f32 %v256_v18, %v337_v16 }
  0x5d   :  { %497 = vst [vmem:[%s1499_s3 + $0x270] sm:$0xff] %v416_v17  ;;  %498 = vst [vmem:[%s1499_s3 + $0x278] sm:$0xff] %v417_v19 }
  0x5e   :  { %499 = vst [vmem:[%s1499_s3 + $0x280] sm:$0xff] %v418_v20 }

// kernel: an3ddr_forward.29
= control target key start
LH: loop header
LB: loop body
LE: loop exit
PB: predicated region body
PF: predicated region fallthrough
CT: control target
= control target key end

     0   :  { %s524_s0 = inlined_call_operand.vmem [shape: f32[216,128], index: 0, kind: input, shape index: {}]   ;;  %s525_s1 = inlined_call_operand.vmem [shape: f32[216,128], index: 1, kind: input, shape index: {}]   ;;  %s526_s2 = inlined_call_operand.vmem [shape: f32[216,128], index: 2, kind: input, shape index: {}]   ;;  %s527_s3 = inlined_call_operand.vmem [shape: f32[216,128], index: 3, kind: output, shape index: {}]  }
   0x1   :  { %v14_v0 = vld [vmem:[%s524_s0] sm:$0xff]  ;;  %v15_v4 = vld [vmem:[%s524_s0 + $0x8] sm:$0xff]  ;;  %v16_v8 = vld [vmem:[%s524_s0 + $0x10] sm:$0xff] }
   0x2   :  { %v41_v1 = vld [vmem:[%s525_s1] sm:$0xff]  ;;  %v42_v5 = vld [vmem:[%s525_s1 + $0x8] sm:$0xff]  ;;  %v43_v9 = vld [vmem:[%s525_s1 + $0x10] sm:$0xff] }
   0x3   :  { %v95_v2 = vld [vmem:[%s526_s2] sm:$0xff]  ;;  %v68_v3 = vmax.f32 %v14_v0, %v41_v1  ;;  %v96_v6 = vld [vmem:[%s526_s2 + $0x8] sm:$0xff]  ;;  %v69_v7 = vmax.f32 %v15_v4, %v42_v5  ;;  %v97_v10 = vld [vmem:[%s526_s2 + $0x10] sm:$0xff]  ;;  %v70_v12 = vmax.f32 %v16_v8, %v43_v9 }
   0x4   :  { %v17_v13 = vld [vmem:[%s524_s0 + $0x18] sm:$0xff]  ;;  %v18_v18 = vld [vmem:[%s524_s0 + $0x20] sm:$0xff]  ;;  %v19_v23 = vld [vmem:[%s524_s0 + $0x28] sm:$0xff] }
   0x5   :  { %v122_v11 = vmax.f32 %v68_v3, %v95_v2  ;;  %v44_v14 = vld [vmem:[%s525_s1 + $0x18] sm:$0xff]  ;;  %v123_v16 = vmax.f32 %v69_v7, %v96_v6  ;;  %v45_v19 = vld [vmem:[%s525_s1 + $0x20] sm:$0xff]  ;;  %v124_v21 = vmax.f32 %v70_v12, %v97_v10  ;;  %v46_v24 = vld [vmem:[%s525_s1 + $0x28] sm:$0xff] }
   0x6   :  { %v98_v15 = vld [vmem:[%s526_s2 + $0x18] sm:$0xff]  ;;  %v71_v17 = vmax.f32 %v17_v13, %v44_v14  ;;  %v99_v20 = vld [vmem:[%s526_s2 + $0x20] sm:$0xff]  ;;  %v72_v22 = vmax.f32 %v18_v18, %v45_v19  ;;  %v100_v25 = vld [vmem:[%s526_s2 + $0x28] sm:$0xff]  ;;  %v73_v27 = vmax.f32 %v19_v23, %v46_v24 }
   0x7   :  { %149 = vst [vmem:[%s527_s3] sm:$0xff] %v122_v11  ;;  %150 = vst [vmem:[%s527_s3 + $0x8] sm:$0xff] %v123_v16  ;;  %v20_v28 = vld [vmem:[%s524_s0 + $0x30] sm:$0xff]  ;;  %v21_v33 = vld [vmem:[%s524_s0 + $0x38] sm:$0xff] }
   0x8   :  { %v125_v26 = vmax.f32 %v71_v17, %v98_v15  ;;  %v47_v29 = vld [vmem:[%s525_s1 + $0x30] sm:$0xff]  ;;  %151 = vst [vmem:[%s527_s3 + $0x10] sm:$0xff] %v124_v21  ;;  %v126_v31 = vmax.f32 %v72_v22, %v99_v20  ;;  %v48_v34 = vld [vmem:[%s525_s1 + $0x38] sm:$0xff]  ;;  %v127_v36 = vmax.f32 %v73_v27, %v100_v25  ;;  %v22_v38 = vld [vmem:[%s524_s0 + $0x40] sm:$0xff] }
   0x9   :  { %v101_v30 = vld [vmem:[%s526_s2 + $0x30] sm:$0xff]  ;;  %v74_v32 = vmax.f32 %v20_v28, %v47_v29  ;;  %v102_v35 = vld [vmem:[%s526_s2 + $0x38] sm:$0xff]  ;;  %v75_v37 = vmax.f32 %v21_v33, %v48_v34  ;;  %v49_v39 = vld [vmem:[%s525_s1 + $0x40] sm:$0xff] }
   0xa   :  { %152 = vst [vmem:[%s527_s3 + $0x18] sm:$0xff] %v125_v26  ;;  %v103_v40 = vld [vmem:[%s526_s2 + $0x40] sm:$0xff]  ;;  %153 = vst [vmem:[%s527_s3 + $0x20] sm:$0xff] %v126_v31  ;;  %v76_v42 = vmax.f32 %v22_v38, %v49_v39  ;;  %v23_v43 = vld [vmem:[%s524_s0 + $0x48] sm:$0xff] }
   0xb   :  { %v128_v41 = vmax.f32 %v74_v32, %v101_v30  ;;  %v50_v44 = vld [vmem:[%s525_s1 + $0x48] sm:$0xff]  ;;  %154 = vst [vmem:[%s527_s3 + $0x28] sm:$0xff] %v127_v36  ;;  %v129_v46 = vmax.f32 %v75_v37, %v102_v35  ;;  %v24_v48 = vld [vmem:[%s524_s0 + $0x50] sm:$0xff]  ;;  %v25_v53 = vld [vmem:[%s524_s0 + $0x58] sm:$0xff] }
   0xc   :  { %v104_v45 = vld [vmem:[%s526_s2 + $0x48] sm:$0xff]  ;;  %v77_v47 = vmax.f32 %v23_v43, %v50_v44  ;;  %v51_v49 = vld [vmem:[%s525_s1 + $0x50] sm:$0xff]  ;;  %v130_v51 = vmax.f32 %v76_v42, %v103_v40  ;;  %v52_v54 = vld [vmem:[%s525_s1 + $0x58] sm:$0xff] }
   0xd   :  { %v105_v50 = vld [vmem:[%s526_s2 + $0x50] sm:$0xff]  ;;  %155 = vst [vmem:[%s527_s3 + $0x30] sm:$0xff] %v128_v41  ;;  %v78_v52 = vmax.f32 %v24_v48, %v51_v49  ;;  %v106_v55 = vld [vmem:[%s526_s2 + $0x58] sm:$0xff]  ;;  %156 = vst [vmem:[%s527_s3 + $0x38] sm:$0xff] %v129_v46  ;;  %v79_v57 = vmax.f32 %v25_v53, %v52_v54 }
   0xe   :  { %v131_v56 = vmax.f32 %v77_v47, %v104_v45  ;;  %v26_v58 = vld [vmem:[%s524_s0 + $0x60] sm:$0xff]  ;;  %157 = vst [vmem:[%s527_s3 + $0x40] sm:$0xff] %v130_v51  ;;  %v27_v63 = vld [vmem:[%s524_s0 + $0x68] sm:$0xff]  ;;  %v28_v4 = vld [vmem:[%s524_s0 + $0x70] sm:$0xff] }
   0xf   :  { %v53_v59 = vld [vmem:[%s525_s1 + $0x60] sm:$0xff]  ;;  %v132_v61 = vmax.f32 %v78_v52, %v105_v50  ;;  %v54_v0 = vld [vmem:[%s525_s1 + $0x68] sm:$0xff]  ;;  %v133_v2 = vmax.f32 %v79_v57, %v106_v55  ;;  %v55_v5 = vld [vmem:[%s525_s1 + $0x70] sm:$0xff] }
  0x10   :  { %v107_v60 = vld [vmem:[%s526_s2 + $0x60] sm:$0xff]  ;;  %v80_v62 = vmax.f32 %v26_v58, %v53_v59  ;;  %v108_v1 = vld [vmem:[%s526_s2 + $0x68] sm:$0xff]  ;;  %158 = vst [vmem:[%s527_s3 + $0x48] sm:$0xff] %v131_v56  ;;  %v81_v3 = vmax.f32 %v27_v63, %v54_v0  ;;  %v109_v6 = vld [vmem:[%s526_s2 + $0x70] sm:$0xff]  ;;  %v82_v8 = vmax.f32 %v28_v4, %v55_v5 }
  0x11   :  { %159 = vst [vmem:[%s527_s3 + $0x50] sm:$0xff] %v132_v61  ;;  %v29_v9 = vld [vmem:[%s524_s0 + $0x78] sm:$0xff]  ;;  %160 = vst [vmem:[%s527_s3 + $0x58] sm:$0xff] %v133_v2  ;;  %v30_v14 = vld [vmem:[%s524_s0 + $0x80] sm:$0xff] }
  0x12   :  { %v134_v7 = vmax.f32 %v80_v62, %v107_v60  ;;  %v56_v10 = vld [vmem:[%s525_s1 + $0x78] sm:$0xff]  ;;  %v135_v12 = vmax.f32 %v81_v3, %v108_v1  ;;  %v57_v15 = vld [vmem:[%s525_s1 + $0x80] sm:$0xff]  ;;  %v136_v17 = vmax.f32 %v82_v8, %v109_v6  ;;  %v31_v19 = vld [vmem:[%s524_s0 + $0x88] sm:$0xff] }
  0x13   :  { %v110_v11 = vld [vmem:[%s526_s2 + $0x78] sm:$0xff]  ;;  %v83_v13 = vmax.f32 %v29_v9, %v56_v10  ;;  %v111_v16 = vld [vmem:[%s526_s2 + $0x80] sm:$0xff]  ;;  %v84_v18 = vmax.f32 %v30_v14, %v57_v15  ;;  %v58_v20 = vld [vmem:[%s525_s1 + $0x88] sm:$0xff] }
  0x14   :  { %161 = vst [vmem:[%s527_s3 + $0x60] sm:$0xff] %v134_v7  ;;  %v112_v21 = vld [vmem:[%s526_s2 + $0x88] sm:$0xff]  ;;  %162 = vst [vmem:[%s527_s3 + $0x68] sm:$0xff] %v135_v12  ;;  %v85_v23 = vmax.f32 %v31_v19, %v58_v20  ;;  %v32_v24 = vld [vmem:[%s524_s0 + $0x90] sm:$0xff] }
  0x15   :  { %v137_v22 = vmax.f32 %v83_v13, %v110_v11  ;;  %v59_v25 = vld [vmem:[%s525_s1 + $0x90] sm:$0xff]  ;;  %163 = vst [vmem:[%s527_s3 + $0x70] sm:$0xff] %v136_v17  ;;  %v138_v27 = vmax.f32 %v84_v18, %v111_v16  ;;  %v33_v29 = vld [vmem:[%s524_s0 + $0x98] sm:$0xff]  ;;  %v34_v34 = vld [vmem:[%s524_s0 + $0xa0] sm:$0xff] }
  0x16   :  { %v113_v26 = vld [vmem:[%s526_s2 + $0x90] sm:$0xff]  ;;  %v86_v28 = vmax.f32 %v32_v24, %v59_v25  ;;  %v60_v30 = vld [vmem:[%s525_s1 + $0x98] sm:$0xff]  ;;  %v139_v32 = vmax.f32 %v85_v23, %v112_v21  ;;  %v61_v35 = vld [vmem:[%s525_s1 + $0xa0] sm:$0xff] }
  0x17   :  { %v114_v31 = vld [vmem:[%s526_s2 + $0x98] sm:$0xff]  ;;  %164 = vst [vmem:[%s527_s3 + $0x78] sm:$0xff] %v137_v22  ;;  %v87_v33 = vmax.f32 %v33_v29, %v60_v30  ;;  %v115_v36 = vld [vmem:[%s526_s2 + $0xa0] sm:$0xff]  ;;  %165 = vst [vmem:[%s527_s3 + $0x80] sm:$0xff] %v138_v27  ;;  %v88_v38 = vmax.f32 %v34_v34, %v61_v35 }
  0x18   :  { %v140_v37 = vmax.f32 %v86_v28, %v113_v26  ;;  %v35_v39 = vld [vmem:[%s524_s0 + $0xa8] sm:$0xff]  ;;  %166 = vst [vmem:[%s527_s3 + $0x88] sm:$0xff] %v139_v32  ;;  %v36_v44 = vld [vmem:[%s524_s0 + $0xb0] sm:$0xff]  ;;  %v37_v49 = vld [vmem:[%s524_s0 + $0xb8] sm:$0xff] }
  0x19   :  { %v62_v40 = vld [vmem:[%s525_s1 + $0xa8] sm:$0xff]  ;;  %v141_v42 = vmax.f32 %v87_v33, %v114_v31  ;;  %v63_v45 = vld [vmem:[%s525_s1 + $0xb0] sm:$0xff]  ;;  %v142_v47 = vmax.f32 %v88_v38, %v115_v36  ;;  %v64_v50 = vld [vmem:[%s525_s1 + $0xb8] sm:$0xff] }
  0x1a   :  { %v116_v41 = vld [vmem:[%s526_s2 + $0xa8] sm:$0xff]  ;;  %v89_v43 = vmax.f32 %v35_v39, %v62_v40  ;;  %v117_v46 = vld [vmem:[%s526_s2 + $0xb0] sm:$0xff]  ;;  %167 = vst [vmem:[%s527_s3 + $0x90] sm:$0xff] %v140_v37  ;;  %v90_v48 = vmax.f32 %v36_v44, %v63_v45  ;;  %v118_v51 = vld [vmem:[%s526_s2 + $0xb8] sm:$0xff]  ;;  %v91_v53 = vmax.f32 %v37_v49, %v64_v50 }
  0x1b   :  { %168 = vst [vmem:[%s527_s3 + $0x98] sm:$0xff] %v141_v42  ;;  %v38_v54 = vld [vmem:[%s524_s0 + $0xc0] sm:$0xff]  ;;  %169 = vst [vmem:[%s527_s3 + $0xa0] sm:$0xff] %v142_v47  ;;  %v39_v59 = vld [vmem:[%s524_s0 + $0xc8] sm:$0xff] }
  0x1c   :  { %v143_v52 = vmax.f32 %v89_v43, %v116_v41  ;;  %v65_v55 = vld [vmem:[%s525_s1 + $0xc0] sm:$0xff]  ;;  %v144_v57 = vmax.f32 %v90_v48, %v117_v46  ;;  %v66_v60 = vld [vmem:[%s525_s1 + $0xc8] sm:$0xff]  ;;  %v145_v62 = vmax.f32 %v91_v53, %v118_v51  ;;  %v40_v0 = vld [vmem:[%s524_s0 + $0xd0] sm:$0xff] }
  0x1d   :  { %v119_v56 = vld [vmem:[%s526_s2 + $0xc0] sm:$0xff]  ;;  %v92_v58 = vmax.f32 %v38_v54, %v65_v55  ;;  %v120_v61 = vld [vmem:[%s526_s2 + $0xc8] sm:$0xff]  ;;  %v93_v63 = vmax.f32 %v39_v59, %v66_v60  ;;  %v67_v1 = vld [vmem:[%s525_s1 + $0xd0] sm:$0xff] }
  0x1e   :  { %170 = vst [vmem:[%s527_s3 + $0xa8] sm:$0xff] %v143_v52  ;;  %v121_v2 = vld [vmem:[%s526_s2 + $0xd0] sm:$0xff]  ;;  %171 = vst [vmem:[%s527_s3 + $0xb0] sm:$0xff] %v144_v57  ;;  %v94_v4 = vmax.f32 %v40_v0, %v67_v1 }
  0x1f   :  { %v146_v3 = vmax.f32 %v92_v58, %v119_v56  ;;  %172 = vst [vmem:[%s527_s3 + $0xb8] sm:$0xff] %v145_v62  ;;  %v147_v5 = vmax.f32 %v93_v63, %v120_v61 }
  0x20   :  { %v148_v6 = vmax.f32 %v94_v4, %v121_v2 }
  0x21   :  { %173 = vst [vmem:[%s527_s3 + $0xc0] sm:$0xff] %v146_v3  ;;  %174 = vst [vmem:[%s527_s3 + $0xc8] sm:$0xff] %v147_v5 }
  0x22   :  { %175 = vst [vmem:[%s527_s3 + $0xd0] sm:$0xff] %v148_v6 }

// kernel: an3ddr_forward.31
= control target key start
LH: loop header
LB: loop body
LE: loop exit
PB: predicated region body
PF: predicated region fallthrough
CT: control target
= control target key end

     0   :  { %v105_v0 = vmov 0.0   ;;  %s187_s1 = inlined_call_operand.vmem [shape: f32[1,128], index: 1, kind: output, shape index: {0}]   ;;  %s188_s2 = inlined_call_operand.vmem [shape: f32[1,128], index: 2, kind: output, shape index: {1}]   ;;  %s189_s0 = inlined_call_operand.vmem [shape: f32[128,128], index: 0, kind: input, shape index: {}]  }
   0x1   :  { %14 = vst [vmem:[%s187_s1] sm:$0x1] %v105_v0  ;;  %15 = vst [vmem:[%s188_s2] sm:$0x1] %v105_v0  ;;  %v16_v1 = vld [vmem:[%s189_s0] sm:$0xff]  ;;  %v17_v2 = vld [vmem:[%s189_s0 + $0x8] sm:$0xff] }
   0x2   :  { %v18_v3 = vld [vmem:[%s189_s0 + $0x10] sm:$0xff]  ;;  %v19_v4 = vld [vmem:[%s189_s0 + $0x18] sm:$0xff]  ;;  %v33_v5 = vadd.f32 %v17_v2, %v16_v1  ;;  %v57_v6 = vmul.f32 %v16_v1, %v16_v1  ;;  %v58_v7 = vmul.f32 %v17_v2, %v17_v2  ;;  %v20_v9 = vld [vmem:[%s189_s0 + $0x20] sm:$0xff] }
   0x3   :  { %v59_v8 = vmul.f32 %v18_v3, %v18_v3  ;;  %v60_v11 = vmul.f32 %v19_v4, %v19_v4  ;;  %v21_v13 = vld [vmem:[%s189_s0 + $0x28] sm:$0xff]  ;;  %v61_v15 = vmul.f32 %v20_v9, %v20_v9  ;;  %v22_v17 = vld [vmem:[%s189_s0 + $0x30] sm:$0xff]  ;;  %v23_v21 = vld [vmem:[%s189_s0 + $0x38] sm:$0xff] }
   0x4   :  { %v34_v10 = vadd.f32 %v33_v5, %v18_v3  ;;  %v73_v12 = vadd.f32 %v58_v7, %v57_v6  ;;  %v62_v19 = vmul.f32 %v21_v13, %v21_v13  ;;  %v63_v23 = vmul.f32 %v22_v17, %v22_v17  ;;  %v24_v25 = vld [vmem:[%s189_s0 + $0x40] sm:$0xff]  ;;  %v25_v29 = vld [vmem:[%s189_s0 + $0x48] sm:$0xff]  ;;  %v26_v33 = vld [vmem:[%s189_s0 + $0x50] sm:$0xff] }
   0x5   :  { %v64_v27 = vmul.f32 %v23_v21, %v23_v21  ;;  %v65_v31 = vmul.f32 %v24_v25, %v24_v25  ;;  %v66_v35 = vmul.f32 %v25_v29, %v25_v29  ;;  %v27_v37 = vld [vmem:[%s189_s0 + $0x58] sm:$0xff]  ;;  %v67_v39 = vmul.f32 %v26_v33, %v26_v33  ;;  %v28_v41 = vld [vmem:[%s189_s0 + $0x60] sm:$0xff]  ;;  %v29_v45 = vld [vmem:[%s189_s0 + $0x68] sm:$0xff] }
   0x6   :  { %v35_v14 = vadd.f32 %v34_v10, %v19_v4  ;;  %v74_v16 = vadd.f32 %v73_v12, %v59_v8  ;;  %v68_v43 = vmul.f32 %v27_v37, %v27_v37  ;;  %v69_v47 = vmul.f32 %v28_v41, %v28_v41  ;;  %v30_v49 = vld [vmem:[%s189_s0 + $0x70] sm:$0xff]  ;;  %v31_v53 = vld [vmem:[%s189_s0 + $0x78] sm:$0xff] }
   0x7   :  { %v70_v51 = vmul.f32 %v29_v45, %v29_v45  ;;  %v71_v55 = vmul.f32 %v30_v49, %v30_v49  ;;  %v72_v58 = vmul.f32 %v31_v53, %v31_v53 }
   0x8   :  { %v36_v18 = vadd.f32 %v35_v14, %v20_v9  ;;  %v75_v20 = vadd.f32 %v74_v16, %v60_v11  ;;  %v32_v7 = vld [vmem:[%s187_s1] sm:$0x1] }
   0x9   :  { %v56_v12 = vld [vmem:[%s188_s2] sm:$0x1] }
   0xa   :  { %v37_v22 = vadd.f32 %v36_v18, %v21_v13  ;;  %v76_v24 = vadd.f32 %v75_v20, %v61_v15 }
   0xc   :  { %v38_v26 = vadd.f32 %v37_v22, %v22_v17  ;;  %v77_v28 = vadd.f32 %v76_v24, %v62_v19 }
   0xe   :  { %v39_v30 = vadd.f32 %v38_v26, %v23_v21  ;;  %v78_v32 = vadd.f32 %v77_v28, %v63_v23 }
  0x10   :  { %v40_v34 = vadd.f32 %v39_v30, %v24_v25  ;;  %v79_v36 = vadd.f32 %v78_v32, %v64_v27 }
  0x12   :  { %v41_v38 = vadd.f32 %v40_v34, %v25_v29  ;;  %v80_v40 = vadd.f32 %v79_v36, %v65_v31 }
  0x14   :  { %v42_v42 = vadd.f32 %v41_v38, %v26_v33  ;;  %v81_v44 = vadd.f32 %v80_v40, %v66_v35 }
  0x16   :  { %v43_v46 = vadd.f32 %v42_v42, %v27_v37  ;;  %v82_v48 = vadd.f32 %v81_v44, %v67_v39 }
  0x18   :  { %v44_v50 = vadd.f32 %v43_v46, %v28_v41  ;;  %v83_v52 = vadd.f32 %v82_v48, %v68_v43 }
  0x1a   :  { %v45_v54 = vadd.f32 %v44_v50, %v29_v45  ;;  %v84_v56 = vadd.f32 %v83_v52, %v69_v47 }
  0x1c   :  { %v46_v57 = vadd.f32 %v45_v54, %v30_v49  ;;  %v85_v59 = vadd.f32 %v84_v56, %v70_v51 }
  0x1e   :  { %v47_v60 = vadd.f32 %v46_v57, %v31_v53  ;;  %v86_v61 = vadd.f32 %v85_v59, %v71_v55 }
  0x20   :  { %v48_v62 = vrot.slane %v47_v60, 4  ;;  %v87_v63 = vadd.f32 %v86_v61, %v72_v58 }
  0x22   :  { %v49_v0 = vadd.f32 %v48_v62, %v47_v60  ;;  %v88_v1 = vrot.slane %v87_v63, 4 }
  0x24   :  { %v50_v2 = vrot.slane %v49_v0, 2  ;;  %v89_v3 = vadd.f32 %v88_v1, %v87_v63 }
  0x26   :  { %v51_v4 = vadd.f32 %v50_v2, %v49_v0  ;;  %v90_v5 = vrot.slane %v89_v3, 2 }
  0x28   :  { %v52_v6 = vrot.slane %v51_v4, 1  ;;  %v91_v8 = vadd.f32 %v90_v5, %v89_v3 }
  0x2a   :  { %v53_v9 = vadd.f32 %v52_v6, %v51_v4  ;;  %v92_v10 = vrot.slane %v91_v8, 1 }
  0x2c   :  { %v54_v11 = vadd.f32 %v53_v9, %v32_v7  ;;  %v93_v13 = vadd.f32 %v92_v10, %v91_v8 }
  0x2e   :  { %55 = vst [vmem:[%s187_s1] sm:$0x1] %v54_v11  ;;  %v94_v14 = vadd.f32 %v93_v13, %v56_v12 }
  0x30   :  { %95 = vst [vmem:[%s188_s2] sm:$0x1] %v94_v14 }

// kernel: an3ddr_forward.32
= control target key start
LH: loop header
LB: loop body
LE: loop exit
PB: predicated region body
PF: predicated region fallthrough
CT: control target
= control target key end

     0   :  { %s254_s0 = inlined_call_operand.vmem [shape: f32[128,128], index: 0, kind: input, shape index: {}]   ;;  %s255_s1 = inlined_call_operand.vmem [shape: f32[1,128], index: 1, kind: input, shape index: {}]   ;;  %s256_s2 = inlined_call_operand.vmem [shape: f32[1,128], index: 2, kind: input, shape index: {}]   ;;  %s257_s3 = inlined_call_operand.vmem [shape: f32[128,128], index: 3, kind: output, shape index: {}]  }
   0x1   :  { %v14_v0 = vld [vmem:[%s254_s0] sm:$0xff]  ;;  %v15_v4 = vld [vmem:[%s254_s0 + $0x8] sm:$0xff]  ;;  %v16_v5 = vld [vmem:[%s254_s0 + $0x10] sm:$0xff] }
   0x2   :  { %v112_v1 = vld [vmem:[%s255_s1] ss:$0 sm:$0xff]  ;;  %v17_v6 = vld [vmem:[%s254_s0 + $0x18] sm:$0xff]  ;;  %v19_v11 = vld [vmem:[%s254_s0 + $0x28] sm:$0xff] }
   0x3   :  { %v143_v2 = vld [vmem:[%s256_s2] ss:$0 sm:$0xff]  ;;  %v37_v3 = vmul.f32 %v112_v1, %v14_v0  ;;  %v38_v7 = vmul.f32 %v112_v1, %v15_v4  ;;  %v39_v8 = vmul.f32 %v112_v1, %v16_v5  ;;  %v40_v9 = vmul.f32 %v112_v1, %v17_v6  ;;  %v20_v12 = vld [vmem:[%s254_s0 + $0x30] sm:$0xff]  ;;  %v21_v17 = vld [vmem:[%s254_s0 + $0x38] sm:$0xff] }
   0x4   :  { %v18_v10 = vld [vmem:[%s254_s0 + $0x20] sm:$0xff]  ;;  %v42_v15 = vmul.f32 %v112_v1, %v19_v11  ;;  %v43_v16 = vmul.f32 %v112_v1, %v20_v12  ;;  %v44_v21 = vmul.f32 %v112_v1, %v21_v17  ;;  %v23_v27 = vld [vmem:[%s254_s0 + $0x48] sm:$0xff]  ;;  %v24_v28 = vld [vmem:[%s254_s0 + $0x50] sm:$0xff] }
   0x5   :  { %v60_v13 = vadd.f32 %v143_v2, %v37_v3  ;;  %v41_v14 = vmul.f32 %v112_v1, %v18_v10  ;;  %v61_v18 = vadd.f32 %v143_v2, %v38_v7  ;;  %v62_v19 = vadd.f32 %v143_v2, %v39_v8  ;;  %v22_v22 = vld [vmem:[%s254_s0 + $0x40] sm:$0xff]  ;;  %v25_v29 = vld [vmem:[%s254_s0 + $0x58] sm:$0xff]  ;;  %v27_v35 = vld [vmem:[%s254_s0 + $0x68] sm:$0xff] }
   0x6   :  { %v63_v20 = vadd.f32 %v143_v2, %v40_v9  ;;  %v65_v25 = vadd.f32 %v143_v2, %v42_v15  ;;  %v66_v26 = vadd.f32 %v143_v2, %v43_v16  ;;  %v67_v33 = vadd.f32 %v143_v2, %v44_v21  ;;  %v26_v34 = vld [vmem:[%s254_s0 + $0x60] sm:$0xff]  ;;  %v28_v36 = vld [vmem:[%s254_s0 + $0x70] sm:$0xff]  ;;  %v29_v41 = vld [vmem:[%s254_s0 + $0x78] sm:$0xff] }
   0x7   :  { %v76_v23 = vmax.f32 %v60_v13, 0.0  ;;  %v64_v24 = vadd.f32 %v143_v2, %v41_v14  ;;  %v77_v30 = vmax.f32 %v61_v18, 0.0  ;;  %v78_v31 = vmax.f32 %v62_v19, 0.0 }
   0x8   :  { %v79_v32 = vmax.f32 %v63_v20, 0.0  ;;  %v81_v38 = vmax.f32 %v65_v25, 0.0  ;;  %v82_v39 = vmax.f32 %v66_v26, 0.0  ;;  %v45_v40 = vmul.f32 %v112_v1, %v22_v22 }
   0x9   :  { %92 = vst [vmem:[%s257_s3] sm:$0xff] %v76_v23  ;;  %v80_v37 = vmax.f32 %v64_v24, 0.0  ;;  %93 = vst [vmem:[%s257_s3 + $0x8] sm:$0xff] %v77_v30  ;;  %v83_v42 = vmax.f32 %v67_v33, 0.0  ;;  %v46_v43 = vmul.f32 %v112_v1, %v23_v27  ;;  %v47_v44 = vmul.f32 %v112_v1, %v24_v28 }
   0xa   :  { %94 = vst [vmem:[%s257_s3 + $0x10] sm:$0xff] %v78_v31  ;;  %95 = vst [vmem:[%s257_s3 + $0x18] sm:$0xff] %v79_v32  ;;  %v48_v45 = vmul.f32 %v112_v1, %v25_v29  ;;  %v68_v46 = vadd.f32 %v143_v2, %v45_v40  ;;  %v49_v47 = vmul.f32 %v112_v1, %v26_v34 }
   0xb   :  { %96 = vst [vmem:[%s257_s3 + $0x20] sm:$0xff] %v80_v37  ;;  %97 = vst [vmem:[%s257_s3 + $0x28] sm:$0xff] %v81_v38  ;;  %v50_v48 = vmul.f32 %v112_v1, %v27_v35  ;;  %v51_v49 = vmul.f32 %v112_v1, %v28_v36  ;;  %v69_v50 = vadd.f32 %v143_v2, %v46_v43 }
   0xc   :  { %98 = vst [vmem:[%s257_s3 + $0x30] sm:$0xff] %v82_v39  ;;  %99 = vst [vmem:[%s257_s3 + $0x38] sm:$0xff] %v83_v42  ;;  %v70_v51 = vadd.f32 %v143_v2, %v47_v44  ;;  %v71_v52 = vadd.f32 %v143_v2, %v48_v45  ;;  %v52_v53 = vmul.f32 %v112_v1, %v29_v41  ;;  %v84_v54 = vmax.f32 %v68_v46, 0.0 }
   0xd   :  { %v72_v55 = vadd.f32 %v143_v2, %v49_v47  ;;  %v73_v56 = vadd.f32 %v143_v2, %v50_v48  ;;  %v74_v57 = vadd.f32 %v143_v2, %v51_v49  ;;  %v85_v58 = vmax.f32 %v69_v50, 0.0 }
   0xe   :  { %v86_v59 = vmax.f32 %v70_v51, 0.0  ;;  %v87_v60 = vmax.f32 %v71_v52, 0.0  ;;  %v75_v61 = vadd.f32 %v143_v2, %v52_v53  ;;  %100 = vst [vmem:[%s257_s3 + $0x40] sm:$0xff] %v84_v54 }
   0xf   :  { %v88_v62 = vmax.f32 %v72_v55, 0.0  ;;  %v89_v63 = vmax.f32 %v73_v56, 0.0  ;;  %v90_v0 = vmax.f32 %v74_v57, 0.0  ;;  %101 = vst [vmem:[%s257_s3 + $0x48] sm:$0xff] %v85_v58 }
  0x10   :  { %102 = vst [vmem:[%s257_s3 + $0x50] sm:$0xff] %v86_v59  ;;  %103 = vst [vmem:[%s257_s3 + $0x58] sm:$0xff] %v87_v60  ;;  %v91_v1 = vmax.f32 %v75_v61, 0.0 }
  0x11   :  { %104 = vst [vmem:[%s257_s3 + $0x60] sm:$0xff] %v88_v62  ;;  %105 = vst [vmem:[%s257_s3 + $0x68] sm:$0xff] %v89_v63 }
  0x12   :  { %106 = vst [vmem:[%s257_s3 + $0x70] sm:$0xff] %v90_v0  ;;  %107 = vst [vmem:[%s257_s3 + $0x78] sm:$0xff] %v91_v1 }

// kernel: an3ddr_forward.33
= control target key start
LH: loop header
LB: loop body
LE: loop exit
PB: predicated region body
PF: predicated region fallthrough
CT: control target
= control target key end

     0   :  { %s182_s0 = inlined_call_operand.vmem [shape: f32[64,128], index: 0, kind: input, shape index: {}]   ;;  %s183_s1 = inlined_call_operand.vmem [shape: f32[64,128], index: 1, kind: input, shape index: {}]   ;;  %s184_s2 = inlined_call_operand.vmem [shape: f32[64,128], index: 2, kind: input, shape index: {}]   ;;  %s185_s3 = inlined_call_operand.vmem [shape: f32[64,128], index: 3, kind: output, shape index: {}]  }
   0x1   :  { %v14_v0 = vld [vmem:[%s182_s0] sm:$0xff]  ;;  %v15_v4 = vld [vmem:[%s182_s0 + $0x8] sm:$0xff]  ;;  %v16_v8 = vld [vmem:[%s182_s0 + $0x10] sm:$0xff] }
   0x2   :  { %v22_v1 = vld [vmem:[%s183_s1] sm:$0xff]  ;;  %v23_v5 = vld [vmem:[%s183_s1 + $0x8] sm:$0xff]  ;;  %v24_v9 = vld [vmem:[%s183_s1 + $0x10] sm:$0xff] }
   0x3   :  { %v38_v2 = vld [vmem:[%s184_s2] sm:$0xff]  ;;  %v30_v3 = vmax.f32 %v14_v0, %v22_v1  ;;  %v39_v6 = vld [vmem:[%s184_s2 + $0x8] sm:$0xff]  ;;  %v31_v7 = vmax.f32 %v15_v4, %v23_v5  ;;  %v40_v10 = vld [vmem:[%s184_s2 + $0x10] sm:$0xff]  ;;  %v32_v12 = vmax.f32 %v16_v8, %v24_v9 }
   0x4   :  { %v17_v13 = vld [vmem:[%s182_s0 + $0x18] sm:$0xff]  ;;  %v18_v18 = vld [vmem:[%s182_s0 + $0x20] sm:$0xff]  ;;  %v19_v23 = vld [vmem:[%s182_s0 + $0x28] sm:$0xff] }
   0x5   :  { %v46_v11 = vmax.f32 %v30_v3, %v38_v2  ;;  %v25_v14 = vld [vmem:[%s183_s1 + $0x18] sm:$0xff]  ;;  %v47_v16 = vmax.f32 %v31_v7, %v39_v6  ;;  %v26_v19 = vld [vmem:[%s183_s1 + $0x20] sm:$0xff]  ;;  %v48_v21 = vmax.f32 %v32_v12, %v40_v10  ;;  %v27_v24 = vld [vmem:[%s183_s1 + $0x28] sm:$0xff] }
   0x6   :  { %v41_v15 = vld [vmem:[%s184_s2 + $0x18] sm:$0xff]  ;;  %v33_v17 = vmax.f32 %v17_v13, %v25_v14  ;;  %v42_v20 = vld [vmem:[%s184_s2 + $0x20] sm:$0xff]  ;;  %v34_v22 = vmax.f32 %v18_v18, %v26_v19  ;;  %v43_v25 = vld [vmem:[%s184_s2 + $0x28] sm:$0xff]  ;;  %v35_v27 = vmax.f32 %v19_v23, %v27_v24 }
   0x7   :  { %54 = vst [vmem:[%s185_s3] sm:$0xff] %v46_v11  ;;  %55 = vst [vmem:[%s185_s3 + $0x8] sm:$0xff] %v47_v16  ;;  %v20_v28 = vld [vmem:[%s182_s0 + $0x30] sm:$0xff]  ;;  %v21_v33 = vld [vmem:[%s182_s0 + $0x38] sm:$0xff] }
   0x8   :  { %v49_v26 = vmax.f32 %v33_v17, %v41_v15  ;;  %v28_v29 = vld [vmem:[%s183_s1 + $0x30] sm:$0xff]  ;;  %56 = vst [vmem:[%s185_s3 + $0x10] sm:$0xff] %v48_v21  ;;  %v50_v31 = vmax.f32 %v34_v22, %v42_v20  ;;  %v29_v34 = vld [vmem:[%s183_s1 + $0x38] sm:$0xff]  ;;  %v51_v36 = vmax.f32 %v35_v27, %v43_v25 }
   0x9   :  { %v44_v30 = vld [vmem:[%s184_s2 + $0x30] sm:$0xff]  ;;  %v36_v32 = vmax.f32 %v20_v28, %v28_v29  ;;  %v45_v35 = vld [vmem:[%s184_s2 + $0x38] sm:$0xff]  ;;  %v37_v37 = vmax.f32 %v21_v33, %v29_v34 }
   0xa   :  { %57 = vst [vmem:[%s185_s3 + $0x18] sm:$0xff] %v49_v26  ;;  %58 = vst [vmem:[%s185_s3 + $0x20] sm:$0xff] %v50_v31 }
   0xb   :  { %v52_v38 = vmax.f32 %v36_v32, %v44_v30  ;;  %59 = vst [vmem:[%s185_s3 + $0x28] sm:$0xff] %v51_v36  ;;  %v53_v39 = vmax.f32 %v37_v37, %v45_v35 }
   0xd   :  { %60 = vst [vmem:[%s185_s3 + $0x30] sm:$0xff] %v52_v38  ;;  %61 = vst [vmem:[%s185_s3 + $0x38] sm:$0xff] %v53_v39 }

// kernel: an3ddr_forward.30
= control target key start
LH: loop header
LB: loop body
LE: loop exit
PB: predicated region body
PF: predicated region fallthrough
CT: control target
= control target key end

     0   :  { %s4398_s1 = inlined_call_operand.vmem [shape: bf16[1792,128], index: 1, kind: input, shape index: {}]   ;;  %s4399_s0 = inlined_call_operand.vmem [shape: bf16[128,1792], index: 0, kind: input, shape index: {}]   ;;  %s4400_s2 = inlined_call_operand.vmem [shape: f32[1,128], index: 2, kind: input, shape index: {}]   ;;  %s4401_s3 = inlined_call_operand.vmem [shape: f32[128,128], index: 3, kind: output, shape index: {}]  }
   0x1   :  { %v3081_v0 = vld [vmem:[%s4398_s1 + $0x78] sm:$0xff]   ;;  %v3083_v2 = vld [vmem:[%s4398_s1 + $0x70] sm:$0xff]   ;;  %v3085_v4 = vld [vmem:[%s4398_s1 + $0x68] sm:$0xff]  }
   0x2   :  { %v3082_v1 = vld [vmem:[%s4398_s1 + $0x38] sm:$0xff]   ;;  %2617 = vmatprep.subr.bf16.mxu0 %v3081_v0  ;;  %3065 = vmatprep.subr.bf16.mxu1 %v3081_v0  ;;  %v3084_v3 = vld [vmem:[%s4398_s1 + $0x30] sm:$0xff]   ;;  %v3086_v5 = vld [vmem:[%s4398_s1 + $0x28] sm:$0xff]  }
   0x3   :  { %2618 = vmatpush3.bf16.msra.mxu0 %v3082_v1  ;;  %3073 = vmatpush3.bf16.msra.mxu1 %v3082_v1  ;;  %v3087_v6 = vld [vmem:[%s4398_s1 + $0x60] sm:$0xff]   ;;  %v3089_v8 = vld [vmem:[%s4398_s1 + $0x58] sm:$0xff]   ;;  %v3091_v10 = vld [vmem:[%s4398_s1 + $0x50] sm:$0xff]  }
   0x4   :  { %2619 = vmatprep.subr.bf16.mxu0 %v3083_v2  ;;  %3066 = vmatprep.subr.bf16.mxu1 %v3083_v2  ;;  %v3088_v7 = vld [vmem:[%s4398_s1 + $0x20] sm:$0xff]   ;;  %v3090_v9 = vld [vmem:[%s4398_s1 + $0x18] sm:$0xff]   ;;  %v3092_v13 = vld [vmem:[%s4398_s1 + $0x10] sm:$0xff]  }
   0x5   :  { %v3099_v11 = vld [vmem:[%s4399_s0 + $0x4] ss:$56 sps:$4 sm:$0xff]   ;;  %v3093_v14 = vld [vmem:[%s4398_s1 + $0x48] sm:$0xff]   ;;  %v3097_v18 = vld [vmem:[%s4399_s0] ss:$56 sps:$4 sm:$0xff]  }
   0x6   :  { %v3102_v12 = vld [vmem:[%s4399_s0 + $0x1c4] ss:$56 sps:$4 sm:$0xff]   ;;  %1651 = vmatprep.mubr.bf16.mxu0 %v3099_v11  ;;  %v3094_v15 = vld [vmem:[%s4398_s1 + $0x8] sm:$0xff]   ;;  %v3100_v19 = vld [vmem:[%s4399_s0 + $0x1c0] ss:$56 sps:$4 sm:$0xff]  }
   0x7   :  { %2620 = vmatpush3.bf16.msra.mxu0 %v3084_v3  ;;  %3074 = vmatpush3.bf16.msra.mxu1 %v3084_v3  ;;  %v3095_v16 = vld [vmem:[%s4398_s1 + $0x40] sm:$0xff]   ;;  %v3103_v20 = vld [vmem:[%s4398_s1 + $0xf8] sm:$0xff]   ;;  %v3107_v24 = vld [vmem:[%s4398_s1 + $0xf0] sm:$0xff]  }
   0x8   :  { %2621 = vmatprep.subr.bf16.mxu0 %v3085_v4  ;;  %3067 = vmatprep.subr.bf16.mxu1 %v3085_v4  ;;  %v3096_v17 = vld [vmem:[%s4398_s1] sm:$0xff]   ;;  %v3104_v21 = vld [vmem:[%s4398_s1 + $0x178] sm:$0xff]   ;;  %v3108_v25 = vld [vmem:[%s4398_s1 + $0x170] sm:$0xff]  }
   0x9   :  { %1683 = vmatprep.mubr.bf16.mxu1 %v3102_v12  ;;  %v3105_v22 = vld [vmem:[%s4398_s1 + $0xb8] sm:$0xff]   ;;  %v3111_v26 = vld [vmem:[%s4399_s0 + $0x74] ss:$56 sps:$4 sm:$0xff]   ;;  %v3115_v31 = vld [vmem:[%s4399_s0 + $0x70] ss:$56 sps:$4 sm:$0xff]  }
   0xa   :  { %v3106_v23 = vld [vmem:[%s4398_s1 + $0x138] sm:$0xff]   ;;  %v3109_v27 = vld [vmem:[%s4398_s1 + $0xb0] sm:$0xff]   ;;  %v3117_v30 = vld [vmem:[%s4398_s1 + $0xe8] sm:$0xff]  }
   0xb   :  { %2622 = vmatpush3.bf16.msra.mxu0 %v3086_v5  ;;  %3075 = vmatpush3.bf16.msra.mxu1 %v3086_v5  ;;  %v3113_v28 = vld [vmem:[%s4399_s0 + $0x234] ss:$56 sps:$4 sm:$0xff]   ;;  %v3116_v33 = vld [vmem:[%s4399_s0 + $0x230] ss:$56 sps:$4 sm:$0xff]   ;;  %v3121_v36 = vld [vmem:[%s4398_s1 + $0xe0] sm:$0xff]  }
   0xc   :  { %2623 = vmatprep.subr.bf16.mxu0 %v3087_v6  ;;  %3068 = vmatprep.subr.bf16.mxu1 %v3087_v6  ;;  %v3110_v29 = vld [vmem:[%s4398_s1 + $0x130] sm:$0xff]   ;;  %v3118_v32 = vld [vmem:[%s4398_s1 + $0x168] sm:$0xff]   ;;  %v3122_v37 = vld [vmem:[%s4398_s1 + $0x160] sm:$0xff]  }
   0xd   :  { %v3119_v34 = vld [vmem:[%s4398_s1 + $0xa8] sm:$0xff]   ;;  %v3125_v38 = vld [vmem:[%s4399_s0 + $0xe4] ss:$56 sps:$4 sm:$0xff]   ;;  %v3129_v43 = vld [vmem:[%s4399_s0 + $0xe0] ss:$56 sps:$4 sm:$0xff]  }
   0xe   :  { %v3120_v35 = vld [vmem:[%s4398_s1 + $0x128] sm:$0xff]   ;;  %v3123_v39 = vld [vmem:[%s4398_s1 + $0xa0] sm:$0xff]   ;;  %v3131_v42 = vld [vmem:[%s4398_s1 + $0xd8] sm:$0xff]  }
   0xf   :  { %2624 = vmatpush3.bf16.msra.mxu0 %v3088_v7  ;;  %3076 = vmatpush3.bf16.msra.mxu1 %v3088_v7  ;;  %v3127_v40 = vld [vmem:[%s4399_s0 + $0x2a4] ss:$56 sps:$4 sm:$0xff]   ;;  %v3130_v44 = vld [vmem:[%s4399_s0 + $0x2a0] ss:$56 sps:$4 sm:$0xff]   ;;  %v3135_v48 = vld [vmem:[%s4398_s1 + $0xd0] sm:$0xff]  }
  0x10   :  { %2625 = vmatprep.subr.bf16.mxu0 %v3089_v8  ;;  %3069 = vmatprep.subr.bf16.mxu1 %v3089_v8  ;;  %v3124_v41 = vld [vmem:[%s4398_s1 + $0x120] sm:$0xff]   ;;  %v3132_v45 = vld [vmem:[%s4398_s1 + $0x158] sm:$0xff]   ;;  %v3136_v49 = vld [vmem:[%s4398_s1 + $0x150] sm:$0xff]  }
  0x11   :  { %v3133_v46 = vld [vmem:[%s4398_s1 + $0x98] sm:$0xff]   ;;  %v3139_v50 = vld [vmem:[%s4399_s0 + $0x154] ss:$56 sps:$4 sm:$0xff]   ;;  %v3143_v55 = vld [vmem:[%s4399_s0 + $0x150] ss:$56 sps:$4 sm:$0xff]  }
  0x12   :  { %v3134_v47 = vld [vmem:[%s4398_s1 + $0x118] sm:$0xff]   ;;  %v3141_v51 = vld [vmem:[%s4399_s0 + $0x314] ss:$56 sps:$4 sm:$0xff]   ;;  %v3144_v56 = vld [vmem:[%s4399_s0 + $0x310] ss:$56 sps:$4 sm:$0xff]  }
  0x13   :  { %2626 = vmatpush3.bf16.msra.mxu0 %v3090_v9  ;;  %3077 = vmatpush3.bf16.msra.mxu1 %v3090_v9  ;;  %v3137_v52 = vld [vmem:[%s4398_s1 + $0x90] sm:$0xff]   ;;  %v3145_v54 = vld [vmem:[%s4398_s1 + $0xc8] sm:$0xff]   ;;  %v3149_v60 = vld [vmem:[%s4398_s1 + $0xc0] sm:$0xff]  }
  0x14   :  { %2627 = vmatprep.subr.bf16.mxu0 %v3091_v10  ;;  %3070 = vmatprep.subr.bf16.mxu1 %v3091_v10  ;;  %v3138_v53 = vld [vmem:[%s4398_s1 + $0x110] sm:$0xff]   ;;  %v3146_v57 = vld [vmem:[%s4398_s1 + $0x148] sm:$0xff]   ;;  %v3150_v61 = vld [vmem:[%s4398_s1 + $0x140] sm:$0xff]  }
  0x15   :  { %v3147_v58 = vld [vmem:[%s4398_s1 + $0x88] sm:$0xff]   ;;  %v3151_v62 = vld [vmem:[%s4398_s1 + $0x80] sm:$0xff]   ;;  %v3159_v4 = vld [vmem:[%s4398_s1 + $0x1f8] sm:$0xff]  }
  0x16   :  { %v3148_v59 = vld [vmem:[%s4398_s1 + $0x108] sm:$0xff]   ;;  %v3152_v63 = vld [vmem:[%s4398_s1 + $0x100] sm:$0xff]   ;;  %v3160_v5 = vld [vmem:[%s4398_s1 + $0x1b8] sm:$0xff]  }
  0x17   :  { %2628 = vmatpush3.bf16.msra.mxu0 %v3092_v13  ;;  %3078 = vmatpush3.bf16.msra.mxu1 %v3092_v13  ;;  %v3155_v0 = vld [vmem:[%s4399_s0 + $0xc] ss:$56 sps:$4 sm:$0xff]   ;;  %v3153_v1 = vld [vmem:[%s4399_s0 + $0x8] ss:$56 sps:$4 sm:$0xff]   ;;  %v3161_v6 = vld [vmem:[%s4398_s1 + $0x278] sm:$0xff]  }
  0x18   :  { %2629 = vmatprep.subr.bf16.mxu0 %v3093_v14  ;;  %3071 = vmatprep.subr.bf16.mxu1 %v3093_v14  ;;  %v3156_v2 = vld [vmem:[%s4399_s0 + $0x10] ss:$56 sps:$4 sm:$0xff]   ;;  %v3158_v3 = vld [vmem:[%s4399_s0 + $0x14] ss:$56 sps:$4 sm:$0xff]   ;;  %v3162_v7 = vld [vmem:[%s4398_s1 + $0x238] sm:$0xff]  }
  0x19   :  { %v3163_v8 = vld [vmem:[%s4399_s0 + $0x7c] ss:$56 sps:$4 sm:$0xff]   ;;  %v3167_v10 = vld [vmem:[%s4399_s0 + $0x78] ss:$56 sps:$4 sm:$0xff]  }
  0x1a   :  { %v3165_v9 = vld [vmem:[%s4399_s0 + $0x84] ss:$56 sps:$4 sm:$0xff]   ;;  %v3168_v11 = vld [vmem:[%s4399_s0 + $0x80] ss:$56 sps:$4 sm:$0xff]   ;;  %v3169_v12 = vld [vmem:[%s4398_s1 + $0x1f0] sm:$0xff]  }
  0x1b   :  { %2630 = vmatpush3.bf16.msra.mxu0 %v3094_v15  ;;  %3079 = vmatpush3.bf16.msra.mxu1 %v3094_v15  ;;  %v3170_v13 = vld [vmem:[%s4398_s1 + $0x1b0] sm:$0xff]  }
  0x1c   :  { %2631 = vmatprep.subr.bf16.mxu0 %v3095_v16  ;;  %3072 = vmatprep.subr.bf16.mxu1 %v3095_v16  ;;  %v3171_v14 = vld [vmem:[%s4398_s1 + $0x270] sm:$0xff]   ;;  %v3173_v16 = vld [vmem:[%s4399_s0 + $0xec] ss:$56 sps:$4 sm:$0xff]  }
  0x1d   :  { %v3172_v15 = vld [vmem:[%s4398_s1 + $0x230] sm:$0xff]  }
  0x1f   :  { %2632 = vmatpush3.bf16.msra.mxu0 %v3096_v17  ;;  %3080 = vmatpush3.bf16.msra.mxu1 %v3096_v17  ;;  %v3175_v17 = vld [vmem:[%s4399_s0 + $0xf4] ss:$56 sps:$4 sm:$0xff]  }
  0x20   :  { %2681 = vmatprep.subr.bf16.mxu1 %v3103_v20  ;;  %2745 = vmatprep.subr.bf16.mxu0 %v3104_v21  ;;  %v3178_v20 = vld [vmem:[%s4399_s0 + $0xf0] ss:$56 sps:$4 sm:$0xff]  }
  0x21   :  { %v3180_v21 = vld [vmem:[%s4398_s1 + $0x1a8] sm:$0xff]  }
  0x22   :  { %1652 = vmatmul.mubr.bf16.vlgmr.msra.gmra.mxu0 %v3097_v18  ;;  %1684 = vmatmul.mubr.bf16.vlgmr.msra.gmra.mxu1 %v3100_v19  ;;  %v3179_v18 = vld [vmem:[%s4398_s1 + $0x1e8] sm:$0xff]  }
  0x23   :  { %2682 = vmatpush3.bf16.msra.mxu1 %v3105_v22  ;;  %2746 = vmatpush3.bf16.msra.mxu0 %v3106_v23  ;;  %v3177_v19 = vld [vmem:[%s4399_s0 + $0xe8] ss:$56 sps:$4 sm:$0xff]  }
  0x24   :  { %2683 = vmatprep.subr.bf16.mxu1 %v3107_v24  ;;  %2747 = vmatprep.subr.bf16.mxu0 %v3108_v25  ;;  %v3181_v22 = vld [vmem:[%s4398_s1 + $0x268] sm:$0xff]   ;;  %v3183_v24 = vld [vmem:[%s4399_s0 + $0x15c] ss:$56 sps:$4 sm:$0xff]  }
  0x25   :  { %1659 = vmatprep.mubr.bf16.mxu0 %v3111_v26  ;;  %1691 = vmatprep.mubr.bf16.mxu1 %v3113_v28  ;;  %v3182_v23 = vld [vmem:[%s4398_s1 + $0x228] sm:$0xff]   ;;  %v3185_v25 = vld [vmem:[%s4399_s0 + $0x164] ss:$56 sps:$4 sm:$0xff]   ;;  %v3187_v28 = vld [vmem:[%s4399_s0 + $0x158] ss:$56 sps:$4 sm:$0xff]  }
  0x26   :  { %v3189_v26 = vld [vmem:[%s4398_s1 + $0x1e0] sm:$0xff]  }
  0x27   :  { %2684 = vmatpush3.bf16.msra.mxu1 %v3109_v27  ;;  %2748 = vmatpush3.bf16.msra.mxu0 %v3110_v29  ;;  %v3190_v27 = vld [vmem:[%s4398_s1 + $0x1a0] sm:$0xff]  }
  0x28   :  { %2685 = vmatprep.subr.bf16.mxu1 %v3117_v30  ;;  %2749 = vmatprep.subr.bf16.mxu0 %v3118_v32  ;;  %v3191_v29 = vld [vmem:[%s4398_s1 + $0x260] sm:$0xff]  }
  0x29   :  { %v3192_v30 = vld [vmem:[%s4398_s1 + $0x220] sm:$0xff]  }
  0x2a   :  { %1660 = vmatmul.mubr.bf16.gmra.mxu0 %v3115_v31  ;;  %1692 = vmatmul.mubr.bf16.gmra.mxu1 %v3116_v33  ;;  %v3188_v31 = vld [vmem:[%s4399_s0 + $0x160] ss:$56 sps:$4 sm:$0xff]   ;;  %v3193_v32 = vld [vmem:[%s4399_s0 + $0x1cc] ss:$56 sps:$4 sm:$0xff]  }
  0x2b   :  { %2686 = vmatpush3.bf16.msra.mxu1 %v3119_v34  ;;  %2750 = vmatpush3.bf16.msra.mxu0 %v3120_v35  ;;  %v3195_v33 = vld [vmem:[%s4399_s0 + $0x1d4] ss:$56 sps:$4 sm:$0xff]   ;;  %v3199_v34 = vld [vmem:[%s4398_s1 + $0x1d8] sm:$0xff]  }
  0x2c   :  { %2687 = vmatprep.subr.bf16.mxu1 %v3121_v36  ;;  %2751 = vmatprep.subr.bf16.mxu0 %v3122_v37  ;;  %v3200_v35 = vld [vmem:[%s4398_s1 + $0x198] sm:$0xff]  }
  0x2d   :  { %1667 = vmatprep.mubr.bf16.mxu0 %v3125_v38  ;;  %1699 = vmatprep.mubr.bf16.mxu1 %v3127_v40  ;;  %v3201_v36 = vld [vmem:[%s4398_s1 + $0x258] sm:$0xff]   ;;  %v3197_v38 = vld [vmem:[%s4399_s0 + $0x1c8] ss:$56 sps:$4 sm:$0xff]  }
  0x2e   :  { %v3202_v37 = vld [vmem:[%s4398_s1 + $0x218] sm:$0xff]  }
  0x2f   :  { %2688 = vmatpush3.bf16.msra.mxu1 %v3123_v39  ;;  %2752 = vmatpush3.bf16.msra.mxu0 %v3124_v41  ;;  %v3198_v39 = vld [vmem:[%s4399_s0 + $0x1d0] ss:$56 sps:$4 sm:$0xff]   ;;  %v3203_v40 = vld [vmem:[%s4399_s0 + $0x23c] ss:$56 sps:$4 sm:$0xff]  }
  0x30   :  { %2689 = vmatprep.subr.bf16.mxu1 %v3131_v42  ;;  %2753 = vmatprep.subr.bf16.mxu0 %v3132_v45  ;;  %v3205_v41 = vld [vmem:[%s4399_s0 + $0x244] ss:$56 sps:$4 sm:$0xff]   ;;  %v3209_v42 = vld [vmem:[%s4398_s1 + $0x1d0] sm:$0xff]  }
  0x31   :  { %v3212_v45 = vld [vmem:[%s4398_s1 + $0x210] sm:$0xff]  }
  0x32   :  { %1668 = vmatmul.mubr.bf16.gmra.mxu0 %v3129_v43  ;;  %1700 = vmatmul.mubr.bf16.gmra.mxu1 %v3130_v44  ;;  %v3210_v43 = vld [vmem:[%s4398_s1 + $0x190] sm:$0xff]  }
  0x33   :  { %2690 = vmatpush3.bf16.msra.mxu1 %v3133_v46  ;;  %2754 = vmatpush3.bf16.msra.mxu0 %v3134_v47  ;;  %v3211_v44 = vld [vmem:[%s4398_s1 + $0x250] sm:$0xff]   ;;  %v3208_v47 = vld [vmem:[%s4399_s0 + $0x240] ss:$56 sps:$4 sm:$0xff]  }
  0x34   :  { %2691 = vmatprep.subr.bf16.mxu1 %v3135_v48  ;;  %2755 = vmatprep.subr.bf16.mxu0 %v3136_v49  ;;  %v3207_v46 = vld [vmem:[%s4399_s0 + $0x238] ss:$56 sps:$4 sm:$0xff]   ;;  %v3213_v48 = vld [vmem:[%s4399_s0 + $0x2ac] ss:$56 sps:$4 sm:$0xff]  }
  0x35   :  { %1675 = vmatprep.mubr.bf16.mxu0 %v3139_v50  ;;  %1707 = vmatprep.mubr.bf16.mxu1 %v3141_v51  ;;  %v3215_v49 = vld [vmem:[%s4399_s0 + $0x2b4] ss:$56 sps:$4 sm:$0xff]  }
  0x36   :  { %v3219_v50 = vld [vmem:[%s4398_s1 + $0x1c8] sm:$0xff]  }
  0x37   :  { %2692 = vmatpush3.bf16.msra.mxu1 %v3137_v52  ;;  %2756 = vmatpush3.bf16.msra.mxu0 %v3138_v53  ;;  %v3220_v51 = vld [vmem:[%s4398_s1 + $0x188] sm:$0xff]  }
  0x38   :  { %2693 = vmatprep.subr.bf16.mxu1 %v3145_v54  ;;  %2757 = vmatprep.subr.bf16.mxu0 %v3146_v57  ;;  %v3221_v52 = vld [vmem:[%s4398_s1 + $0x248] sm:$0xff]   ;;  %v3223_v57 = vld [vmem:[%s4399_s0 + $0x31c] ss:$56 sps:$4 sm:$0xff]  }
  0x39   :  { %v3222_v53 = vld [vmem:[%s4398_s1 + $0x208] sm:$0xff]  }
  0x3a   :  { %1676 = vmatmul.mubr.bf16.gmra.mxu0 %v3143_v55  ;;  %1708 = vmatmul.mubr.bf16.gmra.mxu1 %v3144_v56  ;;  %v3217_v54 = vld [vmem:[%s4399_s0 + $0x2a8] ss:$56 sps:$4 sm:$0xff]  }
  0x3b   :  { %2694 = vmatpush3.bf16.msra.mxu1 %v3147_v58  ;;  %2758 = vmatpush3.bf16.msra.mxu0 %v3148_v59  ;;  %v3218_v55 = vld [vmem:[%s4399_s0 + $0x2b0] ss:$56 sps:$4 sm:$0xff]   ;;  %v3229_v56 = vld [vmem:[%s4398_s1 + $0x1c0] sm:$0xff]  }
  0x3c   :  { %2695 = vmatprep.subr.bf16.mxu1 %v3149_v60  ;;  %2759 = vmatprep.subr.bf16.mxu0 %v3150_v61  ;;  %v3225_v58 = vld [vmem:[%s4399_s0 + $0x324] ss:$56 sps:$4 sm:$0xff]  }
  0x3d   :  { %1748 = vmatprep.mubr.bf16.mxu1 %v3155_v0  ;;  %1845 = vmatprep.mubr.bf16.mxu0 %v3158_v3  ;;  %v3230_v59 = vld [vmem:[%s4398_s1 + $0x180] sm:$0xff]  }
  0x3e   :  { %v3231_v60 = vld [vmem:[%s4398_s1 + $0x240] sm:$0xff]  }
  0x3f   :  { %2696 = vmatpush3.bf16.msra.mxu1 %v3151_v62  ;;  %2760 = vmatpush3.bf16.msra.mxu0 %v3152_v63  ;;  %v3232_v61 = vld [vmem:[%s4398_s1 + $0x200] sm:$0xff]   ;;  %v3239_v62 = vld [vmem:[%s4398_s1 + $0x2f8] sm:$0xff]  }
  0x40   :  { %2809 = vmatprep.subr.bf16.mxu1 %v3159_v4  ;;  %2873 = vmatprep.subr.bf16.mxu0 %v3161_v6  ;;  %v3227_v63 = vld [vmem:[%s4399_s0 + $0x318] ss:$56 sps:$4 sm:$0xff]   ;;  %v3238_v3 = vld [vmem:[%s4399_s0 + $0x24] ss:$56 sps:$4 sm:$0xff]  }
  0x41   :  { %v3228_v0 = vld [vmem:[%s4399_s0 + $0x320] ss:$56 sps:$4 sm:$0xff]  }
  0x42   :  { %1749 = vmatmul.mubr.bf16.vlgmr.msra.gmra.mxu1 %v3153_v1  ;;  %1846 = vmatmul.mubr.bf16.vlgmr.msra.gmra.mxu0 %v3156_v2  ;;  %v3241_v1 = vld [vmem:[%s4398_s1 + $0x378] sm:$0xff]  }
  0x43   :  { %2810 = vmatpush3.bf16.msra.mxu1 %v3160_v5  ;;  %2874 = vmatpush3.bf16.msra.mxu0 %v3162_v7  ;;  %v3235_v2 = vld [vmem:[%s4399_s0 + $0x1c] ss:$56 sps:$4 sm:$0xff]   ;;  %v3233_v4 = vld [vmem:[%s4399_s0 + $0x18] ss:$56 sps:$4 sm:$0xff]  }
  0x44   :  { %1756 = vmatprep.mubr.bf16.mxu1 %v3163_v8  ;;  %1853 = vmatprep.mubr.bf16.mxu0 %v3165_v9  ;;  %v3236_v5 = vld [vmem:[%s4399_s0 + $0x20] ss:$56 sps:$4 sm:$0xff]   ;;  %v3243_v8 = vld [vmem:[%s4399_s0 + $0x8c] ss:$56 sps:$4 sm:$0xff]  }
  0x45   :  { %2811 = vmatprep.subr.bf16.mxu1 %v3169_v12  ;;  %2875 = vmatprep.subr.bf16.mxu0 %v3171_v14  ;;  %v3240_v6 = vld [vmem:[%s4398_s1 + $0x2b8] sm:$0xff]   ;;  %v3245_v9 = vld [vmem:[%s4399_s0 + $0x94] ss:$56 sps:$4 sm:$0xff]  }
  0x46   :  { %v3242_v7 = vld [vmem:[%s4398_s1 + $0x338] sm:$0xff]   ;;  %v3251_v12 = vld [vmem:[%s4398_s1 + $0x370] sm:$0xff]   ;;  %v3259_v14 = vld [vmem:[%s4398_s1 + $0x2e8] sm:$0xff]  }
  0x47   :  { %2812 = vmatpush3.bf16.msra.mxu1 %v3170_v13  ;;  %2876 = vmatpush3.bf16.msra.mxu0 %v3172_v15  ;;  %v3252_v13 = vld [vmem:[%s4398_s1 + $0x330] sm:$0xff]   ;;  %v3247_v15 = vld [vmem:[%s4399_s0 + $0x88] ss:$56 sps:$4 sm:$0xff]  }
  0x48   :  { %2813 = vmatprep.subr.bf16.mxu1 %v3179_v18  ;;  %2877 = vmatprep.subr.bf16.mxu0 %v3181_v22  ;;  %v3253_v18 = vld [vmem:[%s4399_s0 + $0xfc] ss:$56 sps:$4 sm:$0xff]   ;;  %v3269_v22 = vld [vmem:[%s4398_s1 + $0x2e0] sm:$0xff]  }
  0x4a   :  { %1757 = vmatmul.mubr.bf16.gmra.mxu1 %v3167_v10  ;;  %1854 = vmatmul.mubr.bf16.gmra.mxu0 %v3168_v11  ;;  %v3249_v10 = vld [vmem:[%s4398_s1 + $0x2f0] sm:$0xff]  }
  0x4b   :  { %1764 = vmatprep.mubr.bf16.mxu1 %v3173_v16  ;;  %1861 = vmatprep.mubr.bf16.mxu0 %v3175_v17  ;;  %v3250_v11 = vld [vmem:[%s4398_s1 + $0x2b0] sm:$0xff]   ;;  %v3261_v17 = vld [vmem:[%s4398_s1 + $0x368] sm:$0xff]  }
  0x4c   :  { %2814 = vmatpush3.bf16.msra.mxu1 %v3180_v21  ;;  %2878 = vmatpush3.bf16.msra.mxu0 %v3182_v23  ;;  %v3248_v16 = vld [vmem:[%s4399_s0 + $0x90] ss:$56 sps:$4 sm:$0xff]   ;;  %v3271_v23 = vld [vmem:[%s4398_s1 + $0x360] sm:$0xff]  }
  0x4d   :  { %2815 = vmatprep.subr.bf16.mxu1 %v3189_v26  ;;  %2879 = vmatprep.subr.bf16.mxu0 %v3191_v29  ;;  %v3262_v21 = vld [vmem:[%s4398_s1 + $0x328] sm:$0xff]   ;;  %v3270_v26 = vld [vmem:[%s4398_s1 + $0x2a0] sm:$0xff]  }
  0x4e   :  { %v3265_v29 = vld [vmem:[%s4399_s0 + $0x174] ss:$56 sps:$4 sm:$0xff]  }
  0x50   :  { %2816 = vmatpush3.bf16.msra.mxu1 %v3190_v27  ;;  %2880 = vmatpush3.bf16.msra.mxu0 %v3192_v30  ;;  %v3272_v27 = vld [vmem:[%s4398_s1 + $0x320] sm:$0xff]   ;;  %v3279_v30 = vld [vmem:[%s4398_s1 + $0x2d8] sm:$0xff]  }
  0x51   :  { %2817 = vmatprep.subr.bf16.mxu1 %v3199_v34  ;;  %2881 = vmatprep.subr.bf16.mxu0 %v3201_v36  ;;  %v3267_v34 = vld [vmem:[%s4399_s0 + $0x168] ss:$56 sps:$4 sm:$0xff]   ;;  %v3289_v36 = vld [vmem:[%s4398_s1 + $0x2d0] sm:$0xff]  }
  0x52   :  { %1765 = vmatmul.mubr.bf16.gmra.mxu1 %v3177_v19  ;;  %1862 = vmatmul.mubr.bf16.gmra.mxu0 %v3178_v20  ;;  %v3255_v19 = vld [vmem:[%s4399_s0 + $0x104] ss:$56 sps:$4 sm:$0xff]   ;;  %v3260_v20 = vld [vmem:[%s4398_s1 + $0x2a8] sm:$0xff]  }
  0x53   :  { %1772 = vmatprep.mubr.bf16.mxu1 %v3183_v24  ;;  %1869 = vmatprep.mubr.bf16.mxu0 %v3185_v25  ;;  %v3257_v24 = vld [vmem:[%s4399_s0 + $0xf8] ss:$56 sps:$4 sm:$0xff]  }
  0x54   :  { %2818 = vmatpush3.bf16.msra.mxu1 %v3200_v35  ;;  %2882 = vmatpush3.bf16.msra.mxu0 %v3202_v37  ;;  %v3258_v25 = vld [vmem:[%s4399_s0 + $0x100] ss:$56 sps:$4 sm:$0xff]   ;;  %v3268_v35 = vld [vmem:[%s4399_s0 + $0x170] ss:$56 sps:$4 sm:$0xff]   ;;  %v3273_v37 = vld [vmem:[%s4399_s0 + $0x1dc] ss:$56 sps:$4 sm:$0xff]  }
  0x55   :  { %2819 = vmatprep.subr.bf16.mxu1 %v3209_v42  ;;  %2883 = vmatprep.subr.bf16.mxu0 %v3211_v44  ;;  %v3299_v42 = vld [vmem:[%s4398_s1 + $0x2c8] sm:$0xff]   ;;  %v3278_v44 = vld [vmem:[%s4399_s0 + $0x1e0] ss:$56 sps:$4 sm:$0xff]  }
  0x58   :  { %2820 = vmatpush3.bf16.msra.mxu1 %v3210_v43  ;;  %2884 = vmatpush3.bf16.msra.mxu0 %v3212_v45  ;;  %v3277_v43 = vld [vmem:[%s4399_s0 + $0x1d8] ss:$56 sps:$4 sm:$0xff]   ;;  %v3300_v45 = vld [vmem:[%s4398_s1 + $0x288] sm:$0xff]  }
  0x59   :  { %2821 = vmatprep.subr.bf16.mxu1 %v3219_v50  ;;  %2885 = vmatprep.subr.bf16.mxu0 %v3221_v52  ;;  %v3309_v50 = vld [vmem:[%s4398_s1 + $0x2c0] sm:$0xff]  }
  0x5a   :  { %1773 = vmatmul.mubr.bf16.gmra.mxu1 %v3187_v28  ;;  %1870 = vmatmul.mubr.bf16.gmra.mxu0 %v3188_v31  ;;  %v3263_v28 = vld [vmem:[%s4399_s0 + $0x16c] ss:$56 sps:$4 sm:$0xff]   ;;  %v3280_v31 = vld [vmem:[%s4398_s1 + $0x298] sm:$0xff]  }
  0x5b   :  { %1780 = vmatprep.mubr.bf16.mxu1 %v3193_v32  ;;  %1877 = vmatprep.mubr.bf16.mxu0 %v3195_v33  ;;  %v3281_v32 = vld [vmem:[%s4398_s1 + $0x358] sm:$0xff]   ;;  %v3311_v52 = vld [vmem:[%s4398_s1 + $0x340] sm:$0xff]  }
  0x5c   :  { %2822 = vmatpush3.bf16.msra.mxu1 %v3220_v51  ;;  %2886 = vmatpush3.bf16.msra.mxu0 %v3222_v53  ;;  %v3282_v33 = vld [vmem:[%s4398_s1 + $0x318] sm:$0xff]   ;;  %v3310_v51 = vld [vmem:[%s4398_s1 + $0x280] sm:$0xff]  }
  0x5d   :  { %2823 = vmatprep.subr.bf16.mxu1 %v3229_v56  ;;  %2887 = vmatprep.subr.bf16.mxu0 %v3231_v60  ;;  %v3312_v53 = vld [vmem:[%s4398_s1 + $0x300] sm:$0xff]   ;;  %v3293_v56 = vld [vmem:[%s4399_s0 + $0x2bc] ss:$56 sps:$4 sm:$0xff]  }
  0x5e   :  { %v3303_v60 = vld [vmem:[%s4399_s0 + $0x32c] ss:$56 sps:$4 sm:$0xff]  }
  0x60   :  { %2824 = vmatpush3.bf16.msra.mxu1 %v3230_v59  ;;  %2888 = vmatpush3.bf16.msra.mxu0 %v3232_v61  ;;  %v3298_v59 = vld [vmem:[%s4399_s0 + $0x2c0] ss:$56 sps:$4 sm:$0xff]   ;;  %v3305_v61 = vld [vmem:[%s4399_s0 + $0x334] ss:$56 sps:$4 sm:$0xff]  }
  0x61   :  { %2937 = vmatprep.subr.bf16.mxu1 %v3239_v62  ;;  %3001 = vmatprep.subr.bf16.mxu0 %v3241_v1  ;;  %v3307_v62 = vld [vmem:[%s4399_s0 + $0x328] ss:$56 sps:$4 sm:$0xff]   ;;  %v3318_v1 = vld [vmem:[%s4399_s0 + $0x34] ss:$56 sps:$4 sm:$0xff]  }
  0x62   :  { %1781 = vmatmul.mubr.bf16.gmra.mxu1 %v3197_v38  ;;  %1878 = vmatmul.mubr.bf16.gmra.mxu0 %v3198_v39  ;;  %v3275_v38 = vld [vmem:[%s4399_s0 + $0x1e4] ss:$56 sps:$4 sm:$0xff]   ;;  %v3290_v39 = vld [vmem:[%s4398_s1 + $0x290] sm:$0xff]  }
  0x63   :  { %1788 = vmatprep.mubr.bf16.mxu1 %v3203_v40  ;;  %1885 = vmatprep.mubr.bf16.mxu0 %v3205_v41  ;;  %v3291_v40 = vld [vmem:[%s4398_s1 + $0x350] sm:$0xff]  }
  0x64   :  { %v3292_v41 = vld [vmem:[%s4398_s1 + $0x310] sm:$0xff]  }
  0x6a   :  { %1789 = vmatmul.mubr.bf16.gmra.mxu1 %v3207_v46  ;;  %1886 = vmatmul.mubr.bf16.gmra.mxu0 %v3208_v47  ;;  %v3283_v46 = vld [vmem:[%s4399_s0 + $0x24c] ss:$56 sps:$4 sm:$0xff]  }
  0x6b   :  { %1796 = vmatprep.mubr.bf16.mxu1 %v3213_v48  ;;  %1893 = vmatprep.mubr.bf16.mxu0 %v3215_v49  ;;  %v3301_v47 = vld [vmem:[%s4398_s1 + $0x348] sm:$0xff]  }
  0x6c   :  { %v3302_v48 = vld [vmem:[%s4398_s1 + $0x308] sm:$0xff]  }
  0x6d   :  { %v3285_v49 = vld [vmem:[%s4399_s0 + $0x254] ss:$56 sps:$4 sm:$0xff]  }
  0x72   :  { %1797 = vmatmul.mubr.bf16.gmra.mxu1 %v3217_v54  ;;  %1894 = vmatmul.mubr.bf16.gmra.mxu0 %v3218_v55  ;;  %v3287_v54 = vld [vmem:[%s4399_s0 + $0x248] ss:$56 sps:$4 sm:$0xff]  }
  0x73   :  { %1804 = vmatprep.mubr.bf16.mxu1 %v3223_v57  ;;  %1901 = vmatprep.mubr.bf16.mxu0 %v3225_v58  ;;  %v3288_v55 = vld [vmem:[%s4399_s0 + $0x250] ss:$56 sps:$4 sm:$0xff]   ;;  %v3295_v57 = vld [vmem:[%s4399_s0 + $0x2c4] ss:$56 sps:$4 sm:$0xff]  }
  0x74   :  { %v3297_v58 = vld [vmem:[%s4399_s0 + $0x2b8] ss:$56 sps:$4 sm:$0xff]  }
  0x7a   :  { %1805 = vmatmul.mubr.bf16.gmra.mxu1 %v3227_v63  ;;  %1902 = vmatmul.mubr.bf16.gmra.mxu0 %v3228_v0  ;;  %v3308_v63 = vld [vmem:[%s4399_s0 + $0x330] ss:$56 sps:$4 sm:$0xff]   ;;  %v3315_v0 = vld [vmem:[%s4399_s0 + $0x2c] ss:$56 sps:$4 sm:$0xff]  }
  0x7b   :  { %1942 = vmatprep.mubr.bf16.mxu1 %v3235_v2  ;;  %2039 = vmatprep.mubr.bf16.mxu0 %v3238_v3  ;;  %v3313_v2 = vld [vmem:[%s4399_s0 + $0x28] ss:$56 sps:$4 sm:$0xff]  }
  0x7c   :  { %v3316_v3 = vld [vmem:[%s4399_s0 + $0x30] ss:$56 sps:$4 sm:$0xff]  }
  0x82   :  { %1943 = vmatmul.mubr.bf16.vlgmr.msra.gmra.mxu1 %v3233_v4  ;;  %2040 = vmatmul.mubr.bf16.vlgmr.msra.gmra.mxu0 %v3236_v5  ;;  %v3319_v4 = vld [vmem:[%s4399_s0 + $0x9c] ss:$56 sps:$4 sm:$0xff]  }
  0x83   :  { %2938 = vmatpush3.bf16.msra.mxu1 %v3240_v6  ;;  %3002 = vmatpush3.bf16.msra.mxu0 %v3242_v7  ;;  %v3321_v5 = vld [vmem:[%s4399_s0 + $0xa4] ss:$56 sps:$4 sm:$0xff]   ;;  %v3323_v6 = vld [vmem:[%s4399_s0 + $0x98] ss:$56 sps:$4 sm:$0xff]  }
  0x84   :  { %1950 = vmatprep.mubr.bf16.mxu1 %v3243_v8  ;;  %2047 = vmatprep.mubr.bf16.mxu0 %v3245_v9  ;;  %v3324_v7 = vld [vmem:[%s4399_s0 + $0xa0] ss:$56 sps:$4 sm:$0xff]   ;;  %v3325_v8 = vld [vmem:[%s4399_s0 + $0x10c] ss:$56 sps:$4 sm:$0xff]  }
  0x85   :  { %2939 = vmatprep.subr.bf16.mxu1 %v3249_v10  ;;  %3003 = vmatprep.subr.bf16.mxu0 %v3251_v12  ;;  %v3327_v9 = vld [vmem:[%s4399_s0 + $0x114] ss:$56 sps:$4 sm:$0xff]   ;;  %v3329_v10 = vld [vmem:[%s4399_s0 + $0x108] ss:$56 sps:$4 sm:$0xff]  }
  0x86   :  { %v3331_v12 = vld [vmem:[%s4399_s0 + $0x17c] ss:$56 sps:$4 sm:$0xff]  }
  0x87   :  { %2940 = vmatpush3.bf16.msra.mxu1 %v3250_v11  ;;  %3004 = vmatpush3.bf16.msra.mxu0 %v3252_v13  ;;  %v3330_v11 = vld [vmem:[%s4399_s0 + $0x110] ss:$56 sps:$4 sm:$0xff]   ;;  %v3333_v13 = vld [vmem:[%s4399_s0 + $0x184] ss:$56 sps:$4 sm:$0xff]  }
  0x88   :  { %2941 = vmatprep.subr.bf16.mxu1 %v3259_v14  ;;  %3005 = vmatprep.subr.bf16.mxu0 %v3261_v17  ;;  %v3335_v14 = vld [vmem:[%s4399_s0 + $0x178] ss:$56 sps:$4 sm:$0xff]   ;;  %v3339_v17 = vld [vmem:[%s4399_s0 + $0x1f4] ss:$56 sps:$4 sm:$0xff]  }
  0x8a   :  { %1951 = vmatmul.mubr.bf16.gmra.mxu1 %v3247_v15  ;;  %2048 = vmatmul.mubr.bf16.gmra.mxu0 %v3248_v16  ;;  %v3336_v15 = vld [vmem:[%s4399_s0 + $0x180] ss:$56 sps:$4 sm:$0xff]   ;;  %v3337_v16 = vld [vmem:[%s4399_s0 + $0x1ec] ss:$56 sps:$4 sm:$0xff]  }
  0x8b   :  { %1958 = vmatprep.mubr.bf16.mxu1 %v3253_v18  ;;  %2055 = vmatprep.mubr.bf16.mxu0 %v3255_v19  ;;  %v3341_v18 = vld [vmem:[%s4399_s0 + $0x1e8] ss:$56 sps:$4 sm:$0xff]  }
  0x8c   :  { %2942 = vmatpush3.bf16.msra.mxu1 %v3260_v20  ;;  %3006 = vmatpush3.bf16.msra.mxu0 %v3262_v21  ;;  %v3342_v19 = vld [vmem:[%s4399_s0 + $0x1f0] ss:$56 sps:$4 sm:$0xff]   ;;  %v3343_v20 = vld [vmem:[%s4399_s0 + $0x25c] ss:$56 sps:$4 sm:$0xff]  }
  0x8d   :  { %2943 = vmatprep.subr.bf16.mxu1 %v3269_v22  ;;  %3007 = vmatprep.subr.bf16.mxu0 %v3271_v23  ;;  %v3345_v21 = vld [vmem:[%s4399_s0 + $0x264] ss:$56 sps:$4 sm:$0xff]  }
  0x90   :  { %2944 = vmatpush3.bf16.msra.mxu1 %v3270_v26  ;;  %3008 = vmatpush3.bf16.msra.mxu0 %v3272_v27 }
  0x91   :  { %2945 = vmatprep.subr.bf16.mxu1 %v3279_v30  ;;  %3009 = vmatprep.subr.bf16.mxu0 %v3281_v32  ;;  %v3347_v30 = vld [vmem:[%s4399_s0 + $0x258] ss:$56 sps:$4 sm:$0xff]   ;;  %v3349_v32 = vld [vmem:[%s4399_s0 + $0x2cc] ss:$56 sps:$4 sm:$0xff]  }
  0x92   :  { %1959 = vmatmul.mubr.bf16.gmra.mxu1 %v3257_v24  ;;  %2056 = vmatmul.mubr.bf16.gmra.mxu0 %v3258_v25 }
  0x93   :  { %1966 = vmatprep.mubr.bf16.mxu1 %v3263_v28  ;;  %2063 = vmatprep.mubr.bf16.mxu0 %v3265_v29 }
  0x94   :  { %2946 = vmatpush3.bf16.msra.mxu1 %v3280_v31  ;;  %3010 = vmatpush3.bf16.msra.mxu0 %v3282_v33  ;;  %v3348_v31 = vld [vmem:[%s4399_s0 + $0x260] ss:$56 sps:$4 sm:$0xff]   ;;  %v3351_v33 = vld [vmem:[%s4399_s0 + $0x2d4] ss:$56 sps:$4 sm:$0xff]  }
  0x95   :  { %2947 = vmatprep.subr.bf16.mxu1 %v3289_v36  ;;  %3011 = vmatprep.subr.bf16.mxu0 %v3291_v40 }
  0x98   :  { %2948 = vmatpush3.bf16.msra.mxu1 %v3290_v39  ;;  %3012 = vmatpush3.bf16.msra.mxu0 %v3292_v41 }
  0x99   :  { %2949 = vmatprep.subr.bf16.mxu1 %v3299_v42  ;;  %3013 = vmatprep.subr.bf16.mxu0 %v3301_v47  ;;  %v3354_v47 = vld [vmem:[%s4399_s0 + $0x2d0] ss:$56 sps:$4 sm:$0xff]  }
  0x9a   :  { %1967 = vmatmul.mubr.bf16.gmra.mxu1 %v3267_v34  ;;  %2064 = vmatmul.mubr.bf16.gmra.mxu0 %v3268_v35 }
  0x9b   :  { %1974 = vmatprep.mubr.bf16.mxu1 %v3273_v37  ;;  %2071 = vmatprep.mubr.bf16.mxu0 %v3275_v38 }
  0x9c   :  { %2950 = vmatpush3.bf16.msra.mxu1 %v3300_v45  ;;  %3014 = vmatpush3.bf16.msra.mxu0 %v3302_v48  ;;  %v3355_v48 = vld [vmem:[%s4399_s0 + $0x33c] ss:$56 sps:$4 sm:$0xff]  }
  0x9d   :  { %2951 = vmatprep.subr.bf16.mxu1 %v3309_v50  ;;  %3015 = vmatprep.subr.bf16.mxu0 %v3311_v52 }
  0xa0   :  { %2952 = vmatpush3.bf16.msra.mxu1 %v3310_v51  ;;  %3016 = vmatpush3.bf16.msra.mxu0 %v3312_v53 }
  0xa2   :  { %1975 = vmatmul.mubr.bf16.gmra.mxu1 %v3277_v43  ;;  %2072 = vmatmul.mubr.bf16.gmra.mxu0 %v3278_v44 }
  0xa3   :  { %1982 = vmatprep.mubr.bf16.mxu1 %v3283_v46  ;;  %2079 = vmatprep.mubr.bf16.mxu0 %v3285_v49  ;;  %v3353_v46 = vld [vmem:[%s4399_s0 + $0x2c8] ss:$56 sps:$4 sm:$0xff]   ;;  %v3357_v49 = vld [vmem:[%s4399_s0 + $0x344] ss:$56 sps:$4 sm:$0xff]  }
  0xaa   :  { %1983 = vmatmul.mubr.bf16.gmra.mxu1 %v3287_v54  ;;  %2080 = vmatmul.mubr.bf16.gmra.mxu0 %v3288_v55 }
  0xab   :  { %1990 = vmatprep.mubr.bf16.mxu1 %v3293_v56  ;;  %2087 = vmatprep.mubr.bf16.mxu0 %v3295_v57 }
  0xb2   :  { %1991 = vmatmul.mubr.bf16.gmra.mxu1 %v3297_v58  ;;  %2088 = vmatmul.mubr.bf16.gmra.mxu0 %v3298_v59 }
  0xb3   :  { %1998 = vmatprep.mubr.bf16.mxu1 %v3303_v60  ;;  %2095 = vmatprep.mubr.bf16.mxu0 %v3305_v61 }
  0xba   :  { %1999 = vmatmul.mubr.bf16.gmra.mxu1 %v3307_v62  ;;  %2096 = vmatmul.mubr.bf16.gmra.mxu0 %v3308_v63  ;;  %v3359_v62 = vld [vmem:[%s4399_s0 + $0x338] ss:$56 sps:$4 sm:$0xff]  }
  0xbb   :  { %2136 = vmatprep.mubr.bf16.mxu1 %v3315_v0  ;;  %2233 = vmatprep.mubr.bf16.mxu0 %v3318_v1  ;;  %v3360_v63 = vld [vmem:[%s4399_s0 + $0x340] ss:$56 sps:$4 sm:$0xff]  }
  0xc2   :  { %2137 = vmatmul.mubr.bf16.vlgmr.msra.gmra.mxu1 %v3313_v2  ;;  %2234 = vmatmul.mubr.bf16.vlgmr.msra.gmra.mxu0 %v3316_v3 }
  0xc3   :  { %2144 = vmatprep.mubr.bf16.mxu1 %v3319_v4  ;;  %2241 = vmatprep.mubr.bf16.mxu0 %v3321_v5 }
  0xca   :  { %2145 = vmatmul.mubr.bf16.gmra.mxu1 %v3323_v6  ;;  %2242 = vmatmul.mubr.bf16.gmra.mxu0 %v3324_v7 }
  0xcb   :  { %2152 = vmatprep.mubr.bf16.mxu1 %v3325_v8  ;;  %2249 = vmatprep.mubr.bf16.mxu0 %v3327_v9 }
  0xd2   :  { %2153 = vmatmul.mubr.bf16.gmra.mxu1 %v3329_v10  ;;  %2250 = vmatmul.mubr.bf16.gmra.mxu0 %v3330_v11 }
  0xd3   :  { %2160 = vmatprep.mubr.bf16.mxu1 %v3331_v12  ;;  %2257 = vmatprep.mubr.bf16.mxu0 %v3333_v13 }
  0xda   :  { %2161 = vmatmul.mubr.bf16.gmra.mxu1 %v3335_v14  ;;  %2258 = vmatmul.mubr.bf16.gmra.mxu0 %v3336_v15 }
  0xdb   :  { %2168 = vmatprep.mubr.bf16.mxu1 %v3337_v16  ;;  %2265 = vmatprep.mubr.bf16.mxu0 %v3339_v17 }
  0xe2   :  { %v2633_v22 = vpop.f32.mrf.mxu0  ;;  %v2657_v23 = vpop.f32.mrf.mxu1  ;;  %2169 = vmatmul.mubr.bf16.gmra.mxu1 %v3341_v18  ;;  %2266 = vmatmul.mubr.bf16.gmra.mxu0 %v3342_v19 }
  0xe3   :  { %2176 = vmatprep.mubr.bf16.mxu1 %v3343_v20  ;;  %2273 = vmatprep.mubr.bf16.mxu0 %v3345_v21 }
  0xe4   :  { %v2634_v24 = vpop.f32.mrf.mxu0  ;;  %v2658_v25 = vpop.f32.mrf.mxu1 }
  0xe5   :  { %v4023_v26 = vadd.f32 %v2634_v24, %v2633_v22  ;;  %v4025_v27 = vadd.f32 %v2658_v25, %v2657_v23 }
  0xe6   :  { %v2636_v28 = vpop.f32.mrf.mxu0  ;;  %v2660_v29 = vpop.f32.mrf.mxu1 }
  0xe8   :  { %v2637_v34 = vpop.f32.mrf.mxu0  ;;  %v2661_v35 = vpop.f32.mrf.mxu1 }
  0xe9   :  { %v4039_v36 = vadd.f32 %v2637_v34, %v2636_v28  ;;  %v4041_v37 = vadd.f32 %v2661_v35, %v2660_v29 }
  0xea   :  { %v2639_v38 = vpop.f32.mrf.mxu0  ;;  %v2663_v39 = vpop.f32.mrf.mxu1  ;;  %2177 = vmatmul.mubr.bf16.gmra.mxu1 %v3347_v30  ;;  %2274 = vmatmul.mubr.bf16.gmra.mxu0 %v3348_v31 }
  0xeb   :  { %2184 = vmatprep.mubr.bf16.mxu1 %v3349_v32  ;;  %2281 = vmatprep.mubr.bf16.mxu0 %v3351_v33 }
  0xec   :  { %v2640_v40 = vpop.f32.mrf.mxu0  ;;  %v2664_v41 = vpop.f32.mrf.mxu1 }
  0xed   :  { %v4043_v42 = vadd.f32 %v2640_v40, %v2639_v38  ;;  %v4045_v43 = vadd.f32 %v2664_v41, %v2663_v39 }
  0xee   :  { %v2642_v44 = vpop.f32.mrf.mxu0  ;;  %v2666_v45 = vpop.f32.mrf.mxu1 }
  0xf0   :  { %v2643_v50 = vpop.f32.mrf.mxu0  ;;  %v2667_v51 = vpop.f32.mrf.mxu1 }
  0xf1   :  { %v4059_v52 = vadd.f32 %v2643_v50, %v2642_v44  ;;  %v4061_v53 = vadd.f32 %v2667_v51, %v2666_v45 }
  0xf2   :  { %v2645_v54 = vpop.f32.mrf.mxu0  ;;  %v2669_v55 = vpop.f32.mrf.mxu1  ;;  %2185 = vmatmul.mubr.bf16.gmra.mxu1 %v3353_v46  ;;  %2282 = vmatmul.mubr.bf16.gmra.mxu0 %v3354_v47 }
  0xf3   :  { %2192 = vmatprep.mubr.bf16.mxu1 %v3355_v48  ;;  %2289 = vmatprep.mubr.bf16.mxu0 %v3357_v49 }
  0xf4   :  { %v2646_v56 = vpop.f32.mrf.mxu0  ;;  %v2670_v57 = vpop.f32.mrf.mxu1 }
  0xf5   :  { %v4063_v58 = vadd.f32 %v2646_v56, %v2645_v54  ;;  %v4065_v59 = vadd.f32 %v2670_v57, %v2669_v55 }
  0xf6   :  { %v2648_v60 = vpop.f32.mrf.mxu0  ;;  %v2672_v61 = vpop.f32.mrf.mxu1 }
  0xf8   :  { %v2649_v0 = vpop.f32.mrf.mxu0  ;;  %v2673_v1 = vpop.f32.mrf.mxu1 }
  0xf9   :  { %v4073_v2 = vadd.f32 %v2649_v0, %v2648_v60  ;;  %v4075_v3 = vadd.f32 %v2673_v1, %v2672_v61 }
  0xfa   :  { %v2651_v4 = vpop.f32.mrf.mxu0  ;;  %v2675_v5 = vpop.f32.mrf.mxu1  ;;  %2193 = vmatmul.mubr.bf16.gmra.mxu1 %v3359_v62  ;;  %2290 = vmatmul.mubr.bf16.gmra.mxu0 %v3360_v63 }
  0xfc   :  { %v2652_v6 = vpop.f32.mrf.mxu0  ;;  %v2676_v7 = vpop.f32.mrf.mxu1 }
  0xfd   :  { %v4077_v8 = vadd.f32 %v2652_v6, %v2651_v4  ;;  %v4079_v9 = vadd.f32 %v2676_v7, %v2675_v5 }
  0xfe   :  { %v2654_v10 = vpop.f32.mrf.mxu0  ;;  %v2678_v11 = vpop.f32.mrf.mxu1 }
 0x100   :  { %v2655_v12 = vpop.f32.mrf.mxu0  ;;  %v2679_v13 = vpop.f32.mrf.mxu1 }
 0x101   :  { %v4081_v14 = vadd.f32 %v2655_v12, %v2654_v10  ;;  %v4083_v15 = vadd.f32 %v2679_v13, %v2678_v11 }
 0x102   :  { %v2697_v16 = vpop.f32.mrf.mxu1  ;;  %v2761_v17 = vpop.f32.mrf.mxu0 }
 0x104   :  { %v2698_v18 = vpop.f32.mrf.mxu1  ;;  %v2762_v19 = vpop.f32.mrf.mxu0 }
 0x105   :  { %v2699_v20 = vadd.f32 %v2698_v18, %v2697_v16  ;;  %v2763_v21 = vadd.f32 %v2762_v19, %v2761_v17 }
 0x106   :  { %v2700_v22 = vpop.f32.mrf.mxu1  ;;  %v2764_v23 = vpop.f32.mrf.mxu0 }
 0x107   :  { %v1751_v24 = vadd.f32 %v2699_v20, %v4023_v26 }
 0x108   :  { %v2701_v25 = vpop.f32.mrf.mxu1  ;;  %v2765_v28 = vpop.f32.mrf.mxu0 }
 0x109   :  { %v4086_v29 = vadd.f32 %v2763_v21, %v1751_v24  ;;  %v2702_v30 = vadd.f32 %v2701_v25, %v2700_v22  ;;  %v2766_v31 = vadd.f32 %v2765_v28, %v2764_v23 }
 0x10a   :  { %v2703_v32 = vpop.f32.mrf.mxu1  ;;  %v2767_v33 = vpop.f32.mrf.mxu0 }
 0x10b   :  { %v1754_v34 = vadd.f32 %v2702_v30, %v4039_v36 }
 0x10c   :  { %v2704_v35 = vpop.f32.mrf.mxu1  ;;  %v2768_v38 = vpop.f32.mrf.mxu0 }
 0x10d   :  { %v4089_v39 = vadd.f32 %v2766_v31, %v1754_v34  ;;  %v2705_v40 = vadd.f32 %v2704_v35, %v2703_v32  ;;  %v2769_v41 = vadd.f32 %v2768_v38, %v2767_v33 }
 0x10e   :  { %v2706_v44 = vpop.f32.mrf.mxu1  ;;  %v2770_v45 = vpop.f32.mrf.mxu0 }
 0x10f   :  { %v1759_v26 = vadd.f32 %v2705_v40, %v4043_v42 }
 0x110   :  { %v2707_v46 = vpop.f32.mrf.mxu1  ;;  %v2771_v47 = vpop.f32.mrf.mxu0 }
 0x111   :  { %v4092_v48 = vadd.f32 %v2769_v41, %v1759_v26  ;;  %v2708_v49 = vadd.f32 %v2707_v46, %v2706_v44  ;;  %v2772_v50 = vadd.f32 %v2771_v47, %v2770_v45 }
 0x112   :  { %v2709_v51 = vpop.f32.mrf.mxu1  ;;  %v2773_v54 = vpop.f32.mrf.mxu0 }
 0x113   :  { %v1762_v36 = vadd.f32 %v2708_v49, %v4059_v52 }
 0x114   :  { %v2710_v55 = vpop.f32.mrf.mxu1  ;;  %v2774_v56 = vpop.f32.mrf.mxu0 }
 0x115   :  { %v4095_v57 = vadd.f32 %v2772_v50, %v1762_v36  ;;  %v2711_v60 = vadd.f32 %v2710_v55, %v2709_v51  ;;  %v2775_v61 = vadd.f32 %v2774_v56, %v2773_v54 }
 0x116   :  { %v2712_v62 = vpop.f32.mrf.mxu1  ;;  %v2776_v63 = vpop.f32.mrf.mxu0 }
 0x117   :  { %v1767_v42 = vadd.f32 %v2711_v60, %v4063_v58 }
 0x118   :  { %v2713_v0 = vpop.f32.mrf.mxu1  ;;  %v2777_v1 = vpop.f32.mrf.mxu0 }
 0x119   :  { %v4098_v4 = vadd.f32 %v2775_v61, %v1767_v42  ;;  %v2714_v5 = vadd.f32 %v2713_v0, %v2712_v62  ;;  %v2778_v6 = vadd.f32 %v2777_v1, %v2776_v63 }
 0x11a   :  { %v2715_v7 = vpop.f32.mrf.mxu1  ;;  %v2779_v10 = vpop.f32.mrf.mxu0 }
 0x11b   :  { %v1770_v52 = vadd.f32 %v2714_v5, %v4073_v2 }
 0x11c   :  { %v2716_v11 = vpop.f32.mrf.mxu1  ;;  %v2780_v12 = vpop.f32.mrf.mxu0 }
 0x11d   :  { %v4101_v13 = vadd.f32 %v2778_v6, %v1770_v52  ;;  %v2717_v16 = vadd.f32 %v2716_v11, %v2715_v7  ;;  %v2781_v17 = vadd.f32 %v2780_v12, %v2779_v10 }
 0x11e   :  { %v2718_v18 = vpop.f32.mrf.mxu1  ;;  %v2782_v19 = vpop.f32.mrf.mxu0 }
 0x11f   :  { %v1775_v58 = vadd.f32 %v2717_v16, %v4077_v8 }
 0x120   :  { %v2719_v20 = vpop.f32.mrf.mxu1  ;;  %v2783_v21 = vpop.f32.mrf.mxu0 }
 0x121   :  { %v4104_v22 = vadd.f32 %v2781_v17, %v1775_v58  ;;  %v2720_v23 = vadd.f32 %v2719_v20, %v2718_v18  ;;  %v2784_v24 = vadd.f32 %v2783_v21, %v2782_v19 }
 0x122   :  { %v2721_v25 = vpop.f32.mrf.mxu1  ;;  %v2785_v28 = vpop.f32.mrf.mxu0 }
 0x123   :  { %v1778_v2 = vadd.f32 %v2720_v23, %v4081_v14 }
 0x124   :  { %v2722_v30 = vpop.f32.mrf.mxu1  ;;  %v2786_v31 = vpop.f32.mrf.mxu0 }
 0x125   :  { %v4107_v32 = vadd.f32 %v2784_v24, %v1778_v2  ;;  %v2723_v33 = vadd.f32 %v2722_v30, %v2721_v25  ;;  %v2787_v34 = vadd.f32 %v2786_v31, %v2785_v28 }
 0x126   :  { %v2724_v35 = vpop.f32.mrf.mxu1  ;;  %v2788_v38 = vpop.f32.mrf.mxu0 }
 0x127   :  { %v1783_v8 = vadd.f32 %v2723_v33, %v4025_v27 }
 0x128   :  { %v2725_v40 = vpop.f32.mrf.mxu1  ;;  %v2789_v41 = vpop.f32.mrf.mxu0 }
 0x129   :  { %v4110_v44 = vadd.f32 %v2787_v34, %v1783_v8  ;;  %v2726_v45 = vadd.f32 %v2725_v40, %v2724_v35  ;;  %v2790_v26 = vadd.f32 %v2789_v41, %v2788_v38 }
 0x12a   :  { %v2727_v46 = vpop.f32.mrf.mxu1  ;;  %v2791_v47 = vpop.f32.mrf.mxu0 }
 0x12b   :  { %v1786_v14 = vadd.f32 %v2726_v45, %v4041_v37 }
 0x12c   :  { %v2728_v49 = vpop.f32.mrf.mxu1  ;;  %v2792_v50 = vpop.f32.mrf.mxu0 }
 0x12d   :  { %v4113_v51 = vadd.f32 %v2790_v26, %v1786_v14  ;;  %v2729_v54 = vadd.f32 %v2728_v49, %v2727_v46  ;;  %v2793_v36 = vadd.f32 %v2792_v50, %v2791_v47 }
 0x12e   :  { %v2730_v55 = vpop.f32.mrf.mxu1  ;;  %v2794_v56 = vpop.f32.mrf.mxu0 }
 0x12f   :  { %v1791_v27 = vadd.f32 %v2729_v54, %v4045_v43 }
 0x130   :  { %v2731_v60 = vpop.f32.mrf.mxu1  ;;  %v2795_v61 = vpop.f32.mrf.mxu0 }
 0x131   :  { %v4116_v62 = vadd.f32 %v2793_v36, %v1791_v27  ;;  %v2732_v63 = vadd.f32 %v2731_v60, %v2730_v55  ;;  %v2796_v42 = vadd.f32 %v2795_v61, %v2794_v56 }
 0x132   :  { %v2733_v0 = vpop.f32.mrf.mxu1  ;;  %v2797_v1 = vpop.f32.mrf.mxu0 }
 0x133   :  { %4402 = vst [vmem:[#allocation3_spill] sm:$0xff] %v4116_v62  ;;  %v1794_v37 = vadd.f32 %v2732_v63, %v4061_v53 }
 0x134   :  { %v2734_v5 = vpop.f32.mrf.mxu1  ;;  %v2798_v6 = vpop.f32.mrf.mxu0 }
 0x135   :  { %v4119_v7 = vadd.f32 %v2796_v42, %v1794_v37  ;;  %v2735_v10 = vadd.f32 %v2734_v5, %v2733_v0  ;;  %v2799_v52 = vadd.f32 %v2798_v6, %v2797_v1 }
 0x136   :  { %v2736_v11 = vpop.f32.mrf.mxu1  ;;  %v2800_v12 = vpop.f32.mrf.mxu0 }
 0x137   :  { %4403 = vst [vmem:[#allocation4_spill] sm:$0xff] %v4119_v7  ;;  %v1799_v43 = vadd.f32 %v2735_v10, %v4065_v59 }
 0x138   :  { %v2737_v16 = vpop.f32.mrf.mxu1  ;;  %v2801_v17 = vpop.f32.mrf.mxu0 }
 0x139   :  { %v4122_v18 = vadd.f32 %v2799_v52, %v1799_v43  ;;  %v2738_v19 = vadd.f32 %v2737_v16, %v2736_v11  ;;  %v2802_v58 = vadd.f32 %v2801_v17, %v2800_v12 }
 0x13a   :  { %v2739_v20 = vpop.f32.mrf.mxu1  ;;  %v2803_v21 = vpop.f32.mrf.mxu0 }
 0x13b   :  { %4404 = vst [vmem:[#allocation5_spill] sm:$0xff] %v4122_v18  ;;  %v1802_v53 = vadd.f32 %v2738_v19, %v4075_v3 }
 0x13c   :  { %v2740_v23 = vpop.f32.mrf.mxu1  ;;  %v2804_v24 = vpop.f32.mrf.mxu0 }
 0x13d   :  { %v4125_v25 = vadd.f32 %v2802_v58, %v1802_v53  ;;  %v2741_v28 = vadd.f32 %v2740_v23, %v2739_v20  ;;  %v2805_v2 = vadd.f32 %v2804_v24, %v2803_v21 }
 0x13e   :  { %v2742_v30 = vpop.f32.mrf.mxu1  ;;  %v2806_v31 = vpop.f32.mrf.mxu0 }
 0x13f   :  { %4405 = vst [vmem:[#allocation6_spill] sm:$0xff] %v4125_v25  ;;  %v1807_v59 = vadd.f32 %v2741_v28, %v4079_v9 }
 0x140   :  { %v2743_v33 = vpop.f32.mrf.mxu1  ;;  %v2807_v34 = vpop.f32.mrf.mxu0 }
 0x141   :  { %v4128_v35 = vadd.f32 %v2805_v2, %v1807_v59  ;;  %v2744_v38 = vadd.f32 %v2743_v33, %v2742_v30  ;;  %v2808_v8 = vadd.f32 %v2807_v34, %v2806_v31 }
 0x142   :  { %v2825_v40 = vpop.f32.mrf.mxu1  ;;  %v4130_v41 = vpop.f32.mrf.mxu0 }
 0x143   :  { %4406 = vst [vmem:[#allocation7_spill] sm:$0xff] %v4128_v35  ;;  %v1810_v3 = vadd.f32 %v2744_v38, %v4083_v15 }
 0x144   :  { %v2826_v45 = vpop.f32.mrf.mxu1  ;;  %v4133_v26 = vpop.f32.mrf.mxu0 }
 0x145   :  { %v4135_v46 = vadd.f32 %v2808_v8, %v1810_v3 }
 0x146   :  { %v2828_v47 = vpop.f32.mrf.mxu1  ;;  %v4137_v14 = vpop.f32.mrf.mxu0 }
 0x147   :  { %4407 = vst [vmem:[#allocation8_spill] sm:$0xff] %v4135_v46 }
 0x148   :  { %v2829_v9 = vpop.f32.mrf.mxu1  ;;  %v4139_v49 = vpop.f32.mrf.mxu0 }
 0x14a   :  { %v4141_v50 = vpop.f32.mrf.mxu1  ;;  %v4143_v54 = vpop.f32.mrf.mxu0 }
 0x14c   :  { %v4145_v36 = vpop.f32.mrf.mxu1  ;;  %v4147_v55 = vpop.f32.mrf.mxu0 }
 0x14e   :  { %v4149_v15 = vpop.f32.mrf.mxu1  ;;  %v4151_v56 = vpop.f32.mrf.mxu0 }
 0x150   :  { %v4153_v27 = vpop.f32.mrf.mxu1  ;;  %v4155_v60 = vpop.f32.mrf.mxu0 }
 0x152   :  { %v4157_v61 = vpop.f32.mrf.mxu1  ;;  %v4159_v63 = vpop.f32.mrf.mxu0 }
 0x154   :  { %v4161_v42 = vpop.f32.mrf.mxu1  ;;  %v4163_v0 = vpop.f32.mrf.mxu0 }
 0x156   :  { %v4165_v1 = vpop.f32.mrf.mxu1  ;;  %v4167_v37 = vpop.f32.mrf.mxu0 }
 0x158   :  { %v4169_v5 = vpop.f32.mrf.mxu1  ;;  %v4171_v6 = vpop.f32.mrf.mxu0 }
 0x15a   :  { %v4173_v10 = vpop.f32.mrf.mxu1  ;;  %v4175_v52 = vpop.f32.mrf.mxu0 }
 0x15c   :  { %v4177_v11 = vpop.f32.mrf.mxu1  ;;  %v4179_v12 = vpop.f32.mrf.mxu0 }
 0x15e   :  { %v4181_v43 = vpop.f32.mrf.mxu1  ;;  %v4183_v16 = vpop.f32.mrf.mxu0 }
 0x160   :  { %v4185_v17 = vpop.f32.mrf.mxu1  ;;  %v4187_v19 = vpop.f32.mrf.mxu0 }
 0x162   :  { %v4189_v58 = vpop.f32.mrf.mxu1  ;;  %v4191_v20 = vpop.f32.mrf.mxu0 }
 0x164   :  { %v4193_v21 = vpop.f32.mrf.mxu1  ;;  %v4195_v53 = vpop.f32.mrf.mxu0 }
 0x166   :  { %v4197_v23 = vpop.f32.mrf.mxu1  ;;  %v4199_v24 = vpop.f32.mrf.mxu0 }
 0x168   :  { %v4201_v28 = vpop.f32.mrf.mxu1  ;;  %v4203_v2 = vpop.f32.mrf.mxu0 }
 0x16a   :  { %v4205_v30 = vpop.f32.mrf.mxu1  ;;  %v4207_v31 = vpop.f32.mrf.mxu0 }
 0x16b   :  { %4408 = vst [vmem:[#allocation9_spill] sm:$0xff] %v4207_v31 }
 0x16c   :  { %v4209_v59 = vpop.f32.mrf.mxu1  ;;  %v4211_v33 = vpop.f32.mrf.mxu0 }
 0x16d   :  { %4409 = vst [vmem:[#allocation10_spill] sm:$0xff] %v4211_v33 }
 0x16e   :  { %v4213_v34 = vpop.f32.mrf.mxu1  ;;  %v4215_v38 = vpop.f32.mrf.mxu0 }
 0x16f   :  { %4410 = vst [vmem:[#allocation11_spill] sm:$0xff] %v4213_v34  ;;  %4411 = vst [vmem:[#allocation12_spill] sm:$0xff] %v4215_v38 }
 0x170   :  { %v4217_v8 = vpop.f32.mrf.mxu1  ;;  %v4219_v3 = vpop.f32.mrf.mxu0 }
 0x171   :  { %4412 = vst [vmem:[#allocation13_spill] sm:$0xff] %v4217_v8  ;;  %4413 = vst [vmem:[#allocation14_spill] sm:$0xff] %v4219_v3 }
 0x172   :  { %v4221_v46 = vpop.f32.mrf.mxu1  ;;  %v4223_v35 = vpop.f32.mrf.mxu0 }
 0x173   :  { %4414 = vst [vmem:[#allocation15_spill] sm:$0xff] %v4221_v46  ;;  %4415 = vst [vmem:[#allocation16_spill] sm:$0xff] %v4223_v35  ;;  %v2827_v35 = vadd.f32 %v2826_v45, %v2825_v40 }
 0x174   :  { %v4225_v25 = vpop.f32.mrf.mxu1  ;;  %v4227_v18 = vpop.f32.mrf.mxu0 }
 0x175   :  { %4416 = vst [vmem:[#allocation17_spill] sm:$0xff] %v4225_v25  ;;  %4417 = vst [vmem:[#allocation18_spill] sm:$0xff] %v4227_v18 }
 0x176   :  { %v4229_v7 = vpop.f32.mrf.mxu1  ;;  %v4231_v31 = vpop.f32.mrf.mxu0 }
 0x177   :  { %4418 = vst [vmem:[#allocation19_spill] sm:$0xff] %v4229_v7  ;;  %4419 = vst [vmem:[#allocation20_spill] sm:$0xff] %v4231_v31  ;;  %v2830_v7 = vadd.f32 %v2829_v9, %v2828_v47  ;;  %v2894_v9 = vadd.f32 %v4139_v49, %v4137_v14 }
 0x178   :  { %v4233_v33 = vpop.f32.mrf.mxu1  ;;  %v4235_v34 = vpop.f32.mrf.mxu0 }
 0x179   :  { %4420 = vst [vmem:[#allocation21_spill] sm:$0xff] %v4233_v33  ;;  %4421 = vst [vmem:[#allocation22_spill] sm:$0xff] %v4235_v34  ;;  %v1945_v34 = vadd.f32 %v2827_v35, %v4086_v29 }
 0x17a   :  { %v4237_v38 = vpop.f32.mrf.mxu1  ;;  %v4239_v8 = vpop.f32.mrf.mxu0 }
 0x17b   :  { %4422 = vst [vmem:[#allocation23_spill] sm:$0xff] %v4237_v38  ;;  %4423 = vst [vmem:[#allocation24_spill] sm:$0xff] %v4239_v8  ;;  %v2891_v8 = vadd.f32 %v4133_v26, %v4130_v41  ;;  %v4264_v41 = vld [vmem:[%s4400_s2] ss:$0 sm:$0xff] }
 0x17c   :  { %v4241_v3 = vpop.f32.mrf.mxu1  ;;  %v4243_v46 = vpop.f32.mrf.mxu0 }
 0x17d   :  { %4424 = vst [vmem:[#allocation25_spill] sm:$0xff] %v4241_v3  ;;  %4425 = vst [vmem:[#allocation26_spill] sm:$0xff] %v4243_v46  ;;  %v1948_v3 = vadd.f32 %v2830_v7, %v4089_v39  ;;  %v2042_v45 = vadd.f32 %v2891_v8, %v1945_v34 }
 0x17e   :  { %v4245_v25 = vpop.f32.mrf.mxu1  ;;  %v4247_v18 = vpop.f32.mrf.mxu0 }
 0x17f   :  { %4426 = vst [vmem:[#allocation27_spill] sm:$0xff] %v4245_v25  ;;  %4427 = vst [vmem:[#allocation28_spill] sm:$0xff] %v4247_v18  ;;  %v2833_v18 = vadd.f32 %v4145_v36, %v4141_v50  ;;  %v2045_v25 = vadd.f32 %v2894_v9, %v1948_v3  ;;  %v2839_v3 = vadd.f32 %v4161_v42, %v4157_v61 }
 0x180   :  { %v4249_v62 = vpop.f32.mrf.mxu1  ;;  %v4251_v31 = vpop.f32.mrf.mxu0 }
 0x181   :  { %4428 = vst [vmem:[#allocation29_spill] sm:$0xff] %v4249_v62  ;;  %4429 = vst [vmem:[#allocation30_spill] sm:$0xff] %v4251_v31  ;;  %v1953_v26 = vadd.f32 %v2833_v18, %v4092_v48  ;;  %v1961_v42 = vadd.f32 %v2839_v3, %v4098_v4 }
 0x182   :  { %v2953_v33 = vpop.f32.mrf.mxu1  ;;  %v3017_v38 = vpop.f32.mrf.mxu0 }
 0x184   :  { %v2954_v46 = vpop.f32.mrf.mxu1  ;;  %v3018_v40 = vpop.f32.mrf.mxu0 }
 0x185   :  { %v2955_v47 = vadd.f32 %v2954_v46, %v2953_v33  ;;  %v3019_v35 = vadd.f32 %v3018_v40, %v3017_v38  ;;  %v2836_v46 = vadd.f32 %v4153_v27, %v4149_v15  ;;  %v2897_v33 = vadd.f32 %v4147_v55, %v4143_v54 }
 0x186   :  { %v2956_v31 = vpop.f32.mrf.mxu1  ;;  %v3020_v62 = vpop.f32.mrf.mxu0 }
 0x187   :  { %v2139_v29 = vadd.f32 %v2955_v47, %v2042_v45  ;;  %v2050_v48 = vadd.f32 %v2897_v33, %v1953_v26  ;;  %v1956_v18 = vadd.f32 %v2836_v46, %v4095_v57 }
 0x188   :  { %v2957_v39 = vpop.f32.mrf.mxu1  ;;  %v3021_v7 = vpop.f32.mrf.mxu0 }
 0x189   :  { %v2236_v50 = vadd.f32 %v3019_v35, %v2139_v29  ;;  %v2958_v36 = vadd.f32 %v2957_v39, %v2956_v31  ;;  %v3022_v8 = vadd.f32 %v3021_v7, %v3020_v62  ;;  %v2842_v29 = vadd.f32 %v4169_v5, %v4165_v1 }
 0x18a   :  { %v2959_v14 = vpop.f32.mrf.mxu1  ;;  %v3023_v49 = vpop.f32.mrf.mxu0  ;;  %v2845_v5 = vadd.f32 %v4177_v11, %v4173_v10 }
 0x18b   :  { %v2356_v34 = vadd.f32 %v4264_v41, %v2236_v50  ;;  %v2142_v38 = vadd.f32 %v2958_v36, %v2045_v25  ;;  %v2900_v25 = vadd.f32 %v4155_v60, %v4151_v56  ;;  %v2903_v56 = vadd.f32 %v4163_v0, %v4159_v63 }
 0x18c   :  { %v2960_v40 = vpop.f32.mrf.mxu1  ;;  %v3024_v45 = vpop.f32.mrf.mxu0  ;;  %v1964_v1 = vadd.f32 %v2842_v29, %v4101_v13  ;;  %v2848_v13 = vadd.f32 %v4185_v17, %v4181_v43 }
 0x18d   :  { %2372 = vst [vmem:[%s4401_s3] sm:$0xff] %v2356_v34  ;;  %v2239_v15 = vadd.f32 %v3022_v8, %v2142_v38  ;;  %v2961_v27 = vadd.f32 %v2960_v40, %v2959_v14  ;;  %v3025_v61 = vadd.f32 %v3024_v45, %v3023_v49  ;;  %v2053_v57 = vadd.f32 %v2900_v25, %v1956_v18 }
 0x18e   :  { %v2962_v31 = vpop.f32.mrf.mxu1  ;;  %v3026_v54 = vpop.f32.mrf.mxu0  ;;  %v2058_v50 = vadd.f32 %v2903_v56, %v1961_v42  ;;  %v2906_v34 = vadd.f32 %v4171_v6, %v4167_v37  ;;  %v1969_v45 = vadd.f32 %v2845_v5, %v4104_v22  ;;  %v2909_v6 = vadd.f32 %v4179_v12, %v4175_v52 }
 0x18f   :  { %v2357_v62 = vadd.f32 %v4264_v41, %v2239_v15  ;;  %v2147_v55 = vadd.f32 %v2961_v27, %v2050_v48  ;;  %v1972_v17 = vadd.f32 %v2848_v13, %v4107_v32  ;;  %v2912_v52 = vadd.f32 %v4187_v19, %v4183_v16 }
 0x190   :  { %v2963_v47 = vpop.f32.mrf.mxu1  ;;  %v3027_v9 = vpop.f32.mrf.mxu0  ;;  %v2061_v11 = vadd.f32 %v2906_v34, %v1964_v1  ;;  %v2066_v22 = vadd.f32 %v2909_v6, %v1969_v45  ;;  %v4431_v34 = vld [vmem:[#allocation11_spill] sm:$0xff] }
 0x191   :  { %2373 = vst [vmem:[%s4401_s3 + $0x8] sm:$0xff] %v2357_v62  ;;  %v2244_v35 = vadd.f32 %v3025_v61, %v2147_v55  ;;  %v2964_v39 = vadd.f32 %v2963_v47, %v2962_v31  ;;  %v3028_v46 = vadd.f32 %v3027_v9, %v3026_v54  ;;  %v2851_v62 = vadd.f32 %v4193_v21, %v4189_v58 }
 0x192   :  { %v2965_v60 = vpop.f32.mrf.mxu1  ;;  %v3029_v7 = vpop.f32.mrf.mxu0  ;;  %v2854_v21 = vadd.f32 %v4201_v28, %v4197_v23 }
 0x193   :  { %v2358_v26 = vadd.f32 %v4264_v41, %v2244_v35  ;;  %v2150_v4 = vadd.f32 %v2964_v39, %v2053_v57  ;;  %v2069_v57 = vadd.f32 %v2912_v52, %v1972_v17  ;;  %v1977_v58 = vadd.f32 %v2851_v62, %v4110_v44  ;;  %v4437_v17 = vld [vmem:[#allocation17_spill] sm:$0xff]  ;;  %v4439_v52 = vld [vmem:[#allocation14_spill] sm:$0xff] }
 0x194   :  { %v2966_v36 = vpop.f32.mrf.mxu1  ;;  %v3030_v14 = vpop.f32.mrf.mxu0  ;;  %v2857_v44 = vadd.f32 %v4209_v59, %v4205_v30  ;;  %v4430_v59 = vld [vmem:[#allocation3_spill] sm:$0xff] }
 0x195   :  { %2374 = vst [vmem:[%s4401_s3 + $0x10] sm:$0xff] %v2358_v26  ;;  %v2247_v49 = vadd.f32 %v3028_v46, %v2150_v4  ;;  %v2967_v63 = vadd.f32 %v2966_v36, %v2965_v60  ;;  %v3031_v3 = vadd.f32 %v3030_v14, %v3029_v7  ;;  %v2915_v60 = vadd.f32 %v4195_v53, %v4191_v20 }
 0x196   :  { %v2968_v0 = vpop.f32.mrf.mxu1  ;;  %v3032_v33 = vpop.f32.mrf.mxu0  ;;  %v2918_v53 = vadd.f32 %v4203_v2, %v4199_v24  ;;  %v4434_v24 = vld [vmem:[#allocation10_spill] sm:$0xff] }
 0x197   :  { %v2359_v38 = vadd.f32 %v4264_v41, %v2247_v49  ;;  %v2155_v8 = vadd.f32 %v2967_v63, %v2058_v50  ;;  %v2074_v28 = vadd.f32 %v2915_v60, %v1977_v58  ;;  %v1980_v50 = vadd.f32 %v2854_v21, %v4113_v51 }
 0x198   :  { %v2969_v40 = vpop.f32.mrf.mxu1  ;;  %v3033_v10 = vpop.f32.mrf.mxu0  ;;  %v1985_v63 = vadd.f32 %v2857_v44, %v4430_v59 }
 0x199   :  { %2375 = vst [vmem:[%s4401_s3 + $0x18] sm:$0xff] %v2359_v38  ;;  %v2252_v48 = vadd.f32 %v3031_v3, %v2155_v8  ;;  %v2970_v18 = vadd.f32 %v2969_v40, %v2968_v0  ;;  %v3034_v43 = vadd.f32 %v3033_v10, %v3032_v33  ;;  %v2077_v51 = vadd.f32 %v2918_v53, %v1980_v50  ;;  %v4432_v38 = vld [vmem:[#allocation13_spill] sm:$0xff]  ;;  %v4445_v50 = vld [vmem:[#allocation6_spill] sm:$0xff]  ;;  %v4446_v53 = vld [vmem:[#allocation23_spill] sm:$0xff] }
 0x19a   :  { %v2971_v15 = vpop.f32.mrf.mxu1  ;;  %v3035_v37 = vpop.f32.mrf.mxu0  ;;  %v2860_v8 = vadd.f32 %v4432_v38, %v4431_v34  ;;  %v4433_v40 = vld [vmem:[#allocation9_spill] sm:$0xff] }
 0x19b   :  { %v2360_v27 = vadd.f32 %v4264_v41, %v2252_v48  ;;  %v2158_v31 = vadd.f32 %v2970_v18, %v2061_v11  ;;  %v2921_v2 = vadd.f32 %v4434_v24, %v4433_v40 }
 0x19c   :  { %v2972_v54 = vpop.f32.mrf.mxu1  ;;  %v3036_v25 = vpop.f32.mrf.mxu0 }
 0x19d   :  { %2376 = vst [vmem:[%s4401_s3 + $0x20] sm:$0xff] %v2360_v27  ;;  %v2255_v55 = vadd.f32 %v3034_v43, %v2158_v31  ;;  %v2973_v61 = vadd.f32 %v2972_v54, %v2971_v15  ;;  %v3037_v9 = vadd.f32 %v3036_v25, %v3035_v37  ;;  %v2082_v15 = vadd.f32 %v2921_v2, %v1985_v63  ;;  %v4435_v27 = vld [vmem:[#allocation4_spill] sm:$0xff]  ;;  %v4436_v43 = vld [vmem:[#allocation15_spill] sm:$0xff] }
 0x19e   :  { %v2974_v12 = vpop.f32.mrf.mxu1  ;;  %v3038_v42 = vpop.f32.mrf.mxu0  ;;  %v1988_v31 = vadd.f32 %v2860_v8, %v4435_v27  ;;  %v2863_v54 = vadd.f32 %v4437_v17, %v4436_v43  ;;  %v4448_v63 = vld [vmem:[#allocation20_spill] sm:$0xff]  ;;  %v4450_v2 = vld [vmem:[#allocation7_spill] sm:$0xff] }
 0x19f   :  { %v2361_v47 = vadd.f32 %v4264_v41, %v2255_v55  ;;  %v2163_v32 = vadd.f32 %v2973_v61, %v2066_v22  ;;  %v4438_v61 = vld [vmem:[#allocation12_spill] sm:$0xff] }
 0x1a0   :  { %v2975_v29 = vpop.f32.mrf.mxu1  ;;  %v3039_v35 = vpop.f32.mrf.mxu0  ;;  %v4453_v27 = vld [vmem:[#allocation24_spill] sm:$0xff] }
 0x1a1   :  { %2377 = vst [vmem:[%s4401_s3 + $0x28] sm:$0xff] %v2361_v47  ;;  %v2260_v39 = vadd.f32 %v3037_v9, %v2163_v32  ;;  %v2976_v16 = vadd.f32 %v2975_v29, %v2974_v12  ;;  %v3040_v4 = vadd.f32 %v3039_v35, %v3038_v42  ;;  %v2924_v12 = vadd.f32 %v4439_v52, %v4438_v61  ;;  %v4440_v9 = vld [vmem:[#allocation19_spill] sm:$0xff]  ;;  %v4455_v61 = vld [vmem:[#allocation8_spill] sm:$0xff] }
 0x1a2   :  { %v2977_v19 = vpop.f32.mrf.mxu1  ;;  %v3041_v56 = vpop.f32.mrf.mxu0 }
 0x1a3   :  { %v2362_v7 = vadd.f32 %v4264_v41, %v2260_v39  ;;  %v2166_v26 = vadd.f32 %v2976_v16, %v2069_v57  ;;  %v4441_v57 = vld [vmem:[#allocation21_spill] sm:$0xff]  ;;  %v2085_v21 = vadd.f32 %v2924_v12, %v1988_v31  ;;  %v4454_v31 = vld [vmem:[#allocation26_spill] sm:$0xff] }
 0x1a4   :  { %v2978_v46 = vpop.f32.mrf.mxu1  ;;  %v3042_v23 = vpop.f32.mrf.mxu0  ;;  %v2866_v29 = vadd.f32 %v4441_v57, %v4440_v9  ;;  %v4442_v39 = vld [vmem:[#allocation5_spill] sm:$0xff]  ;;  %v2933_v43 = vadd.f32 %v4454_v31, %v4453_v27  ;;  %v4456_v9 = vld [vmem:[#allocation28_spill] sm:$0xff]  ;;  %v4457_v57 = vld [vmem:[#allocation30_spill] sm:$0xff] }
 0x1a5   :  { %2378 = vst [vmem:[%s4401_s3 + $0x30] sm:$0xff] %v2362_v7  ;;  %v2263_v36 = vadd.f32 %v3040_v4, %v2166_v26  ;;  %v2979_v14 = vadd.f32 %v2978_v46, %v2977_v19  ;;  %v3043_v30 = vadd.f32 %v3042_v23, %v3041_v56  ;;  %v1993_v16 = vadd.f32 %v2863_v54, %v4442_v39  ;;  %v4443_v26 = vld [vmem:[#allocation16_spill] sm:$0xff]  ;;  %v4444_v4 = vld [vmem:[#allocation18_spill] sm:$0xff] }
 0x1a6   :  { %v2980_v1 = vpop.f32.mrf.mxu1  ;;  %v3044_v20 = vpop.f32.mrf.mxu0  ;;  %v2927_v44 = vadd.f32 %v4444_v4, %v4443_v26 }
 0x1a7   :  { %v2363_v5 = vadd.f32 %v4264_v41, %v2263_v36  ;;  %v2171_v49 = vadd.f32 %v2979_v14, %v2074_v28  ;;  %v1996_v36 = vadd.f32 %v2866_v29, %v4445_v50  ;;  %v2936_v29 = vadd.f32 %v4457_v57, %v4456_v9 }
 0x1a8   :  { %v2981_v0 = vpop.f32.mrf.mxu1  ;;  %v3045_v33 = vpop.f32.mrf.mxu0 }
 0x1a9   :  { %2379 = vst [vmem:[%s4401_s3 + $0x38] sm:$0xff] %v2363_v5  ;;  %v2268_v3 = vadd.f32 %v3043_v30, %v2171_v49  ;;  %v2982_v13 = vadd.f32 %v2981_v0, %v2980_v1  ;;  %v3046_v18 = vadd.f32 %v3045_v33, %v3044_v20  ;;  %v2090_v20 = vadd.f32 %v2927_v44, %v1993_v16  ;;  %v4447_v5 = vld [vmem:[#allocation25_spill] sm:$0xff]  ;;  %v4449_v0 = vld [vmem:[#allocation22_spill] sm:$0xff] }
 0x1aa   :  { %v2983_v10 = vpop.f32.mrf.mxu1  ;;  %v3047_v11 = vpop.f32.mrf.mxu0  ;;  %v2869_v49 = vadd.f32 %v4447_v5, %v4446_v53  ;;  %v2930_v33 = vadd.f32 %v4449_v0, %v4448_v63 }
 0x1ab   :  { %v2364_v45 = vadd.f32 %v4264_v41, %v2268_v3  ;;  %v2174_v48 = vadd.f32 %v2982_v13, %v2077_v51 }
 0x1ac   :  { %v2984_v37 = vpop.f32.mrf.mxu1  ;;  %v3048_v6 = vpop.f32.mrf.mxu0  ;;  %v2093_v13 = vadd.f32 %v2930_v33, %v1996_v36 }
 0x1ad   :  { %2380 = vst [vmem:[%s4401_s3 + $0x40] sm:$0xff] %v2364_v45  ;;  %v2271_v25 = vadd.f32 %v3046_v18, %v2174_v48  ;;  %v2985_v22 = vadd.f32 %v2984_v37, %v2983_v10  ;;  %v3049_v32 = vadd.f32 %v3048_v6, %v3047_v11  ;;  %v2001_v10 = vadd.f32 %v2869_v49, %v4450_v2  ;;  %v4451_v11 = vld [vmem:[#allocation27_spill] sm:$0xff]  ;;  %v4452_v45 = vld [vmem:[#allocation29_spill] sm:$0xff] }
 0x1ae   :  { %v2986_v62 = vpop.f32.mrf.mxu1  ;;  %v3050_v55 = vpop.f32.mrf.mxu0  ;;  %v2872_v48 = vadd.f32 %v4452_v45, %v4451_v11 }
 0x1af   :  { %v2365_v42 = vadd.f32 %v4264_v41, %v2271_v25  ;;  %v2179_v47 = vadd.f32 %v2985_v22, %v2082_v15 }
 0x1b0   :  { %v2987_v35 = vpop.f32.mrf.mxu1  ;;  %v3051_v58 = vpop.f32.mrf.mxu0  ;;  %v2004_v52 = vadd.f32 %v2872_v48, %v4455_v61 }
 0x1b1   :  { %2381 = vst [vmem:[%s4401_s3 + $0x48] sm:$0xff] %v2365_v42  ;;  %v2276_v19 = vadd.f32 %v3049_v32, %v2179_v47  ;;  %v2988_v56 = vadd.f32 %v2987_v35, %v2986_v62  ;;  %v3052_v28 = vadd.f32 %v3051_v58, %v3050_v55  ;;  %v2098_v55 = vadd.f32 %v2933_v43, %v2001_v10 }
 0x1b2   :  { %v2989_v60 = vpop.f32.mrf.mxu1  ;;  %v3053_v7 = vpop.f32.mrf.mxu0 }
 0x1b3   :  { %v2366_v46 = vadd.f32 %v4264_v41, %v2276_v19  ;;  %v2182_v23 = vadd.f32 %v2988_v56, %v2085_v21  ;;  %v2101_v19 = vadd.f32 %v2936_v29, %v2004_v52 }
 0x1b4   :  { %v2990_v14 = vpop.f32.mrf.mxu1  ;;  %v3054_v1 = vpop.f32.mrf.mxu0 }
 0x1b5   :  { %2382 = vst [vmem:[%s4401_s3 + $0x50] sm:$0xff] %v2366_v46  ;;  %v2279_v30 = vadd.f32 %v3052_v28, %v2182_v23  ;;  %v2991_v59 = vadd.f32 %v2990_v14, %v2989_v60  ;;  %v3055_v3 = vadd.f32 %v3054_v1, %v3053_v7 }
 0x1b6   :  { %v2992_v51 = vpop.f32.mrf.mxu1  ;;  %v3056_v34 = vpop.f32.mrf.mxu0 }
 0x1b7   :  { %v2367_v38 = vadd.f32 %v4264_v41, %v2279_v30  ;;  %v2187_v8 = vadd.f32 %v2991_v59, %v2090_v20 }
 0x1b8   :  { %v2993_v40 = vpop.f32.mrf.mxu1  ;;  %v3057_v24 = vpop.f32.mrf.mxu0 }
 0x1b9   :  { %2383 = vst [vmem:[%s4401_s3 + $0x58] sm:$0xff] %v2367_v38  ;;  %v2284_v18 = vadd.f32 %v3055_v3, %v2187_v8  ;;  %v2994_v15 = vadd.f32 %v2993_v40, %v2992_v51  ;;  %v3058_v25 = vadd.f32 %v3057_v24, %v3056_v34 }
 0x1ba   :  { %v2995_v37 = vpop.f32.mrf.mxu1  ;;  %v3059_v6 = vpop.f32.mrf.mxu0 }
 0x1bb   :  { %v2368_v17 = vadd.f32 %v4264_v41, %v2284_v18  ;;  %v2190_v54 = vadd.f32 %v2994_v15, %v2093_v13 }
 0x1bc   :  { %v2996_v22 = vpop.f32.mrf.mxu1  ;;  %v3060_v62 = vpop.f32.mrf.mxu0 }
 0x1bd   :  { %2384 = vst [vmem:[%s4401_s3 + $0x60] sm:$0xff] %v2368_v17  ;;  %v2287_v12 = vadd.f32 %v3058_v25, %v2190_v54  ;;  %v2997_v42 = vadd.f32 %v2996_v22, %v2995_v37  ;;  %v3061_v21 = vadd.f32 %v3060_v62, %v3059_v6 }
 0x1be   :  { %v2998_v47 = vpop.f32.mrf.mxu1  ;;  %v3062_v32 = vpop.f32.mrf.mxu0 }
 0x1bf   :  { %v2369_v35 = vadd.f32 %v4264_v41, %v2287_v12  ;;  %v2195_v58 = vadd.f32 %v2997_v42, %v2098_v55 }
 0x1c0   :  { %v2999_v39 = vpop.f32.mrf.mxu1  ;;  %v3063_v16 = vpop.f32.mrf.mxu0 }
 0x1c1   :  { %2385 = vst [vmem:[%s4401_s3 + $0x68] sm:$0xff] %v2369_v35  ;;  %v2292_v56 = vadd.f32 %v3061_v21, %v2195_v58  ;;  %v3000_v60 = vadd.f32 %v2999_v39, %v2998_v47  ;;  %v3064_v4 = vadd.f32 %v3063_v16, %v3062_v32 }
 0x1c3   :  { %v2370_v7 = vadd.f32 %v4264_v41, %v2292_v56  ;;  %v2198_v26 = vadd.f32 %v3000_v60, %v2101_v19 }
 0x1c5   :  { %2386 = vst [vmem:[%s4401_s3 + $0x70] sm:$0xff] %v2370_v7  ;;  %v2295_v44 = vadd.f32 %v3064_v4, %v2198_v26 }
 0x1c7   :  { %v2371_v46 = vadd.f32 %v4264_v41, %v2295_v44 }
 0x1c9   :  { %2387 = vst [vmem:[%s4401_s3 + $0x78] sm:$0xff] %v2371_v46 }

// kernel: an3ddr_forward.34
= control target key start
LH: loop header
LB: loop body
LE: loop exit
PB: predicated region body
PF: predicated region fallthrough
CT: control target
= control target key end

     0   :  { %s110_s0 = inlined_call_operand.vmem [shape: f32[32,128], index: 0, kind: input, shape index: {}]   ;;  %s111_s1 = inlined_call_operand.vmem [shape: f32[32,128], index: 1, kind: input, shape index: {}]   ;;  %s112_s2 = inlined_call_operand.vmem [shape: f32[32,128], index: 2, kind: input, shape index: {}]   ;;  %s113_s3 = inlined_call_operand.vmem [shape: f32[32,128], index: 3, kind: output, shape index: {}]  }
   0x1   :  { %v14_v0 = vld [vmem:[%s110_s0] sm:$0xff]  ;;  %v15_v4 = vld [vmem:[%s110_s0 + $0x8] sm:$0xff]  ;;  %v16_v8 = vld [vmem:[%s110_s0 + $0x10] sm:$0xff] }
   0x2   :  { %v18_v1 = vld [vmem:[%s111_s1] sm:$0xff]  ;;  %v19_v5 = vld [vmem:[%s111_s1 + $0x8] sm:$0xff]  ;;  %v20_v9 = vld [vmem:[%s111_s1 + $0x10] sm:$0xff] }
   0x3   :  { %v26_v2 = vld [vmem:[%s112_s2] sm:$0xff]  ;;  %v22_v3 = vmax.f32 %v14_v0, %v18_v1  ;;  %v27_v6 = vld [vmem:[%s112_s2 + $0x8] sm:$0xff]  ;;  %v23_v7 = vmax.f32 %v15_v4, %v19_v5  ;;  %v28_v10 = vld [vmem:[%s112_s2 + $0x10] sm:$0xff]  ;;  %v24_v12 = vmax.f32 %v16_v8, %v20_v9 }
   0x4   :  { %v17_v13 = vld [vmem:[%s110_s0 + $0x18] sm:$0xff] }
   0x5   :  { %v30_v11 = vmax.f32 %v22_v3, %v26_v2  ;;  %v21_v14 = vld [vmem:[%s111_s1 + $0x18] sm:$0xff]  ;;  %v31_v16 = vmax.f32 %v23_v7, %v27_v6  ;;  %v32_v18 = vmax.f32 %v24_v12, %v28_v10 }
   0x6   :  { %v29_v15 = vld [vmem:[%s112_s2 + $0x18] sm:$0xff]  ;;  %v25_v17 = vmax.f32 %v17_v13, %v21_v14 }
   0x7   :  { %34 = vst [vmem:[%s113_s3] sm:$0xff] %v30_v11  ;;  %35 = vst [vmem:[%s113_s3 + $0x8] sm:$0xff] %v31_v16 }
   0x8   :  { %v33_v19 = vmax.f32 %v25_v17, %v29_v15  ;;  %36 = vst [vmem:[%s113_s3 + $0x10] sm:$0xff] %v32_v18 }
   0xa   :  { %37 = vst [vmem:[%s113_s3 + $0x18] sm:$0xff] %v33_v19 }

// kernel: an3ddr_forward.35
= control target key start
LH: loop header
LB: loop body
LE: loop exit
PB: predicated region body
PF: predicated region fallthrough
CT: control target
= control target key end

     0   :  { %s74_s0 = inlined_call_operand.vmem [shape: f32[16,128], index: 0, kind: input, shape index: {}]   ;;  %s75_s1 = inlined_call_operand.vmem [shape: f32[16,128], index: 1, kind: input, shape index: {}]   ;;  %s76_s2 = inlined_call_operand.vmem [shape: f32[16,128], index: 2, kind: input, shape index: {}]   ;;  %s77_s3 = inlined_call_operand.vmem [shape: f32[16,128], index: 3, kind: output, shape index: {}]  }
   0x1   :  { %v14_v0 = vld [vmem:[%s74_s0] sm:$0xff]  ;;  %v15_v4 = vld [vmem:[%s74_s0 + $0x8] sm:$0xff] }
   0x2   :  { %v16_v1 = vld [vmem:[%s75_s1] sm:$0xff]  ;;  %v17_v5 = vld [vmem:[%s75_s1 + $0x8] sm:$0xff] }
   0x3   :  { %v20_v2 = vld [vmem:[%s76_s2] sm:$0xff]  ;;  %v18_v3 = vmax.f32 %v14_v0, %v16_v1  ;;  %v21_v6 = vld [vmem:[%s76_s2 + $0x8] sm:$0xff]  ;;  %v19_v7 = vmax.f32 %v15_v4, %v17_v5 }
   0x5   :  { %v22_v8 = vmax.f32 %v18_v3, %v20_v2  ;;  %v23_v9 = vmax.f32 %v19_v7, %v21_v6 }
   0x7   :  { %24 = vst [vmem:[%s77_s3] sm:$0xff] %v22_v8  ;;  %25 = vst [vmem:[%s77_s3 + $0x8] sm:$0xff] %v23_v9 }

// kernel: an3ddr_forward.36
= control target key start
LH: loop header
LB: loop body
LE: loop exit
PB: predicated region body
PF: predicated region fallthrough
CT: control target
= control target key end

     0   :  { %s1254_s12 = smov 0   ;;  %s1256_s13 = smov 0   ;;  %s1408_s0 = inlined_call_operand.vmem [shape: bf16[16,3584], index: 0, kind: input, shape index: {}]   ;;  %s1409_s1 = inlined_call_operand.vmem [shape: bf16[3584,256], index: 1, kind: input, shape index: {}]   ;;  %s1410_s2 = inlined_call_operand.vmem [shape: f32[1,256], index: 2, kind: input, shape index: {}]   ;;  %s1411_s3 = inlined_call_operand.vmem [shape: f32[16,256], index: 3, kind: output, shape index: {}]  }
   0x1   :  { %s1258_s14 = smov 0   ;;  %s1260_s15 = smov 0  }
   0x2   :  { %s1262_s16 = smov 0  }
   0x3 LB: > { %s25_s17 = sadd.s32 1, %s1227_s15  ;;  %p48_p1 = scmp.ne.s32.totalorder %s1219_s13, %s1215_s12  ;;  %s1231_s16 = sphi %s1262_s16, %s13_s16   ;;  %s1227_s15 = sphi %s1260_s15, %s1415_s15   ;;  %s1223_s14 = sphi %s1258_s14, %s1414_s14   ;;  %s1219_s13 = sphi %s1256_s13, %s1413_s13   ;;  %s1215_s12 = sphi %s1254_s12, %s1412_s12  }
   0x4   : > { %p26_p0 = scmp.ge.s32.totalorder %s25_s17, 7  ;;  %p49_p2 = scmp.eq.s32.totalorder %s1231_s16, 0 }
   0x5   : > { %s41_s19 = sadd.s32 1, %s1219_s13  ;;  %p965_p5 = scmp.ge.s32.totalorder %s1231_s16, 7 }
   0x6   : > { %s1417_s17 = smov (%p26_p0, %s25_s17), 0  ;;  %p50_p3 = por %p49_p2, %p48_p1 }
   0x7   : > { %s37_s18 = ssub.s32 %s1227_s15, %s1417_s17  ;;  %164 = sbr.rel (%p965_p5) target bundleno = 18 (0x12), region = 20 }
   0x8   : > { %p39_p4 = scmp.eq.s32.totalorder %s37_s18, 0 }
   0xa   : > { %s1289_s20 = scalar_select %p39_p4, %s1219_s13, %s41_s19  }
   0xc   : > { %167 = sbr.rel (!%p50_p3) target bundleno = 18 (0x12), region = 24  ;;  %s169_s21 = sand.u32 (%p50_p3), 1, %s1219_s13  }
   0xd   : > { %s1048_s22 = sshll.u32 (%p50_p3), %s1227_s15, 4  ;;  %s966_s23 = sshll.u32 (%p50_p3), %s169_s21, 5 }
   0xe   : > { %s177_s26 = scalar_lea.vmem (%p50_p3), %s1408_s0, %s1048_s22  ;;  %s171_s27 = scalar_lea.vmem (%p50_p3), [#allocation3], %s966_s23 }
   0xf   : > { %v190_v0 = vld [vmem:[%s177_s26] sm:$0xff] (%p50_p3)  ;;  %v192_v1 = vld [vmem:[%s177_s26 + $0x8] sm:$0xff] (%p50_p3)  ;;  %v194_v2 = vld [vmem:[%s177_s26 + $0x70] sm:$0xff] (%p50_p3) }
  0x10   : > { %191 = vst [vmem:[%s171_s27] sm:$0xff] (%p50_p3), %v190_v0  ;;  %193 = vst [vmem:[%s171_s27 + $0x8] sm:$0xff] (%p50_p3), %v192_v1  ;;  %v196_v3 = vld [vmem:[%s177_s26 + $0x78] sm:$0xff] (%p50_p3) }
  0x11   : > { %195 = vst [vmem:[%s171_s27 + $0x10] sm:$0xff] %v194_v2  ;;  %197 = vst [vmem:[%s171_s27 + $0x18] sm:$0xff] %v196_v3 }
  0x12 PF: > { %p969_p6 = scmp.ge.s32.totalorder %s1231_s16, 1  ;;  %p217_p7 = scmp.lt.s32.totalorder %s1231_s16, 8 }
  0x14   : > { %p218_p8 = pnand %p969_p6, %p217_p7 }
  0x15   : > { %s224_s28 = sand.u32 (!%p218_p8), 1, %s1215_s12   ;;  %s971_s29 = sshll.u32 (!%p218_p8), %s1223_s14, 6 }
  0x16   : > { %221 = sbr.rel (%p218_p8) target bundleno = 317 (0x13d), region = 51  ;;  %s970_s30 = sshll.u32 (!%p218_p8), %s224_s28, 5 }
  0x17   : > { %p270_p9 = scmp.lt.s32.totalorder (!%p218_p8), %s971_s29, 447  ;;  %s1306_s8 = scalar_lea.vmem (!%p218_p8), [#allocation3], %s970_s30 }
  0x18   : > { %p974_p10 = scmp.ne.s32.totalorder (!%p218_p8), %s1223_s14, 0 }
  0x1b   : > { %s1419_s29 = smov (!%p270_p9, %s971_s29), 447  ;;  %300 = sbr.rel (%p974_p10) target bundleno = 35 (0x23), region = 59 }
  0x1c   : > { %s1049_s4 = sshll.u32 %s1419_s29, 3 }
  0x1d   : > { %s1304_s7 = scalar_lea.vmem %s1409_s1, %s1049_s4 }
  0x20   : > { %v1233_v4 = vmov 0.0  }
  0x21   : > { %301 = vst [vmem:[#allocation2 + $0x10] sm:$0xff] %v1233_v4  ;;  %302 = vst [vmem:[#allocation2] sm:$0xff] %v1233_v4 }
  0x22   : > { %303 = vst [vmem:[#allocation2 + $0x18] sm:$0xff] %v1233_v4  ;;  %304 = vst [vmem:[#allocation2 + $0x8] sm:$0xff] %v1233_v4 }
  0x23 PF: > { %v1091_v5 = vld [vmem:[%s1304_s7 + $0x74] ss:$8 sps:$4 sm:$0xff]   ;;  %v1095_v7 = vld [vmem:[%s1304_s7 + $0x70] ss:$8 sps:$4 sm:$0xff]   ;;  %v1097_v9 = vld [vmem:[%s1304_s7 + $0x64] ss:$8 sps:$4 sm:$0xff]  }
  0x24   : > { %v1093_v6 = vld [vmem:[%s1304_s7 + $0x174] ss:$8 sps:$4 sm:$0xff]   ;;  %717 = vmatprep.subr.bf16.mxu0 %v1091_v5  ;;  %v1096_v8 = vld [vmem:[%s1304_s7 + $0x170] ss:$8 sps:$4 sm:$0xff]   ;;  %v1099_v10 = vld [vmem:[%s1304_s7 + $0x164] ss:$8 sps:$4 sm:$0xff]  }
  0x25   : > { %760 = vmatprep.subr.bf16.mxu1 %v1093_v6  ;;  %718 = vmatpush1.bf16.msra.mxu0 %v1095_v7  ;;  %v1101_v11 = vld [vmem:[%s1304_s7 + $0x60] ss:$8 sps:$4 sm:$0xff]   ;;  %v1103_v13 = vld [vmem:[%s1304_s7 + $0x54] ss:$8 sps:$4 sm:$0xff]   ;;  %v1107_v15 = vld [vmem:[%s1304_s7 + $0x50] ss:$8 sps:$4 sm:$0xff]  }
  0x26   : > { %761 = vmatpush1.bf16.msra.mxu1 %v1096_v8  ;;  %719 = vmatprep.subr.bf16.mxu0 %v1097_v9  ;;  %v1102_v12 = vld [vmem:[%s1304_s7 + $0x160] ss:$8 sps:$4 sm:$0xff]   ;;  %v1105_v14 = vld [vmem:[%s1304_s7 + $0x154] ss:$8 sps:$4 sm:$0xff]   ;;  %v1108_v16 = vld [vmem:[%s1304_s7 + $0x150] ss:$8 sps:$4 sm:$0xff]  }
  0x27   : > { %762 = vmatprep.subr.bf16.mxu1 %v1099_v10  ;;  %v1109_v17 = vld [vmem:[%s1304_s7 + $0x44] ss:$8 sps:$4 sm:$0xff]   ;;  %v1113_v19 = vld [vmem:[%s1304_s7 + $0x40] ss:$8 sps:$4 sm:$0xff]   ;;  %v1115_v21 = vld [vmem:[%s1304_s7 + $0x34] ss:$8 sps:$4 sm:$0xff]  }
  0x28   : > { %v1111_v18 = vld [vmem:[%s1304_s7 + $0x144] ss:$8 sps:$4 sm:$0xff]   ;;  %v1114_v20 = vld [vmem:[%s1304_s7 + $0x140] ss:$8 sps:$4 sm:$0xff]   ;;  %v1117_v22 = vld [vmem:[%s1304_s7 + $0x134] ss:$8 sps:$4 sm:$0xff]  }
  0x29   : > { %720 = vmatpush1.bf16.msra.mxu0 %v1101_v11  ;;  %v1119_v23 = vld [vmem:[%s1304_s7 + $0x30] ss:$8 sps:$4 sm:$0xff]   ;;  %v1121_v25 = vld [vmem:[%s1304_s7 + $0x24] ss:$8 sps:$4 sm:$0xff]   ;;  %v1125_v27 = vld [vmem:[%s1304_s7 + $0x20] ss:$8 sps:$4 sm:$0xff]  }
  0x2a   : > { %763 = vmatpush1.bf16.msra.mxu1 %v1102_v12  ;;  %721 = vmatprep.subr.bf16.mxu0 %v1103_v13  ;;  %v1120_v24 = vld [vmem:[%s1304_s7 + $0x130] ss:$8 sps:$4 sm:$0xff]   ;;  %v1123_v26 = vld [vmem:[%s1304_s7 + $0x124] ss:$8 sps:$4 sm:$0xff]   ;;  %v1126_v28 = vld [vmem:[%s1304_s7 + $0x120] ss:$8 sps:$4 sm:$0xff]  }
  0x2b   : > { %764 = vmatprep.subr.bf16.mxu1 %v1105_v14  ;;  %v1127_v29 = vld [vmem:[%s1304_s7 + $0x14] ss:$8 sps:$4 sm:$0xff]   ;;  %v1131_v31 = vld [vmem:[%s1304_s7 + $0x10] ss:$8 sps:$4 sm:$0xff]   ;;  %v1133_v33 = vld [vmem:[%s1304_s7 + $0x4] ss:$8 sps:$4 sm:$0xff]  }
  0x2c   : > { %v1129_v30 = vld [vmem:[%s1304_s7 + $0x114] ss:$8 sps:$4 sm:$0xff]   ;;  %v1132_v32 = vld [vmem:[%s1304_s7 + $0x110] ss:$8 sps:$4 sm:$0xff]   ;;  %v1135_v34 = vld [vmem:[%s1304_s7 + $0x104] ss:$8 sps:$4 sm:$0xff]  }
  0x2d   : > { %722 = vmatpush1.bf16.msra.mxu0 %v1107_v15  ;;  %v1137_v35 = vld [vmem:[%s1304_s7] ss:$8 sps:$4 sm:$0xff]   ;;  %v1139_v37 = vld [vmem:[%s1304_s7 + $0xf4] ss:$8 sps:$4 sm:$0xff]   ;;  %v1143_v39 = vld [vmem:[%s1304_s7 + $0xf0] ss:$8 sps:$4 sm:$0xff]  }
  0x2e   : > { %765 = vmatpush1.bf16.msra.mxu1 %v1108_v16  ;;  %723 = vmatprep.subr.bf16.mxu0 %v1109_v17  ;;  %v1138_v36 = vld [vmem:[%s1304_s7 + $0x100] ss:$8 sps:$4 sm:$0xff]   ;;  %v1141_v38 = vld [vmem:[%s1304_s7 + $0x1f4] ss:$8 sps:$4 sm:$0xff]   ;;  %v1144_v40 = vld [vmem:[%s1304_s7 + $0x1f0] ss:$8 sps:$4 sm:$0xff]  }
  0x2f   : > { %766 = vmatprep.subr.bf16.mxu1 %v1111_v18  ;;  %v1145_v41 = vld [vmem:[%s1304_s7 + $0xe4] ss:$8 sps:$4 sm:$0xff]   ;;  %v1149_v43 = vld [vmem:[%s1304_s7 + $0xe0] ss:$8 sps:$4 sm:$0xff]   ;;  %v1151_v45 = vld [vmem:[%s1304_s7 + $0xd4] ss:$8 sps:$4 sm:$0xff]  }
  0x30   : > { %v1147_v42 = vld [vmem:[%s1304_s7 + $0x1e4] ss:$8 sps:$4 sm:$0xff]   ;;  %v1150_v44 = vld [vmem:[%s1304_s7 + $0x1e0] ss:$8 sps:$4 sm:$0xff]   ;;  %v1153_v46 = vld [vmem:[%s1304_s7 + $0x1d4] ss:$8 sps:$4 sm:$0xff]  }
  0x31   : > { %724 = vmatpush1.bf16.msra.mxu0 %v1113_v19  ;;  %v1155_v47 = vld [vmem:[%s1304_s7 + $0xd0] ss:$8 sps:$4 sm:$0xff]   ;;  %v1157_v49 = vld [vmem:[%s1304_s7 + $0xc4] ss:$8 sps:$4 sm:$0xff]   ;;  %v1161_v51 = vld [vmem:[%s1304_s7 + $0xc0] ss:$8 sps:$4 sm:$0xff]  }
  0x32   : > { %767 = vmatpush1.bf16.msra.mxu1 %v1114_v20  ;;  %725 = vmatprep.subr.bf16.mxu0 %v1115_v21  ;;  %v1156_v48 = vld [vmem:[%s1304_s7 + $0x1d0] ss:$8 sps:$4 sm:$0xff]   ;;  %v1159_v50 = vld [vmem:[%s1304_s7 + $0x1c4] ss:$8 sps:$4 sm:$0xff]   ;;  %v1162_v53 = vld [vmem:[%s1304_s7 + $0x1c0] ss:$8 sps:$4 sm:$0xff]  }
  0x33   : > { %768 = vmatprep.subr.bf16.mxu1 %v1117_v22  ;;  %v1189_v52 = vld [vmem:[%s1306_s8 + $0x4] ss:$16 sps:$4 sm:$0xff]   ;;  %v1192_v56 = vld [vmem:[%s1306_s8 + $0xc] ss:$16 sps:$4 sm:$0xff]   ;;  %v1167_v57 = vld [vmem:[%s1304_s7 + $0xb0] ss:$8 sps:$4 sm:$0xff]  }
  0x34   : > { %v1163_v54 = vld [vmem:[%s1304_s7 + $0xb4] ss:$8 sps:$4 sm:$0xff]   ;;  %749 = vmatprep.mubr.bf16.mxu0 %v1189_v52  ;;  %792 = vmatprep.mubr.bf16.mxu1 %v1192_v56  ;;  %v1168_v58 = vld [vmem:[%s1304_s7 + $0x1b0] ss:$8 sps:$4 sm:$0xff]   ;;  %v1169_v59 = vld [vmem:[%s1304_s7 + $0xa4] ss:$8 sps:$4 sm:$0xff]  }
  0x35   : > { %726 = vmatpush1.bf16.msra.mxu0 %v1119_v23  ;;  %v1165_v55 = vld [vmem:[%s1304_s7 + $0x1b4] ss:$8 sps:$4 sm:$0xff]   ;;  %v1171_v60 = vld [vmem:[%s1304_s7 + $0x1a4] ss:$8 sps:$4 sm:$0xff]   ;;  %v1173_v61 = vld [vmem:[%s1304_s7 + $0xa0] ss:$8 sps:$4 sm:$0xff]  }
  0x36   : > { %769 = vmatpush1.bf16.msra.mxu1 %v1120_v24  ;;  %727 = vmatprep.subr.bf16.mxu0 %v1121_v25  ;;  %v1174_v62 = vld [vmem:[%s1304_s7 + $0x1a0] ss:$8 sps:$4 sm:$0xff]   ;;  %v1175_v63 = vld [vmem:[%s1304_s7 + $0x94] ss:$8 sps:$4 sm:$0xff]   ;;  %v1179_v1 = vld [vmem:[%s1304_s7 + $0x90] ss:$8 sps:$4 sm:$0xff]  }
  0x37   : > { %770 = vmatprep.subr.bf16.mxu1 %v1123_v26  ;;  %v1177_v0 = vld [vmem:[%s1304_s7 + $0x194] ss:$8 sps:$4 sm:$0xff]   ;;  %v1180_v2 = vld [vmem:[%s1304_s7 + $0x190] ss:$8 sps:$4 sm:$0xff]   ;;  %v1181_v3 = vld [vmem:[%s1304_s7 + $0x84] ss:$8 sps:$4 sm:$0xff]  }
  0x38   : > { %v1183_v4 = vld [vmem:[%s1304_s7 + $0x184] ss:$8 sps:$4 sm:$0xff]   ;;  %v1185_v5 = vld [vmem:[%s1304_s7 + $0x80] ss:$8 sps:$4 sm:$0xff]   ;;  %v305_v10 = vld [vmem:[#allocation2 + $0x10] sm:$0xff]  ;;  %p1043_p11 = scmp.ne.s32.totalorder %s1223_s14, 6 }
  0x39   : > { %728 = vmatpush1.bf16.msra.mxu0 %v1125_v27  ;;  %v1186_v6 = vld [vmem:[%s1304_s7 + $0x180] ss:$8 sps:$4 sm:$0xff]   ;;  %v307_v19 = vld [vmem:[#allocation2 + $0x18] sm:$0xff] }
  0x3a   : > { %771 = vmatpush1.bf16.msra.mxu1 %v1126_v28  ;;  %729 = vmatprep.subr.bf16.mxu0 %v1127_v29  ;;  %v1187_v7 = vld [vmem:[%s1306_s8] ss:$16 sps:$4 sm:$0xff]   ;;  %v1190_v8 = vld [vmem:[%s1306_s8 + $0x8] ss:$16 sps:$4 sm:$0xff]  }
  0x3b   : > { %772 = vmatprep.subr.bf16.mxu1 %v1129_v30  ;;  %v306_v14 = vld [vmem:[#allocation2] sm:$0xff]  ;;  %v308_v24 = vld [vmem:[#allocation2 + $0x8] sm:$0xff] }
  0x3d   : > { %730 = vmatpush1.bf16.msra.mxu0 %v1131_v31 }
  0x3e   : > { %773 = vmatpush1.bf16.msra.mxu1 %v1132_v32  ;;  %731 = vmatprep.subr.bf16.mxu0 %v1133_v33 }
  0x3f   : > { %774 = vmatprep.subr.bf16.mxu1 %v1135_v34 }
  0x41   : > { %732 = vmatpush1.bf16.msra.mxu0 %v1137_v35 }
  0x42   : > { %775 = vmatpush1.bf16.msra.mxu1 %v1138_v36  ;;  %733 = vmatprep.subr.bf16.mxu0 %v1139_v37 }
  0x43   : > { %776 = vmatprep.subr.bf16.mxu1 %v1141_v38 }
  0x45   : > { %734 = vmatpush2.bf16.msra.mxu0 %v1143_v39 }
  0x46   : > { %777 = vmatpush2.bf16.msra.mxu1 %v1144_v40  ;;  %735 = vmatprep.subr.bf16.mxu0 %v1145_v41 }
  0x47   : > { %778 = vmatprep.subr.bf16.mxu1 %v1147_v42 }
  0x49   : > { %736 = vmatpush2.bf16.msra.mxu0 %v1149_v43 }
  0x4a   : > { %779 = vmatpush2.bf16.msra.mxu1 %v1150_v44  ;;  %737 = vmatprep.subr.bf16.mxu0 %v1151_v45 }
  0x4b   : > { %780 = vmatprep.subr.bf16.mxu1 %v1153_v46 }
  0x4d   : > { %738 = vmatpush2.bf16.msra.mxu0 %v1155_v47 }
  0x4e   : > { %781 = vmatpush2.bf16.msra.mxu1 %v1156_v48  ;;  %739 = vmatprep.subr.bf16.mxu0 %v1157_v49 }
  0x4f   : > { %782 = vmatprep.subr.bf16.mxu1 %v1159_v50 }
  0x51   : > { %740 = vmatpush2.bf16.msra.mxu0 %v1161_v51 }
  0x52   : > { %783 = vmatpush2.bf16.msra.mxu1 %v1162_v53  ;;  %741 = vmatprep.subr.bf16.mxu0 %v1163_v54 }
  0x53   : > { %784 = vmatprep.subr.bf16.mxu1 %v1165_v55 }
  0x55   : > { %742 = vmatpush2.bf16.msra.mxu0 %v1167_v57 }
  0x56   : > { %785 = vmatpush2.bf16.msra.mxu1 %v1168_v58  ;;  %743 = vmatprep.subr.bf16.mxu0 %v1169_v59 }
  0x57   : > { %786 = vmatprep.subr.bf16.mxu1 %v1171_v60 }
  0x59   : > { %744 = vmatpush2.bf16.msra.mxu0 %v1173_v61 }
  0x5a   : > { %787 = vmatpush2.bf16.msra.mxu1 %v1174_v62  ;;  %745 = vmatprep.subr.bf16.mxu0 %v1175_v63 }
  0x5b   : > { %788 = vmatprep.subr.bf16.mxu1 %v1177_v0 }
  0x5d   : > { %746 = vmatpush2.bf16.msra.mxu0 %v1179_v1 }
  0x5e   : > { %789 = vmatpush2.bf16.msra.mxu1 %v1180_v2  ;;  %747 = vmatprep.subr.bf16.mxu0 %v1181_v3 }
  0x5f   : > { %790 = vmatprep.subr.bf16.mxu1 %v1183_v4 }
  0x61   : > { %748 = vmatpush2.bf16.msra.mxu0 %v1185_v5 }
  0x62   : > { %791 = vmatpush2.bf16.msra.mxu1 %v1186_v6 }
  0x64   : > { %750 = vmatmul.mubr.bf16.vlgmr.msra.gmra.mxu0 %v1187_v7 }
  0x65   : > { %793 = vmatmul.mubr.bf16.vlgmr.msra.gmra.mxu1 %v1190_v8 }
 0x124   : > { %v751_v9 = vpop.f32.mrf.mxu0 }
 0x125   : > { %v794_v11 = vpop.f32.mrf.mxu1 }
 0x126   : > { %v795_v12 = vadd.f32 %v794_v11, %v751_v9  ;;  %v753_v13 = vpop.f32.mrf.mxu0 }
 0x127   : > { %v796_v15 = vpop.f32.mrf.mxu1 }
 0x128   : > { %v803_v16 = vadd.f32 %v795_v12, %v305_v10  ;;  %v797_v17 = vadd.f32 %v796_v15, %v753_v13  ;;  %v755_v18 = vpop.f32.mrf.mxu0 }
 0x129   : > { %v798_v20 = vpop.f32.mrf.mxu1 }
 0x12a   : > { %807 = vst [vmem:[#allocation2 + $0x10] sm:$0xff] %v803_v16  ;;  %v804_v21 = vadd.f32 %v797_v17, %v306_v14  ;;  %v799_v22 = vadd.f32 %v798_v20, %v755_v18  ;;  %v757_v23 = vpop.f32.mrf.mxu0 }
 0x12b   : > { %v800_v25 = vpop.f32.mrf.mxu1 }
 0x12c   : > { %808 = vst [vmem:[#allocation2] sm:$0xff] %v804_v21  ;;  %v805_v26 = vadd.f32 %v799_v22, %v307_v19  ;;  %v801_v27 = vadd.f32 %v800_v25, %v757_v23  ;;  %814 = sbr.rel (%p1043_p11) target bundleno = 317 (0x13d), region = 63 }
 0x12e   : > { %809 = vst [vmem:[#allocation2 + $0x18] sm:$0xff] %v805_v26  ;;  %v806_v28 = vadd.f32 %v801_v27, %v308_v24 }
 0x130   : > { %810 = vst [vmem:[#allocation2 + $0x8] sm:$0xff] %v806_v28 }
 0x131   : > { %v821_v29 = vlaneseq  ;;  %v819_v31 = vld [vmem:[%s1410_s2] sm:$0x3]  ;;  %v815_v32 = vld [vmem:[#allocation2 + $0x10] sm:$0xff] }
 0x133   : > { %v822_v30 = vshrl.u32 %v821_v29, 7  ;;  %v816_v35 = vld [vmem:[#allocation2] sm:$0xff] }
 0x135   : > { %v823_v33 = vsub.s32 0, %v822_v30  ;;  %v827_v34 = vsub.s32 1, %v822_v30  ;;  %v817_v36 = vld [vmem:[#allocation2 + $0x18] sm:$0xff] }
 0x137   : > { %v818_v37 = vld [vmem:[#allocation2 + $0x8] sm:$0xff]  ;;  %v824_v38 = vrot.slane %v819_v31, %v823_v33  ;;  %v828_v39 = vrot.slane %v819_v31, %v827_v34 }
 0x139   : > { %v831_v40 = vadd.f32 %v824_v38, %v815_v32  ;;  %v832_v41 = vadd.f32 %v828_v39, %v816_v35  ;;  %v833_v42 = vadd.f32 %v824_v38, %v817_v36  ;;  %v834_v43 = vadd.f32 %v828_v39, %v818_v37 }
 0x13b   : > { %835 = vst [vmem:[%s1411_s3] sm:$0xff] %v831_v40  ;;  %836 = vst [vmem:[%s1411_s3 + $0x8] sm:$0xff] %v832_v41 }
 0x13c   : > { %837 = vst [vmem:[%s1411_s3 + $0x10] sm:$0xff] %v833_v42  ;;  %838 = vst [vmem:[%s1411_s3 + $0x18] sm:$0xff] %v834_v43 }
 0x13d PF: > { %s13_s16 = sadd.s32 1, %s1231_s16   ;;  %s1412_s12 = smov %s1219_s13 }
 0x13e   : > { %p10_p12 = scmp.ge.s32.totalorder %s13_s16, 9   ;;  %s1413_s13 = smov %s1289_s20 }
 0x13f   : > { %s1414_s14 = smov %s1227_s15  ;;  %s1415_s15 = smov %s1417_s17 }
 0x140   :  { %12 = sbr.rel (!%p10_p12) target bundleno = 3 (0x3), region = 104 }

// kernel: an3ddr_forward.37
= control target key start
LH: loop header
LB: loop body
LE: loop exit
PB: predicated region body
PF: predicated region fallthrough
CT: control target
= control target key end

     0   :  { %v14_v0 = vlaneseq  ;;  %vm32_vm0 = vcmask 523264   ;;  %v117_v8 = vmov 0.0   ;;  %v118_v24 = vmov 1966171168   ;;  %s180_s0 = inlined_call_operand.vmem [shape: f32[16,192], index: 0, kind: input, shape index: {}]   ;;  %s181_s1 = inlined_call_operand.vmem [shape: f32[1,192], index: 1, kind: output, shape index: {0}]   ;;  %s182_s2 = inlined_call_operand.vmem [shape: f32[1,192], index: 2, kind: output, shape index: {1}]  }
   0x1   :  { %v20_v1 = vld [vmem:[%s180_s0] sm:$0xff]  ;;  %v21_v2 = vld [vmem:[%s180_s0 + $0x8] sm:$0xff]  ;;  %v22_v3 = vld [vmem:[%s180_s0 + $0x10] sm:$0xff]  ;;  %v46_v25 = vunpack.c.l.s4 %v118_v24 }
   0x2   :  { %vm143_vm1 = vcmp.lt.s32.totalorder %v14_v0, 192  ;;  %v23_v5 = vld [vmem:[%s180_s0 + $0x18] sm:$0xff]  ;;  %v25_v6 = vadd.f32 %v22_v3, %v20_v1  ;;  %v33_v7 = vsel %vm32_vm0, %v21_v2, 0.0  ;;  %v67_v10 = vmul.f32 %v20_v1, %v20_v1 }
   0x3   :  { %18 = vst.msk [vmem:[%s181_s1] sm:$0x3] %vm143_vm1, %v117_v8  ;;  %v34_v9 = vsel %vm32_vm0, %v23_v5, 0.0  ;;  %19 = vst.msk [vmem:[%s182_s2] sm:$0x3] %vm143_vm1, %v117_v8  ;;  %v68_v11 = vmul.f32 %v21_v2, %v21_v2  ;;  %v69_v14 = vmul.f32 %v22_v3, %v22_v3  ;;  %v70_v15 = vmul.f32 %v23_v5, %v23_v5 }
   0x4   :  { %v26_v12 = vrot.slane %v25_v6, 4  ;;  %v35_v13 = vadd.f32 %v34_v9, %v33_v7  ;;  %v49_v31 = vshrl.u32 %v14_v0, 7  ;;  %v47_v35 = vunpack.c.0.s8 %v46_v25 }
   0x5   :  { %v78_v16 = vsel %vm32_vm0, %v68_v11, 0.0  ;;  %v71_v19 = vadd.f32 %v69_v14, %v67_v10  ;;  %v79_v20 = vsel %vm32_vm0, %v70_v15, 0.0 }
   0x6   :  { %v27_v17 = vadd.f32 %v26_v12, %v25_v6  ;;  %v36_v18 = vrot.slane %v35_v13, 4  ;;  %v80_v21 = vadd.f32 %v79_v20, %v78_v16  ;;  %v50_v43 = vsub.s32 %v47_v35, %v49_v31 }
   0x7   :  { %v72_v26 = vrot.slane %v71_v19, 4 }
   0x8   :  { %v28_v22 = vrot.slane %v27_v17, 2  ;;  %v37_v23 = vadd.f32 %v36_v18, %v35_v13  ;;  %v81_v27 = vrot.slane %v80_v21, 4 }
   0x9   :  { %v73_v30 = vadd.f32 %v72_v26, %v71_v19 }
   0xa   :  { %v29_v28 = vadd.f32 %v28_v22, %v27_v17  ;;  %v38_v29 = vrot.slane %v37_v23, 2  ;;  %v82_v32 = vadd.f32 %v81_v27, %v80_v21  ;;  %v24_v50 = vld [vmem:[%s181_s1] sm:$0x3] }
   0xb   :  { %v74_v36 = vrot.slane %v73_v30, 2  ;;  %v66_v55 = vld [vmem:[%s182_s2] sm:$0x3] }
   0xc   :  { %v30_v33 = vrot.slane %v29_v28, 1  ;;  %v39_v34 = vadd.f32 %v38_v29, %v37_v23  ;;  %v83_v37 = vrot.slane %v82_v32, 2 }
   0xd   :  { %v75_v40 = vadd.f32 %v74_v36, %v73_v30 }
   0xe   :  { %v31_v38 = vadd.f32 %v30_v33, %v29_v28  ;;  %v40_v39 = vrot.slane %v39_v34, 1  ;;  %v84_v41 = vadd.f32 %v83_v37, %v82_v32 }
   0xf   :  { %v76_v44 = vrot.slane %v75_v40, 1 }
  0x10   :  { %v41_v42 = vadd.f32 %v40_v39, %v39_v34  ;;  %v85_v45 = vrot.slane %v84_v41, 1 }
  0x11   :  { %v77_v47 = vadd.f32 %v76_v44, %v75_v40 }
  0x12   :  { %v44_v46 = vcombine.low %v31_v38, %v41_v42  ;;  %v86_v48 = vadd.f32 %v85_v45, %v84_v41 }
  0x14   :  { %v51_v49 = vrot.slane %v44_v46, %v50_v43  ;;  %v89_v51 = vcombine.low %v77_v47, %v86_v48 }
  0x16   :  { %v58_v52 = vrot.slane %v51_v49, %v50_v43  ;;  %v96_v53 = vrot.slane %v89_v51, %v50_v43 }
  0x18   :  { %v60_v54 = vadd.f32 %v58_v52, %v24_v50  ;;  %v103_v56 = vrot.slane %v96_v53, %v50_v43 }
  0x1a   :  { %65 = vst.msk [vmem:[%s181_s1] sm:$0x3] %vm143_vm1, %v60_v54  ;;  %v105_v57 = vadd.f32 %v103_v56, %v66_v55 }
  0x1c   :  { %106 = vst.msk [vmem:[%s182_s2] sm:$0x3] %vm143_vm1, %v105_v57 }

// kernel: an3ddr_forward.38
= control target key start
LH: loop header
LB: loop body
LE: loop exit
PB: predicated region body
PF: predicated region fallthrough
CT: control target
= control target key end

     0   :  { %v20_v0 = vlaneseq  ;;  %vm55_vm0 = vcmask 523264   ;;  %s113_s1 = inlined_call_operand.vmem [shape: f32[1,192], index: 1, kind: input, shape index: {}]   ;;  %s114_s2 = inlined_call_operand.vmem [shape: f32[1,192], index: 2, kind: input, shape index: {}]   ;;  %s115_s0 = inlined_call_operand.vmem [shape: f32[16,192], index: 0, kind: input, shape index: {}]   ;;  %s116_s3 = inlined_call_operand.vmem [shape: f32[16,192], index: 3, kind: output, shape index: {}]  }
   0x1   :  { %v18_v2 = vld [vmem:[%s113_s1] sm:$0x3]  ;;  %v15_v7 = vld [vmem:[%s115_s0 + $0x8] sm:$0xff]  ;;  %v16_v8 = vld [vmem:[%s115_s0 + $0x10] sm:$0xff] }
   0x2   :  { %v21_v1 = vshrl.u32 %v20_v0, 7  ;;  %v34_v3 = vld [vmem:[%s114_s2] sm:$0x3]  ;;  %v17_v9 = vld [vmem:[%s115_s0 + $0x18] sm:$0xff] }
   0x3   :  { %v14_v4 = vld [vmem:[%s115_s0] sm:$0xff] }
   0x4   :  { %v22_v5 = vsub.s32 0, %v21_v1  ;;  %v26_v6 = vsub.s32 1, %v21_v1 }
   0x6   :  { %v23_v10 = vrot.slane %v18_v2, %v22_v5  ;;  %v27_v11 = vrot.slane %v18_v2, %v26_v6  ;;  %v39_v12 = vrot.slane %v34_v3, %v22_v5  ;;  %v43_v13 = vrot.slane %v34_v3, %v26_v6 }
   0x8   :  { %v30_v14 = vmul.f32 %v23_v10, %v14_v4  ;;  %v31_v15 = vmul.f32 %v27_v11, %v15_v7  ;;  %v32_v16 = vmul.f32 %v23_v10, %v16_v8  ;;  %v33_v17 = vmul.f32 %v27_v11, %v17_v9 }
   0xa   :  { %v46_v18 = vadd.f32 %v39_v12, %v30_v14  ;;  %v47_v19 = vadd.f32 %v43_v13, %v31_v15  ;;  %v48_v20 = vadd.f32 %v39_v12, %v32_v16  ;;  %v49_v21 = vadd.f32 %v43_v13, %v33_v17 }
   0xc   :  { %v50_v22 = vmax.f32 %v46_v18, 0.0  ;;  %v51_v23 = vmax.f32 %v47_v19, 0.0  ;;  %v52_v24 = vmax.f32 %v48_v20, 0.0  ;;  %v53_v25 = vmax.f32 %v49_v21, 0.0 }
   0xe   :  { %54 = vst [vmem:[%s116_s3] sm:$0xff] %v50_v22  ;;  %56 = vst.msk [vmem:[%s116_s3 + $0x8] sm:$0xff] %vm55_vm0, %v51_v23 }
   0xf   :  { %57 = vst [vmem:[%s116_s3 + $0x10] sm:$0xff] %v52_v24  ;;  %58 = vst.msk [vmem:[%s116_s3 + $0x18] sm:$0xff] %vm55_vm0, %v53_v25 }

// kernel: an3ddr_forward.39
= control target key start
LH: loop header
LB: loop body
LE: loop exit
PB: predicated region body
PF: predicated region fallthrough
CT: control target
= control target key end

     0   :  { %s1254_s12 = smov 0   ;;  %s1256_s13 = smov 0   ;;  %s1408_s0 = inlined_call_operand.vmem [shape: bf16[16,5632], index: 0, kind: input, shape index: {}]   ;;  %s1409_s1 = inlined_call_operand.vmem [shape: bf16[5632,256], index: 1, kind: input, shape index: {}]   ;;  %s1410_s2 = inlined_call_operand.vmem [shape: f32[1,256], index: 2, kind: input, shape index: {}]   ;;  %s1411_s3 = inlined_call_operand.vmem [shape: f32[16,256], index: 3, kind: output, shape index: {}]  }
   0x1   :  { %s1258_s14 = smov 0   ;;  %s1260_s15 = smov 0  }
   0x2   :  { %s1262_s16 = smov 0  }
   0x3 LB: > { %s25_s17 = sadd.s32 1, %s1227_s15  ;;  %p48_p1 = scmp.ne.s32.totalorder %s1219_s13, %s1215_s12  ;;  %s1231_s16 = sphi %s1262_s16, %s13_s16   ;;  %s1227_s15 = sphi %s1260_s15, %s1415_s15   ;;  %s1223_s14 = sphi %s1258_s14, %s1414_s14   ;;  %s1219_s13 = sphi %s1256_s13, %s1413_s13   ;;  %s1215_s12 = sphi %s1254_s12, %s1412_s12  }
   0x4   : > { %p26_p0 = scmp.ge.s32.totalorder %s25_s17, 11  ;;  %p49_p2 = scmp.eq.s32.totalorder %s1231_s16, 0 }
   0x5   : > { %s41_s19 = sadd.s32 1, %s1219_s13  ;;  %p965_p5 = scmp.ge.s32.totalorder %s1231_s16, 11 }
   0x6   : > { %s1417_s17 = smov (%p26_p0, %s25_s17), 0  ;;  %p50_p3 = por %p49_p2, %p48_p1 }
   0x7   : > { %s37_s18 = ssub.s32 %s1227_s15, %s1417_s17  ;;  %164 = sbr.rel (%p965_p5) target bundleno = 18 (0x12), region = 20 }
   0x8   : > { %p39_p4 = scmp.eq.s32.totalorder %s37_s18, 0 }
   0xa   : > { %s1289_s20 = scalar_select %p39_p4, %s1219_s13, %s41_s19  }
   0xc   : > { %167 = sbr.rel (!%p50_p3) target bundleno = 18 (0x12), region = 24  ;;  %s169_s21 = sand.u32 (%p50_p3), 1, %s1219_s13  }
   0xd   : > { %s1048_s22 = sshll.u32 (%p50_p3), %s1227_s15, 4  ;;  %s966_s23 = sshll.u32 (%p50_p3), %s169_s21, 5 }
   0xe   : > { %s177_s26 = scalar_lea.vmem (%p50_p3), %s1408_s0, %s1048_s22  ;;  %s171_s27 = scalar_lea.vmem (%p50_p3), [#allocation3], %s966_s23 }
   0xf   : > { %v190_v0 = vld [vmem:[%s177_s26] sm:$0xff] (%p50_p3)  ;;  %v192_v1 = vld [vmem:[%s177_s26 + $0x8] sm:$0xff] (%p50_p3)  ;;  %v194_v2 = vld [vmem:[%s177_s26 + $0xb0] sm:$0xff] (%p50_p3) }
  0x10   : > { %191 = vst [vmem:[%s171_s27] sm:$0xff] (%p50_p3), %v190_v0  ;;  %193 = vst [vmem:[%s171_s27 + $0x8] sm:$0xff] (%p50_p3), %v192_v1  ;;  %v196_v3 = vld [vmem:[%s177_s26 + $0xb8] sm:$0xff] (%p50_p3) }
  0x11   : > { %195 = vst [vmem:[%s171_s27 + $0x10] sm:$0xff] %v194_v2  ;;  %197 = vst [vmem:[%s171_s27 + $0x18] sm:$0xff] %v196_v3 }
  0x12 PF: > { %p969_p6 = scmp.ge.s32.totalorder %s1231_s16, 1  ;;  %p217_p7 = scmp.lt.s32.totalorder %s1231_s16, 12 }
  0x14   : > { %p218_p8 = pnand %p969_p6, %p217_p7 }
  0x15   : > { %s224_s28 = sand.u32 (!%p218_p8), 1, %s1215_s12   ;;  %s971_s29 = sshll.u32 (!%p218_p8), %s1223_s14, 6 }
  0x16   : > { %221 = sbr.rel (%p218_p8) target bundleno = 317 (0x13d), region = 51  ;;  %s970_s30 = sshll.u32 (!%p218_p8), %s224_s28, 5 }
  0x17   : > { %p270_p9 = scmp.lt.s32.totalorder (!%p218_p8), %s971_s29, 703  ;;  %s1306_s8 = scalar_lea.vmem (!%p218_p8), [#allocation3], %s970_s30 }
  0x18   : > { %p974_p10 = scmp.ne.s32.totalorder (!%p218_p8), %s1223_s14, 0 }
  0x1b   : > { %s1419_s29 = smov (!%p270_p9, %s971_s29), 703  ;;  %300 = sbr.rel (%p974_p10) target bundleno = 35 (0x23), region = 59 }
  0x1c   : > { %s1049_s4 = sshll.u32 %s1419_s29, 3 }
  0x1d   : > { %s1304_s7 = scalar_lea.vmem %s1409_s1, %s1049_s4 }
  0x20   : > { %v1233_v4 = vmov 0.0  }
  0x21   : > { %301 = vst [vmem:[#allocation2 + $0x10] sm:$0xff] %v1233_v4  ;;  %302 = vst [vmem:[#allocation2] sm:$0xff] %v1233_v4 }
  0x22   : > { %303 = vst [vmem:[#allocation2 + $0x18] sm:$0xff] %v1233_v4  ;;  %304 = vst [vmem:[#allocation2 + $0x8] sm:$0xff] %v1233_v4 }
  0x23 PF: > { %v1091_v5 = vld [vmem:[%s1304_s7 + $0x74] ss:$8 sps:$4 sm:$0xff]   ;;  %v1095_v7 = vld [vmem:[%s1304_s7 + $0x70] ss:$8 sps:$4 sm:$0xff]   ;;  %v1097_v9 = vld [vmem:[%s1304_s7 + $0x64] ss:$8 sps:$4 sm:$0xff]  }
  0x24   : > { %v1093_v6 = vld [vmem:[%s1304_s7 + $0x174] ss:$8 sps:$4 sm:$0xff]   ;;  %717 = vmatprep.subr.bf16.mxu0 %v1091_v5  ;;  %v1096_v8 = vld [vmem:[%s1304_s7 + $0x170] ss:$8 sps:$4 sm:$0xff]   ;;  %v1099_v10 = vld [vmem:[%s1304_s7 + $0x164] ss:$8 sps:$4 sm:$0xff]  }
  0x25   : > { %760 = vmatprep.subr.bf16.mxu1 %v1093_v6  ;;  %718 = vmatpush1.bf16.msra.mxu0 %v1095_v7  ;;  %v1101_v11 = vld [vmem:[%s1304_s7 + $0x60] ss:$8 sps:$4 sm:$0xff]   ;;  %v1103_v13 = vld [vmem:[%s1304_s7 + $0x54] ss:$8 sps:$4 sm:$0xff]   ;;  %v1107_v15 = vld [vmem:[%s1304_s7 + $0x50] ss:$8 sps:$4 sm:$0xff]  }
  0x26   : > { %761 = vmatpush1.bf16.msra.mxu1 %v1096_v8  ;;  %719 = vmatprep.subr.bf16.mxu0 %v1097_v9  ;;  %v1102_v12 = vld [vmem:[%s1304_s7 + $0x160] ss:$8 sps:$4 sm:$0xff]   ;;  %v1105_v14 = vld [vmem:[%s1304_s7 + $0x154] ss:$8 sps:$4 sm:$0xff]   ;;  %v1108_v16 = vld [vmem:[%s1304_s7 + $0x150] ss:$8 sps:$4 sm:$0xff]  }
  0x27   : > { %762 = vmatprep.subr.bf16.mxu1 %v1099_v10  ;;  %v1109_v17 = vld [vmem:[%s1304_s7 + $0x44] ss:$8 sps:$4 sm:$0xff]   ;;  %v1113_v19 = vld [vmem:[%s1304_s7 + $0x40] ss:$8 sps:$4 sm:$0xff]   ;;  %v1115_v21 = vld [vmem:[%s1304_s7 + $0x34] ss:$8 sps:$4 sm:$0xff]  }
  0x28   : > { %v1111_v18 = vld [vmem:[%s1304_s7 + $0x144] ss:$8 sps:$4 sm:$0xff]   ;;  %v1114_v20 = vld [vmem:[%s1304_s7 + $0x140] ss:$8 sps:$4 sm:$0xff]   ;;  %v1117_v22 = vld [vmem:[%s1304_s7 + $0x134] ss:$8 sps:$4 sm:$0xff]  }
  0x29   : > { %720 = vmatpush1.bf16.msra.mxu0 %v1101_v11  ;;  %v1119_v23 = vld [vmem:[%s1304_s7 + $0x30] ss:$8 sps:$4 sm:$0xff]   ;;  %v1121_v25 = vld [vmem:[%s1304_s7 + $0x24] ss:$8 sps:$4 sm:$0xff]   ;;  %v1125_v27 = vld [vmem:[%s1304_s7 + $0x20] ss:$8 sps:$4 sm:$0xff]  }
  0x2a   : > { %763 = vmatpush1.bf16.msra.mxu1 %v1102_v12  ;;  %721 = vmatprep.subr.bf16.mxu0 %v1103_v13  ;;  %v1120_v24 = vld [vmem:[%s1304_s7 + $0x130] ss:$8 sps:$4 sm:$0xff]   ;;  %v1123_v26 = vld [vmem:[%s1304_s7 + $0x124] ss:$8 sps:$4 sm:$0xff]   ;;  %v1126_v28 = vld [vmem:[%s1304_s7 + $0x120] ss:$8 sps:$4 sm:$0xff]  }
  0x2b   : > { %764 = vmatprep.subr.bf16.mxu1 %v1105_v14  ;;  %v1127_v29 = vld [vmem:[%s1304_s7 + $0x14] ss:$8 sps:$4 sm:$0xff]   ;;  %v1131_v31 = vld [vmem:[%s1304_s7 + $0x10] ss:$8 sps:$4 sm:$0xff]   ;;  %v1133_v33 = vld [vmem:[%s1304_s7 + $0x4] ss:$8 sps:$4 sm:$0xff]  }
  0x2c   : > { %v1129_v30 = vld [vmem:[%s1304_s7 + $0x114] ss:$8 sps:$4 sm:$0xff]   ;;  %v1132_v32 = vld [vmem:[%s1304_s7 + $0x110] ss:$8 sps:$4 sm:$0xff]   ;;  %v1135_v34 = vld [vmem:[%s1304_s7 + $0x104] ss:$8 sps:$4 sm:$0xff]  }
  0x2d   : > { %722 = vmatpush1.bf16.msra.mxu0 %v1107_v15  ;;  %v1137_v35 = vld [vmem:[%s1304_s7] ss:$8 sps:$4 sm:$0xff]   ;;  %v1139_v37 = vld [vmem:[%s1304_s7 + $0xf4] ss:$8 sps:$4 sm:$0xff]   ;;  %v1143_v39 = vld [vmem:[%s1304_s7 + $0xf0] ss:$8 sps:$4 sm:$0xff]  }
  0x2e   : > { %765 = vmatpush1.bf16.msra.mxu1 %v1108_v16  ;;  %723 = vmatprep.subr.bf16.mxu0 %v1109_v17  ;;  %v1138_v36 = vld [vmem:[%s1304_s7 + $0x100] ss:$8 sps:$4 sm:$0xff]   ;;  %v1141_v38 = vld [vmem:[%s1304_s7 + $0x1f4] ss:$8 sps:$4 sm:$0xff]   ;;  %v1144_v40 = vld [vmem:[%s1304_s7 + $0x1f0] ss:$8 sps:$4 sm:$0xff]  }
  0x2f   : > { %766 = vmatprep.subr.bf16.mxu1 %v1111_v18  ;;  %v1145_v41 = vld [vmem:[%s1304_s7 + $0xe4] ss:$8 sps:$4 sm:$0xff]   ;;  %v1149_v43 = vld [vmem:[%s1304_s7 + $0xe0] ss:$8 sps:$4 sm:$0xff]   ;;  %v1151_v45 = vld [vmem:[%s1304_s7 + $0xd4] ss:$8 sps:$4 sm:$0xff]  }
  0x30   : > { %v1147_v42 = vld [vmem:[%s1304_s7 + $0x1e4] ss:$8 sps:$4 sm:$0xff]   ;;  %v1150_v44 = vld [vmem:[%s1304_s7 + $0x1e0] ss:$8 sps:$4 sm:$0xff]   ;;  %v1153_v46 = vld [vmem:[%s1304_s7 + $0x1d4] ss:$8 sps:$4 sm:$0xff]  }
  0x31   : > { %724 = vmatpush1.bf16.msra.mxu0 %v1113_v19  ;;  %v1155_v47 = vld [vmem:[%s1304_s7 + $0xd0] ss:$8 sps:$4 sm:$0xff]   ;;  %v1157_v49 = vld [vmem:[%s1304_s7 + $0xc4] ss:$8 sps:$4 sm:$0xff]   ;;  %v1161_v51 = vld [vmem:[%s1304_s7 + $0xc0] ss:$8 sps:$4 sm:$0xff]  }
  0x32   : > { %767 = vmatpush1.bf16.msra.mxu1 %v1114_v20  ;;  %725 = vmatprep.subr.bf16.mxu0 %v1115_v21  ;;  %v1156_v48 = vld [vmem:[%s1304_s7 + $0x1d0] ss:$8 sps:$4 sm:$0xff]   ;;  %v1159_v50 = vld [vmem:[%s1304_s7 + $0x1c4] ss:$8 sps:$4 sm:$0xff]   ;;  %v1162_v53 = vld [vmem:[%s1304_s7 + $0x1c0] ss:$8 sps:$4 sm:$0xff]  }
  0x33   : > { %768 = vmatprep.subr.bf16.mxu1 %v1117_v22  ;;  %v1189_v52 = vld [vmem:[%s1306_s8 + $0x4] ss:$16 sps:$4 sm:$0xff]   ;;  %v1192_v56 = vld [vmem:[%s1306_s8 + $0xc] ss:$16 sps:$4 sm:$0xff]   ;;  %v1167_v57 = vld [vmem:[%s1304_s7 + $0xb0] ss:$8 sps:$4 sm:$0xff]  }
  0x34   : > { %v1163_v54 = vld [vmem:[%s1304_s7 + $0xb4] ss:$8 sps:$4 sm:$0xff]   ;;  %749 = vmatprep.mubr.bf16.mxu0 %v1189_v52  ;;  %792 = vmatprep.mubr.bf16.mxu1 %v1192_v56  ;;  %v1168_v58 = vld [vmem:[%s1304_s7 + $0x1b0] ss:$8 sps:$4 sm:$0xff]   ;;  %v1169_v59 = vld [vmem:[%s1304_s7 + $0xa4] ss:$8 sps:$4 sm:$0xff]  }
  0x35   : > { %726 = vmatpush1.bf16.msra.mxu0 %v1119_v23  ;;  %v1165_v55 = vld [vmem:[%s1304_s7 + $0x1b4] ss:$8 sps:$4 sm:$0xff]   ;;  %v1171_v60 = vld [vmem:[%s1304_s7 + $0x1a4] ss:$8 sps:$4 sm:$0xff]   ;;  %v1173_v61 = vld [vmem:[%s1304_s7 + $0xa0] ss:$8 sps:$4 sm:$0xff]  }
  0x36   : > { %769 = vmatpush1.bf16.msra.mxu1 %v1120_v24  ;;  %727 = vmatprep.subr.bf16.mxu0 %v1121_v25  ;;  %v1174_v62 = vld [vmem:[%s1304_s7 + $0x1a0] ss:$8 sps:$4 sm:$0xff]   ;;  %v1175_v63 = vld [vmem:[%s1304_s7 + $0x94] ss:$8 sps:$4 sm:$0xff]   ;;  %v1179_v1 = vld [vmem:[%s1304_s7 + $0x90] ss:$8 sps:$4 sm:$0xff]  }
  0x37   : > { %770 = vmatprep.subr.bf16.mxu1 %v1123_v26  ;;  %v1177_v0 = vld [vmem:[%s1304_s7 + $0x194] ss:$8 sps:$4 sm:$0xff]   ;;  %v1180_v2 = vld [vmem:[%s1304_s7 + $0x190] ss:$8 sps:$4 sm:$0xff]   ;;  %v1181_v3 = vld [vmem:[%s1304_s7 + $0x84] ss:$8 sps:$4 sm:$0xff]  }
  0x38   : > { %v1183_v4 = vld [vmem:[%s1304_s7 + $0x184] ss:$8 sps:$4 sm:$0xff]   ;;  %v1185_v5 = vld [vmem:[%s1304_s7 + $0x80] ss:$8 sps:$4 sm:$0xff]   ;;  %v305_v10 = vld [vmem:[#allocation2 + $0x10] sm:$0xff]  ;;  %p1043_p11 = scmp.ne.s32.totalorder %s1223_s14, 10 }
  0x39   : > { %728 = vmatpush1.bf16.msra.mxu0 %v1125_v27  ;;  %v1186_v6 = vld [vmem:[%s1304_s7 + $0x180] ss:$8 sps:$4 sm:$0xff]   ;;  %v307_v19 = vld [vmem:[#allocation2 + $0x18] sm:$0xff] }
  0x3a   : > { %771 = vmatpush1.bf16.msra.mxu1 %v1126_v28  ;;  %729 = vmatprep.subr.bf16.mxu0 %v1127_v29  ;;  %v1187_v7 = vld [vmem:[%s1306_s8] ss:$16 sps:$4 sm:$0xff]   ;;  %v1190_v8 = vld [vmem:[%s1306_s8 + $0x8] ss:$16 sps:$4 sm:$0xff]  }
  0x3b   : > { %772 = vmatprep.subr.bf16.mxu1 %v1129_v30  ;;  %v306_v14 = vld [vmem:[#allocation2] sm:$0xff]  ;;  %v308_v24 = vld [vmem:[#allocation2 + $0x8] sm:$0xff] }
  0x3d   : > { %730 = vmatpush1.bf16.msra.mxu0 %v1131_v31 }
  0x3e   : > { %773 = vmatpush1.bf16.msra.mxu1 %v1132_v32  ;;  %731 = vmatprep.subr.bf16.mxu0 %v1133_v33 }
  0x3f   : > { %774 = vmatprep.subr.bf16.mxu1 %v1135_v34 }
  0x41   : > { %732 = vmatpush1.bf16.msra.mxu0 %v1137_v35 }
  0x42   : > { %775 = vmatpush1.bf16.msra.mxu1 %v1138_v36  ;;  %733 = vmatprep.subr.bf16.mxu0 %v1139_v37 }
  0x43   : > { %776 = vmatprep.subr.bf16.mxu1 %v1141_v38 }
  0x45   : > { %734 = vmatpush2.bf16.msra.mxu0 %v1143_v39 }
  0x46   : > { %777 = vmatpush2.bf16.msra.mxu1 %v1144_v40  ;;  %735 = vmatprep.subr.bf16.mxu0 %v1145_v41 }
  0x47   : > { %778 = vmatprep.subr.bf16.mxu1 %v1147_v42 }
  0x49   : > { %736 = vmatpush2.bf16.msra.mxu0 %v1149_v43 }
  0x4a   : > { %779 = vmatpush2.bf16.msra.mxu1 %v1150_v44  ;;  %737 = vmatprep.subr.bf16.mxu0 %v1151_v45 }
  0x4b   : > { %780 = vmatprep.subr.bf16.mxu1 %v1153_v46 }
  0x4d   : > { %738 = vmatpush2.bf16.msra.mxu0 %v1155_v47 }
  0x4e   : > { %781 = vmatpush2.bf16.msra.mxu1 %v1156_v48  ;;  %739 = vmatprep.subr.bf16.mxu0 %v1157_v49 }
  0x4f   : > { %782 = vmatprep.subr.bf16.mxu1 %v1159_v50 }
  0x51   : > { %740 = vmatpush2.bf16.msra.mxu0 %v1161_v51 }
  0x52   : > { %783 = vmatpush2.bf16.msra.mxu1 %v1162_v53  ;;  %741 = vmatprep.subr.bf16.mxu0 %v1163_v54 }
  0x53   : > { %784 = vmatprep.subr.bf16.mxu1 %v1165_v55 }
  0x55   : > { %742 = vmatpush2.bf16.msra.mxu0 %v1167_v57 }
  0x56   : > { %785 = vmatpush2.bf16.msra.mxu1 %v1168_v58  ;;  %743 = vmatprep.subr.bf16.mxu0 %v1169_v59 }
  0x57   : > { %786 = vmatprep.subr.bf16.mxu1 %v1171_v60 }
  0x59   : > { %744 = vmatpush2.bf16.msra.mxu0 %v1173_v61 }
  0x5a   : > { %787 = vmatpush2.bf16.msra.mxu1 %v1174_v62  ;;  %745 = vmatprep.subr.bf16.mxu0 %v1175_v63 }
  0x5b   : > { %788 = vmatprep.subr.bf16.mxu1 %v1177_v0 }
  0x5d   : > { %746 = vmatpush2.bf16.msra.mxu0 %v1179_v1 }
  0x5e   : > { %789 = vmatpush2.bf16.msra.mxu1 %v1180_v2  ;;  %747 = vmatprep.subr.bf16.mxu0 %v1181_v3 }
  0x5f   : > { %790 = vmatprep.subr.bf16.mxu1 %v1183_v4 }
  0x61   : > { %748 = vmatpush2.bf16.msra.mxu0 %v1185_v5 }
  0x62   : > { %791 = vmatpush2.bf16.msra.mxu1 %v1186_v6 }
  0x64   : > { %750 = vmatmul.mubr.bf16.vlgmr.msra.gmra.mxu0 %v1187_v7 }
  0x65   : > { %793 = vmatmul.mubr.bf16.vlgmr.msra.gmra.mxu1 %v1190_v8 }
 0x124   : > { %v751_v9 = vpop.f32.mrf.mxu0 }
 0x125   : > { %v794_v11 = vpop.f32.mrf.mxu1 }
 0x126   : > { %v795_v12 = vadd.f32 %v794_v11, %v751_v9  ;;  %v753_v13 = vpop.f32.mrf.mxu0 }
 0x127   : > { %v796_v15 = vpop.f32.mrf.mxu1 }
 0x128   : > { %v803_v16 = vadd.f32 %v795_v12, %v305_v10  ;;  %v797_v17 = vadd.f32 %v796_v15, %v753_v13  ;;  %v755_v18 = vpop.f32.mrf.mxu0 }
 0x129   : > { %v798_v20 = vpop.f32.mrf.mxu1 }
 0x12a   : > { %807 = vst [vmem:[#allocation2 + $0x10] sm:$0xff] %v803_v16  ;;  %v804_v21 = vadd.f32 %v797_v17, %v306_v14  ;;  %v799_v22 = vadd.f32 %v798_v20, %v755_v18  ;;  %v757_v23 = vpop.f32.mrf.mxu0 }
 0x12b   : > { %v800_v25 = vpop.f32.mrf.mxu1 }
 0x12c   : > { %808 = vst [vmem:[#allocation2] sm:$0xff] %v804_v21  ;;  %v805_v26 = vadd.f32 %v799_v22, %v307_v19  ;;  %v801_v27 = vadd.f32 %v800_v25, %v757_v23  ;;  %814 = sbr.rel (%p1043_p11) target bundleno = 317 (0x13d), region = 63 }
 0x12e   : > { %809 = vst [vmem:[#allocation2 + $0x18] sm:$0xff] %v805_v26  ;;  %v806_v28 = vadd.f32 %v801_v27, %v308_v24 }
 0x130   : > { %810 = vst [vmem:[#allocation2 + $0x8] sm:$0xff] %v806_v28 }
 0x131   : > { %v821_v29 = vlaneseq  ;;  %v819_v31 = vld [vmem:[%s1410_s2] sm:$0x3]  ;;  %v815_v32 = vld [vmem:[#allocation2 + $0x10] sm:$0xff] }
 0x133   : > { %v822_v30 = vshrl.u32 %v821_v29, 7  ;;  %v816_v35 = vld [vmem:[#allocation2] sm:$0xff] }
 0x135   : > { %v823_v33 = vsub.s32 0, %v822_v30  ;;  %v827_v34 = vsub.s32 1, %v822_v30  ;;  %v817_v36 = vld [vmem:[#allocation2 + $0x18] sm:$0xff] }
 0x137   : > { %v818_v37 = vld [vmem:[#allocation2 + $0x8] sm:$0xff]  ;;  %v824_v38 = vrot.slane %v819_v31, %v823_v33  ;;  %v828_v39 = vrot.slane %v819_v31, %v827_v34 }
 0x139   : > { %v831_v40 = vadd.f32 %v824_v38, %v815_v32  ;;  %v832_v41 = vadd.f32 %v828_v39, %v816_v35  ;;  %v833_v42 = vadd.f32 %v824_v38, %v817_v36  ;;  %v834_v43 = vadd.f32 %v828_v39, %v818_v37 }
 0x13b   : > { %835 = vst [vmem:[%s1411_s3] sm:$0xff] %v831_v40  ;;  %836 = vst [vmem:[%s1411_s3 + $0x8] sm:$0xff] %v832_v41 }
 0x13c   : > { %837 = vst [vmem:[%s1411_s3 + $0x10] sm:$0xff] %v833_v42  ;;  %838 = vst [vmem:[%s1411_s3 + $0x18] sm:$0xff] %v834_v43 }
 0x13d PF: > { %s13_s16 = sadd.s32 1, %s1231_s16   ;;  %s1412_s12 = smov %s1219_s13 }
 0x13e   : > { %p10_p12 = scmp.ge.s32.totalorder %s13_s16, 13   ;;  %s1413_s13 = smov %s1289_s20 }
 0x13f   : > { %s1414_s14 = smov %s1227_s15  ;;  %s1415_s15 = smov %s1417_s17 }
 0x140   :  { %12 = sbr.rel (!%p10_p12) target bundleno = 3 (0x3), region = 104 }

// kernel: an3ddr_forward.43
= control target key start
LH: loop header
LB: loop body
LE: loop exit
PB: predicated region body
PF: predicated region fallthrough
CT: control target
= control target key end

     0   :  { %v49_v0 = vmov 0.0   ;;  %s89_s1 = inlined_call_operand.vmem [shape: f32[1,128], index: 1, kind: output, shape index: {0}]   ;;  %s90_s2 = inlined_call_operand.vmem [shape: f32[1,128], index: 2, kind: output, shape index: {1}]   ;;  %s91_s0 = inlined_call_operand.vmem [shape: f32[16,128], index: 0, kind: input, shape index: {}]  }
   0x1   :  { %14 = vst [vmem:[%s89_s1] sm:$0x1] %v49_v0  ;;  %15 = vst [vmem:[%s90_s2] sm:$0x1] %v49_v0  ;;  %v16_v1 = vld [vmem:[%s91_s0] sm:$0xff]  ;;  %v17_v2 = vld [vmem:[%s91_s0 + $0x8] sm:$0xff] }
   0x2   :  { %v19_v3 = vadd.f32 %v17_v2, %v16_v1  ;;  %v29_v4 = vmul.f32 %v16_v1, %v16_v1  ;;  %v30_v5 = vmul.f32 %v17_v2, %v17_v2 }
   0x4   :  { %v20_v6 = vrot.slane %v19_v3, 4  ;;  %v31_v7 = vadd.f32 %v30_v5, %v29_v4 }
   0x6   :  { %v21_v8 = vadd.f32 %v20_v6, %v19_v3  ;;  %v32_v9 = vrot.slane %v31_v7, 4 }
   0x8   :  { %v22_v10 = vrot.slane %v21_v8, 2  ;;  %v33_v11 = vadd.f32 %v32_v9, %v31_v7  ;;  %v18_v16 = vld [vmem:[%s89_s1] sm:$0x1] }
   0x9   :  { %v28_v19 = vld [vmem:[%s90_s2] sm:$0x1] }
   0xa   :  { %v23_v12 = vadd.f32 %v22_v10, %v21_v8  ;;  %v34_v13 = vrot.slane %v33_v11, 2 }
   0xc   :  { %v24_v14 = vrot.slane %v23_v12, 1  ;;  %v35_v15 = vadd.f32 %v34_v13, %v33_v11 }
   0xe   :  { %v25_v17 = vadd.f32 %v24_v14, %v23_v12  ;;  %v36_v18 = vrot.slane %v35_v15, 1 }
  0x10   :  { %v26_v20 = vadd.f32 %v25_v17, %v18_v16  ;;  %v37_v21 = vadd.f32 %v36_v18, %v35_v15 }
  0x12   :  { %27 = vst [vmem:[%s89_s1] sm:$0x1] %v26_v20  ;;  %v38_v22 = vadd.f32 %v37_v21, %v28_v19 }
  0x14   :  { %39 = vst [vmem:[%s90_s2] sm:$0x1] %v38_v22 }

// kernel: an3ddr_forward.42
= control target key start
LH: loop header
LB: loop body
LE: loop exit
PB: predicated region body
PF: predicated region fallthrough
CT: control target
= control target key end

     0   :  { %s1021_s12 = smov 0   ;;  %s1023_s13 = smov 0   ;;  %s1137_s0 = inlined_call_operand.vmem [shape: bf16[16,5632], index: 0, kind: input, shape index: {}]   ;;  %s1138_s1 = inlined_call_operand.vmem [shape: bf16[5632,128], index: 1, kind: input, shape index: {}]   ;;  %s1139_s2 = inlined_call_operand.vmem [shape: f32[1,128], index: 2, kind: input, shape index: {}]   ;;  %s1140_s3 = inlined_call_operand.vmem [shape: f32[16,128], index: 3, kind: output, shape index: {}]  }
   0x1   :  { %s1025_s14 = smov 0   ;;  %s1027_s15 = smov 0  }
   0x2   :  { %s1029_s16 = smov 0  }
   0x3 LB: > { %s25_s17 = sadd.s32 1, %s994_s15  ;;  %p48_p1 = scmp.ne.s32.totalorder %s986_s13, %s982_s12  ;;  %s998_s16 = sphi %s1029_s16, %s13_s16   ;;  %s994_s15 = sphi %s1027_s15, %s1144_s15   ;;  %s990_s14 = sphi %s1025_s14, %s1143_s14   ;;  %s986_s13 = sphi %s1023_s13, %s1142_s13   ;;  %s982_s12 = sphi %s1021_s12, %s1141_s12  }
   0x4   : > { %p26_p0 = scmp.ge.s32.totalorder %s25_s17, 11  ;;  %p49_p2 = scmp.eq.s32.totalorder %s998_s16, 0 }
   0x5   : > { %s41_s19 = sadd.s32 1, %s986_s13  ;;  %p785_p5 = scmp.ge.s32.totalorder %s998_s16, 11 }
   0x6   : > { %s1146_s17 = smov (%p26_p0, %s25_s17), 0  ;;  %p50_p3 = por %p49_p2, %p48_p1 }
   0x7   : > { %s37_s18 = ssub.s32 %s994_s15, %s1146_s17  ;;  %162 = sbr.rel (%p785_p5) target bundleno = 18 (0x12), region = 20 }
   0x8   : > { %p39_p4 = scmp.eq.s32.totalorder %s37_s18, 0 }
   0xa   : > { %s1056_s20 = scalar_select %p39_p4, %s986_s13, %s41_s19  }
   0xc   : > { %165 = sbr.rel (!%p50_p3) target bundleno = 18 (0x12), region = 24  ;;  %s167_s21 = sand.u32 (%p50_p3), 1, %s986_s13  }
   0xd   : > { %s836_s22 = sshll.u32 (%p50_p3), %s994_s15, 4  ;;  %s786_s23 = sshll.u32 (%p50_p3), %s167_s21, 5 }
   0xe   : > { %s175_s26 = scalar_lea.vmem (%p50_p3), %s1137_s0, %s836_s22  ;;  %s169_s27 = scalar_lea.vmem (%p50_p3), [#allocation3], %s786_s23 }
   0xf   : > { %v188_v0 = vld [vmem:[%s175_s26] sm:$0xff] (%p50_p3)  ;;  %v190_v1 = vld [vmem:[%s175_s26 + $0x8] sm:$0xff] (%p50_p3)  ;;  %v192_v2 = vld [vmem:[%s175_s26 + $0xb0] sm:$0xff] (%p50_p3) }
  0x10   : > { %189 = vst [vmem:[%s169_s27] sm:$0xff] (%p50_p3), %v188_v0  ;;  %191 = vst [vmem:[%s169_s27 + $0x8] sm:$0xff] (%p50_p3), %v190_v1  ;;  %v194_v3 = vld [vmem:[%s175_s26 + $0xb8] sm:$0xff] (%p50_p3) }
  0x11   : > { %193 = vst [vmem:[%s169_s27 + $0x10] sm:$0xff] %v192_v2  ;;  %195 = vst [vmem:[%s169_s27 + $0x18] sm:$0xff] %v194_v3 }
  0x12 PF: > { %p789_p6 = scmp.ge.s32.totalorder %s998_s16, 1  ;;  %p212_p7 = scmp.lt.s32.totalorder %s998_s16, 12 }
  0x14   : > { %p213_p8 = pnand %p789_p6, %p212_p7 }
  0x15   : > { %s219_s28 = sand.u32 (!%p213_p8), 1, %s982_s12   ;;  %s791_s29 = sshll.u32 (!%p213_p8), %s990_s14, 6 }
  0x16   : > { %216 = sbr.rel (%p213_p8) target bundleno = 285 (0x11d), region = 51  ;;  %s790_s30 = sshll.u32 (!%p213_p8), %s219_s28, 5 }
  0x17   : > { %p259_p9 = scmp.lt.s32.totalorder (!%p213_p8), %s791_s29, 703  ;;  %s1073_s8 = scalar_lea.vmem (!%p213_p8), [#allocation3], %s790_s30 }
  0x18   : > { %p793_p10 = scmp.ne.s32.totalorder (!%p213_p8), %s990_s14, 0 }
  0x1b   : > { %s1148_s29 = smov (!%p259_p9, %s791_s29), 703  ;;  %283 = sbr.rel (%p793_p10) target bundleno = 34 (0x22), region = 59 }
  0x1c   : > { %s792_s4 = sshll.u32 %s1148_s29, 2 }
  0x1d   : > { %s1071_s7 = scalar_lea.vmem %s1138_s1, %s792_s4 }
  0x20   : > { %v1000_v4 = vmov 0.0  }
  0x21   : > { %284 = vst [vmem:[#allocation2] sm:$0xff] %v1000_v4  ;;  %285 = vst [vmem:[#allocation2 + $0x8] sm:$0xff] %v1000_v4 }
  0x22 PF: > { %v922_v5 = vld [vmem:[%s1071_s7 + $0x78] sm:$0xff]   ;;  %v926_v9 = vld [vmem:[%s1071_s7 + $0x70] sm:$0xff]   ;;  %v930_v13 = vld [vmem:[%s1071_s7 + $0x68] sm:$0xff]   ;;  %p830_p11 = scmp.ne.s32.totalorder %s990_s14, 10 }
  0x23   : > { %v923_v6 = vld [vmem:[%s1071_s7 + $0xf8] sm:$0xff]   ;;  %837 = vmatprep.subr.bf16.mxu0 %v922_v5  ;;  %v927_v10 = vld [vmem:[%s1071_s7 + $0xf0] sm:$0xff]   ;;  %v931_v14 = vld [vmem:[%s1071_s7 + $0xe8] sm:$0xff]  }
  0x24   : > { %v924_v7 = vld [vmem:[%s1071_s7 + $0x38] sm:$0xff]   ;;  %859 = vmatprep.subr.bf16.mxu1 %v923_v6  ;;  %v928_v11 = vld [vmem:[%s1071_s7 + $0x30] sm:$0xff]   ;;  %v932_v15 = vld [vmem:[%s1071_s7 + $0x28] sm:$0xff]  }
  0x25   : > { %v925_v8 = vld [vmem:[%s1071_s7 + $0xb8] sm:$0xff]   ;;  %838 = vmatpush3.bf16.msra.mxu0 %v924_v7  ;;  %v929_v12 = vld [vmem:[%s1071_s7 + $0xb0] sm:$0xff]   ;;  %v933_v16 = vld [vmem:[%s1071_s7 + $0xa8] sm:$0xff]  }
  0x26   : > { %860 = vmatpush3.bf16.msra.mxu1 %v925_v8  ;;  %839 = vmatprep.subr.bf16.mxu0 %v926_v9  ;;  %v934_v17 = vld [vmem:[%s1071_s7 + $0x60] sm:$0xff]   ;;  %v938_v21 = vld [vmem:[%s1071_s7 + $0x58] sm:$0xff]   ;;  %v942_v25 = vld [vmem:[%s1071_s7 + $0x50] sm:$0xff]  }
  0x27   : > { %861 = vmatprep.subr.bf16.mxu1 %v927_v10  ;;  %v935_v18 = vld [vmem:[%s1071_s7 + $0xe0] sm:$0xff]   ;;  %v939_v22 = vld [vmem:[%s1071_s7 + $0xd8] sm:$0xff]   ;;  %v943_v26 = vld [vmem:[%s1071_s7 + $0xd0] sm:$0xff]  }
  0x28   : > { %v936_v19 = vld [vmem:[%s1071_s7 + $0x20] sm:$0xff]   ;;  %v940_v23 = vld [vmem:[%s1071_s7 + $0x18] sm:$0xff]   ;;  %v944_v27 = vld [vmem:[%s1071_s7 + $0x10] sm:$0xff]  }
  0x29   : > { %840 = vmatpush3.bf16.msra.mxu0 %v928_v11  ;;  %v937_v20 = vld [vmem:[%s1071_s7 + $0xa0] sm:$0xff]   ;;  %v941_v24 = vld [vmem:[%s1071_s7 + $0x98] sm:$0xff]   ;;  %v945_v28 = vld [vmem:[%s1071_s7 + $0x90] sm:$0xff]  }
  0x2a   : > { %862 = vmatpush3.bf16.msra.mxu1 %v929_v12  ;;  %841 = vmatprep.subr.bf16.mxu0 %v930_v13  ;;  %v946_v29 = vld [vmem:[%s1071_s7 + $0x48] sm:$0xff]   ;;  %v950_v33 = vld [vmem:[%s1071_s7 + $0x40] sm:$0xff]  }
  0x2b   : > { %863 = vmatprep.subr.bf16.mxu1 %v931_v14  ;;  %v947_v30 = vld [vmem:[%s1071_s7 + $0xc8] sm:$0xff]   ;;  %v951_v34 = vld [vmem:[%s1071_s7 + $0xc0] sm:$0xff]  }
  0x2c   : > { %v948_v31 = vld [vmem:[%s1071_s7 + $0x8] sm:$0xff]   ;;  %v952_v35 = vld [vmem:[%s1071_s7] sm:$0xff]  }
  0x2d   : > { %842 = vmatpush3.bf16.msra.mxu0 %v932_v15  ;;  %v949_v32 = vld [vmem:[%s1071_s7 + $0x88] sm:$0xff]   ;;  %v953_v36 = vld [vmem:[%s1071_s7 + $0x80] sm:$0xff]  }
  0x2e   : > { %864 = vmatpush3.bf16.msra.mxu1 %v933_v16  ;;  %843 = vmatprep.subr.bf16.mxu0 %v934_v17  ;;  %v954_v37 = vld [vmem:[%s1073_s8] ss:$16 sps:$4 sm:$0xff]   ;;  %v956_v38 = vld [vmem:[%s1073_s8 + $0x4] ss:$16 sps:$4 sm:$0xff]   ;;  %v957_v39 = vld [vmem:[%s1073_s8 + $0x8] ss:$16 sps:$4 sm:$0xff]  }
  0x2f   : > { %865 = vmatprep.subr.bf16.mxu1 %v935_v18  ;;  %v959_v40 = vld [vmem:[%s1073_s8 + $0xc] ss:$16 sps:$4 sm:$0xff]   ;;  %600 = vmatprep.mubr.bf16.mxu0 %v956_v38  ;;  %v286_v48 = vld [vmem:[#allocation2] sm:$0xff] }
  0x30   : > { %641 = vmatprep.mubr.bf16.mxu1 %v959_v40  ;;  %v287_v56 = vld [vmem:[#allocation2 + $0x8] sm:$0xff] }
  0x31   : > { %844 = vmatpush3.bf16.msra.mxu0 %v936_v19 }
  0x32   : > { %866 = vmatpush3.bf16.msra.mxu1 %v937_v20  ;;  %845 = vmatprep.subr.bf16.mxu0 %v938_v21 }
  0x33   : > { %867 = vmatprep.subr.bf16.mxu1 %v939_v22 }
  0x35   : > { %846 = vmatpush3.bf16.msra.mxu0 %v940_v23 }
  0x36   : > { %868 = vmatpush3.bf16.msra.mxu1 %v941_v24  ;;  %847 = vmatprep.subr.bf16.mxu0 %v942_v25 }
  0x37   : > { %869 = vmatprep.subr.bf16.mxu1 %v943_v26 }
  0x39   : > { %848 = vmatpush3.bf16.msra.mxu0 %v944_v27 }
  0x3a   : > { %870 = vmatpush3.bf16.msra.mxu1 %v945_v28  ;;  %849 = vmatprep.subr.bf16.mxu0 %v946_v29 }
  0x3b   : > { %871 = vmatprep.subr.bf16.mxu1 %v947_v30 }
  0x3d   : > { %850 = vmatpush3.bf16.msra.mxu0 %v948_v31 }
  0x3e   : > { %872 = vmatpush3.bf16.msra.mxu1 %v949_v32  ;;  %851 = vmatprep.subr.bf16.mxu0 %v950_v33 }
  0x3f   : > { %873 = vmatprep.subr.bf16.mxu1 %v951_v34 }
  0x41   : > { %852 = vmatpush3.bf16.msra.mxu0 %v952_v35 }
  0x42   : > { %874 = vmatpush3.bf16.msra.mxu1 %v953_v36 }
  0x44   : > { %601 = vmatmul.mubr.bf16.vlgmr.msra.gmra.mxu0 %v954_v37 }
  0x45   : > { %642 = vmatmul.mubr.bf16.vlgmr.msra.gmra.mxu1 %v957_v39 }
 0x104   : > { %v853_v41 = vpop.f32.mrf.mxu0 }
 0x105   : > { %v875_v42 = vpop.f32.mrf.mxu1 }
 0x106   : > { %v854_v43 = vpop.f32.mrf.mxu0 }
 0x107   : > { %v855_v44 = vadd.f32 %v854_v43, %v853_v41  ;;  %v876_v45 = vpop.f32.mrf.mxu1 }
 0x108   : > { %v877_v46 = vadd.f32 %v876_v45, %v875_v42  ;;  %v856_v47 = vpop.f32.mrf.mxu0 }
 0x109   : > { %v878_v49 = vpop.f32.mrf.mxu1 }
 0x10a   : > { %v644_v50 = vadd.f32 %v877_v46, %v855_v44  ;;  %v857_v51 = vpop.f32.mrf.mxu0 }
 0x10b   : > { %v858_v52 = vadd.f32 %v857_v51, %v856_v47  ;;  %v879_v53 = vpop.f32.mrf.mxu1 }
 0x10c   : > { %v650_v54 = vadd.f32 %v644_v50, %v286_v48  ;;  %v880_v55 = vadd.f32 %v879_v53, %v878_v49 }
 0x10e   : > { %652 = vst [vmem:[#allocation2] sm:$0xff] %v650_v54  ;;  %v647_v57 = vadd.f32 %v880_v55, %v858_v52  ;;  %657 = sbr.rel (%p830_p11) target bundleno = 285 (0x11d), region = 63 }
 0x110   : > { %v651_v58 = vadd.f32 %v647_v57, %v287_v56 }
 0x112   : > { %653 = vst [vmem:[#allocation2 + $0x8] sm:$0xff] %v651_v58 }
 0x113   : > { %v831_v60 = vld [vmem:[%s1139_s2] ss:$0 sm:$0xff] }
 0x115   : > { %v658_v59 = vld [vmem:[#allocation2] sm:$0xff] }
 0x116   : > { %v667_v62 = vadd.f32 %v831_v60, %v658_v59 }
 0x118   : > { %669 = vst [vmem:[%s1140_s3] sm:$0xff] %v667_v62 }
 0x119   : > { %v659_v61 = vld [vmem:[#allocation2 + $0x8] sm:$0xff] }
 0x11a   : > { %v668_v63 = vadd.f32 %v831_v60, %v659_v61 }
 0x11c   : > { %670 = vst [vmem:[%s1140_s3 + $0x8] sm:$0xff] %v668_v63 }
 0x11d PF: > { %s13_s16 = sadd.s32 1, %s998_s16   ;;  %s1141_s12 = smov %s986_s13 }
 0x11e   : > { %p10_p12 = scmp.ge.s32.totalorder %s13_s16, 13   ;;  %s1142_s13 = smov %s1056_s20 }
 0x11f   : > { %s1143_s14 = smov %s994_s15  ;;  %s1144_s15 = smov %s1146_s17 }
 0x120   :  { %12 = sbr.rel (!%p10_p12) target bundleno = 3 (0x3), region = 104 }

// kernel: an3ddr_forward.44
= control target key start
LH: loop header
LB: loop body
LE: loop exit
PB: predicated region body
PF: predicated region fallthrough
CT: control target
= control target key end

     0   :  { %s82_s0 = inlined_call_operand.vmem [shape: f32[16,128], index: 0, kind: input, shape index: {}]   ;;  %s83_s1 = inlined_call_operand.vmem [shape: f32[1,128], index: 1, kind: input, shape index: {}]   ;;  %s84_s2 = inlined_call_operand.vmem [shape: f32[1,128], index: 2, kind: input, shape index: {}]   ;;  %s85_s3 = inlined_call_operand.vmem [shape: f32[16,128], index: 3, kind: output, shape index: {}]  }
   0x1   :  { %v14_v0 = vld [vmem:[%s82_s0] sm:$0xff]  ;;  %v15_v4 = vld [vmem:[%s82_s0 + $0x8] sm:$0xff] }
   0x2   :  { %v42_v1 = vld [vmem:[%s83_s1] ss:$0 sm:$0xff] }
   0x3   :  { %v43_v2 = vld [vmem:[%s84_s2] ss:$0 sm:$0xff]  ;;  %v23_v3 = vmul.f32 %v42_v1, %v14_v0  ;;  %v24_v5 = vmul.f32 %v42_v1, %v15_v4 }
   0x5   :  { %v32_v6 = vadd.f32 %v43_v2, %v23_v3  ;;  %v33_v7 = vadd.f32 %v43_v2, %v24_v5 }
   0x7   :  { %v34_v8 = vmax.f32 %v32_v6, 0.0  ;;  %v35_v9 = vmax.f32 %v33_v7, 0.0 }
   0x9   :  { %36 = vst [vmem:[%s85_s3] sm:$0xff] %v34_v8  ;;  %37 = vst [vmem:[%s85_s3 + $0x8] sm:$0xff] %v35_v9 }

// kernel: an3ddr_forward.45
= control target key start
LH: loop header
LB: loop body
LE: loop exit
PB: predicated region body
PF: predicated region fallthrough
CT: control target
= control target key end

     0   :  { %s274_s6 = smov 0   ;;  %s276_s7 = smov 0   ;;  %s300_s0 = inlined_call_operand.vmem [shape: f32[2,8,128], index: 0, kind: input, shape index: {}]   ;;  %s301_s1 = inlined_call_operand.vmem [shape: f32[2,1,128], index: 1, kind: output, shape index: {}]  }
   0x1   :  { %s278_s8 = smov 0  }
   0x2 LB: > { %s23_s9 = sadd.s32 1, %s257_s7  ;;  %p210_p0 = scmp.ge.s32.totalorder %s261_s8, 1  ;;  %s261_s8 = sphi %s278_s8, %s11_s8   ;;  %s257_s7 = sphi %s276_s7, %s303_s7   ;;  %s253_s6 = sphi %s274_s6, %s302_s6  }
   0x3   : > { %p25_p1 = scmp.ge.s32.totalorder %s23_s9, 2  ;;  %p103_p2 = scmp.lt.s32.totalorder %s261_s8, 3 }
   0x5   : > { %s305_s9 = smov (%p25_p1, %s23_s9), 0  ;;  %p104_p3 = pnand %p210_p0, %p103_p2 }
   0x6   : > { %p123_p4 = scmp.lt.s32.totalorder (!%p104_p3), %s253_s6, 1 }
   0x7   : > { %107 = sbr.rel (%p104_p3) target bundleno = 31 (0x1f), region = 24 }
   0xc   : > { %s307_s6 = smov (!%p123_p4, %s253_s6), 1  ;;  %v263_v0 = vmov 0.0  }
   0xd   : > { %s211_s10 = sshll.u32 %s307_s6, 3  ;;  %s132_s13 = scalar_lea.vmem %s301_s1, %s307_s6 }
   0xe   : > { %s129_s16 = scalar_lea.vmem %s300_s0, %s211_s10  ;;  %137 = vst [vmem:[%s132_s13] sm:$0x1] %v263_v0 }
   0xf   : > { %v139_v1 = vld [vmem:[%s129_s16] sm:$0xff] }
  0x10   : > { %v140_v2 = vrot.slane %v139_v1, 4 }
  0x12   : > { %v141_v3 = vadd.f32 %v140_v2, %v139_v1 }
  0x14   : > { %v142_v4 = vrot.slane %v141_v3, 2 }
  0x15   : > { %v138_v7 = vld [vmem:[%s132_s13] sm:$0x1] }
  0x16   : > { %v143_v5 = vadd.f32 %v142_v4, %v141_v3 }
  0x18   : > { %v144_v6 = vrot.slane %v143_v5, 1 }
  0x1a   : > { %v145_v8 = vadd.f32 %v144_v6, %v143_v5 }
  0x1c   : > { %v146_v9 = vadd.f32 %v145_v8, %v138_v7 }
  0x1e   : > { %147 = vst [vmem:[%s132_s13] sm:$0x1] %v146_v9 }
  0x1f PF: > { %s11_s8 = sadd.s32 1, %s261_s8   ;;  %s302_s6 = smov %s257_s7 }
  0x20   : > { %p8_p5 = scmp.ge.s32.totalorder %s11_s8, 4   ;;  %s303_s7 = smov %s305_s9 }
  0x22   :  { %10 = sbr.rel (!%p8_p5) target bundleno = 2 (0x2), region = 58 }

// kernel: an3ddr_forward.46
= control target key start
LH: loop header
LB: loop body
LE: loop exit
PB: predicated region body
PF: predicated region fallthrough
CT: control target
= control target key end

     0   :  { %v194_v0 = vmov 0.0   ;;  %vm195_vm0 = vmmov 0   ;;  %s249_s1 = inlined_call_operand.vmem [shape: bf16[128,128], index: 1, kind: input, shape index: {}]   ;;  %s250_s0 = inlined_call_operand.vmem [shape: bf16[8,128], index: 0, kind: input, shape index: {}]   ;;  %s251_s2 = inlined_call_operand.vmem [shape: f32[1,128], index: 2, kind: input, shape index: {}]   ;;  %s252_s3 = inlined_call_operand.vmem [shape: f32[8,128], index: 3, kind: output, shape index: {}]  }
   0x1   :  { %164 = vmatprep.subr.bf16.mxu0 %v194_v0  ;;  %v186_v1 = vld [vmem:[%s249_s1 + $0x38] sm:$0xff]   ;;  %180 = vmatprep.mubr.msk.bf16.mxu0 %vm195_vm0, %v194_v0  ;;  %v187_v2 = vld [vmem:[%s249_s1 + $0x30] sm:$0xff]   ;;  %v188_v3 = vld [vmem:[%s249_s1 + $0x28] sm:$0xff]  }
   0x2   :  { %165 = vmatpush3.bf16.msra.mxu0 %v186_v1  ;;  %v189_v4 = vld [vmem:[%s249_s1 + $0x20] sm:$0xff]   ;;  %v190_v5 = vld [vmem:[%s249_s1 + $0x18] sm:$0xff]   ;;  %v191_v6 = vld [vmem:[%s249_s1 + $0x10] sm:$0xff]  }
   0x3   :  { %166 = vmatprep.subr.bf16.mxu0 %v194_v0  ;;  %v192_v7 = vld [vmem:[%s249_s1 + $0x8] sm:$0xff]   ;;  %v193_v8 = vld [vmem:[%s249_s1] sm:$0xff]  }
   0x4   :  { %v21_v9 = vld [vmem:[%s250_s0] sm:$0xf] }
   0x5   :  { %v154_v10 = vld [vmem:[%s251_s2] ss:$0 sm:$0xff] }
   0x6   :  { %167 = vmatpush3.bf16.msra.mxu0 %v187_v2 }
   0x7   :  { %168 = vmatprep.subr.bf16.mxu0 %v194_v0 }
   0xa   :  { %169 = vmatpush3.bf16.msra.mxu0 %v188_v3 }
   0xb   :  { %170 = vmatprep.subr.bf16.mxu0 %v194_v0 }
   0xe   :  { %171 = vmatpush3.bf16.msra.mxu0 %v189_v4 }
   0xf   :  { %172 = vmatprep.subr.bf16.mxu0 %v194_v0 }
  0x12   :  { %173 = vmatpush3.bf16.msra.mxu0 %v190_v5 }
  0x13   :  { %174 = vmatprep.subr.bf16.mxu0 %v194_v0 }
  0x16   :  { %175 = vmatpush3.bf16.msra.mxu0 %v191_v6 }
  0x17   :  { %176 = vmatprep.subr.bf16.mxu0 %v194_v0 }
  0x1a   :  { %177 = vmatpush3.bf16.msra.mxu0 %v192_v7 }
  0x1b   :  { %178 = vmatprep.subr.bf16.mxu0 %v194_v0 }
  0x1e   :  { %179 = vmatpush3.bf16.msra.mxu0 %v193_v8 }
  0x21   :  { %181 = vmatmul.mubr.bf16.vlgmr.msra.gmra.mxu0 %v21_v9 }
  0xe1   :  { %v120_v11 = vpop.f32.mrf.mxu0 }
  0xe2   :  { %v139_v12 = vadd.f32 %v154_v10, %v120_v11 }
  0xe3   :  { %v182_v13 = vpop.f32.mrf.mxu0 }
  0xe4   :  { %v140_v14 = vmax.f32 %v139_v12, 0.0 }
  0xe5   :  { %v123_v15 = vpop.f32.mrf.mxu0 }
  0xe6   :  { %141 = vst [vmem:[%s252_s3] sm:$0xff] %v140_v14 }
  0xe7   :  { %v183_v16 = vpop.f32.mrf.mxu0 }

// kernel: an3ddr_forward.47
= control target key start
LH: loop header
LB: loop body
LE: loop exit
PB: predicated region body
PF: predicated region fallthrough
CT: control target
= control target key end

     0   :  { %v193_v0 = vmov 0.0   ;;  %vm194_vm0 = vmmov 0   ;;  %s248_s1 = inlined_call_operand.vmem [shape: bf16[128,128], index: 1, kind: input, shape index: {}]   ;;  %s249_s0 = inlined_call_operand.vmem [shape: bf16[8,128], index: 0, kind: input, shape index: {}]   ;;  %s250_s2 = inlined_call_operand.vmem [shape: f32[1,128], index: 2, kind: input, shape index: {}]   ;;  %s251_s3 = inlined_call_operand.vmem [shape: f32[8,128], index: 3, kind: output, shape index: {}]  }
   0x1   :  { %163 = vmatprep.subr.bf16.mxu0 %v193_v0  ;;  %v185_v1 = vld [vmem:[%s248_s1 + $0x38] sm:$0xff]   ;;  %179 = vmatprep.mubr.msk.bf16.mxu0 %vm194_vm0, %v193_v0  ;;  %v186_v2 = vld [vmem:[%s248_s1 + $0x30] sm:$0xff]   ;;  %v187_v3 = vld [vmem:[%s248_s1 + $0x28] sm:$0xff]  }
   0x2   :  { %164 = vmatpush3.bf16.msra.mxu0 %v185_v1  ;;  %v188_v4 = vld [vmem:[%s248_s1 + $0x20] sm:$0xff]   ;;  %v189_v5 = vld [vmem:[%s248_s1 + $0x18] sm:$0xff]   ;;  %v190_v6 = vld [vmem:[%s248_s1 + $0x10] sm:$0xff]  }
   0x3   :  { %165 = vmatprep.subr.bf16.mxu0 %v193_v0  ;;  %v191_v7 = vld [vmem:[%s248_s1 + $0x8] sm:$0xff]   ;;  %v192_v8 = vld [vmem:[%s248_s1] sm:$0xff]  }
   0x4   :  { %v21_v9 = vld [vmem:[%s249_s0] sm:$0xf] }
   0x5   :  { %v153_v10 = vld [vmem:[%s250_s2] ss:$0 sm:$0xff] }
   0x6   :  { %166 = vmatpush3.bf16.msra.mxu0 %v186_v2 }
   0x7   :  { %167 = vmatprep.subr.bf16.mxu0 %v193_v0 }
   0xa   :  { %168 = vmatpush3.bf16.msra.mxu0 %v187_v3 }
   0xb   :  { %169 = vmatprep.subr.bf16.mxu0 %v193_v0 }
   0xe   :  { %170 = vmatpush3.bf16.msra.mxu0 %v188_v4 }
   0xf   :  { %171 = vmatprep.subr.bf16.mxu0 %v193_v0 }
  0x12   :  { %172 = vmatpush3.bf16.msra.mxu0 %v189_v5 }
  0x13   :  { %173 = vmatprep.subr.bf16.mxu0 %v193_v0 }
  0x16   :  { %174 = vmatpush3.bf16.msra.mxu0 %v190_v6 }
  0x17   :  { %175 = vmatprep.subr.bf16.mxu0 %v193_v0 }
  0x1a   :  { %176 = vmatpush3.bf16.msra.mxu0 %v191_v7 }
  0x1b   :  { %177 = vmatprep.subr.bf16.mxu0 %v193_v0 }
  0x1e   :  { %178 = vmatpush3.bf16.msra.mxu0 %v192_v8 }
  0x21   :  { %180 = vmatmul.mubr.bf16.vlgmr.msra.gmra.mxu0 %v21_v9 }
  0xe1   :  { %v120_v11 = vpop.f32.mrf.mxu0 }
  0xe2   :  { %v139_v12 = vadd.f32 %v153_v10, %v120_v11 }
  0xe3   :  { %v181_v13 = vpop.f32.mrf.mxu0 }
  0xe4   :  { %140 = vst [vmem:[%s251_s3] sm:$0xff] %v139_v12 }
  0xe5   :  { %v123_v14 = vpop.f32.mrf.mxu0 }
  0xe7   :  { %v182_v15 = vpop.f32.mrf.mxu0 }

</bundles_post_ra>
